<compile_context>
chip_gen: v6e
topology: v6e:2x2x1
jax: 0.10.0
libtpu: 0.0.40
codegen_flags: <defaults>
</compile_context>

<pallas_src>
import functools

import jax
import jax.numpy as jnp
from jax import lax
from jax.experimental import pallas as pl
from jax.experimental.pallas import tpu as pltpu


# ---------------------------------------------------------------------------
# Per-chip tiling / compiler configuration
# ---------------------------------------------------------------------------
@functools.lru_cache(maxsize=None)
def _cfg():
    """(preferred M-tile rows, CompilerParams) sized from the chip's VMEM."""
    tile_m, vlimit = 256, 32 * 1024 * 1024            # conservative fallback
    try:
        vmem = int(pltpu.get_tpu_info().vmem_capacity_bytes)
        if vmem > 0:
            # v5e/v6e: 128 MiB VMEM -> 512-row tiles, ~64 MiB scoped limit.
            # v7x    :  64 MiB VMEM -> 256-row tiles, ~48 MiB scoped limit.
            tile_m = 512 if vmem >= 96 * 1024 * 1024 else 256
            vlimit = max(32 * 1024 * 1024,
                         min(64 * 1024 * 1024, (vmem * 3) // 4))
    except Exception:
        pass
    cparams = pltpu.CompilerParams(
        dimension_semantics=("parallel",),             # all grids are rank-1
        vmem_limit_bytes=vlimit,
    )
    return tile_m, cparams


def _round_up(x, d):
    return (x + d - 1) // d * d


def _tiles(m, tile_pref):
    # Balanced tiling: nt = cdiv(m, tile_pref), tm = round_up(cdiv(m, nt), 8).
    # Padding waste is < 8*nt rows, so an awkward M (e.g. 520) no longer pads
    # up to a nearly-empty extra 256-row tile.
    nt = max(1, (m + tile_pref - 1) // tile_pref)
    tm = _round_up((m + nt - 1) // nt, 8)
    return nt, tm, nt * tm


# ---------------------------------------------------------------------------
# Pallas kernels
# ---------------------------------------------------------------------------
def _mm3_stats_kernel(x_ref, w_ref, y1_ref, y2_ref, y3_ref, stats_ref, *,
                      c1, c2):
    # Fused 1x1 convs (b1, b2-reduce, b3-reduce) as one MXU matmul.
    #   x: (TM, Cin) bf16, w: (Cin, c1+c2+c3) bf16.
    # Outputs: the three pre-BN branch slices in bf16 plus per-tile
    # per-channel (sum, sum(y^2)) BN stats from the f32 accumulator.
    y = jnp.dot(x_ref[...], w_ref[...], preferred_element_type=jnp.float32)
    y1_ref[...] = y[:, :c1].astype(y1_ref.dtype)
    y2_ref[...] = y[:, c1:c1 + c2].astype(y2_ref.dtype)
    y3_ref[...] = y[:, c1 + c2:].astype(y3_ref.dtype)
    stats_ref[0, 0:1, :] = jnp.sum(y, axis=0, keepdims=True)
    stats_ref[0, 1:2, :] = jnp.sum(y * y, axis=0, keepdims=True)


def _bnrelu_conv3x3_stats_kernel(x_ref, s_ref, b_ref, w_ref, y_ref, stats_ref,
                                 xp_ref):
    # One image per grid step.  The PRODUCER's folded BN (scale, shift) + ReLU
    # is applied to the loaded pre-BN bf16 tile here (no separate HBM apply
    # pass).  The 3x3 / stride-1 / pad-1 conv is 9 accumulated bf16 MXU dots;
    # the zero halo lives only in the VMEM scratch xp_ref (no padded HBM copy,
    # no 9*Cin im2col patch tensor, no f32 image round trip).
    _, h, wd, cin = x_ref.shape
    cout = w_ref.shape[-1]
    s = s_ref[...].reshape(1, 1, cin)
    b = b_ref[...].reshape(1, 1, cin)
    t = jnp.maximum(x_ref[0].astype(jnp.float32) * s + b, 0.0)
    t = t.astype(jnp.bfloat16)                                 # (H, W, Cin)

    xp_ref[...] = jnp.zeros_like(xp_ref)        # cheap halo fill, per step so
    xp_ref[1:h + 1, 1:wd + 1, :] = t            # each step is self-contained
    xp = xp_ref[...]                                           # (H+2,W+2,Cin)

    acc = jnp.zeros((h * wd, cout), jnp.float32)
    for dh in range(3):
        for dw in range(3):
            sl = xp[dh:dh + h, dw:dw + wd, :].reshape(h * wd, cin)
            acc += jnp.dot(sl, w_ref[dh, dw],
                           preferred_element_type=jnp.float32)
    y_ref[0] = acc.astype(y_ref.dtype)
    stats_ref[0, 0:1, :] = jnp.sum(acc, axis=0, keepdims=True)
    stats_ref[0, 1:2, :] = jnp.sum(acc * acc, axis=0, keepdims=True)


def _pool_conv1x1_stats_kernel(x_ref, w_ref, y_ref, stats_ref, xp_ref):
    # Fused 3x3/stride-1 max-pool (bf16, exact: rounding is monotone so the
    # max commutes with the cast) + 1x1 conv, one image per grid step.
    _, h, wd, cin = x_ref.shape
    xp_ref[...] = jnp.full_like(xp_ref, -jnp.inf)      # -inf halo for the max
    xp_ref[1:h + 1, 1:wd + 1, :] = x_ref[0]
    xp = xp_ref[...]

    m = xp[0:h, 0:wd, :]
    for dh in range(3):
        for dw in range(3):
            if dh == 0 and dw == 0:
                continue
            m = jnp.maximum(m, xp[dh:dh + h, dw:dw + wd, :])
    y = jnp.dot(m.reshape(h * wd, cin), w_ref[...],
                preferred_element_type=jnp.float32)
    y_ref[0] = y.astype(y_ref.dtype)
    stats_ref[0, 0:1, :] = jnp.sum(y, axis=0, keepdims=True)
    stats_ref[0, 1:2, :] = jnp.sum(y * y, axis=0, keepdims=True)


def _concat_scale_relu_kernel(y1_ref, y2_ref, y3_ref, y4_ref, s_ref, b_ref,
                              o_ref):
    # Final epilogue: folded BN affine + ReLU for all four branches, written
    # as ONE lane-dense channel-concatenated tile (no XLA concat, no narrow
    # per-branch stores).  Math in f32 (v5e has no bf16 VPU).
    y = jnp.concatenate(
        [y1_ref[...], y2_ref[...], y3_ref[...], y4_ref[...]],
        axis=-1).astype(jnp.float32)
    o_ref[...] = jnp.maximum(y * s_ref[...] + b_ref[...], 0.0)


# ---------------------------------------------------------------------------
# Stage wrappers (pallas_call plumbing + tiny JAX BN-stat folding)
# ---------------------------------------------------------------------------
def fused_1x1_stats(x_nhwc, w_cat, c_splits):
    # One matmul for the three 1x1 convs reading the shared input x.
    n, h, wd, cin = x_nhwc.shape
    m = n * h * wd
    c1, c2, c3 = c_splits
    ctot = c1 + c2 + c3
    tile_pref, cparams = _cfg()
    nt, tm, mp = _tiles(m, tile_pref)

    x2d = x_nhwc.reshape(m, cin).astype(jnp.bfloat16)
    if mp != m:
        # Zero padded rows contribute nothing to (sum, sum(y^2)); _fold_bn
        # divides by the REAL row count m, so BN statistics stay exact.
        x2d = jnp.pad(x2d, ((0, mp - m), (0, 0)))

    kernel = functools.partial(_mm3_stats_kernel, c1=c1, c2=c2)
    y1, y2, y3, stats = pl.pallas_call(
        kernel,
        out_shape=(jax.ShapeDtypeStruct((mp, c1), jnp.bfloat16),
                   jax.ShapeDtypeStruct((mp, c2), jnp.bfloat16),
                   jax.ShapeDtypeStruct((mp, c3), jnp.bfloat16),
                   jax.ShapeDtypeStruct((nt, 2, ctot), jnp.float32)),
        grid=(nt,),
        in_specs=[pl.BlockSpec((tm, cin), lambda i: (i, 0)),
                  pl.BlockSpec((cin, ctot), lambda i: (0, 0))],
        out_specs=(pl.BlockSpec((tm, c1), lambda i: (i, 0)),
                   pl.BlockSpec((tm, c2), lambda i: (i, 0)),
                   pl.BlockSpec((tm, c3), lambda i: (i, 0)),
                   pl.BlockSpec((1, 2, ctot), lambda i: (i, 0, 0))),
        compiler_params=cparams,
    )(x2d, w_cat.astype(jnp.bfloat16))
    return y1[:m], y2[:m], y3[:m], stats


def conv3x3_stats(y_prev, scale_in, shift_in, w_hwio, n, h, wd):
    # y_prev: (M, Cin) bf16 pre-BN activation of the producer stage; its
    # folded BN + ReLU is applied inside this kernel (prologue fusion).
    cin = y_prev.shape[-1]
    cout = w_hwio.shape[-1]
    _, cparams = _cfg()
    x4d = y_prev.reshape(n, h, wd, cin)
    y, stats = pl.pallas_call(
        _bnrelu_conv3x3_stats_kernel,
        out_shape=(jax.ShapeDtypeStruct((n, h * wd, cout), jnp.bfloat16),
                   jax.ShapeDtypeStruct((n, 2, cout), jnp.float32)),
        grid=(n,),
        in_specs=[pl.BlockSpec((1, h, wd, cin), lambda i: (i, 0, 0, 0)),
                  pl.BlockSpec((1, cin), lambda i: (0, 0)),
                  pl.BlockSpec((1, cin), lambda i: (0, 0)),
                  pl.BlockSpec((3, 3, cin, cout), lambda i: (0, 0, 0, 0))],
        out_specs=(pl.BlockSpec((1, h * wd, cout), lambda i: (i, 0, 0)),
                   pl.BlockSpec((1, 2, cout), lambda i: (i, 0, 0))),
        scratch_shapes=[pltpu.VMEM((h + 2, wd + 2, cin), jnp.bfloat16)],
        compiler_params=cparams,
    )(x4d, scale_in, shift_in, w_hwio.astype(jnp.bfloat16))
    return y.reshape(n * h * wd, cout), stats


def maxpool_conv1x1_stats(x_nhwc, w):
    n, h, wd, cin = x_nhwc.shape
    cout = w.shape[-1]
    _, cparams = _cfg()
    y, stats = pl.pallas_call(
        _pool_conv1x1_stats_kernel,
        out_shape=(jax.ShapeDtypeStruct((n, h * wd, cout), jnp.bfloat16),
                   jax.ShapeDtypeStruct((n, 2, cout), jnp.float32)),
        grid=(n,),
        in_specs=[pl.BlockSpec((1, h, wd, cin), lambda i: (i, 0, 0, 0)),
                  pl.BlockSpec((cin, cout), lambda i: (0, 0))],
        out_specs=(pl.BlockSpec((1, h * wd, cout), lambda i: (i, 0, 0)),
                   pl.BlockSpec((1, 2, cout), lambda i: (i, 0, 0))),
        scratch_shapes=[pltpu.VMEM((h + 2, wd + 2, cin), jnp.bfloat16)],
        compiler_params=cparams,
    )(x_nhwc.astype(jnp.bfloat16), w.astype(jnp.bfloat16))
    return y.reshape(n * h * wd, cout), stats


def _fold_bn(stats, m_real, gamma, beta, eps):
    # Reduce per-tile (sum, sum(y^2)) -> batch mean/var -> folded scale/shift.
    # NOTE: the divisor MUST stay m_real (not the padded row count) for the
    # zero-row M padding in fused_1x1_stats to leave BN stats exact.
    s = jnp.sum(stats, axis=0)                       # (2, C)
    mean = s[0] / m_real
    var = jnp.maximum(s[1] / m_real - mean * mean, 0.0)
    scale = (gamma * lax.rsqrt(var + eps)).astype(jnp.float32)
    shift = (beta - mean * scale).astype(jnp.float32)
    return scale.reshape(1, -1), shift.reshape(1, -1)


def concat_bn_relu(ys, scales, shifts):
    # ys: four (M, Ci) bf16 pre-BN tensors; outputs one (M, sum Ci) f32 slab.
    m = ys[0].shape[0]
    cs = [int(y.shape[1]) for y in ys]
    ctot = sum(cs)
    tile_pref, cparams = _cfg()
    nt, tm, mp = _tiles(m, tile_pref)
    if mp != m:
        ys = [jnp.pad(y, ((0, mp - m), (0, 0))) for y in ys]
    s_cat = jnp.concatenate(scales, axis=-1)
    b_cat = jnp.concatenate(shifts, axis=-1)
    out = pl.pallas_call(
        _concat_scale_relu_kernel,
        out_shape=jax.ShapeDtypeStruct((mp, ctot), jnp.float32),
        grid=(nt,),
        in_specs=[pl.BlockSpec((tm, c), lambda i: (i, 0)) for c in cs]
                 + [pl.BlockSpec((1, ctot), lambda i: (0, 0)),
                    pl.BlockSpec((1, ctot), lambda i: (0, 0))],
        out_specs=pl.BlockSpec((tm, ctot), lambda i: (i, 0)),
        compiler_params=cparams,
    )(*ys, s_cat, b_cat)
    return out[:m]


# ---------------------------------------------------------------------------
# Inception forward (Pallas)
# ---------------------------------------------------------------------------
def inception_forward(x_nchw, P):
    x = jnp.transpose(x_nchw, (0, 2, 3, 1))          # NCHW -> NHWC (boundary)
    n, h, wd, _ = x.shape
    m = n * h * wd
    b1p, b2p, b3p, b4p = P["b1"], P["b2"], P["b3"], P["b4"]
    n1x1 = b1p["w"].shape[1]
    n3r = b2p["w1"].shape[1]
    n5r = b3p["w1"].shape[1]

    # ---- stage 1: one MXU matmul for the three 1x1 convs that read x -------
    w_cat = jnp.concatenate([b1p["w"], b2p["w1"], b3p["w1"]], axis=1)
    y_b1, y_b2r, y_b3r, st1 = fused_1x1_stats(x, w_cat, (n1x1, n3r, n5r))
    g_cat = jnp.concatenate([b1p["g"], b2p["g1"], b3p["g1"]])
    bt_cat = jnp.concatenate([b1p["bt"], b2p["bt1"], b3p["bt1"]])
    sc_all, sh_all = _fold_bn(st1, m, g_cat, bt_cat, 1e-5)
    sc_b1, sh_b1 = sc_all[:, :n1x1], sh_all[:, :n1x1]
    sc_2r, sh_2r = sc_all[:, n1x1:n1x1 + n3r], sh_all[:, n1x1:n1x1 + n3r]
    sc_3r, sh_3r = sc_all[:, n1x1 + n3r:], sh_all[:, n1x1 + n3r:]

    # ---- branch 2: 3x3 conv (producer BN+ReLU fused into its prologue) -----
    y2, st2 = conv3x3_stats(y_b2r, sc_2r, sh_2r, b2p["w2"], n, h, wd)
    sc2, sh2 = _fold_bn(st2, m, b2p["g2"], b2p["bt2"], 1e-5)

    # ---- branch 3: two chained 3x3 convs ------------------------------------
    y3a, st3a = conv3x3_stats(y_b3r, sc_3r, sh_3r, b3p["w2"], n, h, wd)
    sc3a, sh3a = _fold_bn(st3a, m, b3p["g2"], b3p["bt2"], P["eps_b3_mid"])
    y3b, st3b = conv3x3_stats(y3a, sc3a, sh3a, b3p["w3"], n, h, wd)
    sc3b, sh3b = _fold_bn(st3b, m, b3p["g3"], b3p["bt3"], 1e-5)

    # ---- branch 4: fused 3x3 max-pool + 1x1 conv ----------------------------
    y4, st4 = maxpool_conv1x1_stats(x, b4p["w"])
    sc4, sh4 = _fold_bn(st4, m, b4p["g"], b4p["bt"], 1e-5)

    # ---- final: per-branch folded BN + ReLU, lane-dense concat, one pass ----
    out = concat_bn_relu([y_b1, y2, y3b, y4],
                         [sc_b1, sc2, sc3b, sc4],
                         [sh_b1, sh2, sh3b, sh4])
    out = out.reshape(n, h, wd, -1)
    return jnp.transpose(out, (0, 3, 1, 2))          # back to NCHW


# ---------------------------------------------------------------------------
# Pure-JAX reference (mirrors the PyTorch module; conv operands in bf16 so the
# MXU precision matches the kernels; keeps the conv bias to show BN cancels it)
# ---------------------------------------------------------------------------
def _bn_relu_ref(y, g, bt, eps):
    mean = jnp.mean(y, axis=(0, 1, 2), keepdims=True)
    var = jnp.mean(jnp.square(y - mean), axis=(0, 1, 2), keepdims=True)
    return jnp.maximum((y - mean) * lax.rsqrt(var + eps) * g + bt, 0.0)


def _conv_ref(x, w_hwio, b, pad):
    y = lax.conv_general_dilated(
        x.astype(jnp.bfloat16), w_hwio.astype(jnp.bfloat16), (1, 1), pad,
        dimension_numbers=("NHWC", "HWIO", "NHWC"),
        preferred_element_type=jnp.float32)
    return y + b


def inception_ref(x_nchw, P):
    x = jnp.transpose(x_nchw, (0, 2, 3, 1))
    eps_mid = P["eps_b3_mid"]
    b1p, b2p, b3p, b4p = P["b1"], P["b2"], P["b3"], P["b4"]

    def c1(xx, w, b, g, bt, eps=1e-5):
        cin, cout = w.shape
        return _bn_relu_ref(_conv_ref(xx, w.reshape(1, 1, cin, cout), b,
                                      "VALID"), g, bt, eps)

    def c3(xx, w, b, g, bt, eps=1e-5):
        return _bn_relu_ref(_conv_ref(xx, w, b, ((1, 1), (1, 1))), g, bt, eps)

    o1 = c1(x, b1p["w"], b1p["b"], b1p["g"], b1p["bt"])

    t = c1(x, b2p["w1"], b2p["b1"], b2p["g1"], b2p["bt1"])
    o2 = c3(t, b2p["w2"], b2p["b2"], b2p["g2"], b2p["bt2"])

    t = c1(x, b3p["w1"], b3p["b1"], b3p["g1"], b3p["bt1"])
    t = c3(t, b3p["w2"], b3p["b2"], b3p["g2"], b3p["bt2"], eps=eps_mid)
    o3 = c3(t, b3p["w3"], b3p["b3"], b3p["g3"], b3p["bt3"])

    t = lax.reduce_window(x, -jnp.inf, lax.max, (1, 3, 3, 1), (1, 1, 1, 1),
                          ((0, 0), (1, 1), (1, 1), (0, 0)))
    o4 = c1(t, b4p["w"], b4p["b"], b4p["g"], b4p["bt"])

    out = jnp.concatenate([o1, o2, o3, o4], axis=-1)
    return jnp.transpose(out, (0, 3, 1, 2))


# ---------------------------------------------------------------------------
# Deterministic parameter init (biases kept for the reference only)
# ---------------------------------------------------------------------------
def init_params(key, cin, n1x1, n3r, n3, n5r, n5, pool_proj):
    keys = iter(jax.random.split(key, 32))

    def conv1x1(ci, co):
        return (0.1 * jax.random.normal(next(keys), (ci, co), jnp.float32),
                0.1 * jax.random.normal(next(keys), (co,), jnp.float32))

    def conv3x3(ci, co):
        return (0.1 * jax.random.normal(next(keys), (3, 3, ci, co), jnp.float32),
                0.1 * jax.random.normal(next(keys), (co,), jnp.float32))

    def bn(co):
        return (1.0 + 0.1 * jax.random.normal(next(keys), (co,), jnp.float32),
                0.1 * jax.random.normal(next(keys), (co,), jnp.float32))

    P = {}
    w, b = conv1x1(cin, n1x1); g, bt = bn(n1x1)
    P["b1"] = dict(w=w, b=b, g=g, bt=bt)

    w1, b1 = conv1x1(cin, n3r); g1, bt1 = bn(n3r)
    w2, b2 = conv3x3(n3r, n3); g2, bt2 = bn(n3)
    P["b2"] = dict(w1=w1, b1=b1, g1=g1, bt1=bt1, w2=w2, b2=b2, g2=g2, bt2=bt2)

    w1, b1 = conv1x1(cin, n5r); g1, bt1 = bn(n5r)
    w2, b2 = conv3x3(n5r, n5); g2, bt2 = bn(n5)
    w3, b3 = conv3x3(n5, n5); g3, bt3 = bn(n5)
    P["b3"] = dict(w1=w1, b1=b1, g1=g1, bt1=bt1,
                   w2=w2, b2=b2, g2=g2, bt2=bt2,
                   w3=w3, b3=b3, g3=g3, bt3=bt3)

    w, b = conv1x1(cin, pool_proj); g, bt = bn(pool_proj)
    P["b4"] = dict(w=w, b=b, g=g, bt=bt)

    P["eps_b3_mid"] = float(n5)  # reproduces nn.BatchNorm2d(n5x5, n5x5) quirk
    return P


# ---------------------------------------------------------------------------
if __name__ == "__main__":
    key = jax.random.PRNGKey(0)
    kx, kp = jax.random.split(key)

    N, Cin, H, W = 2, 4, 16, 16
    n1x1, n3r, n3, n5r, n5, pool_proj = 8, 4, 8, 4, 8, 8

    x = jax.random.normal(kx, (N, Cin, H, W), jnp.float32)  # PyTorch-style NCHW
    P = init_params(kp, Cin, n1x1, n3r, n3, n5r, n5, pool_proj)

    out = jax.jit(inception_forward)(x, P)
    out = jax.block_until_ready(out)

    assert out.shape == (N, n1x1 + n3 + n5 + pool_proj, H, W), out.shape

    ref = inception_ref(x, P)
    max_err = float(jnp.max(jnp.abs(out - ref)))
    # bf16 MXU operands AND bf16-stored intermediates in the kernel path
    # (BN statistics / epilogue stay f32) -> modest drift vs the f32 reference.
    assert jnp.allclose(out, ref, atol=5e-2, rtol=5e-2), max_err

    print("KERNEL_OK")
</pallas_src>

<mosaic_0001>
module attributes {stable_mosaic.version = 11 : i64} {
  func.func @_pool_conv1x1_stats_kernel(%arg0: i32, %arg1: memref<1x16x16x4xbf16, #tpu.memory_space<vmem>>, %arg2: memref<4x8xbf16, #tpu.memory_space<vmem>>, %arg3: memref<1x256x8xbf16, #tpu.memory_space<vmem>>, %arg4: memref<1x2x8xf32, #tpu.memory_space<vmem>>, %arg5: memref<18x18x4xbf16, #tpu.memory_space<vmem>>) attributes {dimension_semantics = [#tpu.dimension_semantics<parallel>], iteration_bounds = array<i64: 2>, scalar_prefetch = 0 : i64, scratch_operands = 1 : i64, tpu.core_type = #tpu.core_type<tc>, window_params = [{transform_indices = @transform_0, window_bounds = array<i64: 1, 16, 16, 4>}, {pipeline_mode = #tpu.pipeline_mode<synchronous>, transform_indices = @transform_1, window_bounds = array<i64: 4, 8>}, {transform_indices = @transform_2, window_bounds = array<i64: 1, 256, 8>}, {transform_indices = @transform_3, window_bounds = array<i64: 1, 2, 8>}]} {
    %cst = arith.constant 0xFF80 : bf16
    %0 = vector.broadcast %cst : bf16 to vector<18x18x4xbf16>
    %c0 = arith.constant 0 : index
    %c0_0 = arith.constant 0 : index
    %c0_1 = arith.constant 0 : index
    %1 = vector.load %arg5[%c0, %c0_0, %c0_1] : memref<18x18x4xbf16, #tpu.memory_space<vmem>>, vector<18x18x4xbf16>
    tpu.vector_store %arg5[%c0, %c0_0, %c0_1], %0 {strides = array<i32>} : memref<18x18x4xbf16, #tpu.memory_space<vmem>>, vector<18x18x4xbf16>,
    %c0_2 = arith.constant 0 : index
    %c0_3 = arith.constant 0 : index
    %c0_4 = arith.constant 0 : index
    %c0_5 = arith.constant 0 : index
    %2 = vector.load %arg1[%c0_2, %c0_3, %c0_4, %c0_5] : memref<1x16x16x4xbf16, #tpu.memory_space<vmem>>, vector<1x16x16x4xbf16>
    %3 = vector.shape_cast %2 : vector<1x16x16x4xbf16> to vector<16x16x4xbf16>
    %c1 = arith.constant 1 : index
    %c1_6 = arith.constant 1 : index
    %c0_7 = arith.constant 0 : index
    %4 = vector.load %arg5[%c1, %c1_6, %c0_7] : memref<18x18x4xbf16, #tpu.memory_space<vmem>>, vector<16x16x4xbf16>
    tpu.vector_store %arg5[%c1, %c1_6, %c0_7], %3 {strides = array<i32>} : memref<18x18x4xbf16, #tpu.memory_space<vmem>>, vector<16x16x4xbf16>,
    %c0_8 = arith.constant 0 : index
    %c0_9 = arith.constant 0 : index
    %c0_10 = arith.constant 0 : index
    %5 = vector.load %arg5[%c0_8, %c0_9, %c0_10] : memref<18x18x4xbf16, #tpu.memory_space<vmem>>, vector<18x18x4xbf16>
    %6 = vector.extract_strided_slice %5 {offsets = [0, 0, 0], sizes = [16, 16, 4], strides = [1, 1, 1]} : vector<18x18x4xbf16> to vector<16x16x4xbf16>
    %7 = vector.extract_strided_slice %5 {offsets = [0, 1, 0], sizes = [16, 16, 4], strides = [1, 1, 1]} : vector<18x18x4xbf16> to vector<16x16x4xbf16>
    %8 = arith.maximumf %6, %7 : vector<16x16x4xbf16>
    %9 = vector.extract_strided_slice %5 {offsets = [0, 2, 0], sizes = [16, 16, 4], strides = [1, 1, 1]} : vector<18x18x4xbf16> to vector<16x16x4xbf16>
    %10 = arith.maximumf %8, %9 : vector<16x16x4xbf16>
    %11 = vector.extract_strided_slice %5 {offsets = [1, 0, 0], sizes = [16, 16, 4], strides = [1, 1, 1]} : vector<18x18x4xbf16> to vector<16x16x4xbf16>
    %12 = arith.maximumf %10, %11 : vector<16x16x4xbf16>
    %13 = vector.extract_strided_slice %5 {offsets = [1, 1, 0], sizes = [16, 16, 4], strides = [1, 1, 1]} : vector<18x18x4xbf16> to vector<16x16x4xbf16>
    %14 = arith.maximumf %12, %13 : vector<16x16x4xbf16>
    %15 = vector.extract_strided_slice %5 {offsets = [1, 2, 0], sizes = [16, 16, 4], strides = [1, 1, 1]} : vector<18x18x4xbf16> to vector<16x16x4xbf16>
    %16 = arith.maximumf %14, %15 : vector<16x16x4xbf16>
    %17 = vector.extract_strided_slice %5 {offsets = [2, 0, 0], sizes = [16, 16, 4], strides = [1, 1, 1]} : vector<18x18x4xbf16> to vector<16x16x4xbf16>
    %18 = arith.maximumf %16, %17 : vector<16x16x4xbf16>
    %19 = vector.extract_strided_slice %5 {offsets = [2, 1, 0], sizes = [16, 16, 4], strides = [1, 1, 1]} : vector<18x18x4xbf16> to vector<16x16x4xbf16>
    %20 = arith.maximumf %18, %19 : vector<16x16x4xbf16>
    %21 = vector.extract_strided_slice %5 {offsets = [2, 2, 0], sizes = [16, 16, 4], strides = [1, 1, 1]} : vector<18x18x4xbf16> to vector<16x16x4xbf16>
    %22 = arith.maximumf %20, %21 : vector<16x16x4xbf16>
    %23 = vector.shape_cast %22 : vector<16x16x4xbf16> to vector<256x4xbf16>
    %c0_11 = arith.constant 0 : index
    %c0_12 = arith.constant 0 : index
    %24 = vector.load %arg2[%c0_11, %c0_12] : memref<4x8xbf16, #tpu.memory_space<vmem>>, vector<4x8xbf16>
    %cst_13 = arith.constant dense<0.000000e+00> : vector<256x8xf32>
    %25 = tpu.matmul %23, %24, %cst_13 {dimension_numbers = #tpu.dot_dimension_numbers<[1], [0], [0], [1], [0, 0, 1, 1], [], []>} : vector<256x4xbf16>, vector<4x8xbf16>, vector<256x8xf32> -> vector<256x8xf32>
    %26 = arith.truncf %25 : vector<256x8xf32> to vector<256x8xbf16>
    %c0_14 = arith.constant 0 : index
    %c0_15 = arith.constant 0 : index
    %c0_16 = arith.constant 0 : index
    %27 = vector.load %arg3[%c0_14, %c0_15, %c0_16] : memref<1x256x8xbf16, #tpu.memory_space<vmem>>, vector<1x256x8xbf16>
    %28 = vector.shape_cast %27 : vector<1x256x8xbf16> to vector<256x8xbf16>
    %29 = vector.shape_cast %26 : vector<256x8xbf16> to vector<1x256x8xbf16>
    tpu.vector_store %arg3[%c0_14, %c0_15, %c0_16], %29 {strides = array<i32>} : memref<1x256x8xbf16, #tpu.memory_space<vmem>>, vector<1x256x8xbf16>,
    %cst_17 = arith.constant dense<0.000000e+00> : vector<8xf32>
    %30 = vector.multi_reduction <add>, %25, %cst_17 [0] : vector<256x8xf32> to vector<8xf32>
    %31 = vector.shape_cast %30 : vector<8xf32> to vector<1x8xf32>
    %c0_18 = arith.constant 0 : index
    %c0_19 = arith.constant 0 : index
    %c0_20 = arith.constant 0 : index
    %32 = vector.load %arg4[%c0_18, %c0_19, %c0_20] : memref<1x2x8xf32, #tpu.memory_space<vmem>>, vector<1x1x8xf32>
    %33 = vector.shape_cast %32 : vector<1x1x8xf32> to vector<1x8xf32>
    %34 = vector.shape_cast %31 : vector<1x8xf32> to vector<1x1x8xf32>
    tpu.vector_store %arg4[%c0_18, %c0_19, %c0_20], %34 {strides = array<i32>} : memref<1x2x8xf32, #tpu.memory_space<vmem>>, vector<1x1x8xf32>,
    %35 = arith.mulf %25, %25 : vector<256x8xf32>
    %cst_21 = arith.constant dense<0.000000e+00> : vector<8xf32>
    %36 = vector.multi_reduction <add>, %35, %cst_21 [0] : vector<256x8xf32> to vector<8xf32>
    %37 = vector.shape_cast %36 : vector<8xf32> to vector<1x8xf32>
    %c0_22 = arith.constant 0 : index
    %c1_23 = arith.constant 1 : index
    %c0_24 = arith.constant 0 : index
    %38 = vector.load %arg4[%c0_22, %c1_23, %c0_24] : memref<1x2x8xf32, #tpu.memory_space<vmem>>, vector<1x1x8xf32>
    %39 = vector.shape_cast %38 : vector<1x1x8xf32> to vector<1x8xf32>
    %40 = vector.shape_cast %37 : vector<1x8xf32> to vector<1x1x8xf32>
    tpu.vector_store %arg4[%c0_22, %c1_23, %c0_24], %40 {strides = array<i32>} : memref<1x2x8xf32, #tpu.memory_space<vmem>>, vector<1x1x8xf32>,
    return
  }
  func.func @transform_0(%arg0: i32) -> (i32, i32, i32, i32) {
    %c0_i32 = arith.constant 0 : i32
    %c0_i32_0 = arith.constant 0 : i32
    %c0_i32_1 = arith.constant 0 : i32
    %c0_i32_2 = arith.constant 0 : i32
    return %arg0, %c0_i32, %c0_i32_0, %c0_i32_1 : i32, i32, i32, i32
  }
  func.func @transform_1(%arg0: i32) -> (i32, i32) {
    %c0_i32 = arith.constant 0 : i32
    %c0_i32_0 = arith.constant 0 : i32
    %c0_i32_1 = arith.constant 0 : i32
    return %c0_i32, %c0_i32_0 : i32, i32
  }
  func.func @transform_2(%arg0: i32) -> (i32, i32, i32) {
    %c0_i32 = arith.constant 0 : i32
    %c0_i32_0 = arith.constant 0 : i32
    %c0_i32_1 = arith.constant 0 : i32
    return %arg0, %c0_i32, %c0_i32_0 : i32, i32, i32
  }
  func.func @transform_3(%arg0: i32) -> (i32, i32, i32) {
    %c0_i32 = arith.constant 0 : i32
    %c0_i32_0 = arith.constant 0 : i32
    %c0_i32_1 = arith.constant 0 : i32
    return %arg0, %c0_i32, %c0_i32_0 : i32, i32, i32
  }
}

module attributes {stable_mosaic.version = 11 : i64} {
  func.func @_mm3_stats_kernel(%arg0: i32, %arg1: memref<256x4xbf16, #tpu.memory_space<vmem>>, %arg2: memref<4x16xbf16, #tpu.memory_space<vmem>>, %arg3: memref<256x8xbf16, #tpu.memory_space<vmem>>, %arg4: memref<256x4xbf16, #tpu.memory_space<vmem>>, %arg5: memref<256x4xbf16, #tpu.memory_space<vmem>>, %arg6: memref<1x2x16xf32, #tpu.memory_space<vmem>>) attributes {dimension_semantics = [#tpu.dimension_semantics<parallel>], iteration_bounds = array<i64: 2>, scalar_prefetch = 0 : i64, scratch_operands = 0 : i64, tpu.core_type = #tpu.core_type<tc>, window_params = [{transform_indices = @transform_0, window_bounds = array<i64: 256, 4>}, {pipeline_mode = #tpu.pipeline_mode<synchronous>, transform_indices = @transform_1, window_bounds = array<i64: 4, 16>}, {transform_indices = @transform_2, window_bounds = array<i64: 256, 8>}, {transform_indices = @transform_3, window_bounds = array<i64: 256, 4>}, {transform_indices = @transform_4, window_bounds = array<i64: 256, 4>}, {transform_indices = @transform_5, window_bounds = array<i64: 1, 2, 16>}]} {
    %c0 = arith.constant 0 : index
    %c0_0 = arith.constant 0 : index
    %0 = vector.load %arg1[%c0, %c0_0] : memref<256x4xbf16, #tpu.memory_space<vmem>>, vector<256x4xbf16>
    %c0_1 = arith.constant 0 : index
    %c0_2 = arith.constant 0 : index
    %1 = vector.load %arg2[%c0_1, %c0_2] : memref<4x16xbf16, #tpu.memory_space<vmem>>, vector<4x16xbf16>
    %cst = arith.constant dense<0.000000e+00> : vector<256x16xf32>
    %2 = tpu.matmul %0, %1, %cst {dimension_numbers = #tpu.dot_dimension_numbers<[1], [0], [0], [1], [0, 0, 1, 1], [], []>} : vector<256x4xbf16>, vector<4x16xbf16>, vector<256x16xf32> -> vector<256x16xf32>
    %3 = vector.extract_strided_slice %2 {offsets = [0, 0], sizes = [256, 8], strides = [1, 1]} : vector<256x16xf32> to vector<256x8xf32>
    %4 = arith.truncf %3 : vector<256x8xf32> to vector<256x8xbf16>
    %c0_3 = arith.constant 0 : index
    %c0_4 = arith.constant 0 : index
    %5 = vector.load %arg3[%c0_3, %c0_4] : memref<256x8xbf16, #tpu.memory_space<vmem>>, vector<256x8xbf16>
    tpu.vector_store %arg3[%c0_3, %c0_4], %4 {strides = array<i32>} : memref<256x8xbf16, #tpu.memory_space<vmem>>, vector<256x8xbf16>,
    %6 = vector.extract_strided_slice %2 {offsets = [0, 8], sizes = [256, 4], strides = [1, 1]} : vector<256x16xf32> to vector<256x4xf32>
    %7 = arith.truncf %6 : vector<256x4xf32> to vector<256x4xbf16>
    %c0_5 = arith.constant 0 : index
    %c0_6 = arith.constant 0 : index
    %8 = vector.load %arg4[%c0_5, %c0_6] : memref<256x4xbf16, #tpu.memory_space<vmem>>, vector<256x4xbf16>
    tpu.vector_store %arg4[%c0_5, %c0_6], %7 {strides = array<i32>} : memref<256x4xbf16, #tpu.memory_space<vmem>>, vector<256x4xbf16>,
    %9 = vector.extract_strided_slice %2 {offsets = [0, 12], sizes = [256, 4], strides = [1, 1]} : vector<256x16xf32> to vector<256x4xf32>
    %10 = arith.truncf %9 : vector<256x4xf32> to vector<256x4xbf16>
    %c0_7 = arith.constant 0 : index
    %c0_8 = arith.constant 0 : index
    %11 = vector.load %arg5[%c0_7, %c0_8] : memref<256x4xbf16, #tpu.memory_space<vmem>>, vector<256x4xbf16>
    tpu.vector_store %arg5[%c0_7, %c0_8], %10 {strides = array<i32>} : memref<256x4xbf16, #tpu.memory_space<vmem>>, vector<256x4xbf16>,
    %cst_9 = arith.constant dense<0.000000e+00> : vector<16xf32>
    %12 = vector.multi_reduction <add>, %2, %cst_9 [0] : vector<256x16xf32> to vector<16xf32>
    %13 = vector.shape_cast %12 : vector<16xf32> to vector<1x16xf32>
    %c0_10 = arith.constant 0 : index
    %c0_11 = arith.constant 0 : index
    %c0_12 = arith.constant 0 : index
    %14 = vector.load %arg6[%c0_10, %c0_11, %c0_12] : memref<1x2x16xf32, #tpu.memory_space<vmem>>, vector<1x1x16xf32>
    %15 = vector.shape_cast %14 : vector<1x1x16xf32> to vector<1x16xf32>
    %16 = vector.shape_cast %13 : vector<1x16xf32> to vector<1x1x16xf32>
    tpu.vector_store %arg6[%c0_10, %c0_11, %c0_12], %16 {strides = array<i32>} : memref<1x2x16xf32, #tpu.memory_space<vmem>>, vector<1x1x16xf32>,
    %17 = arith.mulf %2, %2 : vector<256x16xf32>
    %cst_13 = arith.constant dense<0.000000e+00> : vector<16xf32>
    %18 = vector.multi_reduction <add>, %17, %cst_13 [0] : vector<256x16xf32> to vector<16xf32>
    %19 = vector.shape_cast %18 : vector<16xf32> to vector<1x16xf32>
    %c0_14 = arith.constant 0 : index
    %c1 = arith.constant 1 : index
    %c0_15 = arith.constant 0 : index
    %20 = vector.load %arg6[%c0_14, %c1, %c0_15] : memref<1x2x16xf32, #tpu.memory_space<vmem>>, vector<1x1x16xf32>
    %21 = vector.shape_cast %20 : vector<1x1x16xf32> to vector<1x16xf32>
    %22 = vector.shape_cast %19 : vector<1x16xf32> to vector<1x1x16xf32>
    tpu.vector_store %arg6[%c0_14, %c1, %c0_15], %22 {strides = array<i32>} : memref<1x2x16xf32, #tpu.memory_space<vmem>>, vector<1x1x16xf32>,
    return
  }
  func.func @transform_0(%arg0: i32) -> (i32, i32) {
    %c0_i32 = arith.constant 0 : i32
    %c0_i32_0 = arith.constant 0 : i32
    return %arg0, %c0_i32 : i32, i32
  }
  func.func @transform_1(%arg0: i32) -> (i32, i32) {
    %c0_i32 = arith.constant 0 : i32
    %c0_i32_0 = arith.constant 0 : i32
    %c0_i32_1 = arith.constant 0 : i32
    return %c0_i32, %c0_i32_0 : i32, i32
  }
  func.func @transform_2(%arg0: i32) -> (i32, i32) {
    %c0_i32 = arith.constant 0 : i32
    %c0_i32_0 = arith.constant 0 : i32
    return %arg0, %c0_i32 : i32, i32
  }
  func.func @transform_3(%arg0: i32) -> (i32, i32) {
    %c0_i32 = arith.constant 0 : i32
    %c0_i32_0 = arith.constant 0 : i32
    return %arg0, %c0_i32 : i32, i32
  }
  func.func @transform_4(%arg0: i32) -> (i32, i32) {
    %c0_i32 = arith.constant 0 : i32
    %c0_i32_0 = arith.constant 0 : i32
    return %arg0, %c0_i32 : i32, i32
  }
  func.func @transform_5(%arg0: i32) -> (i32, i32, i32) {
    %c0_i32 = arith.constant 0 : i32
    %c0_i32_0 = arith.constant 0 : i32
    %c0_i32_1 = arith.constant 0 : i32
    return %arg0, %c0_i32, %c0_i32_0 : i32, i32, i32
  }
}

module attributes {stable_mosaic.version = 11 : i64} {
  func.func @_bnrelu_conv3x3_stats_kernel(%arg0: i32, %arg1: memref<1x16x16x4xbf16, #tpu.memory_space<vmem>>, %arg2: memref<1x4xf32, #tpu.memory_space<vmem>>, %arg3: memref<1x4xf32, #tpu.memory_space<vmem>>, %arg4: memref<3x3x4x8xbf16, #tpu.memory_space<vmem>>, %arg5: memref<1x256x8xbf16, #tpu.memory_space<vmem>>, %arg6: memref<1x2x8xf32, #tpu.memory_space<vmem>>, %arg7: memref<18x18x4xbf16, #tpu.memory_space<vmem>>) attributes {dimension_semantics = [#tpu.dimension_semantics<parallel>], iteration_bounds = array<i64: 2>, scalar_prefetch = 0 : i64, scratch_operands = 1 : i64, tpu.core_type = #tpu.core_type<tc>, window_params = [{transform_indices = @transform_0, window_bounds = array<i64: 1, 16, 16, 4>}, {pipeline_mode = #tpu.pipeline_mode<synchronous>, transform_indices = @transform_1, window_bounds = array<i64: 1, 4>}, {pipeline_mode = #tpu.pipeline_mode<synchronous>, transform_indices = @transform_2, window_bounds = array<i64: 1, 4>}, {pipeline_mode = #tpu.pipeline_mode<synchronous>, transform_indices = @transform_3, window_bounds = array<i64: 3, 3, 4, 8>}, {transform_indices = @transform_4, window_bounds = array<i64: 1, 256, 8>}, {transform_indices = @transform_5, window_bounds = array<i64: 1, 2, 8>}]} {
    %c0 = arith.constant 0 : index
    %c0_0 = arith.constant 0 : index
    %0 = vector.load %arg2[%c0, %c0_0] : memref<1x4xf32, #tpu.memory_space<vmem>>, vector<1x4xf32>
    %1 = vector.shape_cast %0 : vector<1x4xf32> to vector<1x1x4xf32>
    %c0_1 = arith.constant 0 : index
    %c0_2 = arith.constant 0 : index
    %2 = vector.load %arg3[%c0_1, %c0_2] : memref<1x4xf32, #tpu.memory_space<vmem>>, vector<1x4xf32>
    %3 = vector.shape_cast %2 : vector<1x4xf32> to vector<1x1x4xf32>
    %c0_3 = arith.constant 0 : index
    %c0_4 = arith.constant 0 : index
    %c0_5 = arith.constant 0 : index
    %c0_6 = arith.constant 0 : index
    %4 = vector.load %arg1[%c0_3, %c0_4, %c0_5, %c0_6] : memref<1x16x16x4xbf16, #tpu.memory_space<vmem>>, vector<1x16x16x4xbf16>
    %5 = vector.shape_cast %4 : vector<1x16x16x4xbf16> to vector<16x16x4xbf16>
    %6 = arith.extf %5 : vector<16x16x4xbf16> to vector<16x16x4xf32>
    %7 = vector.broadcast %1 : vector<1x1x4xf32> to vector<16x16x4xf32>
    %8 = arith.mulf %6, %7 : vector<16x16x4xf32>
    %9 = vector.broadcast %3 : vector<1x1x4xf32> to vector<16x16x4xf32>
    %10 = arith.addf %8, %9 : vector<16x16x4xf32>
    %cst = arith.constant 0.000000e+00 : f32
    %11 = vector.broadcast %cst : f32 to vector<16x16x4xf32>
    %12 = arith.maximumf %10, %11 : vector<16x16x4xf32>
    %13 = arith.truncf %12 : vector<16x16x4xf32> to vector<16x16x4xbf16>
    %cst_7 = arith.constant 0.000000e+00 : bf16
    %14 = vector.broadcast %cst_7 : bf16 to vector<18x18x4xbf16>
    %c0_8 = arith.constant 0 : index
    %c0_9 = arith.constant 0 : index
    %c0_10 = arith.constant 0 : index
    %15 = vector.load %arg7[%c0_8, %c0_9, %c0_10] : memref<18x18x4xbf16, #tpu.memory_space<vmem>>, vector<18x18x4xbf16>
    tpu.vector_store %arg7[%c0_8, %c0_9, %c0_10], %14 {strides = array<i32>} : memref<18x18x4xbf16, #tpu.memory_space<vmem>>, vector<18x18x4xbf16>,
    %c1 = arith.constant 1 : index
    %c1_11 = arith.constant 1 : index
    %c0_12 = arith.constant 0 : index
    %16 = vector.load %arg7[%c1, %c1_11, %c0_12] : memref<18x18x4xbf16, #tpu.memory_space<vmem>>, vector<16x16x4xbf16>
    tpu.vector_store %arg7[%c1, %c1_11, %c0_12], %13 {strides = array<i32>} : memref<18x18x4xbf16, #tpu.memory_space<vmem>>, vector<16x16x4xbf16>,
    %c0_13 = arith.constant 0 : index
    %c0_14 = arith.constant 0 : index
    %c0_15 = arith.constant 0 : index
    %17 = vector.load %arg7[%c0_13, %c0_14, %c0_15] : memref<18x18x4xbf16, #tpu.memory_space<vmem>>, vector<18x18x4xbf16>
    %cst_16 = arith.constant 0.000000e+00 : f32
    %18 = vector.broadcast %cst_16 : f32 to vector<256x8xf32>
    %19 = vector.extract_strided_slice %17 {offsets = [0, 0, 0], sizes = [16, 16, 4], strides = [1, 1, 1]} : vector<18x18x4xbf16> to vector<16x16x4xbf16>
    %20 = vector.shape_cast %19 : vector<16x16x4xbf16> to vector<256x4xbf16>
    %c0_17 = arith.constant 0 : index
    %c0_18 = arith.constant 0 : index
    %c0_19 = arith.constant 0 : index
    %c0_20 = arith.constant 0 : index
    %21 = vector.load %arg4[%c0_17, %c0_18, %c0_19, %c0_20] : memref<3x3x4x8xbf16, #tpu.memory_space<vmem>>, vector<1x1x4x8xbf16>
    %22 = vector.shape_cast %21 : vector<1x1x4x8xbf16> to vector<4x8xbf16>
    %cst_21 = arith.constant dense<0.000000e+00> : vector<256x8xf32>
    %23 = tpu.matmul %20, %22, %cst_21 {dimension_numbers = #tpu.dot_dimension_numbers<[1], [0], [0], [1], [0, 0, 1, 1], [], []>} : vector<256x4xbf16>, vector<4x8xbf16>, vector<256x8xf32> -> vector<256x8xf32>
    %24 = arith.addf %18, %23 : vector<256x8xf32>
    %25 = vector.extract_strided_slice %17 {offsets = [0, 1, 0], sizes = [16, 16, 4], strides = [1, 1, 1]} : vector<18x18x4xbf16> to vector<16x16x4xbf16>
    %26 = vector.shape_cast %25 : vector<16x16x4xbf16> to vector<256x4xbf16>
    %c0_22 = arith.constant 0 : index
    %c1_23 = arith.constant 1 : index
    %c0_24 = arith.constant 0 : index
    %c0_25 = arith.constant 0 : index
    %27 = vector.load %arg4[%c0_22, %c1_23, %c0_24, %c0_25] : memref<3x3x4x8xbf16, #tpu.memory_space<vmem>>, vector<1x1x4x8xbf16>
    %28 = vector.shape_cast %27 : vector<1x1x4x8xbf16> to vector<4x8xbf16>
    %cst_26 = arith.constant dense<0.000000e+00> : vector<256x8xf32>
    %29 = tpu.matmul %26, %28, %cst_26 {dimension_numbers = #tpu.dot_dimension_numbers<[1], [0], [0], [1], [0, 0, 1, 1], [], []>} : vector<256x4xbf16>, vector<4x8xbf16>, vector<256x8xf32> -> vector<256x8xf32>
    %30 = arith.addf %24, %29 : vector<256x8xf32>
    %31 = vector.extract_strided_slice %17 {offsets = [0, 2, 0], sizes = [16, 16, 4], strides = [1, 1, 1]} : vector<18x18x4xbf16> to vector<16x16x4xbf16>
    %32 = vector.shape_cast %31 : vector<16x16x4xbf16> to vector<256x4xbf16>
    %c0_27 = arith.constant 0 : index
    %c2 = arith.constant 2 : index
    %c0_28 = arith.constant 0 : index
    %c0_29 = arith.constant 0 : index
    %33 = vector.load %arg4[%c0_27, %c2, %c0_28, %c0_29] : memref<3x3x4x8xbf16, #tpu.memory_space<vmem>>, vector<1x1x4x8xbf16>
    %34 = vector.shape_cast %33 : vector<1x1x4x8xbf16> to vector<4x8xbf16>
    %cst_30 = arith.constant dense<0.000000e+00> : vector<256x8xf32>
    %35 = tpu.matmul %32, %34, %cst_30 {dimension_numbers = #tpu.dot_dimension_numbers<[1], [0], [0], [1], [0, 0, 1, 1], [], []>} : vector<256x4xbf16>, vector<4x8xbf16>, vector<256x8xf32> -> vector<256x8xf32>
    %36 = arith.addf %30, %35 : vector<256x8xf32>
    %37 = vector.extract_strided_slice %17 {offsets = [1, 0, 0], sizes = [16, 16, 4], strides = [1, 1, 1]} : vector<18x18x4xbf16> to vector<16x16x4xbf16>
    %38 = vector.shape_cast %37 : vector<16x16x4xbf16> to vector<256x4xbf16>
    %c1_31 = arith.constant 1 : index
    %c0_32 = arith.constant 0 : index
    %c0_33 = arith.constant 0 : index
    %c0_34 = arith.constant 0 : index
    %39 = vector.load %arg4[%c1_31, %c0_32, %c0_33, %c0_34] : memref<3x3x4x8xbf16, #tpu.memory_space<vmem>>, vector<1x1x4x8xbf16>
    %40 = vector.shape_cast %39 : vector<1x1x4x8xbf16> to vector<4x8xbf16>
    %cst_35 = arith.constant dense<0.000000e+00> : vector<256x8xf32>
    %41 = tpu.matmul %38, %40, %cst_35 {dimension_numbers = #tpu.dot_dimension_numbers<[1], [0], [0], [1], [0, 0, 1, 1], [], []>} : vector<256x4xbf16>, vector<4x8xbf16>, vector<256x8xf32> -> vector<256x8xf32>
    %42 = arith.addf %36, %41 : vector<256x8xf32>
    %43 = vector.extract_strided_slice %17 {offsets = [1, 1, 0], sizes = [16, 16, 4], strides = [1, 1, 1]} : vector<18x18x4xbf16> to vector<16x16x4xbf16>
    %44 = vector.shape_cast %43 : vector<16x16x4xbf16> to vector<256x4xbf16>
    %c1_36 = arith.constant 1 : index
    %c1_37 = arith.constant 1 : index
    %c0_38 = arith.constant 0 : index
    %c0_39 = arith.constant 0 : index
    %45 = vector.load %arg4[%c1_36, %c1_37, %c0_38, %c0_39] : memref<3x3x4x8xbf16, #tpu.memory_space<vmem>>, vector<1x1x4x8xbf16>
    %46 = vector.shape_cast %45 : vector<1x1x4x8xbf16> to vector<4x8xbf16>
    %cst_40 = arith.constant dense<0.000000e+00> : vector<256x8xf32>
    %47 = tpu.matmul %44, %46, %cst_40 {dimension_numbers = #tpu.dot_dimension_numbers<[1], [0], [0], [1], [0, 0, 1, 1], [], []>} : vector<256x4xbf16>, vector<4x8xbf16>, vector<256x8xf32> -> vector<256x8xf32>
    %48 = arith.addf %42, %47 : vector<256x8xf32>
    %49 = vector.extract_strided_slice %17 {offsets = [1, 2, 0], sizes = [16, 16, 4], strides = [1, 1, 1]} : vector<18x18x4xbf16> to vector<16x16x4xbf16>
    %50 = vector.shape_cast %49 : vector<16x16x4xbf16> to vector<256x4xbf16>
    %c1_41 = arith.constant 1 : index
    %c2_42 = arith.constant 2 : index
    %c0_43 = arith.constant 0 : index
    %c0_44 = arith.constant 0 : index
    %51 = vector.load %arg4[%c1_41, %c2_42, %c0_43, %c0_44] : memref<3x3x4x8xbf16, #tpu.memory_space<vmem>>, vector<1x1x4x8xbf16>
    %52 = vector.shape_cast %51 : vector<1x1x4x8xbf16> to vector<4x8xbf16>
    %cst_45 = arith.constant dense<0.000000e+00> : vector<256x8xf32>
    %53 = tpu.matmul %50, %52, %cst_45 {dimension_numbers = #tpu.dot_dimension_numbers<[1], [0], [0], [1], [0, 0, 1, 1], [], []>} : vector<256x4xbf16>, vector<4x8xbf16>, vector<256x8xf32> -> vector<256x8xf32>
    %54 = arith.addf %48, %53 : vector<256x8xf32>
    %55 = vector.extract_strided_slice %17 {offsets = [2, 0, 0], sizes = [16, 16, 4], strides = [1, 1, 1]} : vector<18x18x4xbf16> to vector<16x16x4xbf16>
    %56 = vector.shape_cast %55 : vector<16x16x4xbf16> to vector<256x4xbf16>
    %c2_46 = arith.constant 2 : index
    %c0_47 = arith.constant 0 : index
    %c0_48 = arith.constant 0 : index
    %c0_49 = arith.constant 0 : index
    %57 = vector.load %arg4[%c2_46, %c0_47, %c0_48, %c0_49] : memref<3x3x4x8xbf16, #tpu.memory_space<vmem>>, vector<1x1x4x8xbf16>
    %58 = vector.shape_cast %57 : vector<1x1x4x8xbf16> to vector<4x8xbf16>
    %cst_50 = arith.constant dense<0.000000e+00> : vector<256x8xf32>
    %59 = tpu.matmul %56, %58, %cst_50 {dimension_numbers = #tpu.dot_dimension_numbers<[1], [0], [0], [1], [0, 0, 1, 1], [], []>} : vector<256x4xbf16>, vector<4x8xbf16>, vector<256x8xf32> -> vector<256x8xf32>
    %60 = arith.addf %54, %59 : vector<256x8xf32>
    %61 = vector.extract_strided_slice %17 {offsets = [2, 1, 0], sizes = [16, 16, 4], strides = [1, 1, 1]} : vector<18x18x4xbf16> to vector<16x16x4xbf16>
    %62 = vector.shape_cast %61 : vector<16x16x4xbf16> to vector<256x4xbf16>
    %c2_51 = arith.constant 2 : index
    %c1_52 = arith.constant 1 : index
    %c0_53 = arith.constant 0 : index
    %c0_54 = arith.constant 0 : index
    %63 = vector.load %arg4[%c2_51, %c1_52, %c0_53, %c0_54] : memref<3x3x4x8xbf16, #tpu.memory_space<vmem>>, vector<1x1x4x8xbf16>
    %64 = vector.shape_cast %63 : vector<1x1x4x8xbf16> to vector<4x8xbf16>
    %cst_55 = arith.constant dense<0.000000e+00> : vector<256x8xf32>
    %65 = tpu.matmul %62, %64, %cst_55 {dimension_numbers = #tpu.dot_dimension_numbers<[1], [0], [0], [1], [0, 0, 1, 1], [], []>} : vector<256x4xbf16>, vector<4x8xbf16>, vector<256x8xf32> -> vector<256x8xf32>
    %66 = arith.addf %60, %65 : vector<256x8xf32>
    %67 = vector.extract_strided_slice %17 {offsets = [2, 2, 0], sizes = [16, 16, 4], strides = [1, 1, 1]} : vector<18x18x4xbf16> to vector<16x16x4xbf16>
    %68 = vector.shape_cast %67 : vector<16x16x4xbf16> to vector<256x4xbf16>
    %c2_56 = arith.constant 2 : index
    %c2_57 = arith.constant 2 : index
    %c0_58 = arith.constant 0 : index
    %c0_59 = arith.constant 0 : index
    %69 = vector.load %arg4[%c2_56, %c2_57, %c0_58, %c0_59] : memref<3x3x4x8xbf16, #tpu.memory_space<vmem>>, vector<1x1x4x8xbf16>
    %70 = vector.shape_cast %69 : vector<1x1x4x8xbf16> to vector<4x8xbf16>
    %cst_60 = arith.constant dense<0.000000e+00> : vector<256x8xf32>
    %71 = tpu.matmul %68, %70, %cst_60 {dimension_numbers = #tpu.dot_dimension_numbers<[1], [0], [0], [1], [0, 0, 1, 1], [], []>} : vector<256x4xbf16>, vector<4x8xbf16>, vector<256x8xf32> -> vector<256x8xf32>
    %72 = arith.addf %66, %71 : vector<256x8xf32>
    %73 = arith.truncf %72 : vector<256x8xf32> to vector<256x8xbf16>
    %c0_61 = arith.constant 0 : index
    %c0_62 = arith.constant 0 : index
    %c0_63 = arith.constant 0 : index
    %74 = vector.load %arg5[%c0_61, %c0_62, %c0_63] : memref<1x256x8xbf16, #tpu.memory_space<vmem>>, vector<1x256x8xbf16>
    %75 = vector.shape_cast %74 : vector<1x256x8xbf16> to vector<256x8xbf16>
    %76 = vector.shape_cast %73 : vector<256x8xbf16> to vector<1x256x8xbf16>
    tpu.vector_store %arg5[%c0_61, %c0_62, %c0_63], %76 {strides = array<i32>} : memref<1x256x8xbf16, #tpu.memory_space<vmem>>, vector<1x256x8xbf16>,
    %cst_64 = arith.constant dense<0.000000e+00> : vector<8xf32>
    %77 = vector.multi_reduction <add>, %72, %cst_64 [0] : vector<256x8xf32> to vector<8xf32>
    %78 = vector.shape_cast %77 : vector<8xf32> to vector<1x8xf32>
    %c0_65 = arith.constant 0 : index
    %c0_66 = arith.constant 0 : index
    %c0_67 = arith.constant 0 : index
    %79 = vector.load %arg6[%c0_65, %c0_66, %c0_67] : memref<1x2x8xf32, #tpu.memory_space<vmem>>, vector<1x1x8xf32>
    %80 = vector.shape_cast %79 : vector<1x1x8xf32> to vector<1x8xf32>
    %81 = vector.shape_cast %78 : vector<1x8xf32> to vector<1x1x8xf32>
    tpu.vector_store %arg6[%c0_65, %c0_66, %c0_67], %81 {strides = array<i32>} : memref<1x2x8xf32, #tpu.memory_space<vmem>>, vector<1x1x8xf32>,
    %82 = arith.mulf %72, %72 : vector<256x8xf32>
    %cst_68 = arith.constant dense<0.000000e+00> : vector<8xf32>
    %83 = vector.multi_reduction <add>, %82, %cst_68 [0] : vector<256x8xf32> to vector<8xf32>
    %84 = vector.shape_cast %83 : vector<8xf32> to vector<1x8xf32>
    %c0_69 = arith.constant 0 : index
    %c1_70 = arith.constant 1 : index
    %c0_71 = arith.constant 0 : index
    %85 = vector.load %arg6[%c0_69, %c1_70, %c0_71] : memref<1x2x8xf32, #tpu.memory_space<vmem>>, vector<1x1x8xf32>
    %86 = vector.shape_cast %85 : vector<1x1x8xf32> to vector<1x8xf32>
    %87 = vector.shape_cast %84 : vector<1x8xf32> to vector<1x1x8xf32>
    tpu.vector_store %arg6[%c0_69, %c1_70, %c0_71], %87 {strides = array<i32>} : memref<1x2x8xf32, #tpu.memory_space<vmem>>, vector<1x1x8xf32>,
    return
  }
  func.func @transform_0(%arg0: i32) -> (i32, i32, i32, i32) {
    %c0_i32 = arith.constant 0 : i32
    %c0_i32_0 = arith.constant 0 : i32
    %c0_i32_1 = arith.constant 0 : i32
    %c0_i32_2 = arith.constant 0 : i32
    return %arg0, %c0_i32, %c0_i32_0, %c0_i32_1 : i32, i32, i32, i32
  }
  func.func @transform_1(%arg0: i32) -> (i32, i32) {
    %c0_i32 = arith.constant 0 : i32
    %c0_i32_0 = arith.constant 0 : i32
    %c0_i32_1 = arith.constant 0 : i32
    return %c0_i32, %c0_i32_0 : i32, i32
  }
  func.func @transform_2(%arg0: i32) -> (i32, i32) {
    %c0_i32 = arith.constant 0 : i32
    %c0_i32_0 = arith.constant 0 : i32
    %c0_i32_1 = arith.constant 0 : i32
    return %c0_i32, %c0_i32_0 : i32, i32
  }
  func.func @transform_3(%arg0: i32) -> (i32, i32, i32, i32) {
    %c0_i32 = arith.constant 0 : i32
    %c0_i32_0 = arith.constant 0 : i32
    %c0_i32_1 = arith.constant 0 : i32
    %c0_i32_2 = arith.constant 0 : i32
    %c0_i32_3 = arith.constant 0 : i32
    return %c0_i32, %c0_i32_0, %c0_i32_1, %c0_i32_2 : i32, i32, i32, i32
  }
  func.func @transform_4(%arg0: i32) -> (i32, i32, i32) {
    %c0_i32 = arith.constant 0 : i32
    %c0_i32_0 = arith.constant 0 : i32
    %c0_i32_1 = arith.constant 0 : i32
    return %arg0, %c0_i32, %c0_i32_0 : i32, i32, i32
  }
  func.func @transform_5(%arg0: i32) -> (i32, i32, i32) {
    %c0_i32 = arith.constant 0 : i32
    %c0_i32_0 = arith.constant 0 : i32
    %c0_i32_1 = arith.constant 0 : i32
    return %arg0, %c0_i32, %c0_i32_0 : i32, i32, i32
  }
}

module attributes {stable_mosaic.version = 11 : i64} {
  func.func @_bnrelu_conv3x3_stats_kernel(%arg0: i32, %arg1: memref<1x16x16x8xbf16, #tpu.memory_space<vmem>>, %arg2: memref<1x8xf32, #tpu.memory_space<vmem>>, %arg3: memref<1x8xf32, #tpu.memory_space<vmem>>, %arg4: memref<3x3x8x8xbf16, #tpu.memory_space<vmem>>, %arg5: memref<1x256x8xbf16, #tpu.memory_space<vmem>>, %arg6: memref<1x2x8xf32, #tpu.memory_space<vmem>>, %arg7: memref<18x18x8xbf16, #tpu.memory_space<vmem>>) attributes {dimension_semantics = [#tpu.dimension_semantics<parallel>], iteration_bounds = array<i64: 2>, scalar_prefetch = 0 : i64, scratch_operands = 1 : i64, tpu.core_type = #tpu.core_type<tc>, window_params = [{transform_indices = @transform_0, window_bounds = array<i64: 1, 16, 16, 8>}, {pipeline_mode = #tpu.pipeline_mode<synchronous>, transform_indices = @transform_1, window_bounds = array<i64: 1, 8>}, {pipeline_mode = #tpu.pipeline_mode<synchronous>, transform_indices = @transform_2, window_bounds = array<i64: 1, 8>}, {pipeline_mode = #tpu.pipeline_mode<synchronous>, transform_indices = @transform_3, window_bounds = array<i64: 3, 3, 8, 8>}, {transform_indices = @transform_4, window_bounds = array<i64: 1, 256, 8>}, {transform_indices = @transform_5, window_bounds = array<i64: 1, 2, 8>}]} {
    %c0 = arith.constant 0 : index
    %c0_0 = arith.constant 0 : index
    %0 = vector.load %arg2[%c0, %c0_0] : memref<1x8xf32, #tpu.memory_space<vmem>>, vector<1x8xf32>
    %1 = vector.shape_cast %0 : vector<1x8xf32> to vector<1x1x8xf32>
    %c0_1 = arith.constant 0 : index
    %c0_2 = arith.constant 0 : index
    %2 = vector.load %arg3[%c0_1, %c0_2] : memref<1x8xf32, #tpu.memory_space<vmem>>, vector<1x8xf32>
    %3 = vector.shape_cast %2 : vector<1x8xf32> to vector<1x1x8xf32>
    %c0_3 = arith.constant 0 : index
    %c0_4 = arith.constant 0 : index
    %c0_5 = arith.constant 0 : index
    %c0_6 = arith.constant 0 : index
    %4 = vector.load %arg1[%c0_3, %c0_4, %c0_5, %c0_6] : memref<1x16x16x8xbf16, #tpu.memory_space<vmem>>, vector<1x16x16x8xbf16>
    %5 = vector.shape_cast %4 : vector<1x16x16x8xbf16> to vector<16x16x8xbf16>
    %6 = arith.extf %5 : vector<16x16x8xbf16> to vector<16x16x8xf32>
    %7 = vector.broadcast %1 : vector<1x1x8xf32> to vector<16x16x8xf32>
    %8 = arith.mulf %6, %7 : vector<16x16x8xf32>
    %9 = vector.broadcast %3 : vector<1x1x8xf32> to vector<16x16x8xf32>
    %10 = arith.addf %8, %9 : vector<16x16x8xf32>
    %cst = arith.constant 0.000000e+00 : f32
    %11 = vector.broadcast %cst : f32 to vector<16x16x8xf32>
    %12 = arith.maximumf %10, %11 : vector<16x16x8xf32>
    %13 = arith.truncf %12 : vector<16x16x8xf32> to vector<16x16x8xbf16>
    %cst_7 = arith.constant 0.000000e+00 : bf16
    %14 = vector.broadcast %cst_7 : bf16 to vector<18x18x8xbf16>
    %c0_8 = arith.constant 0 : index
    %c0_9 = arith.constant 0 : index
    %c0_10 = arith.constant 0 : index
    %15 = vector.load %arg7[%c0_8, %c0_9, %c0_10] : memref<18x18x8xbf16, #tpu.memory_space<vmem>>, vector<18x18x8xbf16>
    tpu.vector_store %arg7[%c0_8, %c0_9, %c0_10], %14 {strides = array<i32>} : memref<18x18x8xbf16, #tpu.memory_space<vmem>>, vector<18x18x8xbf16>,
    %c1 = arith.constant 1 : index
    %c1_11 = arith.constant 1 : index
    %c0_12 = arith.constant 0 : index
    %16 = vector.load %arg7[%c1, %c1_11, %c0_12] : memref<18x18x8xbf16, #tpu.memory_space<vmem>>, vector<16x16x8xbf16>
    tpu.vector_store %arg7[%c1, %c1_11, %c0_12], %13 {strides = array<i32>} : memref<18x18x8xbf16, #tpu.memory_space<vmem>>, vector<16x16x8xbf16>,
    %c0_13 = arith.constant 0 : index
    %c0_14 = arith.constant 0 : index
    %c0_15 = arith.constant 0 : index
    %17 = vector.load %arg7[%c0_13, %c0_14, %c0_15] : memref<18x18x8xbf16, #tpu.memory_space<vmem>>, vector<18x18x8xbf16>
    %cst_16 = arith.constant 0.000000e+00 : f32
    %18 = vector.broadcast %cst_16 : f32 to vector<256x8xf32>
    %19 = vector.extract_strided_slice %17 {offsets = [0, 0, 0], sizes = [16, 16, 8], strides = [1, 1, 1]} : vector<18x18x8xbf16> to vector<16x16x8xbf16>
    %20 = vector.shape_cast %19 : vector<16x16x8xbf16> to vector<256x8xbf16>
    %c0_17 = arith.constant 0 : index
    %c0_18 = arith.constant 0 : index
    %c0_19 = arith.constant 0 : index
    %c0_20 = arith.constant 0 : index
    %21 = vector.load %arg4[%c0_17, %c0_18, %c0_19, %c0_20] : memref<3x3x8x8xbf16, #tpu.memory_space<vmem>>, vector<1x1x8x8xbf16>
    %22 = vector.shape_cast %21 : vector<1x1x8x8xbf16> to vector<8x8xbf16>
    %cst_21 = arith.constant dense<0.000000e+00> : vector<256x8xf32>
    %23 = tpu.matmul %20, %22, %cst_21 {dimension_numbers = #tpu.dot_dimension_numbers<[1], [0], [0], [1], [0, 0, 1, 1], [], []>} : vector<256x8xbf16>, vector<8x8xbf16>, vector<256x8xf32> -> vector<256x8xf32>
    %24 = arith.addf %18, %23 : vector<256x8xf32>
    %25 = vector.extract_strided_slice %17 {offsets = [0, 1, 0], sizes = [16, 16, 8], strides = [1, 1, 1]} : vector<18x18x8xbf16> to vector<16x16x8xbf16>
    %26 = vector.shape_cast %25 : vector<16x16x8xbf16> to vector<256x8xbf16>
    %c0_22 = arith.constant 0 : index
    %c1_23 = arith.constant 1 : index
    %c0_24 = arith.constant 0 : index
    %c0_25 = arith.constant 0 : index
    %27 = vector.load %arg4[%c0_22, %c1_23, %c0_24, %c0_25] : memref<3x3x8x8xbf16, #tpu.memory_space<vmem>>, vector<1x1x8x8xbf16>
    %28 = vector.shape_cast %27 : vector<1x1x8x8xbf16> to vector<8x8xbf16>
    %cst_26 = arith.constant dense<0.000000e+00> : vector<256x8xf32>
    %29 = tpu.matmul %26, %28, %cst_26 {dimension_numbers = #tpu.dot_dimension_numbers<[1], [0], [0], [1], [0, 0, 1, 1], [], []>} : vector<256x8xbf16>, vector<8x8xbf16>, vector<256x8xf32> -> vector<256x8xf32>
    %30 = arith.addf %24, %29 : vector<256x8xf32>
    %31 = vector.extract_strided_slice %17 {offsets = [0, 2, 0], sizes = [16, 16, 8], strides = [1, 1, 1]} : vector<18x18x8xbf16> to vector<16x16x8xbf16>
    %32 = vector.shape_cast %31 : vector<16x16x8xbf16> to vector<256x8xbf16>
    %c0_27 = arith.constant 0 : index
    %c2 = arith.constant 2 : index
    %c0_28 = arith.constant 0 : index
    %c0_29 = arith.constant 0 : index
    %33 = vector.load %arg4[%c0_27, %c2, %c0_28, %c0_29] : memref<3x3x8x8xbf16, #tpu.memory_space<vmem>>, vector<1x1x8x8xbf16>
    %34 = vector.shape_cast %33 : vector<1x1x8x8xbf16> to vector<8x8xbf16>
    %cst_30 = arith.constant dense<0.000000e+00> : vector<256x8xf32>
    %35 = tpu.matmul %32, %34, %cst_30 {dimension_numbers = #tpu.dot_dimension_numbers<[1], [0], [0], [1], [0, 0, 1, 1], [], []>} : vector<256x8xbf16>, vector<8x8xbf16>, vector<256x8xf32> -> vector<256x8xf32>
    %36 = arith.addf %30, %35 : vector<256x8xf32>
    %37 = vector.extract_strided_slice %17 {offsets = [1, 0, 0], sizes = [16, 16, 8], strides = [1, 1, 1]} : vector<18x18x8xbf16> to vector<16x16x8xbf16>
    %38 = vector.shape_cast %37 : vector<16x16x8xbf16> to vector<256x8xbf16>
    %c1_31 = arith.constant 1 : index
    %c0_32 = arith.constant 0 : index
    %c0_33 = arith.constant 0 : index
    %c0_34 = arith.constant 0 : index
    %39 = vector.load %arg4[%c1_31, %c0_32, %c0_33, %c0_34] : memref<3x3x8x8xbf16, #tpu.memory_space<vmem>>, vector<1x1x8x8xbf16>
    %40 = vector.shape_cast %39 : vector<1x1x8x8xbf16> to vector<8x8xbf16>
    %cst_35 = arith.constant dense<0.000000e+00> : vector<256x8xf32>
    %41 = tpu.matmul %38, %40, %cst_35 {dimension_numbers = #tpu.dot_dimension_numbers<[1], [0], [0], [1], [0, 0, 1, 1], [], []>} : vector<256x8xbf16>, vector<8x8xbf16>, vector<256x8xf32> -> vector<256x8xf32>
    %42 = arith.addf %36, %41 : vector<256x8xf32>
    %43 = vector.extract_strided_slice %17 {offsets = [1, 1, 0], sizes = [16, 16, 8], strides = [1, 1, 1]} : vector<18x18x8xbf16> to vector<16x16x8xbf16>
    %44 = vector.shape_cast %43 : vector<16x16x8xbf16> to vector<256x8xbf16>
    %c1_36 = arith.constant 1 : index
    %c1_37 = arith.constant 1 : index
    %c0_38 = arith.constant 0 : index
    %c0_39 = arith.constant 0 : index
    %45 = vector.load %arg4[%c1_36, %c1_37, %c0_38, %c0_39] : memref<3x3x8x8xbf16, #tpu.memory_space<vmem>>, vector<1x1x8x8xbf16>
    %46 = vector.shape_cast %45 : vector<1x1x8x8xbf16> to vector<8x8xbf16>
    %cst_40 = arith.constant dense<0.000000e+00> : vector<256x8xf32>
    %47 = tpu.matmul %44, %46, %cst_40 {dimension_numbers = #tpu.dot_dimension_numbers<[1], [0], [0], [1], [0, 0, 1, 1], [], []>} : vector<256x8xbf16>, vector<8x8xbf16>, vector<256x8xf32> -> vector<256x8xf32>
    %48 = arith.addf %42, %47 : vector<256x8xf32>
    %49 = vector.extract_strided_slice %17 {offsets = [1, 2, 0], sizes = [16, 16, 8], strides = [1, 1, 1]} : vector<18x18x8xbf16> to vector<16x16x8xbf16>
    %50 = vector.shape_cast %49 : vector<16x16x8xbf16> to vector<256x8xbf16>
    %c1_41 = arith.constant 1 : index
    %c2_42 = arith.constant 2 : index
    %c0_43 = arith.constant 0 : index
    %c0_44 = arith.constant 0 : index
    %51 = vector.load %arg4[%c1_41, %c2_42, %c0_43, %c0_44] : memref<3x3x8x8xbf16, #tpu.memory_space<vmem>>, vector<1x1x8x8xbf16>
    %52 = vector.shape_cast %51 : vector<1x1x8x8xbf16> to vector<8x8xbf16>
    %cst_45 = arith.constant dense<0.000000e+00> : vector<256x8xf32>
    %53 = tpu.matmul %50, %52, %cst_45 {dimension_numbers = #tpu.dot_dimension_numbers<[1], [0], [0], [1], [0, 0, 1, 1], [], []>} : vector<256x8xbf16>, vector<8x8xbf16>, vector<256x8xf32> -> vector<256x8xf32>
    %54 = arith.addf %48, %53 : vector<256x8xf32>
    %55 = vector.extract_strided_slice %17 {offsets = [2, 0, 0], sizes = [16, 16, 8], strides = [1, 1, 1]} : vector<18x18x8xbf16> to vector<16x16x8xbf16>
    %56 = vector.shape_cast %55 : vector<16x16x8xbf16> to vector<256x8xbf16>
    %c2_46 = arith.constant 2 : index
    %c0_47 = arith.constant 0 : index
    %c0_48 = arith.constant 0 : index
    %c0_49 = arith.constant 0 : index
    %57 = vector.load %arg4[%c2_46, %c0_47, %c0_48, %c0_49] : memref<3x3x8x8xbf16, #tpu.memory_space<vmem>>, vector<1x1x8x8xbf16>
    %58 = vector.shape_cast %57 : vector<1x1x8x8xbf16> to vector<8x8xbf16>
    %cst_50 = arith.constant dense<0.000000e+00> : vector<256x8xf32>
    %59 = tpu.matmul %56, %58, %cst_50 {dimension_numbers = #tpu.dot_dimension_numbers<[1], [0], [0], [1], [0, 0, 1, 1], [], []>} : vector<256x8xbf16>, vector<8x8xbf16>, vector<256x8xf32> -> vector<256x8xf32>
    %60 = arith.addf %54, %59 : vector<256x8xf32>
    %61 = vector.extract_strided_slice %17 {offsets = [2, 1, 0], sizes = [16, 16, 8], strides = [1, 1, 1]} : vector<18x18x8xbf16> to vector<16x16x8xbf16>
    %62 = vector.shape_cast %61 : vector<16x16x8xbf16> to vector<256x8xbf16>
    %c2_51 = arith.constant 2 : index
    %c1_52 = arith.constant 1 : index
    %c0_53 = arith.constant 0 : index
    %c0_54 = arith.constant 0 : index
    %63 = vector.load %arg4[%c2_51, %c1_52, %c0_53, %c0_54] : memref<3x3x8x8xbf16, #tpu.memory_space<vmem>>, vector<1x1x8x8xbf16>
    %64 = vector.shape_cast %63 : vector<1x1x8x8xbf16> to vector<8x8xbf16>
    %cst_55 = arith.constant dense<0.000000e+00> : vector<256x8xf32>
    %65 = tpu.matmul %62, %64, %cst_55 {dimension_numbers = #tpu.dot_dimension_numbers<[1], [0], [0], [1], [0, 0, 1, 1], [], []>} : vector<256x8xbf16>, vector<8x8xbf16>, vector<256x8xf32> -> vector<256x8xf32>
    %66 = arith.addf %60, %65 : vector<256x8xf32>
    %67 = vector.extract_strided_slice %17 {offsets = [2, 2, 0], sizes = [16, 16, 8], strides = [1, 1, 1]} : vector<18x18x8xbf16> to vector<16x16x8xbf16>
    %68 = vector.shape_cast %67 : vector<16x16x8xbf16> to vector<256x8xbf16>
    %c2_56 = arith.constant 2 : index
    %c2_57 = arith.constant 2 : index
    %c0_58 = arith.constant 0 : index
    %c0_59 = arith.constant 0 : index
    %69 = vector.load %arg4[%c2_56, %c2_57, %c0_58, %c0_59] : memref<3x3x8x8xbf16, #tpu.memory_space<vmem>>, vector<1x1x8x8xbf16>
    %70 = vector.shape_cast %69 : vector<1x1x8x8xbf16> to vector<8x8xbf16>
    %cst_60 = arith.constant dense<0.000000e+00> : vector<256x8xf32>
    %71 = tpu.matmul %68, %70, %cst_60 {dimension_numbers = #tpu.dot_dimension_numbers<[1], [0], [0], [1], [0, 0, 1, 1], [], []>} : vector<256x8xbf16>, vector<8x8xbf16>, vector<256x8xf32> -> vector<256x8xf32>
    %72 = arith.addf %66, %71 : vector<256x8xf32>
    %73 = arith.truncf %72 : vector<256x8xf32> to vector<256x8xbf16>
    %c0_61 = arith.constant 0 : index
    %c0_62 = arith.constant 0 : index
    %c0_63 = arith.constant 0 : index
    %74 = vector.load %arg5[%c0_61, %c0_62, %c0_63] : memref<1x256x8xbf16, #tpu.memory_space<vmem>>, vector<1x256x8xbf16>
    %75 = vector.shape_cast %74 : vector<1x256x8xbf16> to vector<256x8xbf16>
    %76 = vector.shape_cast %73 : vector<256x8xbf16> to vector<1x256x8xbf16>
    tpu.vector_store %arg5[%c0_61, %c0_62, %c0_63], %76 {strides = array<i32>} : memref<1x256x8xbf16, #tpu.memory_space<vmem>>, vector<1x256x8xbf16>,
    %cst_64 = arith.constant dense<0.000000e+00> : vector<8xf32>
    %77 = vector.multi_reduction <add>, %72, %cst_64 [0] : vector<256x8xf32> to vector<8xf32>
    %78 = vector.shape_cast %77 : vector<8xf32> to vector<1x8xf32>
    %c0_65 = arith.constant 0 : index
    %c0_66 = arith.constant 0 : index
    %c0_67 = arith.constant 0 : index
    %79 = vector.load %arg6[%c0_65, %c0_66, %c0_67] : memref<1x2x8xf32, #tpu.memory_space<vmem>>, vector<1x1x8xf32>
    %80 = vector.shape_cast %79 : vector<1x1x8xf32> to vector<1x8xf32>
    %81 = vector.shape_cast %78 : vector<1x8xf32> to vector<1x1x8xf32>
    tpu.vector_store %arg6[%c0_65, %c0_66, %c0_67], %81 {strides = array<i32>} : memref<1x2x8xf32, #tpu.memory_space<vmem>>, vector<1x1x8xf32>,
    %82 = arith.mulf %72, %72 : vector<256x8xf32>
    %cst_68 = arith.constant dense<0.000000e+00> : vector<8xf32>
    %83 = vector.multi_reduction <add>, %82, %cst_68 [0] : vector<256x8xf32> to vector<8xf32>
    %84 = vector.shape_cast %83 : vector<8xf32> to vector<1x8xf32>
    %c0_69 = arith.constant 0 : index
    %c1_70 = arith.constant 1 : index
    %c0_71 = arith.constant 0 : index
    %85 = vector.load %arg6[%c0_69, %c1_70, %c0_71] : memref<1x2x8xf32, #tpu.memory_space<vmem>>, vector<1x1x8xf32>
    %86 = vector.shape_cast %85 : vector<1x1x8xf32> to vector<1x8xf32>
    %87 = vector.shape_cast %84 : vector<1x8xf32> to vector<1x1x8xf32>
    tpu.vector_store %arg6[%c0_69, %c1_70, %c0_71], %87 {strides = array<i32>} : memref<1x2x8xf32, #tpu.memory_space<vmem>>, vector<1x1x8xf32>,
    return
  }
  func.func @transform_0(%arg0: i32) -> (i32, i32, i32, i32) {
    %c0_i32 = arith.constant 0 : i32
    %c0_i32_0 = arith.constant 0 : i32
    %c0_i32_1 = arith.constant 0 : i32
    %c0_i32_2 = arith.constant 0 : i32
    return %arg0, %c0_i32, %c0_i32_0, %c0_i32_1 : i32, i32, i32, i32
  }
  func.func @transform_1(%arg0: i32) -> (i32, i32) {
    %c0_i32 = arith.constant 0 : i32
    %c0_i32_0 = arith.constant 0 : i32
    %c0_i32_1 = arith.constant 0 : i32
    return %c0_i32, %c0_i32_0 : i32, i32
  }
  func.func @transform_2(%arg0: i32) -> (i32, i32) {
    %c0_i32 = arith.constant 0 : i32
    %c0_i32_0 = arith.constant 0 : i32
    %c0_i32_1 = arith.constant 0 : i32
    return %c0_i32, %c0_i32_0 : i32, i32
  }
  func.func @transform_3(%arg0: i32) -> (i32, i32, i32, i32) {
    %c0_i32 = arith.constant 0 : i32
    %c0_i32_0 = arith.constant 0 : i32
    %c0_i32_1 = arith.constant 0 : i32
    %c0_i32_2 = arith.constant 0 : i32
    %c0_i32_3 = arith.constant 0 : i32
    return %c0_i32, %c0_i32_0, %c0_i32_1, %c0_i32_2 : i32, i32, i32, i32
  }
  func.func @transform_4(%arg0: i32) -> (i32, i32, i32) {
    %c0_i32 = arith.constant 0 : i32
    %c0_i32_0 = arith.constant 0 : i32
    %c0_i32_1 = arith.constant 0 : i32
    return %arg0, %c0_i32, %c0_i32_0 : i32, i32, i32
  }
  func.func @transform_5(%arg0: i32) -> (i32, i32, i32) {
    %c0_i32 = arith.constant 0 : i32
    %c0_i32_0 = arith.constant 0 : i32
    %c0_i32_1 = arith.constant 0 : i32
    return %arg0, %c0_i32, %c0_i32_0 : i32, i32, i32
  }
}

module attributes {stable_mosaic.version = 11 : i64} {
  func.func @_concat_scale_relu_kernel(%arg0: i32, %arg1: memref<256x8xbf16, #tpu.memory_space<vmem>>, %arg2: memref<256x8xbf16, #tpu.memory_space<vmem>>, %arg3: memref<256x8xbf16, #tpu.memory_space<vmem>>, %arg4: memref<256x8xbf16, #tpu.memory_space<vmem>>, %arg5: memref<1x32xf32, #tpu.memory_space<vmem>>, %arg6: memref<1x32xf32, #tpu.memory_space<vmem>>, %arg7: memref<256x32xf32, #tpu.memory_space<vmem>>) attributes {dimension_semantics = [#tpu.dimension_semantics<parallel>], iteration_bounds = array<i64: 2>, scalar_prefetch = 0 : i64, scratch_operands = 0 : i64, tpu.core_type = #tpu.core_type<tc>, window_params = [{transform_indices = @transform_0, window_bounds = array<i64: 256, 8>}, {transform_indices = @transform_1, window_bounds = array<i64: 256, 8>}, {transform_indices = @transform_2, window_bounds = array<i64: 256, 8>}, {transform_indices = @transform_3, window_bounds = array<i64: 256, 8>}, {pipeline_mode = #tpu.pipeline_mode<synchronous>, transform_indices = @transform_4, window_bounds = array<i64: 1, 32>}, {pipeline_mode = #tpu.pipeline_mode<synchronous>, transform_indices = @transform_5, window_bounds = array<i64: 1, 32>}, {transform_indices = @transform_6, window_bounds = array<i64: 256, 32>}]} {
    %c0 = arith.constant 0 : index
    %c0_0 = arith.constant 0 : index
    %0 = vector.load %arg1[%c0, %c0_0] : memref<256x8xbf16, #tpu.memory_space<vmem>>, vector<256x8xbf16>
    %c0_1 = arith.constant 0 : index
    %c0_2 = arith.constant 0 : index
    %1 = vector.load %arg2[%c0_1, %c0_2] : memref<256x8xbf16, #tpu.memory_space<vmem>>, vector<256x8xbf16>
    %c0_3 = arith.constant 0 : index
    %c0_4 = arith.constant 0 : index
    %2 = vector.load %arg3[%c0_3, %c0_4] : memref<256x8xbf16, #tpu.memory_space<vmem>>, vector<256x8xbf16>
    %c0_5 = arith.constant 0 : index
    %c0_6 = arith.constant 0 : index
    %3 = vector.load %arg4[%c0_5, %c0_6] : memref<256x8xbf16, #tpu.memory_space<vmem>>, vector<256x8xbf16>
    %4 = tpu.concatenate %0, %1, %2, %3 in 1 : vector<256x8xbf16>, vector<256x8xbf16>, vector<256x8xbf16>, vector<256x8xbf16> -> vector<256x32xbf16>
    %5 = arith.extf %4 : vector<256x32xbf16> to vector<256x32xf32>
    %c0_7 = arith.constant 0 : index
    %c0_8 = arith.constant 0 : index
    %6 = vector.load %arg5[%c0_7, %c0_8] : memref<1x32xf32, #tpu.memory_space<vmem>>, vector<1x32xf32>
    %7 = vector.broadcast %6 : vector<1x32xf32> to vector<256x32xf32>
    %8 = arith.mulf %5, %7 : vector<256x32xf32>
    %c0_9 = arith.constant 0 : index
    %c0_10 = arith.constant 0 : index
    %9 = vector.load %arg6[%c0_9, %c0_10] : memref<1x32xf32, #tpu.memory_space<vmem>>, vector<1x32xf32>
    %10 = vector.broadcast %9 : vector<1x32xf32> to vector<256x32xf32>
    %11 = arith.addf %8, %10 : vector<256x32xf32>
    %cst = arith.constant 0.000000e+00 : f32
    %12 = vector.broadcast %cst : f32 to vector<256x32xf32>
    %13 = arith.maximumf %11, %12 : vector<256x32xf32>
    %c0_11 = arith.constant 0 : index
    %c0_12 = arith.constant 0 : index
    %14 = vector.load %arg7[%c0_11, %c0_12] : memref<256x32xf32, #tpu.memory_space<vmem>>, vector<256x32xf32>
    tpu.vector_store %arg7[%c0_11, %c0_12], %13 {strides = array<i32>} : memref<256x32xf32, #tpu.memory_space<vmem>>, vector<256x32xf32>,
    return
  }
  func.func @transform_0(%arg0: i32) -> (i32, i32) {
    %c0_i32 = arith.constant 0 : i32
    %c0_i32_0 = arith.constant 0 : i32
    return %arg0, %c0_i32 : i32, i32
  }
  func.func @transform_1(%arg0: i32) -> (i32, i32) {
    %c0_i32 = arith.constant 0 : i32
    %c0_i32_0 = arith.constant 0 : i32
    return %arg0, %c0_i32 : i32, i32
  }
  func.func @transform_2(%arg0: i32) -> (i32, i32) {
    %c0_i32 = arith.constant 0 : i32
    %c0_i32_0 = arith.constant 0 : i32
    return %arg0, %c0_i32 : i32, i32
  }
  func.func @transform_3(%arg0: i32) -> (i32, i32) {
    %c0_i32 = arith.constant 0 : i32
    %c0_i32_0 = arith.constant 0 : i32
    return %arg0, %c0_i32 : i32, i32
  }
  func.func @transform_4(%arg0: i32) -> (i32, i32) {
    %c0_i32 = arith.constant 0 : i32
    %c0_i32_0 = arith.constant 0 : i32
    %c0_i32_1 = arith.constant 0 : i32
    return %c0_i32, %c0_i32_0 : i32, i32
  }
  func.func @transform_5(%arg0: i32) -> (i32, i32) {
    %c0_i32 = arith.constant 0 : i32
    %c0_i32_0 = arith.constant 0 : i32
    %c0_i32_1 = arith.constant 0 : i32
    return %c0_i32, %c0_i32_0 : i32, i32
  }
  func.func @transform_6(%arg0: i32) -> (i32, i32) {
    %c0_i32 = arith.constant 0 : i32
    %c0_i32_0 = arith.constant 0 : i32
    return %arg0, %c0_i32 : i32, i32
  }
}

</mosaic_0001>

<bundles_post_ra>
// kernel: inception_forward.6
= control target key start
LH: loop header
LB: loop body
LE: loop exit
PB: predicated region body
PF: predicated region fallthrough
CT: control target
= control target key end

     0   :  { %s1573_s18 = smov 0   ;;  %s2230_s0 = inlined_call_operand.vmem [shape: bf16[512,4], index: 0, kind: input, shape index: {}]   ;;  %s2231_s1 = inlined_call_operand.vmem [shape: bf16[4,16], index: 1, kind: input, shape index: {}]   ;;  %s2232_s2 = inlined_call_operand.vmem [shape: bf16[512,8], index: 2, kind: output, shape index: {0}]   ;;  %s2233_s3 = inlined_call_operand.vmem [shape: bf16[512,4], index: 3, kind: output, shape index: {1}]   ;;  %s2234_s4 = inlined_call_operand.vmem [shape: bf16[512,4], index: 4, kind: output, shape index: {2}]   ;;  %s2235_s5 = inlined_call_operand.vmem [shape: f32[2,2,16], index: 5, kind: output, shape index: {3}]  }
   0x1 LB: > { %s1579_s19 = sadd.s32 4294967295, %s1539_s18   ;;  %p1344_p0 = scmp.ge.s32.totalorder %s1539_s18, 1  ;;  %s1539_s18 = sphi %s1573_s18, %s16_s18  }
   0x2   : > { %p195_p1 = scmp.lt.s32.totalorder %s1539_s18, 3 }
   0x4   : > { %p196_p2 = pnand %p1344_p0, %p195_p1 }
   0x5   : > { %s1345_s22 = sshll.u32 (!%p196_p2), %s1579_s19, 5  ;;  %s1541_s30 = smov (!%p196_p2), 120  }
   0x6   : > { %199 = sbr.rel (%p196_p2) target bundleno = 452 (0x1c4), region = 28  ;;  %p238_p3 = scmp.lt.s32.totalorder (!%p196_p2), %s1345_s22, 63 }
   0x7   : > { %s1542_s6 = smov (!%p196_p2), 116   ;;  %p261_p4 = scmp.lt.s32.totalorder (!%p196_p2), %s1579_s19, 1 }
   0xb   : > { %v298_v0 = vld [vmem:[%s2231_s1] sm:$0x3]  ;;  %vm428_vm0 = vcmask 1041408   ;;  %s2237_s22 = smov (!%p238_p3, %s1345_s22), 63  ;;  %vm379_vm1 = vcmask 31744   ;;  %vm721_vm2 = vcmask 60416  }
   0xc   : > { %1505 = vmatprep.subr.msk.bf16.mxu0 %vm428_vm0, %v298_v0  ;;  %1506 = vmatprep.subr.msk.bf16.mxu1 %vm428_vm0, %v298_v0  ;;  %v430_v1 = vsel %vm428_vm0, %v298_v0, 0  ;;  %s1587_s23 = sshll.u32 %s2237_s22, 2  ;;  %vm1011_vm3 = vcmask 130048   ;;  %s2239_s19 = smov (!%p261_p4, %s1579_s19), 1  ;;  %vm1081_vm4 = vcmask 122880   ;;  %vm850_vm5 = vcmask 27648  }
   0xd   : > { %1470 = vmatpush3.bf16.msra.mxu0 %v430_v1  ;;  %1504 = vmatpush3.bf16.msra.mxu1 %v430_v1  ;;  %s1593_s26 = scalar_lea.vmem %s2230_s0, %s1587_s23  ;;  %s1631_s29 = scalar_lea.vmem %s2232_s2, %s1587_s23 }
   0xe   : > { %v1517_v2 = vld [vmem:[%s1593_s26] sm:$0xff]   ;;  %v1519_v4 = vld [vmem:[%s1593_s26 + $0x8] sm:$0xff]   ;;  %v1521_v6 = vld [vmem:[%s1593_s26 + $0x10] sm:$0xff]   ;;  %s1353_s7 = sshll.u32 %s2239_s19, 1  ;;  %s2077_s13 = scalar_lea.vmem %s2233_s3, %s1587_s23 }
   0xf   : > { %v1518_v3 = vld [vmem:[%s1593_s26 + $0x40] sm:$0xff]   ;;  %1471 = vmatprep.mubr.msk.bf16.mxu0 %vm379_vm1, %v1517_v2  ;;  %v1520_v5 = vld [vmem:[%s1593_s26 + $0x48] sm:$0xff]   ;;  %v1522_v7 = vld [vmem:[%s1593_s26 + $0x18] sm:$0xff]   ;;  %s264_s10 = scalar_lea.vmem %s2235_s5, %s1353_s7  ;;  %s2093_s16 = scalar_lea.vmem %s2234_s4, %s1587_s23 }
  0x10   : > { %1487 = vmatprep.mubr.msk.bf16.mxu1 %vm379_vm1, %v1518_v3  ;;  %1472 = vmatmul.mubr.msk.bf16.vlgmr.msra.gmra.mxu0 %vm379_vm1, %v1519_v4  ;;  %v1523_v8 = vld [vmem:[%s1593_s26 + $0x20] sm:$0xff]   ;;  %v1527_v9 = vld [vmem:[%s1593_s26 + $0x50] sm:$0xff]   ;;  %v1528_v10 = vld [vmem:[%s1593_s26 + $0x58] sm:$0xff]  }
  0x11   : > { %1488 = vmatmul.mubr.msk.bf16.vlgmr.msra.gmra.mxu1 %vm379_vm1, %v1520_v5  ;;  %1475 = vmatprep.mubr.msk.bf16.mxu0 %vm379_vm1, %v1521_v6  ;;  %v1529_v11 = vld [vmem:[%s1593_s26 + $0x60] sm:$0xff]   ;;  %v1524_v12 = vld [vmem:[%s1593_s26 + $0x28] sm:$0xff]   ;;  %v1525_v13 = vld [vmem:[%s1593_s26 + $0x30] sm:$0xff]  }
  0x12   : > { %1491 = vmatprep.mubr.msk.bf16.mxu1 %vm379_vm1, %v1527_v9  ;;  %v1530_v14 = vld [vmem:[%s1593_s26 + $0x68] sm:$0xff]   ;;  %v1531_v15 = vld [vmem:[%s1593_s26 + $0x70] sm:$0xff]   ;;  %v1526_v16 = vld [vmem:[%s1593_s26 + $0x38] sm:$0xff]  }
  0x13   : > { %v1532_v17 = vld [vmem:[%s1593_s26 + $0x78] sm:$0xff]  }
  0x18   : > { %1476 = vmatmul.mubr.msk.bf16.gmra.mxu0 %vm379_vm1, %v1522_v7 }
  0x19   : > { %1479 = vmatprep.mubr.msk.bf16.mxu0 %vm379_vm1, %v1523_v8  ;;  %1492 = vmatmul.mubr.msk.bf16.gmra.mxu1 %vm379_vm1, %v1528_v10 }
  0x1a   : > { %1495 = vmatprep.mubr.msk.bf16.mxu1 %vm379_vm1, %v1529_v11 }
  0x20   : > { %1480 = vmatmul.mubr.msk.bf16.gmra.mxu0 %vm379_vm1, %v1524_v12 }
  0x21   : > { %1483 = vmatprep.mubr.msk.bf16.mxu0 %vm379_vm1, %v1525_v13  ;;  %1496 = vmatmul.mubr.msk.bf16.gmra.mxu1 %vm379_vm1, %v1530_v14 }
  0x22   : > { %1499 = vmatprep.mubr.msk.bf16.mxu1 %vm379_vm1, %v1531_v15 }
  0x28   : > { %1484 = vmatmul.mubr.msk.bf16.gmra.mxu0 %vm379_vm1, %v1526_v16 }
  0x29   : > { %1500 = vmatmul.mubr.msk.bf16.gmra.mxu1 %vm379_vm1, %v1532_v17 }
  0xd0   : > { %v1473_v18 = vpop.f32.mrf.mxu0 }
  0xd1   : > { %v1422_v19 = vpack.c.bf16 %v1473_v18, %v1473_v18  ;;  %v1633_v20 = vpop.f32.mrf.mxu1  ;;  %v1085_v30 = vmul.f32 %v1473_v18, %v1473_v18  ;;  %v1015_v38 = vsel %vm1011_vm3, %v1473_v18, 0.0 }
  0xd2   : > { %v1438_v21 = vpack.c.bf16 %v1633_v20, %v1633_v20  ;;  %v466_v22 = vpop.f32.mrf.mxu0 }
  0xd3   : > { %724 = vst.msk [vmem:[%s1631_s29 + $0x8] sm:$0xf] %vm721_vm2, %v1422_v19  ;;  %v1639_v23 = vpack.c.bf16 %v466_v22, %v466_v22  ;;  %v1641_v24 = vpop.f32.mrf.mxu1  ;;  %758 = vrot.lane.b32.xlu1 %v1422_v19, %s1541_s30  ;;  %v1083_v27 = vmul.f32 %v466_v22, %v466_v22  ;;  %v1012_v33 = vsel %vm1011_vm3, %v466_v22, 0.0  ;;  %v1118_v47 = vsel %vm1011_vm3, %v1085_v30, 0.0 }
  0xd4   : > { %740 = vst.msk [vmem:[%s1631_s29 + $0x48] sm:$0xf] %vm721_vm2, %v1438_v21  ;;  %v1648_v25 = vpack.c.bf16 %v1641_v24, %v1641_v24  ;;  %790 = vrot.lane.b32.xlu0 %v1438_v21, %s1541_s30  ;;  %v1474_v26 = vpop.f32.mrf.mxu0 }
  0xd5   : > { %722 = vst.msk [vmem:[%s1631_s29] sm:$0xf] %vm721_vm2, %v1639_v23  ;;  %v1423_v28 = vpack.c.bf16 %v1474_v26, %v1474_v26  ;;  %v1654_v29 = vpop.f32.mrf.mxu1  ;;  %v1115_v42 = vsel %vm1011_vm3, %v1083_v27, 0.0  ;;  %v1086_v43 = vmul.f32 %v1474_v26, %v1474_v26  ;;  %v1017_v52 = vsel %vm1011_vm3, %v1474_v26, 0.0 }
  0xd6   : > { %738 = vst.msk [vmem:[%s1631_s29 + $0x40] sm:$0xf] %vm721_vm2, %v1648_v25  ;;  %v1661_v31 = vpack.c.bf16 %v1654_v29, %v1654_v29  ;;  %v469_v32 = vpop.f32.mrf.mxu0 }
  0xd7   : > { %725 = vst.msk [vmem:[%s1631_s29 + $0xc] sm:$0xf] %vm721_vm2, %v1423_v28  ;;  %v1666_v34 = vpack.c.bf16 %v469_v32, %v469_v32  ;;  %v1013_v35 = vsel %vm1011_vm3, %v469_v32, 0.0  ;;  %v1084_v36 = vmul.f32 %v469_v32, %v469_v32  ;;  %v1669_v37 = vpop.f32.mrf.mxu1  ;;  %760 = vrot.lane.b32.xlu1 %v1423_v28, %s1541_s30  ;;  %v1120_v60 = vsel %vm1011_vm3, %v1086_v43, 0.0 }
  0xd8   : > { %741 = vst.msk [vmem:[%s1631_s29 + $0x4c] sm:$0xf] %vm721_vm2, %v1661_v31  ;;  %v1014_v39 = vadd.f32 %v1013_v35, %v1012_v33  ;;  %v1678_v40 = vpack.c.bf16 %v1669_v37, %v1669_v37  ;;  %887 = vrot.lane.b32.xlu0 %v1422_v19, %s1542_s6  ;;  %v1477_v41 = vpop.f32.mrf.mxu0 }
  0xd9   : > { %723 = vst.msk [vmem:[%s1631_s29 + $0x4] sm:$0xf] %vm721_vm2, %v1666_v34  ;;  %v1116_v44 = vsel %vm1011_vm3, %v1084_v36, 0.0  ;;  %v1686_v45 = vpack.c.bf16 %v1477_v41, %v1477_v41  ;;  %v1688_v46 = vpop.f32.mrf.mxu1  ;;  %v1089_v61 = vmul.f32 %v1477_v41, %v1477_v41  ;;  %v1023_v1 = vsel %vm1011_vm3, %v1477_v41, 0.0 }
  0xda   : > { %v1016_v48 = vadd.f32 %v1015_v38, %v1014_v39  ;;  %v1117_v49 = vadd.f32 %v1116_v44, %v1115_v42  ;;  %739 = vst.msk [vmem:[%s1631_s29 + $0x44] sm:$0xf] %vm721_vm2, %v1678_v40  ;;  %v482_v50 = vpop.f32.mrf.mxu0  ;;  %v1696_v51 = vpack.c.bf16 %v1688_v46, %v1688_v46 }
  0xdb   : > { %728 = vst.msk [vmem:[%s1631_s29 + $0x18] sm:$0xf] %vm721_vm2, %v1686_v45  ;;  %v1702_v53 = vpack.c.bf16 %v482_v50, %v482_v50  ;;  %v1019_v54 = vsel %vm1011_vm3, %v482_v50, 0.0  ;;  %v1087_v55 = vmul.f32 %v482_v50, %v482_v50  ;;  %792 = vrot.lane.b32.xlu1 %v1661_v31, %s1541_s30  ;;  %v1707_v56 = vpop.f32.mrf.mxu1  ;;  %v1126_v14 = vsel %vm1011_vm3, %v1089_v61, 0.0 }
  0xdc   : > { %v1119_v57 = vadd.f32 %v1118_v47, %v1117_v49  ;;  %v1018_v58 = vadd.f32 %v1017_v52, %v1016_v48  ;;  %919 = vrot.lane.b32.xlu0 %v1438_v21, %s1542_s6  ;;  %v1478_v59 = vpop.f32.mrf.mxu0  ;;  %744 = vst.msk [vmem:[%s1631_s29 + $0x58] sm:$0xf] %vm721_vm2, %v1696_v51  ;;  %v1725_v5 = vpack.c.bf16 %v1707_v56, %v1707_v56 }
  0xdd   : > { %726 = vst.msk [vmem:[%s1631_s29 + $0x10] sm:$0xf] %vm721_vm2, %v1702_v53  ;;  %v1122_v62 = vsel %vm1011_vm3, %v1087_v55, 0.0  ;;  %v1718_v63 = vpack.c.bf16 %v1478_v59, %v1478_v59  ;;  %v1720_v0 = vpop.f32.mrf.mxu1  ;;  %v1090_v6 = vmul.f32 %v1478_v59, %v1478_v59  ;;  %v1025_v15 = vsel %vm1011_vm3, %v1478_v59, 0.0 }
  0xde   : > { %v1020_v2 = vadd.f32 %v1019_v54, %v1018_v58  ;;  %v1121_v3 = vadd.f32 %v1120_v60, %v1119_v57  ;;  %v485_v4 = vpop.f32.mrf.mxu0  ;;  %742 = vst.msk [vmem:[%s1631_s29 + $0x50] sm:$0xf] %vm721_vm2, %v1725_v5  ;;  %v1753_v26 = vpack.c.bf16 %v1720_v0, %v1720_v0 }
  0xdf   : > { %729 = vst.msk [vmem:[%s1631_s29 + $0x1c] sm:$0xf] %vm721_vm2, %v1718_v63  ;;  %v1730_v7 = vpack.c.bf16 %v485_v4, %v485_v4  ;;  %v1021_v8 = vsel %vm1011_vm3, %v485_v4, 0.0  ;;  %v1088_v9 = vmul.f32 %v485_v4, %v485_v4  ;;  %889 = vrot.lane.b32.xlu1 %v1423_v28, %s1542_s6  ;;  %v1734_v10 = vpop.f32.mrf.mxu1  ;;  %v1128_v27 = vsel %vm1011_vm3, %v1090_v6, 0.0 }
  0xe0   : > { %v1123_v11 = vadd.f32 %v1122_v62, %v1121_v3  ;;  %v1022_v12 = vadd.f32 %v1021_v8, %v1020_v2  ;;  %754 = vrot.lane.b32.xlu0 %v1639_v23, %s1541_s30  ;;  %v1481_v13 = vpop.f32.mrf.mxu0  ;;  %745 = vst.msk [vmem:[%s1631_s29 + $0x5c] sm:$0xf] %vm721_vm2, %v1753_v26  ;;  %v1782_v49 = vpack.c.bf16 %v1734_v10, %v1734_v10 }
  0xe1   : > { %727 = vst.msk [vmem:[%s1631_s29 + $0x14] sm:$0xf] %vm721_vm2, %v1730_v7  ;;  %v1124_v16 = vsel %vm1011_vm3, %v1088_v9, 0.0  ;;  %v1747_v17 = vpack.c.bf16 %v1481_v13, %v1481_v13  ;;  %v1749_v18 = vpop.f32.mrf.mxu1  ;;  %v1093_v39 = vmul.f32 %v1481_v13, %v1481_v13  ;;  %v1031_v43 = vsel %vm1011_vm3, %v1481_v13, 0.0 }
  0xe2   : > { %v1024_v19 = vadd.f32 %v1023_v1, %v1022_v12  ;;  %v1125_v21 = vadd.f32 %v1124_v16, %v1123_v11  ;;  %v498_v22 = vpop.f32.mrf.mxu0  ;;  %743 = vst.msk [vmem:[%s1631_s29 + $0x54] sm:$0xf] %vm721_vm2, %v1782_v49  ;;  %v1809_v6 = vpack.c.bf16 %v1749_v18, %v1749_v18 }
  0xe3   : > { %732 = vst.msk [vmem:[%s1631_s29 + $0x28] sm:$0xf] %vm721_vm2, %v1747_v17  ;;  %v1759_v28 = vpack.c.bf16 %v498_v22, %v498_v22  ;;  %v1027_v30 = vsel %vm1011_vm3, %v498_v22, 0.0  ;;  %v1091_v32 = vmul.f32 %v498_v22, %v498_v22  ;;  %921 = vrot.lane.b32.xlu1 %v1661_v31, %s1542_s6  ;;  %v1764_v33 = vpop.f32.mrf.mxu1  ;;  %v1134_v61 = vsel %vm1011_vm3, %v1093_v39, 0.0 }
  0xe4   : > { %v1127_v35 = vadd.f32 %v1126_v14, %v1125_v21  ;;  %v1026_v36 = vadd.f32 %v1025_v15, %v1024_v19  ;;  %786 = vrot.lane.b32.xlu0 %v1648_v25, %s1541_s30  ;;  %v1482_v38 = vpop.f32.mrf.mxu0  ;;  %748 = vst.msk [vmem:[%s1631_s29 + $0x68] sm:$0xf] %vm721_vm2, %v1809_v6 }
  0xe5   : > { %730 = vst.msk [vmem:[%s1631_s29 + $0x20] sm:$0xf] %vm721_vm2, %v1759_v28  ;;  %v1130_v41 = vsel %vm1011_vm3, %v1091_v32, 0.0  ;;  %v1775_v42 = vpack.c.bf16 %v1482_v38, %v1482_v38  ;;  %v1777_v31 = vpop.f32.mrf.mxu1  ;;  %v1094_v50 = vmul.f32 %v1482_v38, %v1482_v38  ;;  %v1033_v62 = vsel %vm1011_vm3, %v1482_v38, 0.0 }
  0xe6   : > { %v1028_v44 = vadd.f32 %v1027_v30, %v1026_v36  ;;  %v1129_v47 = vadd.f32 %v1128_v27, %v1127_v35  ;;  %v501_v48 = vpop.f32.mrf.mxu0 }
  0xe7   : > { %733 = vst.msk [vmem:[%s1631_s29 + $0x2c] sm:$0xf] %vm721_vm2, %v1775_v42  ;;  %v1787_v52 = vpack.c.bf16 %v501_v48, %v501_v48  ;;  %v1029_v54 = vsel %vm1011_vm3, %v501_v48, 0.0  ;;  %v1092_v55 = vmul.f32 %v501_v48, %v501_v48  ;;  %788 = vrot.lane.b32.xlu1 %v1678_v40, %s1541_s30  ;;  %v1792_v57 = vpop.f32.mrf.mxu1  ;;  %v1136_v9 = vsel %vm1011_vm3, %v1094_v50, 0.0 }
  0xe8   : > { %v1131_v58 = vadd.f32 %v1130_v41, %v1129_v47  ;;  %v1030_v59 = vadd.f32 %v1029_v54, %v1028_v44  ;;  %883 = vrot.lane.b32.xlu0 %v1639_v23, %s1542_s6  ;;  %v1485_v60 = vpop.f32.mrf.mxu0 }
  0xe9   : > { %731 = vst.msk [vmem:[%s1631_s29 + $0x24] sm:$0xf] %vm721_vm2, %v1787_v52  ;;  %v1132_v1 = vsel %vm1011_vm3, %v1092_v55, 0.0  ;;  %v1805_v2 = vpack.c.bf16 %v1485_v60, %v1485_v60  ;;  %v1811_v8 = vpop.f32.mrf.mxu1  ;;  %v1097_v19 = vmul.f32 %v1485_v60, %v1485_v60  ;;  %v1039_v27 = vsel %vm1011_vm3, %v1485_v60, 0.0 }
  0xea   : > { %v1032_v3 = vadd.f32 %v1031_v43, %v1030_v59  ;;  %v1133_v4 = vadd.f32 %v1132_v1, %v1131_v58  ;;  %v514_v23 = vpop.f32.mrf.mxu0  ;;  %v1865_v58 = vpack.c.bf16 %v1792_v57, %v1792_v57  ;;  %v1099_v60 = vmul.f32 %v1641_v24, %v1641_v24 }
  0xeb   : > { %736 = vst.msk [vmem:[%s1631_s29 + $0x38] sm:$0xf] %vm721_vm2, %v1805_v2  ;;  %v1817_v11 = vpack.c.bf16 %v514_v23, %v514_v23  ;;  %v1035_v12 = vsel %vm1011_vm3, %v514_v23, 0.0  ;;  %v1095_v13 = vmul.f32 %v514_v23, %v514_v23  ;;  %885 = vrot.lane.b32.xlu1 %v1666_v34, %s1542_s6  ;;  %v1838_v36 = vpop.f32.mrf.mxu1  ;;  %v1142_v48 = vsel %vm1011_vm3, %v1097_v19, 0.0 }
  0xec   : > { %v1135_v14 = vadd.f32 %v1134_v61, %v1133_v4  ;;  %v1034_v15 = vadd.f32 %v1033_v62, %v1032_v3  ;;  %915 = vrot.lane.b32.xlu0 %v1648_v25, %s1542_s6  ;;  %v1486_v16 = vpop.f32.mrf.mxu0  ;;  %v1836_v25 = vpack.c.bf16 %v1764_v33, %v1764_v33  ;;  %v1879_v62 = vpack.c.bf16 %v1811_v8, %v1811_v8 }
  0xed   : > { %734 = vst.msk [vmem:[%s1631_s29 + $0x30] sm:$0xf] %vm721_vm2, %v1817_v11  ;;  %v1138_v21 = vsel %vm1011_vm3, %v1095_v13, 0.0  ;;  %v1831_v22 = vpack.c.bf16 %v1486_v16, %v1486_v16  ;;  %v1098_v38 = vmul.f32 %v1486_v16, %v1486_v16  ;;  %v1041_v50 = vsel %vm1011_vm3, %v1486_v16, 0.0  ;;  %v1867_v59 = vpop.f32.mrf.mxu1  ;;  %747 = vst.msk [vmem:[%s1631_s29 + $0x64] sm:$0xf] %vm721_vm2, %v1865_v58 }
  0xee   : > { %v1036_v30 = vadd.f32 %v1035_v12, %v1034_v15  ;;  %v1137_v32 = vadd.f32 %v1136_v9, %v1135_v14  ;;  %v517_v35 = vpop.f32.mrf.mxu0  ;;  %746 = vst.msk [vmem:[%s1631_s29 + $0x60] sm:$0xf] %vm721_vm2, %v1836_v25  ;;  %v1043_v4 = vsel %vm1011_vm3, %v1641_v24, 0.0  ;;  %v1100_v23 = vmul.f32 %v1669_v37, %v1669_v37  ;;  %752 = vst.msk [vmem:[%s1631_s29 + $0x78] sm:$0xf] %vm721_vm2, %v1879_v62 }
  0xef   : > { %737 = vst.msk [vmem:[%s1631_s29 + $0x3c] sm:$0xf] %vm721_vm2, %v1831_v22  ;;  %v1843_v39 = vpack.c.bf16 %v517_v35, %v517_v35  ;;  %v1037_v41 = vsel %vm1011_vm3, %v517_v35, 0.0  ;;  %v1096_v43 = vmul.f32 %v517_v35, %v517_v35  ;;  %917 = vrot.lane.b32.xlu1 %v1678_v40, %s1542_s6  ;;  %v1861_v40 = vpack.c.bf16 %v1777_v31, %v1777_v31  ;;  %v1901_v15 = vpop.f32.mrf.mxu1 }
  0xf0   : > { %v1139_v44 = vadd.f32 %v1138_v21, %v1137_v32  ;;  %v1038_v47 = vadd.f32 %v1037_v41, %v1036_v30  ;;  %756 = vrot.lane.b32.xlu0 %v1666_v34, %s1541_s30  ;;  %v1144_v61 = vsel %vm1011_vm3, %v1098_v38, 0.0  ;;  %v1895_v9 = vpack.c.bf16 %v1838_v36, %v1838_v36 }
  0xf1   : > { %735 = vst.msk [vmem:[%s1631_s29 + $0x34] sm:$0xf] %vm721_vm2, %v1843_v39  ;;  %v1140_v54 = vsel %vm1011_vm3, %v1096_v43, 0.0  ;;  %749 = vst.msk [vmem:[%s1631_s29 + $0x6c] sm:$0xf] %vm721_vm2, %v1861_v40  ;;  %v1899_v14 = vpack.c.bf16 %v1867_v59, %v1867_v59  ;;  %v1101_v24 = vmul.f32 %v1633_v20, %v1633_v20  ;;  %v1146_v16 = vsel %vm1011_vm3, %v1099_v60, 0.0 }
  0xf2   : > { %v1040_v55 = vadd.f32 %v1039_v27, %v1038_v47  ;;  %v1141_v34 = vadd.f32 %v1140_v54, %v1139_v44  ;;  %v1045_v19 = vsel %vm1011_vm3, %v1669_v37, 0.0  ;;  %750 = vst.msk [vmem:[%s1631_s29 + $0x70] sm:$0xf] %vm721_vm2, %v1895_v9  ;;  %v1915_v21 = vpack.c.bf16 %v1901_v15, %v1901_v15 }
  0xf3   : > { %768 = vrot.lane.b32.xlu1 %v1718_v63, %s1541_s30  ;;  %753 = vst.msk [vmem:[%s1631_s29 + $0x7c] sm:$0xf] %vm721_vm2, %v1899_v14  ;;  %v1047_v37 = vsel %vm1011_vm3, %v1633_v20, 0.0  ;;  %v1102_v32 = vmul.f32 %v1654_v29, %v1654_v29  ;;  %v1148_v35 = vsel %vm1011_vm3, %v1100_v23, 0.0  ;;  %v1150_v43 = vsel %vm1011_vm3, %v1101_v24, 0.0 }
  0xf4   : > { %v1042_v1 = vadd.f32 %v1041_v50, %v1040_v55  ;;  %v1143_v3 = vadd.f32 %v1142_v48, %v1141_v34  ;;  %766 = vrot.lane.b32.xlu0 %v1686_v45, %s1541_s30  ;;  %751 = vst.msk [vmem:[%s1631_s29 + $0x74] sm:$0xf] %vm721_vm2, %v1915_v21  ;;  %v1049_v44 = vsel %vm1011_vm3, %v1654_v29, 0.0  ;;  %v1103_v47 = vmul.f32 %v1707_v56, %v1707_v56 }
  0xf5   : > { %v1152_v50 = vsel %vm1011_vm3, %v1102_v32, 0.0  ;;  %v1051_v54 = vsel %vm1011_vm3, %v1707_v56, 0.0  ;;  %v1104_v55 = vmul.f32 %v1734_v10, %v1734_v10  ;;  %v1105_v60 = vmul.f32 %v1688_v46, %v1688_v46 }
  0xf6   : > { %v1044_v12 = vadd.f32 %v1043_v4, %v1042_v1  ;;  %v1145_v13 = vadd.f32 %v1144_v61, %v1143_v3  ;;  %v1053_v61 = vsel %vm1011_vm3, %v1734_v10, 0.0  ;;  %v1055_v56 = vsel %vm1011_vm3, %v1688_v46, 0.0 }
  0xf7   : > { %800 = vrot.lane.b32.xlu1 %v1753_v26, %s1541_s30  ;;  %v1106_v3 = vmul.f32 %v1720_v0, %v1720_v0  ;;  %v1156_v4 = vsel %vm1011_vm3, %v1104_v55, 0.0  ;;  %v1107_v23 = vmul.f32 %v1764_v33, %v1764_v33  ;;  %v1108_v46 = vmul.f32 %v1792_v57, %v1792_v57 }
  0xf8   : > { %v1046_v27 = vadd.f32 %v1045_v19, %v1044_v12  ;;  %v1147_v30 = vadd.f32 %v1146_v16, %v1145_v13  ;;  %798 = vrot.lane.b32.xlu0 %v1696_v51, %s1541_s30  ;;  %v1057_v13 = vsel %vm1011_vm3, %v1720_v0, 0.0  ;;  %v1063_v32 = vsel %vm1011_vm3, %v1749_v18, 0.0 }
  0xf9   : > { %v1160_v19 = vsel %vm1011_vm3, %v1106_v3, 0.0  ;;  %v1162_v0 = vsel %vm1011_vm3, %v1107_v23, 0.0 }
  0xfa   : > { %v1149_v38 = vadd.f32 %v1148_v35, %v1147_v30  ;;  %v1048_v41 = vadd.f32 %v1047_v37, %v1046_v27  ;;  %v1109_v27 = vmul.f32 %v1749_v18, %v1749_v18  ;;  %v1110_v35 = vmul.f32 %v1777_v31, %v1777_v31 }
  0xfb   : > { %897 = vrot.lane.b32.xlu1 %v1718_v63, %s1542_s6  ;;  %v1154_v63 = vsel %vm1011_vm3, %v1103_v47, 0.0  ;;  %v1111_v18 = vmul.f32 %v1838_v36, %v1838_v36 }
  0xfc   : > { %v1050_v20 = vadd.f32 %v1049_v44, %v1048_v41  ;;  %v1151_v48 = vadd.f32 %v1150_v43, %v1149_v38  ;;  %895 = vrot.lane.b32.xlu0 %v1686_v45, %s1542_s6  ;;  %v1164_v38 = vsel %vm1011_vm3, %v1108_v46, 0.0  ;;  %v1065_v44 = vsel %vm1011_vm3, %v1777_v31, 0.0 }
  0xfd   : > { %v1113_v31 = vmul.f32 %v1811_v8, %v1811_v8 }
  0xfe   : > { %v1052_v29 = vadd.f32 %v1051_v54, %v1050_v20  ;;  %v1153_v34 = vadd.f32 %v1152_v50, %v1151_v48  ;;  %v1168_v48 = vsel %vm1011_vm3, %v1110_v35, 0.0  ;;  %v1067_v50 = vsel %vm1011_vm3, %v1838_v36, 0.0 }
  0xff   : > { %929 = vrot.lane.b32.xlu1 %v1753_v26, %s1542_s6  ;;  %v1158_v26 = vsel %vm1011_vm3, %v1105_v60, 0.0  ;;  %v1112_v54 = vmul.f32 %v1901_v15, %v1901_v15  ;;  %v1069_v60 = vsel %vm1011_vm3, %v1901_v15, 0.0  ;;  %v1174_v15 = vsel %vm1011_vm3, %v1113_v31, 0.0 }
 0x100   : > { %v1054_v45 = vadd.f32 %v1053_v61, %v1052_v29  ;;  %v1155_v1 = vadd.f32 %v1154_v63, %v1153_v34  ;;  %927 = vrot.lane.b32.xlu0 %v1696_v51, %s1542_s6  ;;  %v1059_v51 = vsel %vm1011_vm3, %v1764_v33, 0.0  ;;  %v1061_v33 = vsel %vm1011_vm3, %v1792_v57, 0.0 }
 0x101   : > { %v1166_v57 = vsel %vm1011_vm3, %v1109_v27, 0.0  ;;  %v1170_v34 = vsel %vm1011_vm3, %v1111_v18, 0.0  ;;  %v1114_v61 = vmul.f32 %v1867_v59, %v1867_v59 }
 0x102   : > { %v1056_v10 = vadd.f32 %v1055_v56, %v1054_v45  ;;  %v1157_v12 = vadd.f32 %v1156_v4, %v1155_v1  ;;  %v1172_v45 = vsel %vm1011_vm3, %v1112_v54, 0.0  ;;  %v1073_v56 = vsel %vm1011_vm3, %v1867_v59, 0.0 }
 0x103   : > { %764 = vrot.lane.b32.xlu1 %v1730_v7, %s1541_s30  ;;  %v1176_v4 = vsel %vm1011_vm3, %v1114_v61, 0.0 }
 0x104   : > { %v1159_v24 = vadd.f32 %v1158_v26, %v1157_v12  ;;  %v1058_v16 = vadd.f32 %v1057_v13, %v1056_v10  ;;  %762 = vrot.lane.b32.xlu0 %v1702_v53, %s1541_s30 }
 0x106   : > { %v1060_v30 = vadd.f32 %v1059_v51, %v1058_v16  ;;  %v1161_v37 = vadd.f32 %v1160_v19, %v1159_v24 }
 0x107   : > { %796 = vrot.lane.b32.xlu1 %v1782_v49, %s1541_s30 }
 0x108   : > { %v1163_v41 = vadd.f32 %v1162_v0, %v1161_v37  ;;  %v1062_v43 = vadd.f32 %v1061_v33, %v1060_v30  ;;  %794 = vrot.lane.b32.xlu0 %v1725_v5, %s1541_s30 }
 0x10a   : > { %v1064_v47 = vadd.f32 %v1063_v32, %v1062_v43  ;;  %v1165_v20 = vadd.f32 %v1164_v38, %v1163_v41 }
 0x10b   : > { %893 = vrot.lane.b32.xlu1 %v1730_v7, %s1542_s6  ;;  %v1071_v7 = vsel %vm1011_vm3, %v1811_v8, 0.0 }
 0x10c   : > { %v1167_v55 = vadd.f32 %v1166_v57, %v1165_v20  ;;  %v1066_v29 = vadd.f32 %v1065_v44, %v1064_v47  ;;  %891 = vrot.lane.b32.xlu0 %v1702_v53, %s1542_s6 }
 0x10e   : > { %v1068_v36 = vadd.f32 %v1067_v50, %v1066_v29  ;;  %v1169_v63 = vadd.f32 %v1168_v48, %v1167_v55 }
 0x10f   : > { %925 = vrot.lane.b32.xlu1 %v1782_v49, %s1542_s6 }
 0x110   : > { %v1171_v53 = vadd.f32 %v1170_v34, %v1169_v63  ;;  %v1070_v1 = vadd.f32 %v1069_v60, %v1068_v36  ;;  %923 = vrot.lane.b32.xlu0 %v1725_v5, %s1542_s6 }
 0x112   : > { %v1072_v8 = vadd.f32 %v1071_v7, %v1070_v1  ;;  %v1173_v3 = vadd.f32 %v1172_v45, %v1171_v53 }
 0x113   : > { %776 = vrot.lane.b32.xlu1 %v1775_v42, %s1541_s30 }
 0x114   : > { %v1074_v49 = vadd.f32 %v1073_v56, %v1072_v8  ;;  %v1175_v23 = vadd.f32 %v1174_v15, %v1173_v3  ;;  %774 = vrot.lane.b32.xlu0 %v1747_v17, %s1541_s30 }
 0x116   : > { %v1075_v10 = vrot.slane %v1074_v49, 4  ;;  %v1177_v5 = vadd.f32 %v1176_v4, %v1175_v23 }
 0x117   : > { %808 = vrot.lane.b32.xlu1 %v1861_v40, %s1541_s30 }
 0x118   : > { %v1076_v59 = vadd.f32 %v1075_v10, %v1074_v49  ;;  %v1178_v12 = vrot.slane %v1177_v5, 4  ;;  %806 = vrot.lane.b32.xlu0 %v1809_v6, %s1541_s30 }
 0x11a   : > { %v1077_v26 = vrot.slane %v1076_v59, 2  ;;  %v1179_v13 = vadd.f32 %v1178_v12, %v1177_v5 }
 0x11b   : > { %905 = vrot.lane.b32.xlu1 %v1775_v42, %s1542_s6 }
 0x11c   : > { %v1078_v51 = vadd.f32 %v1077_v26, %v1076_v59  ;;  %v1180_v46 = vrot.slane %v1179_v13, 2  ;;  %903 = vrot.lane.b32.xlu0 %v1747_v17, %s1542_s6 }
 0x11e   : > { %v1079_v24 = vrot.slane %v1078_v51, 1  ;;  %v1181_v16 = vadd.f32 %v1180_v46, %v1179_v13 }
 0x11f   : > { %937 = vrot.lane.b32.xlu1 %v1861_v40, %s1542_s6 }
 0x120   : > { %v1080_v19 = vadd.f32 %v1079_v24, %v1078_v51  ;;  %v1182_v27 = vrot.slane %v1181_v16, 1  ;;  %935 = vrot.lane.b32.xlu0 %v1809_v6, %s1542_s6 }
 0x122   : > { %1082 = vst.msk [vmem:[%s264_s10] sm:$0x1] %vm1081_vm4, %v1080_v19  ;;  %v1183_v42 = vadd.f32 %v1182_v27, %v1181_v16 }
 0x123   : > { %772 = vrot.lane.b32.xlu1 %v1787_v52, %s1541_s30 }
 0x124   : > { %1184 = vst.msk [vmem:[%s264_s10 + $0x1] sm:$0x1] %vm1081_vm4, %v1183_v42  ;;  %770 = vrot.lane.b32.xlu0 %v1759_v28, %s1541_s30 }
 0x127   : > { %804 = vrot.lane.b32.xlu1 %v1865_v58, %s1541_s30 }
 0x128   : > { %802 = vrot.lane.b32.xlu0 %v1836_v25, %s1541_s30 }
 0x12b   : > { %901 = vrot.lane.b32.xlu1 %v1787_v52, %s1542_s6 }
 0x12c   : > { %899 = vrot.lane.b32.xlu0 %v1759_v28, %s1542_s6 }
 0x12f   : > { %933 = vrot.lane.b32.xlu1 %v1865_v58, %s1542_s6 }
 0x130   : > { %931 = vrot.lane.b32.xlu0 %v1836_v25, %s1542_s6 }
 0x133   : > { %784 = vrot.lane.b32.xlu1 %v1831_v22, %s1541_s30 }
 0x134   : > { %782 = vrot.lane.b32.xlu0 %v1805_v2, %s1541_s30 }
 0x137   : > { %816 = vrot.lane.b32.xlu1 %v1899_v14, %s1541_s30 }
 0x138   : > { %814 = vrot.lane.b32.xlu0 %v1879_v62, %s1541_s30 }
 0x13b   : > { %913 = vrot.lane.b32.xlu1 %v1831_v22, %s1542_s6 }
 0x13c   : > { %911 = vrot.lane.b32.xlu0 %v1805_v2, %s1542_s6 }
 0x13f   : > { %780 = vrot.lane.b32.xlu1 %v1843_v39, %s1541_s30 }
 0x140   : > { %778 = vrot.lane.b32.xlu0 %v1817_v11, %s1541_s30 }
 0x143   : > { %812 = vrot.lane.b32.xlu1 %v1915_v21, %s1541_s30 }
 0x144   : > { %810 = vrot.lane.b32.xlu0 %v1895_v9, %s1541_s30 }
 0x145   : > { %v759_v17 = vpop.permute.xlu1 %758 }
 0x146   : > { %v791_v28 = vpop.permute.xlu0 %790  ;;  %853 = vst.msk [vmem:[%s2077_s13 + $0x8] sm:$0xf] %vm850_vm5, %v759_v17 }
 0x147   : > { %869 = vst.msk [vmem:[%s2077_s13 + $0x48] sm:$0xf] %vm850_vm5, %v791_v28  ;;  %909 = vrot.lane.b32.xlu1 %v1843_v39, %s1542_s6 }
 0x148   : > { %907 = vrot.lane.b32.xlu0 %v1817_v11, %s1542_s6 }
 0x149   : > { %v761_v52 = vpop.permute.xlu1 %760 }
 0x14a   : > { %v888_v2 = vpop.permute.xlu0 %887  ;;  %854 = vst.msk [vmem:[%s2077_s13 + $0xc] sm:$0xf] %vm850_vm5, %v761_v52 }
 0x14b   : > { %981 = vst.msk [vmem:[%s2093_s16 + $0x8] sm:$0xf] %vm850_vm5, %v888_v2  ;;  %941 = vrot.lane.b32.xlu1 %v1915_v21, %s1542_s6 }
 0x14c   : > { %939 = vrot.lane.b32.xlu0 %v1895_v9, %s1542_s6 }
 0x14d   : > { %v793_v6 = vpop.permute.xlu1 %792 }
 0x14e   : > { %v920_v11 = vpop.permute.xlu0 %919  ;;  %870 = vst.msk [vmem:[%s2077_s13 + $0x4c] sm:$0xf] %vm850_vm5, %v793_v6 }
 0x14f   : > { %997 = vst.msk [vmem:[%s2093_s16 + $0x48] sm:$0xf] %vm850_vm5, %v920_v11  ;;  %945 = vrot.lane.b32.xlu1 %v1899_v14, %s1542_s6 }
 0x150   : > { %943 = vrot.lane.b32.xlu0 %v1879_v62, %s1542_s6 }
 0x151   : > { %v890_v22 = vpop.permute.xlu1 %889 }
 0x152   : > { %v755_v25 = vpop.permute.xlu0 %754  ;;  %982 = vst.msk [vmem:[%s2093_s16 + $0xc] sm:$0xf] %vm850_vm5, %v890_v22 }
 0x153   : > { %851 = vst.msk [vmem:[%s2077_s13] sm:$0xf] %vm850_vm5, %v755_v25 }
 0x155   : > { %v922_v39 = vpop.permute.xlu1 %921 }
 0x156   : > { %v787_v40 = vpop.permute.xlu0 %786  ;;  %998 = vst.msk [vmem:[%s2093_s16 + $0x4c] sm:$0xf] %vm850_vm5, %v922_v39 }
 0x157   : > { %867 = vst.msk [vmem:[%s2077_s13 + $0x40] sm:$0xf] %vm850_vm5, %v787_v40 }
 0x159   : > { %v789_v58 = vpop.permute.xlu1 %788 }
 0x15a   : > { %v884_v9 = vpop.permute.xlu0 %883  ;;  %868 = vst.msk [vmem:[%s2077_s13 + $0x44] sm:$0xf] %vm850_vm5, %v789_v58 }
 0x15b   : > { %979 = vst.msk [vmem:[%s2093_s16] sm:$0xf] %vm850_vm5, %v884_v9 }
 0x15d   : > { %v886_v62 = vpop.permute.xlu1 %885 }
 0x15e   : > { %v916_v14 = vpop.permute.xlu0 %915  ;;  %980 = vst.msk [vmem:[%s2093_s16 + $0x4] sm:$0xf] %vm850_vm5, %v886_v62 }
 0x15f   : > { %995 = vst.msk [vmem:[%s2093_s16 + $0x40] sm:$0xf] %vm850_vm5, %v916_v14 }
 0x161   : > { %v918_v21 = vpop.permute.xlu1 %917 }
 0x162   : > { %996 = vst.msk [vmem:[%s2093_s16 + $0x44] sm:$0xf] %vm850_vm5, %v918_v21  ;;  %v757_v0 = vpop.permute.xlu0 %756 }
 0x163   : > { %852 = vst.msk [vmem:[%s2077_s13 + $0x4] sm:$0xf] %vm850_vm5, %v757_v0 }
 0x165   : > { %v769_v33 = vpop.permute.xlu1 %768 }
 0x166   : > { %v767_v30 = vpop.permute.xlu0 %766  ;;  %858 = vst.msk [vmem:[%s2077_s13 + $0x1c] sm:$0xf] %vm850_vm5, %v769_v33 }
 0x167   : > { %857 = vst.msk [vmem:[%s2077_s13 + $0x18] sm:$0xf] %vm850_vm5, %v767_v30 }
 0x169   : > { %v801_v37 = vpop.permute.xlu1 %800 }
 0x16a   : > { %v799_v32 = vpop.permute.xlu0 %798  ;;  %874 = vst.msk [vmem:[%s2077_s13 + $0x5c] sm:$0xf] %vm850_vm5, %v801_v37 }
 0x16b   : > { %873 = vst.msk [vmem:[%s2077_s13 + $0x58] sm:$0xf] %vm850_vm5, %v799_v32 }
 0x16d   : > { %v898_v35 = vpop.permute.xlu1 %897 }
 0x16e   : > { %v896_v38 = vpop.permute.xlu0 %895  ;;  %986 = vst.msk [vmem:[%s2093_s16 + $0x1c] sm:$0xf] %vm850_vm5, %v898_v35 }
 0x16f   : > { %985 = vst.msk [vmem:[%s2093_s16 + $0x18] sm:$0xf] %vm850_vm5, %v896_v38 }
 0x171   : > { %v930_v41 = vpop.permute.xlu1 %929 }
 0x172   : > { %v928_v43 = vpop.permute.xlu0 %927  ;;  %1002 = vst.msk [vmem:[%s2093_s16 + $0x5c] sm:$0xf] %vm850_vm5, %v930_v41 }
 0x173   : > { %1001 = vst.msk [vmem:[%s2093_s16 + $0x58] sm:$0xf] %vm850_vm5, %v928_v43 }
 0x175   : > { %v765_v57 = vpop.permute.xlu1 %764 }
 0x176   : > { %v763_v44 = vpop.permute.xlu0 %762  ;;  %856 = vst.msk [vmem:[%s2077_s13 + $0x14] sm:$0xf] %vm850_vm5, %v765_v57 }
 0x177   : > { %855 = vst.msk [vmem:[%s2077_s13 + $0x10] sm:$0xf] %vm850_vm5, %v763_v44 }
 0x179   : > { %v797_v18 = vpop.permute.xlu1 %796 }
 0x17a   : > { %v795_v47 = vpop.permute.xlu0 %794  ;;  %872 = vst.msk [vmem:[%s2077_s13 + $0x54] sm:$0xf] %vm850_vm5, %v797_v18 }
 0x17b   : > { %871 = vst.msk [vmem:[%s2077_s13 + $0x50] sm:$0xf] %vm850_vm5, %v795_v47 }
 0x17d   : > { %v894_v20 = vpop.permute.xlu1 %893 }
 0x17e   : > { %v892_v48 = vpop.permute.xlu0 %891  ;;  %984 = vst.msk [vmem:[%s2093_s16 + $0x14] sm:$0xf] %vm850_vm5, %v894_v20 }
 0x17f   : > { %983 = vst.msk [vmem:[%s2093_s16 + $0x10] sm:$0xf] %vm850_vm5, %v892_v48 }
 0x181   : > { %v926_v50 = vpop.permute.xlu1 %925 }
 0x182   : > { %v924_v54 = vpop.permute.xlu0 %923  ;;  %1000 = vst.msk [vmem:[%s2093_s16 + $0x54] sm:$0xf] %vm850_vm5, %v926_v50 }
 0x183   : > { %999 = vst.msk [vmem:[%s2093_s16 + $0x50] sm:$0xf] %vm850_vm5, %v924_v54 }
 0x185   : > { %v777_v55 = vpop.permute.xlu1 %776 }
 0x186   : > { %v775_v29 = vpop.permute.xlu0 %774  ;;  %862 = vst.msk [vmem:[%s2077_s13 + $0x2c] sm:$0xf] %vm850_vm5, %v777_v55 }
 0x187   : > { %861 = vst.msk [vmem:[%s2077_s13 + $0x28] sm:$0xf] %vm850_vm5, %v775_v29 }
 0x189   : > { %v809_v31 = vpop.permute.xlu1 %808 }
 0x18a   : > { %v807_v34 = vpop.permute.xlu0 %806  ;;  %878 = vst.msk [vmem:[%s2077_s13 + $0x6c] sm:$0xf] %vm850_vm5, %v809_v31 }
 0x18b   : > { %877 = vst.msk [vmem:[%s2077_s13 + $0x68] sm:$0xf] %vm850_vm5, %v807_v34 }
 0x18d   : > { %v906_v60 = vpop.permute.xlu1 %905 }
 0x18e   : > { %v904_v36 = vpop.permute.xlu0 %903  ;;  %990 = vst.msk [vmem:[%s2093_s16 + $0x2c] sm:$0xf] %vm850_vm5, %v906_v60 }
 0x18f   : > { %989 = vst.msk [vmem:[%s2093_s16 + $0x28] sm:$0xf] %vm850_vm5, %v904_v36 }
 0x191   : > { %v938_v63 = vpop.permute.xlu1 %937 }
 0x192   : > { %v936_v7 = vpop.permute.xlu0 %935  ;;  %1006 = vst.msk [vmem:[%s2093_s16 + $0x6c] sm:$0xf] %vm850_vm5, %v938_v63 }
 0x193   : > { %1005 = vst.msk [vmem:[%s2093_s16 + $0x68] sm:$0xf] %vm850_vm5, %v936_v7 }
 0x195   : > { %v773_v61 = vpop.permute.xlu1 %772 }
 0x196   : > { %v771_v45 = vpop.permute.xlu0 %770  ;;  %860 = vst.msk [vmem:[%s2077_s13 + $0x24] sm:$0xf] %vm850_vm5, %v773_v61 }
 0x197   : > { %859 = vst.msk [vmem:[%s2077_s13 + $0x20] sm:$0xf] %vm850_vm5, %v771_v45 }
 0x199   : > { %v805_v53 = vpop.permute.xlu1 %804 }
 0x19a   : > { %v803_v1 = vpop.permute.xlu0 %802  ;;  %876 = vst.msk [vmem:[%s2077_s13 + $0x64] sm:$0xf] %vm850_vm5, %v805_v53 }
 0x19b   : > { %875 = vst.msk [vmem:[%s2077_s13 + $0x60] sm:$0xf] %vm850_vm5, %v803_v1 }
 0x19d   : > { %v902_v15 = vpop.permute.xlu1 %901 }
 0x19e   : > { %v900_v56 = vpop.permute.xlu0 %899  ;;  %988 = vst.msk [vmem:[%s2093_s16 + $0x24] sm:$0xf] %vm850_vm5, %v902_v15 }
 0x19f   : > { %987 = vst.msk [vmem:[%s2093_s16 + $0x20] sm:$0xf] %vm850_vm5, %v900_v56 }
 0x1a1   : > { %v934_v8 = vpop.permute.xlu1 %933 }
 0x1a2   : > { %v932_v3 = vpop.permute.xlu0 %931  ;;  %1004 = vst.msk [vmem:[%s2093_s16 + $0x64] sm:$0xf] %vm850_vm5, %v934_v8 }
 0x1a3   : > { %1003 = vst.msk [vmem:[%s2093_s16 + $0x60] sm:$0xf] %vm850_vm5, %v932_v3 }
 0x1a5   : > { %v785_v4 = vpop.permute.xlu1 %784 }
 0x1a6   : > { %v783_v49 = vpop.permute.xlu0 %782  ;;  %866 = vst.msk [vmem:[%s2077_s13 + $0x3c] sm:$0xf] %vm850_vm5, %v785_v4 }
 0x1a7   : > { %865 = vst.msk [vmem:[%s2077_s13 + $0x38] sm:$0xf] %vm850_vm5, %v783_v49 }
 0x1a9   : > { %v817_v23 = vpop.permute.xlu1 %816 }
 0x1aa   : > { %v815_v10 = vpop.permute.xlu0 %814  ;;  %882 = vst.msk [vmem:[%s2077_s13 + $0x7c] sm:$0xf] %vm850_vm5, %v817_v23 }
 0x1ab   : > { %881 = vst.msk [vmem:[%s2077_s13 + $0x78] sm:$0xf] %vm850_vm5, %v815_v10 }
 0x1ad   : > { %v914_v5 = vpop.permute.xlu1 %913 }
 0x1ae   : > { %v912_v59 = vpop.permute.xlu0 %911  ;;  %994 = vst.msk [vmem:[%s2093_s16 + $0x3c] sm:$0xf] %vm850_vm5, %v914_v5 }
 0x1af   : > { %993 = vst.msk [vmem:[%s2093_s16 + $0x38] sm:$0xf] %vm850_vm5, %v912_v59 }
 0x1b1   : > { %v781_v12 = vpop.permute.xlu1 %780 }
 0x1b2   : > { %v779_v26 = vpop.permute.xlu0 %778  ;;  %864 = vst.msk [vmem:[%s2077_s13 + $0x34] sm:$0xf] %vm850_vm5, %v781_v12 }
 0x1b3   : > { %863 = vst.msk [vmem:[%s2077_s13 + $0x30] sm:$0xf] %vm850_vm5, %v779_v26 }
 0x1b5   : > { %v813_v13 = vpop.permute.xlu1 %812 }
 0x1b6   : > { %v811_v51 = vpop.permute.xlu0 %810  ;;  %880 = vst.msk [vmem:[%s2077_s13 + $0x74] sm:$0xf] %vm850_vm5, %v813_v13 }
 0x1b7   : > { %879 = vst.msk [vmem:[%s2077_s13 + $0x70] sm:$0xf] %vm850_vm5, %v811_v51 }
 0x1b9   : > { %v910_v46 = vpop.permute.xlu1 %909 }
 0x1ba   : > { %v908_v24 = vpop.permute.xlu0 %907  ;;  %992 = vst.msk [vmem:[%s2093_s16 + $0x34] sm:$0xf] %vm850_vm5, %v910_v46 }
 0x1bb   : > { %991 = vst.msk [vmem:[%s2093_s16 + $0x30] sm:$0xf] %vm850_vm5, %v908_v24 }
 0x1bd   : > { %v942_v16 = vpop.permute.xlu1 %941 }
 0x1be   : > { %v940_v19 = vpop.permute.xlu0 %939  ;;  %1008 = vst.msk [vmem:[%s2093_s16 + $0x74] sm:$0xf] %vm850_vm5, %v942_v16 }
 0x1bf   : > { %1007 = vst.msk [vmem:[%s2093_s16 + $0x70] sm:$0xf] %vm850_vm5, %v940_v19 }
 0x1c1   : > { %v946_v27 = vpop.permute.xlu1 %945 }
 0x1c2   : > { %v944_v42 = vpop.permute.xlu0 %943  ;;  %1010 = vst.msk [vmem:[%s2093_s16 + $0x7c] sm:$0xf] %vm850_vm5, %v946_v27 }
 0x1c3   : > { %1009 = vst.msk [vmem:[%s2093_s16 + $0x78] sm:$0xf] %vm850_vm5, %v944_v42 }
 0x1c4 PF: > { %s16_s18 = sadd.s32 1, %s1539_s18  }
 0x1c5   : > { %p13_p5 = scmp.ge.s32.totalorder %s16_s18, 4  }
 0x1c7   :  { %15 = sbr.rel (!%p13_p5) target bundleno = 1 (0x1), region = 94 }

// kernel: inception_forward.10
= control target key start
LH: loop header
LB: loop body
LE: loop exit
PB: predicated region body
PF: predicated region fallthrough
CT: control target
= control target key end

     0   :  { %s2650_s12 = smov 0   ;;  %s3613_s0 = inlined_call_operand.vmem [shape: bf16[2,16,16,4], index: 0, kind: input, shape index: {}]   ;;  %s3614_s1 = inlined_call_operand.vmem [shape: bf16[4,8], index: 1, kind: input, shape index: {}]   ;;  %s3615_s2 = inlined_call_operand.vmem [shape: bf16[2,256,8], index: 2, kind: output, shape index: {0}]   ;;  %s3616_s3 = inlined_call_operand.vmem [shape: f32[2,2,8], index: 3, kind: output, shape index: {1}]  }
   0x1 LB: > { %s2429_s13 = sadd.s32 4294967295, %s2627_s12   ;;  %p2433_p0 = scmp.ge.s32.totalorder %s2627_s12, 1  ;;  %s2627_s12 = sphi %s2650_s12, %s14_s12  }
   0x2   : > { %p140_p1 = scmp.lt.s32.totalorder %s2627_s12, 3 }
   0x4   : > { %p141_p2 = pnand %p2433_p0, %p140_p1 }
   0x5   : > { %p168_p3 = scmp.lt.s32.totalorder (!%p141_p2), %s2429_s13, 1 }
   0x6   : > { %144 = sbr.rel (%p141_p2) target bundleno = 489 (0x1e9), region = 28 }
   0xb   : > { %v1713_v0 = vld [vmem:[%s3614_s1] sm:$0x3]  ;;  %vm1843_vm0 = vcmask 1041408   ;;  %vm184_vm1 = vcmask 27648   ;;  %vm187_vm2 = vcmask 24576   ;;  %s3628_s13 = smov (!%p168_p3, %s2429_s13), 1 }
   0xc   : > { %2610 = vmatprep.subr.msk.bf16.mxu0 %vm1843_vm0, %v1713_v0  ;;  %v1845_v1 = vsel %vm1843_vm0, %v1713_v0, 0  ;;  %2611 = vmatprep.subr.msk.bf16.mxu1 %vm1843_vm0, %v1713_v0  ;;  %v2629_v2 = vmov 4286644096   ;;  %s2523_s16 = sshll.u32 %s3628_s13, 7  ;;  %vm272_vm3 = vsmask.f32 256 }
   0xd   : > { %2575 = vmatpush3.bf16.msra.mxu0 %v1845_v1  ;;  %185 = vst.msk [vmem:[#allocation2] sm:$0xf] %vm184_vm1, %v2629_v2  ;;  %186 = vst.msk [vmem:[#allocation2 + $0x4] sm:$0xf] %vm184_vm1, %v2629_v2  ;;  %2609 = vmatpush3.bf16.msra.mxu1 %v1845_v1  ;;  %s2723_s19 = scalar_lea.vmem %s3613_s0, %s2523_s16  ;;  %vm273_vm4 = vsmask.f32 4368  ;;  %s3476_s22 = scalar_lea.vmem %s3615_s2, %s2523_s16 }
   0xe   : > { %188 = vst.msk [vmem:[#allocation2 + $0x8] sm:$0x1] %vm187_vm2, %v2629_v2  ;;  %191 = vst.msk [vmem:[#allocation2 + $0x14] sm:$0x1] %vm187_vm2, %v2629_v2  ;;  %v240_v3 = vld [vmem:[%s2723_s19] sm:$0xf] }
   0xf   : > { %189 = vst.msk [vmem:[#allocation2 + $0xc] sm:$0xf] %vm184_vm1, %v2629_v2  ;;  %190 = vst.msk [vmem:[#allocation2 + $0x10] sm:$0xf] %vm184_vm1, %v2629_v2  ;;  %v241_v4 = vld [vmem:[%s2723_s19 + $0x4] sm:$0xf] }
  0x10   : > { %192 = vst.msk [vmem:[#allocation2 + $0x18] sm:$0xf] %vm184_vm1, %v2629_v2  ;;  %193 = vst.msk [vmem:[#allocation2 + $0x1c] sm:$0xf] %vm184_vm1, %v2629_v2  ;;  %v242_v5 = vld [vmem:[%s2723_s19 + $0x8] sm:$0xf] }
  0x11   : > { %194 = vst.msk [vmem:[#allocation2 + $0x20] sm:$0x1] %vm187_vm2, %v2629_v2  ;;  %197 = vst.msk [vmem:[#allocation2 + $0x2c] sm:$0x1] %vm187_vm2, %v2629_v2  ;;  %v243_v6 = vld [vmem:[%s2723_s19 + $0xc] sm:$0xf] }
  0x12   : > { %195 = vst.msk [vmem:[#allocation2 + $0x24] sm:$0xf] %vm184_vm1, %v2629_v2  ;;  %196 = vst.msk [vmem:[#allocation2 + $0x28] sm:$0xf] %vm184_vm1, %v2629_v2  ;;  %v244_v7 = vld [vmem:[%s2723_s19 + $0x10] sm:$0xf] }
  0x13   : > { %198 = vst.msk [vmem:[#allocation2 + $0x30] sm:$0xf] %vm184_vm1, %v2629_v2  ;;  %199 = vst.msk [vmem:[#allocation2 + $0x34] sm:$0xf] %vm184_vm1, %v2629_v2  ;;  %vm597_vm5 = vsmask.f32 7938 }
  0x14   : > { %200 = vst.msk [vmem:[#allocation2 + $0x38] sm:$0x1] %vm187_vm2, %v2629_v2  ;;  %203 = vst.msk [vmem:[#allocation2 + $0x44] sm:$0x1] %vm187_vm2, %v2629_v2  ;;  %v245_v8 = vld [vmem:[%s2723_s19 + $0x14] sm:$0xf] }
  0x15   : > { %201 = vst.msk [vmem:[#allocation2 + $0x3c] sm:$0xf] %vm184_vm1, %v2629_v2  ;;  %202 = vst.msk [vmem:[#allocation2 + $0x40] sm:$0xf] %vm184_vm1, %v2629_v2  ;;  %v276_v9 = vshrl.u32 %v240_v3, 16  ;;  %v279_v10 = vshll.u32 %v240_v3, 16 }
  0x16   : > { %204 = vst.msk [vmem:[#allocation2 + $0x48] sm:$0xf] %vm184_vm1, %v2629_v2  ;;  %205 = vst.msk [vmem:[#allocation2 + $0x4c] sm:$0xf] %vm184_vm1, %v2629_v2  ;;  %v284_v11 = vshrl.u32 %v241_v4, 16  ;;  %v287_v12 = vshll.u32 %v241_v4, 16 }
  0x17   : > { %206 = vst.msk [vmem:[#allocation2 + $0x50] sm:$0x1] %vm187_vm2, %v2629_v2  ;;  %209 = vst.msk [vmem:[#allocation2 + $0x5c] sm:$0x1] %vm187_vm2, %v2629_v2  ;;  %v293_v13 = vshrl.u32 %v242_v5, 16  ;;  %v296_v14 = vshll.u32 %v242_v5, 16 }
  0x18   : > { %207 = vst.msk [vmem:[#allocation2 + $0x54] sm:$0xf] %vm184_vm1, %v2629_v2  ;;  %208 = vst.msk [vmem:[#allocation2 + $0x58] sm:$0xf] %vm184_vm1, %v2629_v2  ;;  %v301_v15 = vshrl.u32 %v243_v6, 16  ;;  %v304_v16 = vshll.u32 %v243_v6, 16 }
  0x19   : > { %210 = vst.msk [vmem:[#allocation2 + $0x60] sm:$0xf] %vm184_vm1, %v2629_v2  ;;  %211 = vst.msk [vmem:[#allocation2 + $0x64] sm:$0xf] %vm184_vm1, %v2629_v2  ;;  %vm1266_vm6 = vcmask 1042432   ;;  %vm1267_vm7 = vcmask 1046532  }
  0x1a   : > { %212 = vst.msk [vmem:[#allocation2 + $0x68] sm:$0x1] %vm187_vm2, %v2629_v2  ;;  %215 = vst.msk [vmem:[#allocation2 + $0x74] sm:$0x1] %vm187_vm2, %v2629_v2  ;;  %v278_v18 = vrot.slane %v276_v9, 7  ;;  %v286_v19 = vrot.slane %v284_v11, 7 }
  0x1b   : > { %213 = vst.msk [vmem:[#allocation2 + $0x6c] sm:$0xf] %vm184_vm1, %v2629_v2  ;;  %214 = vst.msk [vmem:[#allocation2 + $0x70] sm:$0xf] %vm184_vm1, %v2629_v2  ;;  %v310_v20 = vshrl.u32 %v244_v7, 16  ;;  %v313_v21 = vshll.u32 %v244_v7, 16 }
  0x1c   : > { %216 = vst.msk [vmem:[#allocation2 + $0x78] sm:$0xf] %vm184_vm1, %v2629_v2  ;;  %217 = vst.msk [vmem:[#allocation2 + $0x7c] sm:$0xf] %vm184_vm1, %v2629_v2  ;;  %v599_v22 = vld [vmem:[#allocation2 + $0xc] sm:$0xf]  ;;  %v281_v29 = vor.u32 %v279_v10, %v278_v18  ;;  %v289_v31 = vor.u32 %v287_v12, %v286_v19 }
  0x1d   : > { %218 = vst.msk [vmem:[#allocation2 + $0x80] sm:$0x1] %vm187_vm2, %v2629_v2  ;;  %221 = vst.msk [vmem:[#allocation2 + $0x8c] sm:$0x1] %vm187_vm2, %v2629_v2  ;;  %v295_v23 = vrot.slane %v293_v13, 7  ;;  %v303_v24 = vrot.slane %v301_v15, 7 }
  0x1e   : > { %219 = vst.msk [vmem:[#allocation2 + $0x84] sm:$0xf] %vm184_vm1, %v2629_v2  ;;  %220 = vst.msk [vmem:[#allocation2 + $0x88] sm:$0xf] %vm184_vm1, %v2629_v2  ;;  %v318_v25 = vshrl.u32 %v245_v8, 16  ;;  %v321_v26 = vshll.u32 %v245_v8, 16 }
  0x1f   : > { %222 = vst.msk [vmem:[#allocation2 + $0x90] sm:$0xf] %vm184_vm1, %v2629_v2  ;;  %223 = vst.msk [vmem:[#allocation2 + $0x94] sm:$0xf] %vm184_vm1, %v2629_v2  ;;  %v605_v28 = vld [vmem:[#allocation2 + $0x14] sm:$0x1]  ;;  %v298_v36 = vor.u32 %v296_v14, %v295_v23  ;;  %v306_v38 = vor.u32 %v304_v16, %v303_v24 }
  0x20   : > { %224 = vst.msk [vmem:[#allocation2 + $0x98] sm:$0x1] %vm187_vm2, %v2629_v2  ;;  %227 = vst.msk [vmem:[#allocation2 + $0xa4] sm:$0x1] %vm187_vm2, %v2629_v2  ;;  %v282_v30 = vrot.slane %v278_v18, 4  ;;  %v291_v32 = vrot.slane %v286_v19, 4 }
  0x21   : > { %225 = vst.msk [vmem:[#allocation2 + $0x9c] sm:$0xf] %vm184_vm1, %v2629_v2  ;;  %226 = vst.msk [vmem:[#allocation2 + $0xa0] sm:$0xf] %vm184_vm1, %v2629_v2  ;;  %v608_v34 = vld [vmem:[#allocation2 + $0x18] sm:$0xf] }
  0x22   : > { %228 = vst.msk [vmem:[#allocation2 + $0xa8] sm:$0xf] %vm184_vm1, %v2629_v2  ;;  %229 = vst.msk [vmem:[#allocation2 + $0xac] sm:$0xf] %vm184_vm1, %v2629_v2  ;;  %v612_v35 = vld [vmem:[#allocation2 + $0x20] sm:$0x1] }
  0x23   : > { %230 = vst.msk [vmem:[#allocation2 + $0xb0] sm:$0x1] %vm187_vm2, %v2629_v2  ;;  %233 = vst.msk [vmem:[#allocation2 + $0xbc] sm:$0x1] %vm187_vm2, %v2629_v2  ;;  %vm767_vm11 = vsmask.f32 3328 }
  0x24   : > { %231 = vst.msk [vmem:[#allocation2 + $0xb4] sm:$0xf] %vm184_vm1, %v2629_v2  ;;  %232 = vst.msk [vmem:[#allocation2 + $0xb8] sm:$0xf] %vm184_vm1, %v2629_v2  ;;  %v299_v37 = vrot.slane %v295_v23, 4  ;;  %v308_v39 = vrot.slane %v303_v24, 4 }
  0x25   : > { %234 = vst.msk [vmem:[#allocation2 + $0xc0] sm:$0xf] %vm184_vm1, %v2629_v2  ;;  %235 = vst.msk [vmem:[#allocation2 + $0xc4] sm:$0xf] %vm184_vm1, %v2629_v2  ;;  %v312_v41 = vrot.slane %v310_v20, 7  ;;  %v320_v42 = vrot.slane %v318_v25, 7 }
  0x26   : > { %236 = vst.msk [vmem:[#allocation2 + $0xc8] sm:$0x1] %vm187_vm2, %v2629_v2  ;;  %239 = vst.msk [vmem:[#allocation2 + $0xd4] sm:$0x1] %vm187_vm2, %v2629_v2  ;;  %v2753_v44 = vld [vmem:[#allocation2] sm:$0xf] }
  0x27   : > { %237 = vst.msk [vmem:[#allocation2 + $0xcc] sm:$0xf] %vm184_vm1, %v2629_v2  ;;  %238 = vst.msk [vmem:[#allocation2 + $0xd0] sm:$0xf] %vm184_vm1, %v2629_v2  ;;  %v2755_v45 = vld [vmem:[#allocation2 + $0x4] sm:$0xf]  ;;  %v315_v53 = vor.u32 %v313_v21, %v312_v41  ;;  %v323_v55 = vor.u32 %v321_v26, %v320_v42 }
  0x28   : > { %vm2733_vm8 = vmor %vm272_vm3, %vm273_vm4  ;;  %v615_v50 = vld [vmem:[#allocation2 + $0x24] sm:$0xf]  ;;  %v619_v51 = vld [vmem:[#allocation2 + $0x2c] sm:$0x1]  ;;  %v316_v54 = vrot.slane %v312_v41, 4  ;;  %v325_v56 = vrot.slane %v320_v42, 4 }
  0x29   : > { %vm2739_vm9 = vmand %vm184_vm1, %vm597_vm5  ;;  %v290_v40 = vsel %vm2733_vm8, %v282_v30, %v289_v31  ;;  %v307_v46 = vsel %vm2733_vm8, %v299_v37, %v306_v38  ;;  %v2766_v52 = vld [vmem:[#allocation2 + $0x8] sm:$0x1]  ;;  %v771_v57 = vshrl.u32 %v2753_v44, 16  ;;  %v774_v58 = vshll.u32 %v2753_v44, 16  ;;  %v2791_v7 = vld [vmem:[%s2723_s19 + $0x18] sm:$0xf] }
  0x2a   : > { %vm2745_vm10 = vmand %vm187_vm2, %vm272_vm3  ;;  %v600_v43 = vsel %vm2739_vm9, %v281_v29, %v599_v22  ;;  %602 = vst.msk [vmem:[#allocation2 + $0x10] sm:$0xf] %vm184_vm1, %v290_v40  ;;  %v609_v48 = vsel %vm2739_vm9, %v298_v36, %v608_v34  ;;  %v780_v59 = vshll.u32 %v2755_v45, 16  ;;  %v784_v60 = vshrl.u32 %v2755_v45, 16  ;;  %v2796_v11 = vld [vmem:[%s2723_s19 + $0x1c] sm:$0xf] }
  0x2b   : > { %601 = vst [vmem:[#allocation2 + $0xc] sm:$0xf] %v600_v43  ;;  %v606_v47 = vsel %vm2745_vm10, %v291_v32, %v605_v28  ;;  %v613_v49 = vsel %vm2745_vm10, %v308_v39, %v612_v35  ;;  %610 = vst [vmem:[#allocation2 + $0x18] sm:$0xf] %v609_v48  ;;  %v324_v61 = vsel %vm2733_vm8, %v316_v54, %v323_v55  ;;  %v790_v0 = vshll.u32 %v2766_v52, 16  ;;  %s2438_s23 = sshll.u32 %s3628_s13, 1 }
  0x2c   : > { %607 = vst [vmem:[#allocation2 + $0x14] sm:$0x1] %v606_v47  ;;  %611 = vst.msk [vmem:[#allocation2 + $0x1c] sm:$0xf] %vm184_vm1, %v307_v46  ;;  %v616_v62 = vsel %vm2739_vm9, %v315_v53, %v615_v50  ;;  %v620_v63 = vsel %vm2745_vm10, %v325_v56, %v619_v51  ;;  %v773_v1 = vrot.slane %v771_v57, 4  ;;  %v776_v2 = vrot.slane %v774_v58, 5  ;;  %s181_s26 = scalar_lea.vmem %s3616_s3, %s2438_s23 }
  0x2d   : > { %614 = vst [vmem:[#allocation2 + $0x20] sm:$0x1] %v613_v49  ;;  %617 = vst [vmem:[#allocation2 + $0x24] sm:$0xf] %v616_v62  ;;  %v2781_v3 = vrot.slane %v780_v59, 5  ;;  %v786_v4 = vrot.slane %v784_v60, 4 }
  0x2e   : > { %618 = vst.msk [vmem:[#allocation2 + $0x28] sm:$0xf] %vm184_vm1, %v324_v61  ;;  %621 = vst [vmem:[#allocation2 + $0x2c] sm:$0x1] %v620_v63  ;;  %vm768_vm12 = vsmask.f32 7440  ;;  %v777_v8 = vor.u32 %v776_v2, %v773_v1 }
  0x2f   : > { %vm2785_vm13 = vmor %vm1266_vm6, %vm1267_vm7  ;;  %v2439_v6 = vrot.slane %v2753_v44, 9  ;;  %v787_v9 = vor.u32 %v786_v4, %v2781_v3  ;;  %v1271_v10 = vrot.slane %v2755_v45, 5  ;;  %v2802_v14 = vrot.slane %v790_v0, 5 }
  0x30   : > { %v1274_v15 = vrot.slane %v2766_v52, 5  ;;  %vm2810_vm14 = vmor %vm767_vm11, %vm768_vm12  ;;  %v327_v21 = vshrl.u32 %v2791_v7, 16  ;;  %v330_v22 = vshll.u32 %v2791_v7, 16  ;;  %v778_v23 = vrot.slane %v777_v8, 4 }
  0x31   : > { %v2800_v13 = vld [vmem:[#allocation2 + $0x10] sm:$0xf]  ;;  %v2816_v20 = vsel %vm2785_vm13, %v2439_v6, %v1271_v10  ;;  %v788_v24 = vrot.slane %v787_v9, 4  ;;  %v1273_v37 = vrot.slane %v1271_v10, 4  ;;  %v335_v38 = vshrl.u32 %v2796_v11, 16 }
  0x32   : > { %v2798_v12 = vld [vmem:[#allocation2 + $0xc] sm:$0xf]  ;;  %v2807_v18 = vld [vmem:[#allocation2 + $0x18] sm:$0xf]  ;;  %v804_v29 = vshll.u32 %v2800_v13, 16  ;;  %v808_v30 = vshrl.u32 %v2800_v13, 16  ;;  %v783_v35 = vsel %vm2810_vm14, %v778_v23, %v2781_v3 }
  0x33   : > { %v2805_v16 = vld [vmem:[#allocation2 + $0x14] sm:$0x1]  ;;  %v795_v25 = vshrl.u32 %v2798_v12, 16  ;;  %v798_v26 = vshll.u32 %v2798_v12, 16  ;;  %v2822_v28 = vld [vmem:[#allocation2 + $0x1c] sm:$0xf]  ;;  %v793_v36 = vsel %vm2810_vm14, %v788_v24, %v2802_v14 }
  0x34   : > { %v814_v31 = vshll.u32 %v2805_v16, 16  ;;  %v819_v32 = vshrl.u32 %v2807_v18, 16  ;;  %v2828_v34 = vld [vmem:[#allocation2 + $0x20] sm:$0x1]  ;;  %v2837_v39 = vld [vmem:[#allocation2 + $0x24] sm:$0xf] }
  0x35   : > { %v797_v40 = vrot.slane %v795_v25, 4  ;;  %v800_v41 = vrot.slane %v798_v26, 5  ;;  %v806_v42 = vrot.slane %v804_v29, 5  ;;  %v810_v43 = vrot.slane %v808_v30, 4  ;;  %v2841_v50 = vld [vmem:[#allocation2 + $0x28] sm:$0xf] }
  0x36   : > { %v816_v46 = vrot.slane %v814_v31, 5  ;;  %v821_v47 = vrot.slane %v819_v32, 4  ;;  %v822_v48 = vshll.u32 %v2807_v18, 16  ;;  %v828_v49 = vshll.u32 %v2822_v28, 16  ;;  %v2847_v59 = vld [vmem:[#allocation2 + $0x2c] sm:$0x1] }
  0x37   : > { %v801_v51 = vor.u32 %v800_v41, %v797_v40  ;;  %v811_v52 = vor.u32 %v810_v43, %v806_v42  ;;  %v832_v53 = vshrl.u32 %v2822_v28, 16  ;;  %v838_v54 = vshll.u32 %v2828_v34, 16 }
  0x38   : > { %v824_v55 = vrot.slane %v822_v48, 5  ;;  %v830_v56 = vrot.slane %v828_v49, 5  ;;  %v843_v57 = vshrl.u32 %v2837_v39, 16  ;;  %v846_v58 = vshll.u32 %v2837_v39, 16 }
  0x39   : > { %v802_v60 = vrot.slane %v801_v51, 4  ;;  %v812_v61 = vrot.slane %v811_v52, 4  ;;  %v834_v62 = vrot.slane %v832_v53, 4  ;;  %v840_v63 = vrot.slane %v838_v54, 5 }
  0x3a   : > { %v825_v0 = vor.u32 %v824_v55, %v821_v47  ;;  %v845_v1 = vrot.slane %v843_v57, 4  ;;  %v848_v2 = vrot.slane %v846_v58, 5  ;;  %v852_v3 = vshll.u32 %v2841_v50, 16 }
  0x3b   : > { %v807_v4 = vsel %vm2810_vm14, %v802_v60, %v806_v42  ;;  %v817_v6 = vsel %vm2810_vm14, %v812_v61, %v816_v46  ;;  %v835_v8 = vor.u32 %v834_v62, %v830_v56  ;;  %v856_v9 = vshrl.u32 %v2841_v50, 16 }
  0x3c   : > { %v826_v10 = vrot.slane %v825_v0, 4  ;;  %v849_v14 = vor.u32 %v848_v2, %v845_v1  ;;  %v854_v23 = vrot.slane %v852_v3, 5  ;;  %v862_v24 = vshll.u32 %v2847_v59, 16 }
  0x3d   : > { %v836_v25 = vrot.slane %v835_v8, 4  ;;  %v858_v26 = vrot.slane %v856_v9, 4  ;;  %v1186_v29 = vmax.bf16 %v783_v35, %v2753_v44  ;;  %v1275_v30 = vsel %vm2785_vm13, %v1273_v37, %v1274_v15 }
  0x3e   : > { %v831_v31 = vsel %vm2810_vm14, %v826_v10, %v830_v56  ;;  %v850_v32 = vrot.slane %v849_v14, 4  ;;  %v864_v40 = vrot.slane %v862_v24, 5  ;;  %v1187_v41 = vmax.bf16 %v793_v36, %v2755_v45 }
  0x3f   : > { %v841_v42 = vsel %vm2810_vm14, %v836_v25, %v840_v63  ;;  %v859_v43 = vor.u32 %v858_v26, %v854_v23  ;;  %v1188_v46 = vmax.bf16 %v807_v4, %v2798_v12  ;;  %v1189_v47 = vmax.bf16 %v817_v6, %v2800_v13 }
  0x40   : > { %v2868_v44 = vsel %vm2810_vm14, %v850_v32, %v854_v23  ;;  %v1190_v15 = vmax.bf16 %v831_v31, %v2807_v18  ;;  %v2440_v35 = vrot.slane %v2798_v12, 9  ;;  %v1278_v37 = vrot.slane %v2800_v13, 5  ;;  %v622_v23 = vld [vmem:[#allocation2 + $0x30] sm:$0xf] }
  0x41   : > { %v1191_v45 = vmax.bf16 %v841_v42, %v2822_v28  ;;  %v1281_v36 = vrot.slane %v2805_v16, 5  ;;  %v2441_v48 = vrot.slane %v2807_v18, 9  ;;  %v1285_v49 = vrot.slane %v2822_v28, 5 }
  0x42   : > { %v1279_v51 = vsel %vm2785_vm13, %v2440_v35, %v1278_v37  ;;  %v1280_v52 = vrot.slane %v1278_v37, 4  ;;  %v1288_v53 = vrot.slane %v2828_v34, 5  ;;  %v1413_v54 = vmax.bf16 %v2816_v20, %v1186_v29 }
  0x43   : > { %v860_v55 = vrot.slane %v859_v43, 4  ;;  %v2883_v56 = vsel %vm2785_vm13, %v2441_v48, %v1285_v49  ;;  %v1287_v57 = vrot.slane %v1285_v49, 4  ;;  %v1414_v58 = vmax.bf16 %v1275_v30, %v1187_v41  ;;  %v249_v49 = vld [vmem:[%s2723_s19 + $0x24] sm:$0xf] }
  0x44   : > { %v1282_v16 = vsel %vm2785_vm13, %v1280_v52, %v1281_v36  ;;  %v1415_v60 = vmax.bf16 %v1279_v51, %v1188_v46  ;;  %v1417_v61 = vmax.bf16 %v2883_v56, %v1190_v15  ;;  %v1445_v62 = vmax.bf16 %v1413_v54, %v2798_v12 }
  0x45   : > { %v1289_v34 = vsel %vm2785_vm13, %v1287_v57, %v1288_v53  ;;  %v1416_v63 = vmax.bf16 %v1282_v16, %v1189_v47  ;;  %v1446_v20 = vmax.bf16 %v1414_v58, %v2800_v13  ;;  %v329_v0 = vrot.slane %v327_v21, 7 }
  0x46   : > { %v1418_v1 = vmax.bf16 %v1289_v34, %v1191_v45  ;;  %v1447_v2 = vmax.bf16 %v1415_v60, %v2807_v18  ;;  %v1449_v3 = vmax.bf16 %v1417_v61, %v2837_v39  ;;  %v1503_v8 = vmax.bf16 %v1445_v62, %v807_v4  ;;  %v248_v45 = vld [vmem:[%s2723_s19 + $0x20] sm:$0xf] }
  0x47   : > { %v865_v9 = vsel %vm2810_vm14, %v860_v55, %v864_v40  ;;  %v1448_v12 = vmax.bf16 %v1416_v63, %v2822_v28  ;;  %v1504_v10 = vmax.bf16 %v1446_v20, %v817_v6  ;;  %v332_v14 = vor.u32 %v330_v22, %v329_v0 }
  0x48   : > { %v1450_v13 = vmax.bf16 %v1418_v1, %v2841_v50  ;;  %v1505_v24 = vmax.bf16 %v1447_v2, %v831_v31  ;;  %v1547_v21 = vmax.bf16 %v1503_v8, %v1279_v51  ;;  %vm1794_vm15 = vcmask 31744   ;;  %v629_v2 = vld [vmem:[#allocation2 + $0x3c] sm:$0xf] }
  0x49   : > { %v333_v25 = vrot.slane %v329_v0, 4  ;;  %v1506_v26 = vmax.bf16 %v1448_v12, %v841_v42  ;;  %v1548_v29 = vmax.bf16 %v1504_v10, %v1282_v16  ;;  %v337_v4 = vrot.slane %v335_v38, 7 }
  0x4a   : > { %v338_v30 = vshll.u32 %v2796_v11, 16  ;;  %v2906_v32 = vmax.bf16 %v1449_v3, %v2868_v44  ;;  %v1549_v7 = vmax.bf16 %v1505_v24, %v2883_v56  ;;  %v1579_v22 = vmax.bf16 %v1547_v21, %v2807_v18  ;;  %v250_v21 = vld [vmem:[%s2723_s19 + $0x28] sm:$0xf] }
  0x4b   : > { %v623_v6 = vsel %vm2739_vm9, %v332_v14, %v622_v23  ;;  %v1550_v40 = vmax.bf16 %v1506_v26, %v1289_v34  ;;  %v1580_v41 = vmax.bf16 %v1548_v29, %v2822_v28  ;;  %v1192_v11 = vmax.bf16 %v2868_v44, %v2837_v39 }
  0x4c   : > { %v340_v43 = vor.u32 %v338_v30, %v337_v4  ;;  %624 = vst [vmem:[#allocation2 + $0x30] sm:$0xf] %v623_v6  ;;  %v1581_v38 = vmax.bf16 %v1549_v7, %v2837_v39  ;;  %v1637_v46 = vmax.bf16 %v1579_v22, %v831_v31  ;;  %v1193_v47 = vmax.bf16 %v865_v9, %v2841_v50  ;;  %v251_v6 = vld [vmem:[%s2723_s19 + $0x2c] sm:$0xf] }
  0x4d   : > { %v2442_v15 = vrot.slane %v2837_v39, 9  ;;  %v1582_v18 = vmax.bf16 %v1550_v40, %v2841_v50  ;;  %v1638_v35 = vmax.bf16 %v1580_v41, %v841_v42  ;;  %v1292_v28 = vrot.slane %v2841_v50, 5 }
  0x4e   : > { %v341_v37 = vsel %vm2733_vm8, %v333_v25, %v340_v43  ;;  %v1681_v36 = vmax.bf16 %v1637_v46, %v2883_v56  ;;  %v1295_v48 = vrot.slane %v2847_v59, 5  ;;  %v1639_v31 = vmax.bf16 %v1581_v38, %v2868_v44  ;;  %v626_v56 = vld [vmem:[#allocation2 + $0x38] sm:$0x1]  ;;  %v633_v38 = vld [vmem:[#allocation2 + $0x44] sm:$0x1] }
  0x4f   : > { %625 = vst.msk [vmem:[#allocation2 + $0x34] sm:$0xf] %vm184_vm1, %v341_v37  ;;  %v342_v51 = vrot.slane %v337_v4, 4  ;;  %v1682_v39 = vmax.bf16 %v1638_v35, %v1289_v34  ;;  %v1293_v42 = vsel %vm2785_vm13, %v2442_v15, %v1292_v28  ;;  %v1294_v52 = vrot.slane %v1292_v28, 4  ;;  %v2965_v35 = vld [vmem:[%s2723_s19 + $0x30] sm:$0xf] }
  0x50   : > { %v1640_v53 = vmax.bf16 %v1582_v18, %v865_v9  ;;  %v1508_v54 = vmax.bf16 %v1450_v13, %v865_v9  ;;  %v2930_v55 = vmax.bf16 %v1293_v42, %v1192_v11  ;;  %v1683_v50 = vmax.bf16 %v1639_v31, %v1293_v42 }
  0x51   : > { %v344_v57 = vshrl.u32 %v248_v45, 16  ;;  %v2457_v58 = vcombine.low %v1681_v36, %v1682_v39  ;;  %v1296_v59 = vsel %vm2785_vm13, %v1294_v52, %v1295_v48  ;;  %v347_v16 = vshll.u32 %v248_v45, 16 }
  0x52   : > { %v352_v44 = vshrl.u32 %v249_v49, 16  ;;  %v1551_v61 = vmax.bf16 %v2906_v32, %v1293_v42  ;;  %v1684_v62 = vmax.bf16 %v1640_v53, %v1296_v59  ;;  %v2938_v63 = vmax.bf16 %v1296_v59, %v1193_v47 }
  0x53   : > { %v2934_v60 = vld [vmem:[#allocation2 + $0x30] sm:$0xf]  ;;  %v346_v34 = vrot.slane %v344_v57, 7  ;;  %2576 = vmatprep.mubr.msk.bf16.mxu0 %vm1794_vm15, %v2457_v58  ;;  %v355_v0 = vshll.u32 %v249_v49, 16  ;;  %v627_v1 = vsel %vm2745_vm10, %v342_v51, %v626_v56  ;;  %v1552_v23 = vmax.bf16 %v1508_v54, %v1296_v59  ;;  %v636_v54 = vld [vmem:[#allocation2 + $0x48] sm:$0xf] }
  0x54   : > { %v354_v20 = vrot.slane %v352_v44, 7  ;;  %v2458_v3 = vcombine.low %v1683_v50, %v1684_v62  ;;  %628 = vst [vmem:[#allocation2 + $0x38] sm:$0x1] %v627_v1  ;;  %v867_v12 = vshrl.u32 %v2934_v60, 16  ;;  %v1451_v14 = vmax.bf16 %v2930_v55, %v2934_v60 }
  0x55   : > { %v349_v8 = vor.u32 %v347_v16, %v346_v34  ;;  %v350_v9 = vrot.slane %v346_v34, 4  ;;  %v870_v24 = vshll.u32 %v2934_v60, 16  ;;  %v2443_v4 = vrot.slane %v2934_v60, 9 }
  0x56   : > { %v2943_v10 = vld [vmem:[#allocation2 + $0x34] sm:$0xf]  ;;  %v357_v13 = vor.u32 %v355_v0, %v354_v20  ;;  %2577 = vmatmul.mubr.msk.bf16.vlgmr.msra.gmra.mxu0 %vm1794_vm15, %v2458_v3  ;;  %v869_v26 = vrot.slane %v867_v12, 4  ;;  %v1583_v41 = vmax.bf16 %v1551_v61, %v2934_v60  ;;  %v359_v43 = vrot.slane %v354_v20, 4 }
  0x57   : > { %v630_v25 = vsel %vm2739_vm9, %v349_v8, %v629_v2  ;;  %v876_v29 = vshll.u32 %v2943_v10, 16  ;;  %v872_v32 = vrot.slane %v870_v24, 5  ;;  %v880_v7 = vshrl.u32 %v2943_v10, 16 }
  0x58   : > { %v358_v30 = vsel %vm2733_vm8, %v350_v9, %v357_v13  ;;  %631 = vst [vmem:[#allocation2 + $0x3c] sm:$0xf] %v630_v25  ;;  %v1299_v22 = vrot.slane %v2943_v10, 5  ;;  %v361_v11 = vshrl.u32 %v250_v21, 16  ;;  %v1452_v46 = vmax.bf16 %v2938_v63, %v2943_v10 }
  0x59   : > { %632 = vst.msk [vmem:[#allocation2 + $0x40] sm:$0xf] %vm184_vm1, %v358_v30  ;;  %v878_v40 = vrot.slane %v876_v29, 5  ;;  %v873_v47 = vor.u32 %v872_v32, %v869_v26  ;;  %v882_v15 = vrot.slane %v880_v7, 4  ;;  %v1584_v18 = vmax.bf16 %v1552_v23, %v2943_v10 }
  0x5a   : > { %v1301_v37 = vrot.slane %v1299_v22, 4  ;;  %v363_v28 = vrot.slane %v361_v11, 7  ;;  %v364_v45 = vshll.u32 %v250_v21, 16  ;;  %v369_v36 = vshrl.u32 %v251_v6, 16 }
  0x5b   : > { %v727_v48 = vld [vmem:[#allocation2 + $0x38] sm:$0x1]  ;;  %v874_v31 = vrot.slane %v873_v47, 4  ;;  %v883_v49 = vor.u32 %v882_v15, %v878_v40  ;;  %v372_v51 = vshll.u32 %v251_v6, 16  ;;  %v634_v39 = vsel %vm2745_vm10, %v359_v43, %v633_v38 }
  0x5c   : > { %v886_v42 = vshll.u32 %v727_v48, 16  ;;  %v1302_v52 = vrot.slane %v727_v48, 5  ;;  %v366_v53 = vor.u32 %v364_v45, %v363_v28  ;;  %635 = vst [vmem:[#allocation2 + $0x44] sm:$0x1] %v634_v39  ;;  %v378_v55 = vshrl.u32 %v2965_v35, 16 }
  0x5d   : > { %v879_v50 = vsel %vm2810_vm14, %v874_v31, %v878_v40  ;;  %v884_v57 = vrot.slane %v883_v49, 4  ;;  %v1300_v56 = vsel %vm2785_vm13, %v2443_v4, %v1299_v22  ;;  %v2974_v58 = vrot.slane %v369_v36, 7  ;;  %v253_v36 = vld [vmem:[%s2723_s19 + $0x34] sm:$0xf] }
  0x5e   : > { %v888_v16 = vrot.slane %v886_v42, 5  ;;  %v1194_v44 = vmax.bf16 %v879_v50, %v2934_v60  ;;  %v1509_v61 = vmax.bf16 %v1451_v14, %v879_v50  ;;  %v367_v62 = vrot.slane %v363_v28, 4 }
  0x5f   : > { %v2976_v59 = vld [vmem:[#allocation2 + $0x3c] sm:$0xf]  ;;  %v1641_v34 = vmax.bf16 %v1583_v41, %v879_v50  ;;  %v374_v63 = vor.u32 %v372_v51, %v2974_v58  ;;  %v637_v20 = vsel %vm2739_vm9, %v366_v53, %v636_v54  ;;  %v1303_v3 = vsel %vm2785_vm13, %v1301_v37, %v1302_v52  ;;  %v640_v54 = vld [vmem:[#allocation2 + $0x50] sm:$0x1] }
  0x60   : > { %v891_v0 = vshrl.u32 %v2976_v59, 16  ;;  %v2983_v1 = vld [vmem:[#allocation2 + $0x40] sm:$0xf]  ;;  %v889_v2 = vsel %vm2810_vm14, %v884_v57, %v888_v16  ;;  %638 = vst [vmem:[#allocation2 + $0x48] sm:$0xf] %v637_v20  ;;  %v894_v60 = vshll.u32 %v2976_v59, 16  ;;  %v1421_v13 = vmax.bf16 %v1300_v56, %v1194_v44 }
  0x61   : > { %v2990_v8 = vrot.slane %v378_v55, 7  ;;  %v1195_v9 = vmax.bf16 %v889_v2, %v2943_v10  ;;  %v1510_v12 = vmax.bf16 %v1452_v46, %v889_v2  ;;  %v1642_v14 = vmax.bf16 %v1584_v18, %v889_v2  ;;  %v643_v55 = vld [vmem:[#allocation2 + $0x54] sm:$0xf] }
  0x62   : > { %v1685_v23 = vmax.bf16 %v1641_v34, %v1300_v56  ;;  %v375_v24 = vsel %vm2733_vm8, %v367_v62, %v374_v63  ;;  %v893_v21 = vrot.slane %v891_v0, 4  ;;  %v896_v25 = vrot.slane %v894_v60, 5 }
  0x63   : > { %v1422_v26 = vmax.bf16 %v1303_v3, %v1195_v9  ;;  %v1553_v29 = vmax.bf16 %v1509_v61, %v1300_v56  ;;  %v1686_v4 = vmax.bf16 %v1642_v14, %v1303_v3  ;;  %639 = vst.msk [vmem:[#allocation2 + $0x4c] sm:$0xf] %vm184_vm1, %v375_v24  ;;  %v730_v30 = vld [vmem:[#allocation2 + $0x44] sm:$0x1]  ;;  %v900_v32 = vshll.u32 %v2983_v1, 16 }
  0x64   : > { %v897_v7 = vor.u32 %v896_v25, %v893_v21  ;;  %v904_v10 = vshrl.u32 %v2983_v1, 16  ;;  %v910_v22 = vshll.u32 %v730_v30, 16  ;;  %v2444_v6 = vrot.slane %v2976_v59, 9 }
  0x65   : > { %v1554_v40 = vmax.bf16 %v1510_v12, %v1303_v3  ;;  %v2459_v41 = vcombine.low %v1685_v23, %v1686_v4  ;;  %v902_v43 = vrot.slane %v900_v32, 5  ;;  %v1306_v11 = vrot.slane %v2983_v1, 5 }
  0x66   : > { %v1453_v38 = vmax.bf16 %v1421_v13, %v2976_v59  ;;  %v898_v46 = vrot.slane %v897_v7, 4  ;;  %v906_v47 = vrot.slane %v904_v10, 4  ;;  %v1309_v15 = vrot.slane %v730_v30, 5  ;;  %v254_v30 = vld [vmem:[%s2723_s19 + $0x38] sm:$0xf] }
  0x67   : > { %2580 = vmatprep.mubr.msk.bf16.mxu0 %vm1794_vm15, %v2459_v41  ;;  %v912_v18 = vrot.slane %v910_v22, 5  ;;  %v3004_v37 = vsel %vm2785_vm13, %v2444_v6, %v1306_v11  ;;  %v1308_v28 = vrot.slane %v1306_v11, 4  ;;  %v1585_v45 = vmax.bf16 %v1553_v29, %v2976_v59  ;;  %v3018_v44 = vld [vmem:[#allocation2 + $0x48] sm:$0xf] }
  0x68   : > { %v903_v48 = vsel %vm2810_vm14, %v898_v46, %v902_v43  ;;  %v907_v31 = vor.u32 %v906_v47, %v902_v43  ;;  %v376_v49 = vrot.slane %v2974_v58, 4  ;;  %v381_v51 = vshll.u32 %v2965_v35, 16  ;;  %v255_v43 = vld [vmem:[%s2723_s19 + $0x3c] sm:$0xf] }
  0x69   : > { %v1454_v39 = vmax.bf16 %v1422_v26, %v2983_v1  ;;  %v1196_v42 = vmax.bf16 %v903_v48, %v2976_v59  ;;  %v1586_v52 = vmax.bf16 %v1554_v40, %v2983_v1  ;;  %v1643_v53 = vmax.bf16 %v1585_v45, %v903_v48 }
  0x6a   : > { %v908_v50 = vrot.slane %v907_v31, 4  ;;  %v1310_v57 = vsel %vm2785_vm13, %v1308_v28, %v1309_v15  ;;  %v383_v56 = vor.u32 %v381_v51, %v2990_v8  ;;  %v386_v16 = vshrl.u32 %v253_v36, 16  ;;  %v3020_v58 = vld [vmem:[#allocation2 + $0x4c] sm:$0xf]  ;;  %v647_v15 = vld [vmem:[#allocation2 + $0x5c] sm:$0x1] }
  0x6b   : > { %v1423_v35 = vmax.bf16 %v3004_v37, %v1196_v42  ;;  %v1511_v61 = vmax.bf16 %v1453_v38, %v903_v48  ;;  %v384_v59 = vrot.slane %v2990_v8, 4  ;;  %v389_v62 = vshll.u32 %v253_v36, 16 }
  0x6c   : > { %v913_v34 = vsel %vm2810_vm14, %v908_v50, %v912_v18  ;;  %v388_v63 = vrot.slane %v386_v16, 7  ;;  %v641_v20 = vsel %vm2745_vm10, %v376_v49, %v640_v54  ;;  %v644_v0 = vsel %vm2739_vm9, %v383_v56, %v643_v55 }
  0x6d   : > { %v1197_v2 = vmax.bf16 %v913_v34, %v2983_v1  ;;  %v1512_v3 = vmax.bf16 %v1454_v39, %v913_v34  ;;  %v1644_v60 = vmax.bf16 %v1586_v52, %v913_v34  ;;  %v1687_v9 = vmax.bf16 %v1643_v53, %v3004_v37  ;;  %642 = vst [vmem:[#allocation2 + $0x50] sm:$0x1] %v641_v20 }
  0x6e   : > { %645 = vst [vmem:[#allocation2 + $0x54] sm:$0xf] %v644_v0  ;;  %v391_v8 = vor.u32 %v389_v62, %v388_v63  ;;  %v915_v12 = vshrl.u32 %v3018_v44, 16  ;;  %v918_v14 = vshll.u32 %v3018_v44, 16  ;;  %v924_v23 = vshll.u32 %v3020_v58, 16 }
  0x6f   : > { %v1424_v13 = vmax.bf16 %v1310_v57, %v1197_v2  ;;  %v1555_v24 = vmax.bf16 %v1511_v61, %v3004_v37  ;;  %v1688_v21 = vmax.bf16 %v1644_v60, %v1310_v57  ;;  %v928_v1 = vshrl.u32 %v3020_v58, 16  ;;  %v650_v62 = vld [vmem:[#allocation2 + $0x60] sm:$0xf] }
  0x70   : > { %v392_v25 = vsel %vm2733_vm8, %v384_v59, %v391_v8  ;;  %v917_v26 = vrot.slane %v915_v12, 4  ;;  %v920_v29 = vrot.slane %v918_v14, 5  ;;  %v926_v4 = vrot.slane %v924_v23, 5 }
  0x71   : > { %v1455_v32 = vmax.bf16 %v1423_v35, %v3018_v44  ;;  %v2460_v7 = vcombine.low %v1687_v9, %v1688_v21  ;;  %646 = vst.msk [vmem:[#allocation2 + $0x58] sm:$0xf] %vm184_vm1, %v392_v25  ;;  %v930_v10 = vrot.slane %v928_v1, 4  ;;  %v1456_v22 = vmax.bf16 %v1424_v13, %v3020_v58 }
  0x72   : > { %v1556_v6 = vmax.bf16 %v1512_v3, %v1310_v57  ;;  %v921_v40 = vor.u32 %v920_v29, %v917_v26  ;;  %v1313_v41 = vrot.slane %v3020_v58, 5  ;;  %v2445_v38 = vrot.slane %v3018_v44, 9 }
  0x73   : > { %2581 = vmatmul.mubr.msk.bf16.gmra.mxu0 %vm1794_vm15, %v2460_v7  ;;  %v931_v11 = vor.u32 %v930_v10, %v926_v4  ;;  %v393_v46 = vrot.slane %v388_v63, 4  ;;  %v395_v47 = vshrl.u32 %v254_v30, 16  ;;  %v1587_v45 = vmax.bf16 %v1555_v24, %v3018_v44 }
  0x74   : > { %v733_v18 = vld [vmem:[#allocation2 + $0x50] sm:$0x1]  ;;  %v922_v37 = vrot.slane %v921_v40, 4  ;;  %v1315_v28 = vrot.slane %v1313_v41, 4  ;;  %v398_v36 = vshll.u32 %v254_v30, 16  ;;  %v1588_v52 = vmax.bf16 %v1556_v6, %v3020_v58 }
  0x75   : > { %v932_v48 = vrot.slane %v931_v11, 4  ;;  %v934_v31 = vshll.u32 %v733_v18, 16  ;;  %v1316_v49 = vrot.slane %v733_v18, 5  ;;  %v397_v51 = vrot.slane %v395_v47, 7  ;;  %v3048_v39 = vld [vmem:[#allocation2 + $0x54] sm:$0xf] }
  0x76   : > { %v927_v42 = vsel %vm2810_vm14, %v922_v37, %v926_v4  ;;  %v403_v53 = vshrl.u32 %v255_v43, 16  ;;  %v648_v54 = vsel %vm2745_vm10, %v393_v46, %v647_v15  ;;  %v406_v56 = vshll.u32 %v255_v43, 16  ;;  %v654_v47 = vld [vmem:[#allocation2 + $0x68] sm:$0x1]  ;;  %v3080_v15 = vld [vmem:[%s2723_s19 + $0x40] sm:$0xf] }
  0x77   : > { %v936_v55 = vrot.slane %v934_v31, 5  ;;  %v1198_v50 = vmax.bf16 %v927_v42, %v3018_v44  ;;  %v1513_v57 = vmax.bf16 %v1455_v32, %v927_v42  ;;  %649 = vst [vmem:[#allocation2 + $0x5c] sm:$0x1] %v648_v54  ;;  %v1314_v16 = vsel %vm2785_vm13, %v2445_v38, %v1313_v41 }
  0x78   : > { %v1645_v35 = vmax.bf16 %v1587_v45, %v927_v42  ;;  %v400_v61 = vor.u32 %v398_v36, %v397_v51  ;;  %v405_v59 = vrot.slane %v403_v53, 7  ;;  %v1317_v63 = vsel %vm2785_vm13, %v1315_v28, %v1316_v49  ;;  %v3063_v44 = vld [vmem:[#allocation2 + $0x58] sm:$0xf] }
  0x79   : > { %v937_v34 = vsel %vm2810_vm14, %v932_v48, %v936_v55  ;;  %v401_v20 = vrot.slane %v397_v51, 4  ;;  %v939_v0 = vshrl.u32 %v3048_v39, 16  ;;  %v1425_v8 = vmax.bf16 %v1314_v16, %v1198_v50 }
  0x7a   : > { %v1199_v2 = vmax.bf16 %v937_v34, %v3020_v58  ;;  %v1514_v3 = vmax.bf16 %v1456_v22, %v937_v34  ;;  %v1646_v60 = vmax.bf16 %v1588_v52, %v937_v34  ;;  %v1689_v9 = vmax.bf16 %v1645_v35, %v1314_v16  ;;  %v257_v34 = vld [vmem:[%s2723_s19 + $0x44] sm:$0xf] }
  0x7b   : > { %v1557_v12 = vmax.bf16 %v1513_v57, %v1314_v16  ;;  %v408_v14 = vor.u32 %v406_v56, %v405_v59  ;;  %v651_v23 = vsel %vm2739_vm9, %v400_v61, %v650_v62  ;;  %v941_v21 = vrot.slane %v939_v0, 4 }
  0x7c   : > { %v1426_v13 = vmax.bf16 %v1317_v63, %v1199_v2  ;;  %v1690_v24 = vmax.bf16 %v1646_v60, %v1317_v63  ;;  %652 = vst [vmem:[#allocation2 + $0x60] sm:$0xf] %v651_v23  ;;  %v942_v1 = vshll.u32 %v3048_v39, 16  ;;  %v1558_v25 = vmax.bf16 %v1514_v3, %v1317_v63 }
  0x7d   : > { %v409_v26 = vsel %vm2733_vm8, %v401_v20, %v408_v14  ;;  %v948_v58 = vshll.u32 %v3063_v44, 16  ;;  %v952_v29 = vshrl.u32 %v3063_v44, 16  ;;  %v2446_v7 = vrot.slane %v3048_v39, 9 }
  0x7e   : > { %v2461_v4 = vcombine.low %v1689_v9, %v1690_v24  ;;  %653 = vst.msk [vmem:[#allocation2 + $0x64] sm:$0xf] %vm184_vm1, %v409_v26  ;;  %v736_v30 = vld [vmem:[#allocation2 + $0x5c] sm:$0x1]  ;;  %v944_v32 = vrot.slane %v942_v1, 5  ;;  %v1320_v10 = vrot.slane %v3063_v44, 5  ;;  %v1457_v43 = vmax.bf16 %v1425_v8, %v3048_v39 }
  0x7f   : > { %v950_v22 = vrot.slane %v948_v58, 5  ;;  %v954_v6 = vrot.slane %v952_v29, 4  ;;  %v958_v40 = vshll.u32 %v736_v30, 16  ;;  %v1323_v41 = vrot.slane %v736_v30, 5  ;;  %v258_v29 = vld [vmem:[%s2723_s19 + $0x48] sm:$0xf] }
  0x80   : > { %v1458_v11 = vmax.bf16 %v1426_v13, %v3063_v44  ;;  %2584 = vmatprep.mubr.msk.bf16.mxu0 %vm1794_vm15, %v2461_v4  ;;  %v945_v38 = vor.u32 %v944_v32, %v941_v21  ;;  %v1322_v46 = vrot.slane %v1320_v10, 4  ;;  %v1589_v28 = vmax.bf16 %v1557_v12, %v3048_v39 }
  0x81   : > { %v955_v18 = vor.u32 %v954_v6, %v950_v22  ;;  %v960_v37 = vrot.slane %v958_v40, 5  ;;  %v410_v45 = vrot.slane %v405_v59, 4  ;;  %v1321_v48 = vsel %vm2785_vm13, %v2446_v7, %v1320_v10 }
  0x82   : > { %v946_v36 = vrot.slane %v945_v38, 4  ;;  %v1324_v31 = vsel %vm2785_vm13, %v1322_v46, %v1323_v41  ;;  %v1590_v49 = vmax.bf16 %v1558_v25, %v3063_v44  ;;  %v412_v53 = vshrl.u32 %v3080_v15, 16 }
  0x83   : > { %v3088_v51 = vld [vmem:[#allocation2 + $0x60] sm:$0xf]  ;;  %v956_v42 = vrot.slane %v955_v18, 4  ;;  %v655_v52 = vsel %vm2745_vm10, %v410_v45, %v654_v47  ;;  %v415_v54 = vshll.u32 %v3080_v15, 16  ;;  %v420_v23 = vshrl.u32 %v257_v34, 16 }
  0x84   : > { %v951_v55 = vsel %vm2810_vm14, %v946_v36, %v950_v22  ;;  %656 = vst [vmem:[#allocation2 + $0x68] sm:$0x1] %v655_v52  ;;  %v963_v50 = vshrl.u32 %v3088_v51, 16  ;;  %v966_v57 = vshll.u32 %v3088_v51, 16  ;;  %v2447_v56 = vrot.slane %v3088_v51, 9 }
  0x85   : > { %v3099_v16 = vld [vmem:[#allocation2 + $0x64] sm:$0xf]  ;;  %v961_v35 = vsel %vm2810_vm14, %v956_v42, %v960_v37  ;;  %v1200_v61 = vmax.bf16 %v951_v55, %v3048_v39  ;;  %v1515_v59 = vmax.bf16 %v1457_v43, %v951_v55  ;;  %v1647_v62 = vmax.bf16 %v1589_v28, %v951_v55  ;;  %v657_v28 = vld [vmem:[#allocation2 + $0x6c] sm:$0xf] }
  0x86   : > { %v1201_v63 = vmax.bf16 %v961_v35, %v3063_v44  ;;  %v1516_v20 = vmax.bf16 %v1458_v11, %v961_v35  ;;  %v1648_v0 = vmax.bf16 %v1590_v49, %v961_v35  ;;  %v965_v2 = vrot.slane %v963_v50, 4  ;;  %v259_v55 = vld [vmem:[%s2723_s19 + $0x4c] sm:$0xf] }
  0x87   : > { %v1427_v3 = vmax.bf16 %v1321_v48, %v1200_v61  ;;  %v1559_v60 = vmax.bf16 %v1515_v59, %v1321_v48  ;;  %v1691_v9 = vmax.bf16 %v1647_v62, %v1321_v48  ;;  %v968_v8 = vrot.slane %v966_v57, 5  ;;  %v260_v62 = vld [vmem:[%s2723_s19 + $0x50] sm:$0xf] }
  0x88   : > { %v1692_v12 = vmax.bf16 %v1648_v0, %v1324_v31  ;;  %v972_v14 = vshll.u32 %v3099_v16, 16  ;;  %v423_v13 = vshll.u32 %v257_v34, 16  ;;  %v1428_v24 = vmax.bf16 %v1324_v31, %v1201_v63 }
  0x89   : > { %v969_v39 = vor.u32 %v968_v8, %v965_v2  ;;  %v976_v21 = vshrl.u32 %v3099_v16, 16  ;;  %v1327_v1 = vrot.slane %v3099_v16, 5  ;;  %v1459_v44 = vmax.bf16 %v1427_v3, %v3088_v51  ;;  %v3147_v3 = vld [vmem:[%s2723_s19 + $0x58] sm:$0xf] }
  0x8a   : > { %v1560_v25 = vmax.bf16 %v1516_v20, %v1324_v31  ;;  %v2462_v26 = vcombine.low %v1691_v9, %v1692_v12  ;;  %v974_v58 = vrot.slane %v972_v14, 5  ;;  %v1591_v10 = vmax.bf16 %v1559_v60, %v3088_v51  ;;  %v261_v20 = vld [vmem:[%s2723_s19 + $0x54] sm:$0xf]  ;;  %v664_v14 = vld [vmem:[#allocation2 + $0x78] sm:$0xf] }
  0x8b   : > { %v739_v4 = vld [vmem:[#allocation2 + $0x68] sm:$0x1]  ;;  %v970_v30 = vrot.slane %v969_v39, 4  ;;  %v978_v32 = vrot.slane %v976_v21, 4  ;;  %v3113_v7 = vsel %vm2785_vm13, %v2447_v56, %v1327_v1  ;;  %v1329_v6 = vrot.slane %v1327_v1, 4 }
  0x8c   : > { %2585 = vmatmul.mubr.msk.bf16.gmra.mxu0 %vm1794_vm15, %v2462_v26  ;;  %v982_v22 = vshll.u32 %v739_v4, 16  ;;  %v1330_v40 = vrot.slane %v739_v4, 5  ;;  %v414_v41 = vrot.slane %v412_v53, 7  ;;  %v422_v38 = vrot.slane %v420_v23, 7  ;;  %v661_v53 = vld [vmem:[#allocation2 + $0x74] sm:$0x1] }
  0x8d   : > { %v975_v43 = vsel %vm2810_vm14, %v970_v30, %v974_v58  ;;  %v979_v11 = vor.u32 %v978_v32, %v974_v58  ;;  %v429_v46 = vshrl.u32 %v258_v29, 16  ;;  %v1592_v37 = vmax.bf16 %v1560_v25, %v3099_v16  ;;  %v668_v25 = vld [vmem:[#allocation2 + $0x80] sm:$0x1] }
  0x8e   : > { %v984_v47 = vrot.slane %v982_v22, 5  ;;  %v1202_v15 = vmax.bf16 %v975_v43, %v3088_v51  ;;  %v3120_v18 = vmax.bf16 %v1459_v44, %v975_v43  ;;  %v1649_v36 = vmax.bf16 %v1591_v10, %v975_v43 }
  0x8f   : > { %v980_v45 = vrot.slane %v979_v11, 4  ;;  %v417_v48 = vor.u32 %v415_v54, %v414_v41  ;;  %v418_v31 = vrot.slane %v414_v41, 4  ;;  %v1460_v49 = vmax.bf16 %v1428_v24, %v3099_v16 }
  0x90   : > { %v425_v42 = vor.u32 %v423_v13, %v422_v38  ;;  %v427_v52 = vrot.slane %v422_v38, 4  ;;  %v3129_v50 = vsel %vm2785_vm13, %v1329_v6, %v1330_v40  ;;  %v431_v57 = vrot.slane %v429_v46, 7 }
  0x91   : > { %v985_v51 = vsel %vm2810_vm14, %v980_v45, %v984_v47  ;;  %v658_v54 = vsel %vm2739_vm9, %v417_v48, %v657_v28  ;;  %v3134_v56 = vmax.bf16 %v3113_v7, %v1202_v15  ;;  %v1693_v61 = vmax.bf16 %v1649_v36, %v3113_v7 }
  0x92   : > { %v1650_v35 = vmax.bf16 %v1592_v37, %v985_v51  ;;  %v426_v59 = vsel %vm2733_vm8, %v418_v31, %v425_v42  ;;  %659 = vst [vmem:[#allocation2 + $0x6c] sm:$0xf] %v658_v54  ;;  %v1561_v34 = vmax.bf16 %v3120_v18, %v3113_v7  ;;  %v662_v63 = vsel %vm2745_vm10, %v427_v52, %v661_v53  ;;  %v671_v52 = vld [vmem:[#allocation2 + $0x84] sm:$0xf]  ;;  %v675_v54 = vld [vmem:[#allocation2 + $0x8c] sm:$0x1] }
  0x93   : > { %660 = vst.msk [vmem:[#allocation2 + $0x70] sm:$0xf] %vm184_vm1, %v426_v59  ;;  %v432_v0 = vshll.u32 %v258_v29, 16  ;;  %v437_v2 = vshrl.u32 %v259_v55, 16  ;;  %v1203_v60 = vmax.bf16 %v985_v51, %v3099_v16  ;;  %v1518_v9 = vmax.bf16 %v1460_v49, %v985_v51  ;;  %663 = vst [vmem:[#allocation2 + $0x74] sm:$0x1] %v662_v63 }
  0x94   : > { %v1694_v8 = vmax.bf16 %v1650_v35, %v3129_v50  ;;  %v440_v12 = vshll.u32 %v259_v55, 16  ;;  %v435_v13 = vrot.slane %v431_v57, 4  ;;  %v446_v39 = vshrl.u32 %v260_v62, 16 }
  0x95   : > { %v434_v23 = vor.u32 %v432_v0, %v431_v57  ;;  %v439_v24 = vrot.slane %v437_v2, 7  ;;  %v449_v1 = vshll.u32 %v260_v62, 16  ;;  %v454_v44 = vshrl.u32 %v261_v20, 16 }
  0x96   : > { %v2463_v21 = vcombine.low %v1693_v61, %v1694_v8  ;;  %v463_v26 = vshrl.u32 %v3147_v3, 16  ;;  %v448_v4 = vrot.slane %v446_v39, 7  ;;  %v3155_v30 = vmax.bf16 %v3129_v50, %v1203_v60 }
  0x97   : > { %v442_v58 = vor.u32 %v440_v12, %v439_v24  ;;  %v444_v29 = vrot.slane %v439_v24, 4  ;;  %v665_v16 = vsel %vm2739_vm9, %v434_v23, %v664_v14  ;;  %v1562_v32 = vmax.bf16 %v1518_v9, %v3129_v50 }
  0x98   : > { %2588 = vmatprep.mubr.msk.bf16.mxu0 %vm1794_vm15, %v2463_v21  ;;  %v456_v7 = vrot.slane %v454_v44, 7  ;;  %v457_v10 = vshll.u32 %v261_v20, 16  ;;  %666 = vst [vmem:[#allocation2 + $0x78] sm:$0xf] %v665_v16  ;;  %v3165_v41 = vrot.slane %v463_v26, 7  ;;  %v466_v43 = vshll.u32 %v3147_v3, 16 }
  0x99   : > { %v3159_v22 = vld [vmem:[#allocation2 + $0x6c] sm:$0xf]  ;;  %v443_v6 = vsel %vm2733_vm8, %v435_v13, %v442_v58  ;;  %v669_v40 = vsel %vm2745_vm10, %v444_v29, %v668_v25  ;;  %v451_v47 = vor.u32 %v449_v1, %v448_v4  ;;  %v452_v15 = vrot.slane %v448_v4, 4 }
  0x9a   : > { %v3168_v11 = vld [vmem:[#allocation2 + $0x70] sm:$0xf]  ;;  %v987_v38 = vshrl.u32 %v3159_v22, 16  ;;  %v990_v46 = vshll.u32 %v3159_v22, 16  ;;  %667 = vst.msk [vmem:[#allocation2 + $0x7c] sm:$0xf] %vm184_vm1, %v443_v6  ;;  %v1593_v42 = vmax.bf16 %v1561_v34, %v3159_v22  ;;  %v459_v61 = vor.u32 %v457_v10, %v456_v7 }
  0x9b   : > { %670 = vst [vmem:[#allocation2 + $0x80] sm:$0x1] %v669_v40  ;;  %v742_v18 = vld [vmem:[#allocation2 + $0x74] sm:$0x1]  ;;  %v996_v37 = vshll.u32 %v3168_v11, 16  ;;  %v1000_v28 = vshrl.u32 %v3168_v11, 16  ;;  %v1594_v35 = vmax.bf16 %v1562_v32, %v3168_v11  ;;  %v672_v34 = vsel %vm2739_vm9, %v451_v47, %v671_v52 }
  0x9c   : > { %v2448_v45 = vrot.slane %v3159_v22, 9  ;;  %v1334_v36 = vrot.slane %v3168_v11, 5  ;;  %v989_v48 = vrot.slane %v987_v38, 4  ;;  %v992_v31 = vrot.slane %v990_v46, 5  ;;  %673 = vst [vmem:[#allocation2 + $0x84] sm:$0xf] %v672_v34 }
  0x9d   : > { %v1006_v49 = vshll.u32 %v742_v18, 16  ;;  %v998_v53 = vrot.slane %v996_v37, 5  ;;  %v1002_v55 = vrot.slane %v1000_v28, 4  ;;  %v1337_v50 = vrot.slane %v742_v18, 5  ;;  %v263_v34 = vld [vmem:[%s2723_s19 + $0x5c] sm:$0xf] }
  0x9e   : > { %v1336_v51 = vrot.slane %v1334_v36, 4  ;;  %v993_v57 = vor.u32 %v992_v31, %v989_v48  ;;  %v461_v59 = vrot.slane %v456_v7, 4  ;;  %v3181_v20 = vsel %vm2785_vm13, %v2448_v45, %v1334_v36 }
  0x9f   : > { %v1003_v62 = vor.u32 %v1002_v55, %v998_v53  ;;  %v1008_v63 = vrot.slane %v1006_v49, 5  ;;  %v3185_v0 = vld [vmem:[#allocation2 + $0x78] sm:$0xf]  ;;  %v460_v60 = vsel %vm2733_vm8, %v452_v15, %v459_v61  ;;  %v1461_v39 = vmax.bf16 %v3134_v56, %v3159_v22 }
  0xa0   : > { %v994_v2 = vrot.slane %v993_v57, 4  ;;  %v676_v9 = vsel %vm2745_vm10, %v461_v59, %v675_v54  ;;  %v1011_v8 = vshrl.u32 %v3185_v0, 16  ;;  %v3194_v14 = vsel %vm2785_vm13, %v1336_v51, %v1337_v50  ;;  %674 = vst.msk [vmem:[#allocation2 + $0x88] sm:$0xf] %vm184_vm1, %v460_v60 }
  0xa1   : > { %v1004_v12 = vrot.slane %v1003_v62, 4  ;;  %677 = vst [vmem:[#allocation2 + $0x8c] sm:$0x1] %v676_v9  ;;  %v3197_v23 = vld [vmem:[#allocation2 + $0x7c] sm:$0xf]  ;;  %v1014_v24 = vshll.u32 %v3185_v0, 16  ;;  %v1462_v36 = vmax.bf16 %v3155_v30, %v3168_v11 }
  0xa2   : > { %v745_v13 = vld [vmem:[#allocation2 + $0x80] sm:$0x1]  ;;  %v999_v21 = vsel %vm2810_vm14, %v994_v2, %v998_v53  ;;  %v1013_v1 = vrot.slane %v1011_v8, 4  ;;  %v1020_v44 = vshll.u32 %v3197_v23, 16  ;;  %v1024_v25 = vshrl.u32 %v3197_v23, 16 }
  0xa3   : > { %v1009_v26 = vsel %vm2810_vm14, %v1004_v12, %v1008_v63  ;;  %v1651_v58 = vmax.bf16 %v1593_v42, %v999_v21  ;;  %v1016_v29 = vrot.slane %v1014_v24, 5  ;;  %v1030_v4 = vshll.u32 %v745_v13, 16  ;;  %v3214_v37 = vld [vmem:[#allocation2 + $0x84] sm:$0xf] }
  0xa4   : > { %v1652_v16 = vmax.bf16 %v1594_v35, %v1009_v26  ;;  %v1022_v32 = vrot.slane %v1020_v44, 5  ;;  %v1026_v7 = vrot.slane %v1024_v25, 4  ;;  %v1204_v10 = vmax.bf16 %v999_v21, %v3159_v22 }
  0xa5   : > { %v1695_v56 = vmax.bf16 %v1651_v58, %v3181_v20  ;;  %v1017_v6 = vor.u32 %v1016_v29, %v1013_v1  ;;  %v1032_v40 = vrot.slane %v1030_v4, 5  ;;  %v1205_v38 = vmax.bf16 %v1009_v26, %v3168_v11 }
  0xa6   : > { %v1696_v46 = vmax.bf16 %v1652_v16, %v3194_v14  ;;  %v1027_v47 = vor.u32 %v1026_v7, %v1022_v32  ;;  %v2449_v15 = vrot.slane %v3185_v0, 9  ;;  %v1341_v18 = vrot.slane %v3197_v23, 5 }
  0xa7   : > { %v1018_v28 = vrot.slane %v1017_v6, 4  ;;  %v1431_v45 = vmax.bf16 %v3181_v20, %v1204_v10  ;;  %v1432_v22 = vmax.bf16 %v3194_v14, %v1205_v38  ;;  %v3220_v31 = vld [vmem:[#allocation2 + $0x88] sm:$0xf]  ;;  %v1035_v52 = vshrl.u32 %v3214_v37, 16 }
  0xa8   : > { %v2464_v48 = vcombine.low %v1695_v56, %v1696_v46  ;;  %v3222_v49 = vld [vmem:[#allocation2 + $0x8c] sm:$0x1]  ;;  %v1028_v42 = vrot.slane %v1027_v47, 4  ;;  %v1342_v53 = vsel %vm2785_vm13, %v2449_v15, %v1341_v18  ;;  %v1038_v51 = vshll.u32 %v3214_v37, 16 }
  0xa9   : > { %v1023_v55 = vsel %vm2810_vm14, %v1018_v28, %v1022_v32  ;;  %v1044_v50 = vshll.u32 %v3220_v31, 16  ;;  %v1048_v30 = vshrl.u32 %v3220_v31, 16  ;;  %v1037_v54 = vrot.slane %v1035_v52, 4 }
  0xaa   : > { %2589 = vmatmul.mubr.msk.bf16.gmra.mxu0 %vm1794_vm15, %v2464_v48  ;;  %v1033_v11 = vsel %vm2810_vm14, %v1028_v42, %v1032_v40  ;;  %v1206_v57 = vmax.bf16 %v1023_v55, %v3185_v0  ;;  %v1344_v35 = vrot.slane %v745_v13, 5  ;;  %v1040_v61 = vrot.slane %v1038_v51, 5 }
  0xab   : > { %v1046_v59 = vrot.slane %v1044_v50, 5  ;;  %v1050_v62 = vrot.slane %v1048_v30, 4  ;;  %v1054_v63 = vshll.u32 %v3222_v49, 16  ;;  %v1207_v2 = vmax.bf16 %v1033_v11, %v3197_v23 }
  0xac   : > { %v1343_v60 = vrot.slane %v1341_v18, 4  ;;  %v1433_v9 = vmax.bf16 %v1342_v53, %v1206_v57  ;;  %v1463_v8 = vmax.bf16 %v1431_v45, %v3185_v0  ;;  %v1041_v12 = vor.u32 %v1040_v61, %v1037_v54 }
  0xad   : > { %v1051_v24 = vor.u32 %v1050_v62, %v1046_v59  ;;  %v1464_v1 = vmax.bf16 %v1432_v22, %v3197_v23  ;;  %v1519_v44 = vmax.bf16 %v1461_v39, %v999_v21  ;;  %v1520_v25 = vmax.bf16 %v1462_v36, %v1009_v26  ;;  %v678_v26 = vld [vmem:[#allocation2 + $0x90] sm:$0xf]  ;;  %v682_v62 = vld [vmem:[#allocation2 + $0x98] sm:$0x1] }
  0xae   : > { %v1345_v13 = vsel %vm2785_vm13, %v1343_v60, %v1344_v35  ;;  %v1521_v58 = vmax.bf16 %v1463_v8, %v1023_v55  ;;  %v471_v29 = vshrl.u32 %v263_v34, 16  ;;  %v1042_v4 = vrot.slane %v1041_v12, 4  ;;  %v265_v35 = vld [vmem:[%s2723_s19 + $0x64] sm:$0xf] }
  0xaf   : > { %v1056_v16 = vrot.slane %v1054_v63, 5  ;;  %v1522_v32 = vmax.bf16 %v1464_v1, %v1033_v11  ;;  %v468_v7 = vor.u32 %v466_v43, %v3165_v41  ;;  %v1052_v10 = vrot.slane %v1051_v24, 4  ;;  %v266_v63 = vld [vmem:[%s2723_s19 + $0x68] sm:$0xf] }
  0xb0   : > { %v1563_v56 = vmax.bf16 %v1519_v44, %v3181_v20  ;;  %v1564_v6 = vmax.bf16 %v1520_v25, %v3194_v14  ;;  %v1565_v40 = vmax.bf16 %v1521_v58, %v1342_v53  ;;  %v1434_v39 = vmax.bf16 %v1345_v13, %v1207_v2  ;;  %v267_v25 = vld [vmem:[%s2723_s19 + $0x6c] sm:$0xf] }
  0xb1   : > { %v1465_v21 = vmax.bf16 %v1433_v9, %v3214_v37  ;;  %v1566_v38 = vmax.bf16 %v1522_v32, %v1345_v13  ;;  %v469_v3 = vrot.slane %v3165_v41, 4  ;;  %v1047_v43 = vsel %vm2810_vm14, %v1042_v4, %v1046_v59 }
  0xb2   : > { %v1595_v46 = vmax.bf16 %v1563_v56, %v3185_v0  ;;  %v1596_v47 = vmax.bf16 %v1564_v6, %v3197_v23  ;;  %v1597_v15 = vmax.bf16 %v1565_v40, %v3214_v37  ;;  %v473_v14 = vrot.slane %v471_v29, 7 }
  0xb3   : > { %v1598_v20 = vmax.bf16 %v1566_v38, %v3220_v31  ;;  %v474_v18 = vshll.u32 %v263_v34, 16  ;;  %v1057_v28 = vsel %vm2810_vm14, %v1052_v10, %v1056_v16  ;;  %v679_v0 = vsel %vm2739_vm9, %v468_v7, %v678_v26 }
  0xb4   : > { %v1653_v45 = vmax.bf16 %v1595_v46, %v1023_v55  ;;  %v1654_v22 = vmax.bf16 %v1596_v47, %v1033_v11  ;;  %v1466_v23 = vmax.bf16 %v1434_v39, %v3220_v31  ;;  %680 = vst [vmem:[#allocation2 + $0x90] sm:$0xf] %v679_v0  ;;  %v2450_v36 = vrot.slane %v3214_v37, 9  ;;  %v264_v55 = vld [vmem:[%s2723_s19 + $0x60] sm:$0xf] }
  0xb5   : > { %v476_v41 = vor.u32 %v474_v18, %v473_v14  ;;  %v1348_v48 = vrot.slane %v3220_v31, 5  ;;  %v1351_v51 = vrot.slane %v3222_v49, 5  ;;  %v1655_v50 = vmax.bf16 %v1597_v15, %v1047_v43 }
  0xb6   : > { %v1697_v42 = vmax.bf16 %v1653_v45, %v1342_v53  ;;  %v1698_v52 = vmax.bf16 %v1654_v22, %v1345_v13  ;;  %v1656_v57 = vmax.bf16 %v1598_v20, %v1057_v28  ;;  %v1523_v61 = vmax.bf16 %v1465_v21, %v1047_v43 }
  0xb7   : > { %v477_v30 = vsel %vm2733_vm8, %v469_v3, %v476_v41  ;;  %v3269_v11 = vsel %vm2785_vm13, %v2450_v36, %v1348_v48  ;;  %v1350_v54 = vrot.slane %v1348_v48, 4  ;;  %v1208_v53 = vmax.bf16 %v1047_v43, %v3214_v37  ;;  %v689_v41 = vld [vmem:[#allocation2 + $0xa4] sm:$0x1] }
  0xb8   : > { %v2465_v59 = vcombine.low %v1697_v42, %v1698_v52  ;;  %681 = vst.msk [vmem:[#allocation2 + $0x94] sm:$0xf] %vm184_vm1, %v477_v30  ;;  %v1699_v49 = vmax.bf16 %v1655_v50, %v3269_v11  ;;  %v478_v2 = vrot.slane %v473_v14, 4  ;;  %v480_v60 = vshrl.u32 %v264_v55, 16 }
  0xb9   : > { %v3278_v34 = vsel %vm2785_vm13, %v1350_v54, %v1351_v51  ;;  %v483_v9 = vshll.u32 %v264_v55, 16  ;;  %v3280_v8 = vmax.bf16 %v1466_v23, %v1057_v28  ;;  %v1209_v12 = vmax.bf16 %v1057_v28, %v3220_v31  ;;  %v685_v31 = vld [vmem:[#allocation2 + $0x9c] sm:$0xf]  ;;  %v692_v51 = vld [vmem:[#allocation2 + $0xa8] sm:$0xf] }
  0xba   : > { %2592 = vmatprep.mubr.msk.bf16.mxu1 %vm1794_vm15, %v2465_v59  ;;  %v1700_v37 = vmax.bf16 %v1656_v57, %v3278_v34  ;;  %v488_v24 = vshrl.u32 %v265_v35, 16  ;;  %v482_v1 = vrot.slane %v480_v60, 7  ;;  %v491_v44 = vshll.u32 %v265_v35, 16 }
  0xbb   : > { %v683_v13 = vsel %vm2745_vm10, %v478_v2, %v682_v62  ;;  %v497_v58 = vshrl.u32 %v266_v63, 16  ;;  %v3288_v29 = vld [vmem:[#allocation2 + $0x90] sm:$0xf]  ;;  %v3291_v4 = vmax.bf16 %v3269_v11, %v1208_v53  ;;  %v1567_v16 = vmax.bf16 %v1523_v61, %v3269_v11 }
  0xbc   : > { %v2466_v32 = vcombine.low %v1699_v49, %v1700_v37  ;;  %v490_v7 = vrot.slane %v488_v24, 7  ;;  %684 = vst [vmem:[#allocation2 + $0x98] sm:$0x1] %v683_v13  ;;  %v485_v10 = vor.u32 %v483_v9, %v482_v1  ;;  %v486_v56 = vrot.slane %v482_v1, 4 }
  0xbd   : > { %v1059_v6 = vshrl.u32 %v3288_v29, 16  ;;  %v500_v40 = vshll.u32 %v266_v63, 16  ;;  %v3296_v39 = vmax.bf16 %v3278_v34, %v1209_v12  ;;  %v1062_v38 = vshll.u32 %v3288_v29, 16 }
  0xbe   : > { %2593 = vmatmul.mubr.msk.bf16.vlgmr.msra.gmra.mxu1 %vm1794_vm15, %v2466_v32  ;;  %v493_v21 = vor.u32 %v491_v44, %v490_v7  ;;  %v505_v26 = vshrl.u32 %v267_v25, 16  ;;  %v1568_v47 = vmax.bf16 %v3280_v8, %v3278_v34  ;;  %v686_v15 = vsel %vm2739_vm9, %v485_v10, %v685_v31  ;;  %v268_v8 = vld [vmem:[%s2723_s19 + $0x70] sm:$0xf] }
  0xbf   : > { %v3300_v46 = vld [vmem:[#allocation2 + $0x94] sm:$0xf]  ;;  %v1061_v3 = vrot.slane %v1059_v6, 4  ;;  %v499_v43 = vrot.slane %v497_v58, 7  ;;  %687 = vst [vmem:[#allocation2 + $0x9c] sm:$0xf] %v686_v15  ;;  %v1467_v45 = vmax.bf16 %v3291_v4, %v3288_v29  ;;  %v1599_v30 = vmax.bf16 %v1567_v16, %v3288_v29 }
  0xc0   : > { %v494_v20 = vsel %vm2733_vm8, %v486_v56, %v493_v21  ;;  %v1064_v14 = vrot.slane %v1062_v38, 5  ;;  %v1068_v18 = vshll.u32 %v3300_v46, 16  ;;  %v495_v28 = vrot.slane %v490_v7, 4 }
  0xc1   : > { %688 = vst.msk [vmem:[#allocation2 + $0xa0] sm:$0xf] %vm184_vm1, %v494_v20  ;;  %v1072_v22 = vshrl.u32 %v3300_v46, 16  ;;  %v1355_v0 = vrot.slane %v3300_v46, 5  ;;  %v502_v23 = vor.u32 %v500_v40, %v499_v43  ;;  %v2451_v42 = vrot.slane %v3288_v29, 9 }
  0xc2   : > { %v1065_v36 = vor.u32 %v1064_v14, %v1061_v3  ;;  %v1070_v48 = vrot.slane %v1068_v18, 5  ;;  %v3315_v52 = vrot.slane %v505_v26, 7  ;;  %v503_v11 = vrot.slane %v499_v43, 4 }
  0xc3   : > { %v751_v50 = vld [vmem:[#allocation2 + $0x98] sm:$0x1]  ;;  %v1074_v55 = vrot.slane %v1072_v22, 4  ;;  %v508_v54 = vshll.u32 %v267_v25, 16  ;;  %v1357_v61 = vrot.slane %v1355_v0, 4  ;;  %v690_v59 = vsel %vm2745_vm10, %v495_v28, %v689_v41 }
  0xc4   : > { %v1066_v57 = vrot.slane %v1065_v36, 4  ;;  %v1078_v35 = vshll.u32 %v751_v50, 16  ;;  %v1358_v49 = vrot.slane %v751_v50, 5  ;;  %691 = vst [vmem:[#allocation2 + $0xa4] sm:$0x1] %v690_v59  ;;  %v693_v63 = vsel %vm2739_vm9, %v502_v23, %v692_v51 }
  0xc5   : > { %v1075_v53 = vor.u32 %v1074_v55, %v1070_v48  ;;  %v510_v62 = vor.u32 %v508_v54, %v3315_v52  ;;  %v1468_v34 = vmax.bf16 %v3296_v39, %v3300_v46  ;;  %v1600_v9 = vmax.bf16 %v1568_v47, %v3300_v46  ;;  %694 = vst [vmem:[#allocation2 + $0xa8] sm:$0xf] %v693_v63  ;;  %v269_v23 = vld [vmem:[%s2723_s19 + $0x74] sm:$0xf] }
  0xc6   : > { %v1071_v2 = vsel %vm2810_vm14, %v1066_v57, %v1070_v48  ;;  %v1080_v60 = vrot.slane %v1078_v35, 5  ;;  %v3329_v12 = vld [vmem:[#allocation2 + $0x9c] sm:$0xf]  ;;  %v1356_v1 = vsel %vm2785_vm13, %v2451_v42, %v1355_v0  ;;  %v514_v31 = vshrl.u32 %v268_v8, 16 }
  0xc7   : > { %v1076_v37 = vrot.slane %v1075_v53, 4  ;;  %v1210_v24 = vmax.bf16 %v1071_v2, %v3288_v29  ;;  %v1657_v44 = vmax.bf16 %v1599_v30, %v1071_v2  ;;  %v1525_v25 = vmax.bf16 %v1467_v45, %v1071_v2 }
  0xc8   : > { %v3334_v13 = vld [vmem:[#allocation2 + $0xa0] sm:$0xf]  ;;  %v511_v58 = vsel %vm2733_vm8, %v503_v11, %v510_v62  ;;  %v1083_v4 = vshrl.u32 %v3329_v12, 16  ;;  %v1086_v16 = vshll.u32 %v3329_v12, 16  ;;  %v1359_v29 = vsel %vm2785_vm13, %v1357_v61, %v1358_v49  ;;  %v696_v62 = vld [vmem:[#allocation2 + $0xb0] sm:$0x1] }
  0xc9   : > { %v1081_v32 = vsel %vm2810_vm14, %v1076_v37, %v1080_v60  ;;  %v1701_v7 = vmax.bf16 %v1657_v44, %v1356_v1  ;;  %695 = vst.msk [vmem:[#allocation2 + $0xac] sm:$0xf] %vm184_vm1, %v511_v58  ;;  %v1437_v39 = vmax.bf16 %v1356_v1, %v1210_v24  ;;  %v1092_v38 = vshll.u32 %v3334_v13, 16 }
  0xca   : > { %v1211_v10 = vmax.bf16 %v1081_v32, %v3300_v46  ;;  %v1526_v56 = vmax.bf16 %v1468_v34, %v1081_v32  ;;  %v1658_v6 = vmax.bf16 %v1600_v9, %v1081_v32  ;;  %v1085_v40 = vrot.slane %v1083_v4, 4  ;;  %v699_v9 = vld [vmem:[#allocation2 + $0xb4] sm:$0xf] }
  0xcb   : > { %v1088_v21 = vrot.slane %v1086_v16, 5  ;;  %v1096_v26 = vshrl.u32 %v3334_v13, 16  ;;  %v1569_v15 = vmax.bf16 %v1525_v25, %v1356_v1  ;;  %v754_v20 = vld [vmem:[#allocation2 + $0xa4] sm:$0x1]  ;;  %v1094_v18 = vrot.slane %v1092_v38, 5 }
  0xcc   : > { %v1438_v47 = vmax.bf16 %v1359_v29, %v1211_v10  ;;  %v1570_v3 = vmax.bf16 %v1526_v56, %v1359_v29  ;;  %v1702_v43 = vmax.bf16 %v1658_v6, %v1359_v29  ;;  %v1102_v45 = vshll.u32 %v754_v20, 16 }
  0xcd   : > { %v1089_v14 = vor.u32 %v1088_v21, %v1085_v40  ;;  %v1098_v28 = vrot.slane %v1096_v26, 4  ;;  %v2452_v22 = vrot.slane %v3329_v12, 9  ;;  %v1362_v0 = vrot.slane %v3334_v13, 5 }
  0xce   : > { %v2467_v46 = vcombine.low %v1701_v7, %v1702_v43  ;;  %v512_v41 = vrot.slane %v3315_v52, 4  ;;  %v1469_v36 = vmax.bf16 %v1437_v39, %v3329_v12  ;;  %v1104_v51 = vrot.slane %v1102_v45, 5 }
  0xcf   : > { %v1090_v48 = vrot.slane %v1089_v14, 4  ;;  %v1099_v42 = vor.u32 %v1098_v28, %v1094_v18  ;;  %v1470_v50 = vmax.bf16 %v1438_v47, %v3334_v13  ;;  %v1601_v55 = vmax.bf16 %v1569_v15, %v3329_v12  ;;  %v703_v14 = vld [vmem:[#allocation2 + $0xbc] sm:$0x1] }
  0xd0   : > { %2596 = vmatprep.mubr.msk.bf16.mxu1 %vm1794_vm15, %v2467_v46  ;;  %v516_v30 = vrot.slane %v514_v31, 7  ;;  %v517_v11 = vshll.u32 %v268_v8, 16  ;;  %v1602_v35 = vmax.bf16 %v1570_v3, %v3334_v13  ;;  %v522_v52 = vshrl.u32 %v269_v23, 16  ;;  %v3361_v8 = vld [vmem:[#allocation2 + $0xa8] sm:$0xf] }
  0xd1   : > { %v1095_v54 = vsel %vm2810_vm14, %v1090_v48, %v1094_v18  ;;  %v1100_v57 = vrot.slane %v1099_v42, 4  ;;  %v1364_v61 = vrot.slane %v1362_v0, 4  ;;  %v1365_v59 = vrot.slane %v754_v20, 5  ;;  %v3367_v25 = vld [vmem:[#allocation2 + $0xac] sm:$0xf] }
  0xd2   : > { %v1659_v53 = vmax.bf16 %v1601_v55, %v1095_v54  ;;  %v519_v49 = vor.u32 %v517_v11, %v516_v30  ;;  %v520_v34 = vrot.slane %v516_v30, 4  ;;  %v524_v2 = vrot.slane %v522_v52, 7 }
  0xd3   : > { %v1105_v63 = vsel %vm2810_vm14, %v1100_v57, %v1104_v51  ;;  %v525_v60 = vshll.u32 %v269_v23, 16  ;;  %v1212_v37 = vmax.bf16 %v1095_v54, %v3329_v12  ;;  %v1363_v1 = vsel %vm2785_vm13, %v2452_v22, %v1362_v0  ;;  %v270_v51 = vld [vmem:[%s2723_s19 + $0x78] sm:$0xf] }
  0xd4   : > { %v1213_v24 = vmax.bf16 %v1105_v63, %v3334_v13  ;;  %v1527_v44 = vmax.bf16 %v1469_v36, %v1095_v54  ;;  %v1660_v58 = vmax.bf16 %v1602_v35, %v1105_v63  ;;  %v1703_v4 = vmax.bf16 %v1659_v53, %v1363_v1 }
  0xd5   : > { %v527_v16 = vor.u32 %v525_v60, %v524_v2  ;;  %v697_v32 = vsel %vm2745_vm10, %v512_v41, %v696_v62  ;;  %v1366_v29 = vsel %vm2785_vm13, %v1364_v61, %v1365_v59  ;;  %v1528_v7 = vmax.bf16 %v1470_v50, %v1105_v63 }
  0xd6   : > { %698 = vst [vmem:[#allocation2 + $0xb0] sm:$0x1] %v697_v32  ;;  %v700_v12 = vsel %vm2739_vm9, %v519_v49, %v699_v9  ;;  %v1704_v13 = vmax.bf16 %v1660_v58, %v1366_v29  ;;  %v1107_v10 = vshrl.u32 %v3361_v8, 16  ;;  %v1110_v56 = vshll.u32 %v3361_v8, 16 }
  0xd7   : > { %v528_v31 = vsel %vm2733_vm8, %v520_v34, %v527_v16  ;;  %701 = vst [vmem:[#allocation2 + $0xb4] sm:$0xf] %v700_v12  ;;  %v1439_v6 = vmax.bf16 %v1363_v1, %v1212_v37  ;;  %v1571_v40 = vmax.bf16 %v1527_v44, %v1363_v1  ;;  %v1116_v39 = vshll.u32 %v3367_v25, 16 }
  0xd8   : > { %702 = vst.msk [vmem:[#allocation2 + $0xb8] sm:$0xf] %vm184_vm1, %v528_v31  ;;  %v1120_v21 = vshrl.u32 %v3367_v25, 16  ;;  %v1440_v38 = vmax.bf16 %v1366_v29, %v1213_v24  ;;  %v2468_v26 = vcombine.low %v1703_v4, %v1704_v13  ;;  %v1109_v47 = vrot.slane %v1107_v10, 4 }
  0xd9   : > { %v1112_v15 = vrot.slane %v1110_v56, 5  ;;  %v1118_v3 = vrot.slane %v1116_v39, 5  ;;  %v1369_v20 = vrot.slane %v3367_v25, 5  ;;  %v1572_v18 = vmax.bf16 %v1528_v7, %v1366_v29 }
  0xda   : > { %v1122_v43 = vrot.slane %v1120_v21, 4  ;;  %2597 = vmatmul.mubr.msk.bf16.gmra.mxu1 %vm1794_vm15, %v2468_v26  ;;  %v529_v45 = vrot.slane %v524_v2, 4  ;;  %v1471_v46 = vmax.bf16 %v1439_v6, %v3361_v8  ;;  %v2453_v0 = vrot.slane %v3361_v8, 9  ;;  %v271_v6 = vld [vmem:[%s2723_s19 + $0x7c] sm:$0xf] }
  0xdb   : > { %v1113_v28 = vor.u32 %v1112_v15, %v1109_v47  ;;  %v1472_v23 = vmax.bf16 %v1440_v38, %v3367_v25  ;;  %v1603_v48 = vmax.bf16 %v1571_v40, %v3361_v8  ;;  %v1371_v11 = vrot.slane %v1369_v20, 4 }
  0xdc   : > { %v1123_v22 = vor.u32 %v1122_v43, %v1118_v3  ;;  %v704_v42 = vsel %vm2745_vm10, %v529_v45, %v703_v14  ;;  %v1604_v52 = vmax.bf16 %v1572_v18, %v3367_v25  ;;  %v1370_v49 = vsel %vm2785_vm13, %v2453_v0, %v1369_v20 }
  0xdd   : > { %v757_v41 = vld [vmem:[#allocation2 + $0xb0] sm:$0x1]  ;;  %v1114_v36 = vrot.slane %v1113_v28, 4  ;;  %705 = vst [vmem:[#allocation2 + $0xbc] sm:$0x1] %v704_v42  ;;  %v531_v63 = vshrl.u32 %v270_v51, 16 }
  0xde   : > { %v3391_v50 = vld [vmem:[#allocation2 + $0xb4] sm:$0xf]  ;;  %v1124_v55 = vrot.slane %v1123_v22, 4  ;;  %v1126_v30 = vshll.u32 %v757_v41, 16  ;;  %v1372_v54 = vrot.slane %v757_v41, 5  ;;  %v534_v16 = vshll.u32 %v270_v51, 16 }
  0xdf   : > { %v3393_v57 = vld [vmem:[#allocation2 + $0xb8] sm:$0xf]  ;;  %v1119_v35 = vsel %vm2810_vm14, %v1114_v36, %v1118_v3  ;;  %v1131_v61 = vshrl.u32 %v3391_v50, 16  ;;  %v1134_v59 = vshll.u32 %v3391_v50, 16  ;;  %v533_v40 = vrot.slane %v531_v63, 7 }
  0xe0   : > { %v1128_v53 = vrot.slane %v1126_v30, 5  ;;  %v1529_v62 = vmax.bf16 %v1471_v46, %v1119_v35  ;;  %v1661_v34 = vmax.bf16 %v1603_v48, %v1119_v35  ;;  %v1140_v9 = vshll.u32 %v3393_v57, 16  ;;  %v706_v22 = vld [vmem:[#allocation2 + $0xc0] sm:$0xf] }
  0xe1   : > { %v1133_v2 = vrot.slane %v1131_v61, 4  ;;  %v1136_v60 = vrot.slane %v1134_v59, 5  ;;  %v1373_v24 = vsel %vm2785_vm13, %v1371_v11, %v1372_v54  ;;  %v1144_v1 = vshrl.u32 %v3393_v57, 16  ;;  %v710_v61 = vld [vmem:[#allocation2 + $0xc8] sm:$0x1] }
  0xe2   : > { %v1129_v37 = vsel %vm2810_vm14, %v1124_v55, %v1128_v53  ;;  %v1705_v4 = vmax.bf16 %v1661_v34, %v1370_v49  ;;  %v1573_v32 = vmax.bf16 %v1529_v62, %v1370_v49  ;;  %v1142_v7 = vrot.slane %v1140_v9, 5 }
  0xe3   : > { %v1530_v44 = vmax.bf16 %v1472_v23, %v1129_v37  ;;  %v1662_v58 = vmax.bf16 %v1604_v52, %v1129_v37  ;;  %v1137_v29 = vor.u32 %v1136_v60, %v1133_v2  ;;  %v1146_v12 = vrot.slane %v1144_v1, 4 }
  0xe4   : > { %v760_v10 = vld [vmem:[#allocation2 + $0xbc] sm:$0x1]  ;;  %v1376_v56 = vrot.slane %v3393_v57, 5  ;;  %v1214_v39 = vmax.bf16 %v1119_v35, %v3361_v8  ;;  %v1215_v47 = vmax.bf16 %v1129_v37, %v3367_v25  ;;  %v2454_v3 = vrot.slane %v3391_v50, 9  ;;  %v3424_v35 = vld [vmem:[#allocation2 + $0xcc] sm:$0xf] }
  0xe5   : > { %v1574_v13 = vmax.bf16 %v1530_v44, %v1373_v24  ;;  %v1706_v31 = vmax.bf16 %v1662_v58, %v1373_v24  ;;  %v1138_v21 = vrot.slane %v1137_v29, 4  ;;  %v1147_v38 = vor.u32 %v1146_v12, %v1142_v7  ;;  %v3440_v37 = vld [vmem:[#allocation2 + $0xd0] sm:$0xf] }
  0xe6   : > { %v1150_v26 = vshll.u32 %v760_v10, 16  ;;  %v1605_v14 = vmax.bf16 %v1573_v32, %v3391_v50  ;;  %v539_v18 = vshrl.u32 %v271_v6, 16  ;;  %v1378_v45 = vrot.slane %v1376_v56, 4 }
  0xe7   : > { %v2469_v15 = vcombine.low %v1705_v4, %v1706_v31  ;;  %v1148_v43 = vrot.slane %v1147_v38, 4  ;;  %v1143_v28 = vsel %vm2810_vm14, %v1138_v21, %v1142_v7  ;;  %v1379_v8 = vrot.slane %v760_v10, 5 }
  0xe8   : > { %v1152_v20 = vrot.slane %v1150_v26, 5  ;;  %v1606_v46 = vmax.bf16 %v1574_v13, %v3393_v57  ;;  %v1441_v0 = vmax.bf16 %v1370_v49, %v1214_v39  ;;  %v1663_v25 = vmax.bf16 %v1605_v14, %v1143_v28 }
  0xe9   : > { %2600 = vmatprep.mubr.msk.bf16.mxu1 %vm1794_vm15, %v2469_v15  ;;  %v536_v23 = vor.u32 %v534_v16, %v533_v40  ;;  %v542_v41 = vshll.u32 %v271_v6, 16  ;;  %v1442_v36 = vmax.bf16 %v1373_v24, %v1215_v47  ;;  %v1377_v42 = vsel %vm2785_vm13, %v2454_v3, %v1376_v56  ;;  %v766_v56 = vld [vmem:[#allocation2 + $0xd4] sm:$0x1] }
  0xea   : > { %v1153_v48 = vsel %vm2810_vm14, %v1148_v43, %v1152_v20  ;;  %v537_v51 = vrot.slane %v533_v40, 4  ;;  %v1707_v30 = vmax.bf16 %v1663_v25, %v1377_v42  ;;  %v541_v11 = vrot.slane %v539_v18, 7 }
  0xeb   : > { %v1664_v55 = vmax.bf16 %v1606_v46, %v1153_v48  ;;  %v707_v54 = vsel %vm2739_vm9, %v536_v23, %v706_v22  ;;  %v3428_v52 = vsel %vm2785_vm13, %v1378_v45, %v1379_v8  ;;  %v1473_v59 = vmax.bf16 %v1441_v0, %v3391_v50 }
  0xec   : > { %708 = vst [vmem:[#allocation2 + $0xc0] sm:$0xf] %v707_v54  ;;  %v544_v49 = vor.u32 %v542_v41, %v541_v11  ;;  %v546_v62 = vrot.slane %v541_v11, 4  ;;  %v1474_v63 = vmax.bf16 %v1442_v36, %v3393_v57  ;;  %v1612_v34 = vshrl.u32 %v3424_v35, 16 }
  0xed   : > { %v1708_v53 = vmax.bf16 %v1664_v55, %v3428_v52  ;;  %v1615_v9 = vshll.u32 %v3424_v35, 16  ;;  %v1216_v24 = vmax.bf16 %v1143_v28, %v3391_v50  ;;  %v1531_v1 = vmax.bf16 %v1473_v59, %v1143_v28 }
  0xee   : > { %v545_v2 = vsel %vm2733_vm8, %v537_v51, %v544_v49  ;;  %v711_v60 = vsel %vm2745_vm10, %v546_v62, %v710_v61  ;;  %v1217_v44 = vmax.bf16 %v1153_v48, %v3393_v57  ;;  %v1532_v58 = vmax.bf16 %v1474_v63, %v1153_v48 }
  0xef   : > { %v2470_v27 = vcombine.low %v1707_v30, %v1708_v53  ;;  %709 = vst.msk [vmem:[#allocation2 + $0xc4] sm:$0xf] %vm184_vm1, %v545_v2  ;;  %712 = vst [vmem:[#allocation2 + $0xc8] sm:$0x1] %v711_v60  ;;  %v1614_v4 = vrot.slane %v1612_v34, 4  ;;  %v1617_v16 = vrot.slane %v1615_v9, 5  ;;  %v1443_v12 = vmax.bf16 %v1377_v42, %v1216_v24 }
  0xf0   : > { %v1621_v33 = vshll.u32 %v3440_v37, 16  ;;  %v1625_v32 = vshrl.u32 %v3440_v37, 16  ;;  %v1575_v13 = vmax.bf16 %v1531_v1, %v1377_v42  ;;  %v1444_v31 = vmax.bf16 %v3428_v52, %v1217_v44 }
  0xf1   : > { %2601 = vmatmul.mubr.msk.bf16.gmra.mxu1 %vm1794_vm15, %v2470_v27  ;;  %v1576_v6 = vmax.bf16 %v1532_v58, %v3428_v52  ;;  %v1618_v39 = vor.u32 %v1617_v16, %v1614_v4  ;;  %v1631_v46 = vshll.u32 %v766_v56, 16  ;;  %v1674_v52 = vrot.slane %v3440_v37, 5 }
  0xf2   : > { %v1623_v21 = vrot.slane %v1621_v33, 5  ;;  %v1627_v38 = vrot.slane %v1625_v32, 4  ;;  %v2456_v53 = vrot.slane %v3424_v35, 9  ;;  %v1677_v1 = vrot.slane %v766_v56, 5 }
  0xf3   : > { %v761_v17 = vld [vmem:[#allocation2 + $0xc0] sm:$0xf]  ;;  %v1619_v25 = vrot.slane %v1618_v39, 4  ;;  %v1633_v59 = vrot.slane %v1631_v46, 5  ;;  %v1676_v24 = vrot.slane %v1674_v52, 4  ;;  %vm2136_vm0 = vcmask 60416  }
  0xf4   : > { %v1478_v29 = vshrl.u32 %v761_v17, 16  ;;  %v1481_v7 = vshll.u32 %v761_v17, 16  ;;  %v2455_v3 = vrot.slane %v761_v17, 9  ;;  %v1475_v43 = vmax.bf16 %v1443_v12, %v761_v17 }
  0xf5   : > { %v1607_v18 = vmax.bf16 %v1575_v13, %v761_v17  ;;  %v1628_v23 = vor.u32 %v1627_v38, %v1623_v21  ;;  %v1624_v63 = vsel %vm2810_vm14, %v1619_v25, %v1623_v21  ;;  %v1675_v16 = vsel %vm2785_vm13, %v2456_v53, %v1674_v52 }
  0xf6   : > { %v1480_v50 = vrot.slane %v1478_v29, 4  ;;  %v1483_v10 = vrot.slane %v1481_v7, 5  ;;  %v762_v57 = vld [vmem:[#allocation2 + $0xc4] sm:$0xf]  ;;  %v763_v40 = vld [vmem:[#allocation2 + $0xc8] sm:$0x1]  ;;  %v1678_v29 = vsel %vm2785_vm13, %v1676_v24, %v1677_v1 }
  0xf7   : > { %v1487_v47 = vshll.u32 %v762_v57, 16  ;;  %v1491_v15 = vshrl.u32 %v762_v57, 16  ;;  %v1497_v20 = vshll.u32 %v763_v40, 16  ;;  %v1540_v14 = vrot.slane %v762_v57, 5 }
  0xf8   : > { %v1484_v26 = vor.u32 %v1483_v10, %v1480_v50  ;;  %v1543_v0 = vrot.slane %v763_v40, 5  ;;  %v1476_v51 = vmax.bf16 %v1444_v31, %v762_v57  ;;  %v1608_v30 = vmax.bf16 %v1576_v6, %v762_v57 }
  0xf9   : > { %v1489_v45 = vrot.slane %v1487_v47, 5  ;;  %v1493_v8 = vrot.slane %v1491_v15, 4  ;;  %v1499_v22 = vrot.slane %v1497_v20, 5  ;;  %v1541_v48 = vsel %vm2785_vm13, %v2455_v3, %v1540_v14 }
  0xfa   : > { %v1485_v28 = vrot.slane %v1484_v26, 4  ;;  %v1542_v42 = vrot.slane %v1540_v14, 4  ;;  %v1629_v34 = vrot.slane %v1628_v23, 4  ;;  %vm2169_vm1 = vcmask 64512  }
  0xfb   : > { %v1494_v36 = vor.u32 %v1493_v8, %v1489_v45  ;;  %vm2239_vm2 = vcmask 57344  }
  0xfc   : > { %v1490_v41 = vsel %vm2810_vm14, %v1485_v28, %v1489_v45  ;;  %v1544_v62 = vsel %vm2785_vm13, %v1542_v42, %v1543_v0  ;;  %v1634_v4 = vsel %vm2810_vm14, %v1629_v34, %v1633_v59 }
  0xfd   : > { %v1533_v55 = vmax.bf16 %v1490_v41, %v1475_v43  ;;  %v1665_v11 = vmax.bf16 %v1607_v18, %v1490_v41  ;;  %v1495_v54 = vrot.slane %v1494_v36, 4 }
  0xff   : > { %v1577_v61 = vmax.bf16 %v1541_v48, %v1533_v55  ;;  %v1500_v49 = vsel %vm2810_vm14, %v1495_v54, %v1499_v22  ;;  %v1709_v60 = vmax.bf16 %v1665_v11, %v1541_v48 }
 0x100   : > { %v1534_v27 = vmax.bf16 %v1500_v49, %v1476_v51  ;;  %v1666_v2 = vmax.bf16 %v1608_v30, %v1500_v49 }
 0x101   : > { %v1609_v9 = vmax.bf16 %v1577_v61, %v3424_v35 }
 0x102   : > { %v1578_v44 = vmax.bf16 %v1544_v62, %v1534_v27  ;;  %v1710_v58 = vmax.bf16 %v1666_v2, %v1544_v62 }
 0x103   : > { %v1667_v17 = vmax.bf16 %v1624_v63, %v1609_v9 }
 0x104   : > { %v2471_v33 = vcombine.low %v1709_v60, %v1710_v58  ;;  %v1610_v32 = vmax.bf16 %v1578_v44, %v3440_v37 }
 0x105   : > { %v1711_v7 = vmax.bf16 %v1675_v16, %v1667_v17 }
 0x106   : > { %2604 = vmatprep.mubr.msk.bf16.mxu1 %vm1794_vm15, %v2471_v33  ;;  %v1668_v35 = vmax.bf16 %v1634_v4, %v1610_v32 }
 0x108   : > { %v1712_v12 = vmax.bf16 %v1678_v29, %v1668_v35 }
 0x10a   : > { %v2472_v13 = vcombine.low %v1711_v7, %v1712_v12 }
 0x10c   : > { %2605 = vmatmul.mubr.msk.bf16.gmra.mxu1 %vm1794_vm15, %v2472_v13 }
 0x116   : > { %v2578_v19 = vpop.f32.mrf.mxu0 }
 0x117   : > { %v2527_v5 = vpack.c.bf16 %v2578_v19, %v2578_v19  ;;  %v2243_v6 = vmul.f32 %v2578_v19, %v2578_v19  ;;  %v2173_v47 = vsel %vm2169_vm1, %v2578_v19, 0.0 }
 0x118   : > { %v1881_v37 = vpop.f32.mrf.mxu0 }
 0x119   : > { %2139 = vst.msk [vmem:[%s3476_s22 + $0x8] sm:$0xf] %vm2136_vm0, %v2527_v5  ;;  %v2525_v31 = vpack.c.bf16 %v1881_v37, %v1881_v37  ;;  %v2241_v10 = vmul.f32 %v1881_v37, %v1881_v37  ;;  %v2170_v40 = vsel %vm2169_vm1, %v1881_v37, 0.0  ;;  %v2276_v18 = vsel %vm2169_vm1, %v2243_v6, 0.0 }
 0x11a   : > { %v2579_v50 = vpop.f32.mrf.mxu0 }
 0x11b   : > { %2137 = vst.msk [vmem:[%s3476_s22] sm:$0xf] %vm2136_vm0, %v2525_v31  ;;  %v2528_v56 = vpack.c.bf16 %v2579_v50, %v2579_v50  ;;  %v2273_v15 = vsel %vm2169_vm1, %v2241_v10, 0.0  ;;  %v2244_v3 = vmul.f32 %v2579_v50, %v2579_v50  ;;  %v2175_v28 = vsel %vm2169_vm1, %v2579_v50, 0.0 }
 0x11c   : > { %v1884_v57 = vpop.f32.mrf.mxu0 }
 0x11d   : > { %2140 = vst.msk [vmem:[%s3476_s22 + $0xc] sm:$0xf] %vm2136_vm0, %v2528_v56  ;;  %v2526_v39 = vpack.c.bf16 %v1884_v57, %v1884_v57  ;;  %v2171_v21 = vsel %vm2169_vm1, %v1884_v57, 0.0  ;;  %v2242_v38 = vmul.f32 %v1884_v57, %v1884_v57  ;;  %v2278_v46 = vsel %vm2169_vm1, %v2244_v3, 0.0 }
 0x11e   : > { %v2172_v26 = vadd.f32 %v2171_v21, %v2170_v40 }
 0x11f   : > { %2138 = vst.msk [vmem:[%s3476_s22 + $0x4] sm:$0xf] %vm2136_vm0, %v2526_v39  ;;  %v2274_v43 = vsel %vm2169_vm1, %v2242_v38, 0.0 }
 0x120   : > { %v2174_v20 = vadd.f32 %v2173_v47, %v2172_v26  ;;  %v2275_v14 = vadd.f32 %v2274_v43, %v2273_v15 }
 0x122   : > { %v2277_v45 = vadd.f32 %v2276_v18, %v2275_v14  ;;  %v2176_v8 = vadd.f32 %v2175_v28, %v2174_v20 }
 0x124   : > { %v2279_v22 = vadd.f32 %v2278_v46, %v2277_v45 }
 0x133   : > { %v2582_v0 = vpop.f32.mrf.mxu0 }
 0x134   : > { %v2531_v25 = vpack.c.bf16 %v2582_v0, %v2582_v0  ;;  %v2247_v52 = vmul.f32 %v2582_v0, %v2582_v0  ;;  %v2181_v62 = vsel %vm2169_vm1, %v2582_v0, 0.0 }
 0x135   : > { %v1897_v23 = vpop.f32.mrf.mxu0 }
 0x136   : > { %2143 = vst.msk [vmem:[%s3476_s22 + $0x18] sm:$0xf] %vm2136_vm0, %v2531_v25  ;;  %v2529_v41 = vpack.c.bf16 %v1897_v23, %v1897_v23  ;;  %v2177_v36 = vsel %vm2169_vm1, %v1897_v23, 0.0  ;;  %v2245_v48 = vmul.f32 %v1897_v23, %v1897_v23  ;;  %v2284_v60 = vsel %vm2169_vm1, %v2247_v52, 0.0 }
 0x137   : > { %v2178_v42 = vadd.f32 %v2177_v36, %v2176_v8  ;;  %v2583_v51 = vpop.f32.mrf.mxu0 }
 0x138   : > { %2141 = vst.msk [vmem:[%s3476_s22 + $0x10] sm:$0xf] %vm2136_vm0, %v2529_v41  ;;  %v2280_v55 = vsel %vm2169_vm1, %v2245_v48, 0.0  ;;  %v2532_v30 = vpack.c.bf16 %v2583_v51, %v2583_v51  ;;  %v2248_v63 = vmul.f32 %v2583_v51, %v2583_v51  ;;  %v2183_v9 = vsel %vm2169_vm1, %v2583_v51, 0.0 }
 0x139   : > { %v2281_v11 = vadd.f32 %v2280_v55, %v2279_v22  ;;  %v1900_v54 = vpop.f32.mrf.mxu0 }
 0x13a   : > { %2144 = vst.msk [vmem:[%s3476_s22 + $0x1c] sm:$0xf] %vm2136_vm0, %v2532_v30  ;;  %v2530_v61 = vpack.c.bf16 %v1900_v54, %v1900_v54  ;;  %v2179_v59 = vsel %vm2169_vm1, %v1900_v54, 0.0  ;;  %v2246_v53 = vmul.f32 %v1900_v54, %v1900_v54  ;;  %v2286_v44 = vsel %vm2169_vm1, %v2248_v63, 0.0 }
 0x13b   : > { %v2180_v49 = vadd.f32 %v2179_v59, %v2178_v42 }
 0x13c   : > { %2142 = vst.msk [vmem:[%s3476_s22 + $0x14] sm:$0xf] %vm2136_vm0, %v2530_v61  ;;  %v2282_v34 = vsel %vm2169_vm1, %v2246_v53, 0.0 }
 0x13d   : > { %v2182_v27 = vadd.f32 %v2181_v62, %v2180_v49  ;;  %v2283_v2 = vadd.f32 %v2282_v34, %v2281_v11 }
 0x13f   : > { %v2285_v24 = vadd.f32 %v2284_v60, %v2283_v2  ;;  %v2184_v1 = vadd.f32 %v2183_v9, %v2182_v27 }
 0x141   : > { %v2287_v58 = vadd.f32 %v2286_v44, %v2285_v24 }
 0x14c   : > { %v2586_v17 = vpop.f32.mrf.mxu0 }
 0x14d   : > { %v2535_v4 = vpack.c.bf16 %v2586_v17, %v2586_v17  ;;  %v2251_v37 = vmul.f32 %v2586_v17, %v2586_v17  ;;  %v2189_v6 = vsel %vm2169_vm1, %v2586_v17, 0.0 }
 0x14e   : > { %v1913_v16 = vpop.f32.mrf.mxu0 }
 0x14f   : > { %2147 = vst.msk [vmem:[%s3476_s22 + $0x28] sm:$0xf] %vm2136_vm0, %v2535_v4  ;;  %v2533_v33 = vpack.c.bf16 %v1913_v16, %v1913_v16  ;;  %v2185_v32 = vsel %vm2169_vm1, %v1913_v16, 0.0  ;;  %v2249_v29 = vmul.f32 %v1913_v16, %v1913_v16  ;;  %v2292_v38 = vsel %vm2169_vm1, %v2251_v37, 0.0 }
 0x150   : > { %v2186_v35 = vadd.f32 %v2185_v32, %v2184_v1  ;;  %v2587_v7 = vpop.f32.mrf.mxu0 }
 0x151   : > { %2145 = vst.msk [vmem:[%s3476_s22 + $0x20] sm:$0xf] %vm2136_vm0, %v2533_v33  ;;  %v2288_v12 = vsel %vm2169_vm1, %v2249_v29, 0.0  ;;  %v2536_v13 = vpack.c.bf16 %v2587_v7, %v2587_v7  ;;  %v2252_v57 = vmul.f32 %v2587_v7, %v2587_v7  ;;  %v2191_v26 = vsel %vm2169_vm1, %v2587_v7, 0.0 }
 0x152   : > { %v2289_v19 = vadd.f32 %v2288_v12, %v2287_v58  ;;  %v1916_v5 = vpop.f32.mrf.mxu0 }
 0x153   : > { %2148 = vst.msk [vmem:[%s3476_s22 + $0x2c] sm:$0xf] %vm2136_vm0, %v2536_v13  ;;  %v2534_v31 = vpack.c.bf16 %v1916_v5, %v1916_v5  ;;  %v2187_v50 = vsel %vm2169_vm1, %v1916_v5, 0.0  ;;  %v2250_v10 = vmul.f32 %v1916_v5, %v1916_v5  ;;  %v2294_v3 = vsel %vm2169_vm1, %v2252_v57, 0.0 }
 0x154   : > { %v2188_v56 = vadd.f32 %v2187_v50, %v2186_v35 }
 0x155   : > { %2146 = vst.msk [vmem:[%s3476_s22 + $0x24] sm:$0xf] %vm2136_vm0, %v2534_v31  ;;  %v2290_v40 = vsel %vm2169_vm1, %v2250_v10, 0.0 }
 0x156   : > { %v2190_v39 = vadd.f32 %v2189_v6, %v2188_v56  ;;  %v2291_v21 = vadd.f32 %v2290_v40, %v2289_v19 }
 0x158   : > { %v2293_v47 = vadd.f32 %v2292_v38, %v2291_v21  ;;  %v2192_v15 = vadd.f32 %v2191_v26, %v2190_v39 }
 0x15a   : > { %v2295_v43 = vadd.f32 %v2294_v3, %v2293_v47 }
 0x16a   : > { %v2590_v20 = vpop.f32.mrf.mxu0 }
 0x16b   : > { %v2539_v14 = vpack.c.bf16 %v2590_v20, %v2590_v20  ;;  %v2255_v36 = vmul.f32 %v2590_v20, %v2590_v20  ;;  %v2197_v30 = vsel %vm2169_vm1, %v2590_v20, 0.0 }
 0x16c   : > { %v1929_v18 = vpop.f32.mrf.mxu0 }
 0x16d   : > { %2151 = vst.msk [vmem:[%s3476_s22 + $0x38] sm:$0xf] %vm2136_vm0, %v2539_v14  ;;  %v2537_v28 = vpack.c.bf16 %v1929_v18, %v1929_v18  ;;  %v2193_v45 = vsel %vm2169_vm1, %v1929_v18, 0.0  ;;  %v2253_v8 = vmul.f32 %v1929_v18, %v1929_v18  ;;  %v2300_v59 = vsel %vm2169_vm1, %v2255_v36, 0.0 }
 0x16e   : > { %v2194_v46 = vadd.f32 %v2193_v45, %v2192_v15  ;;  %v2591_v22 = vpop.f32.mrf.mxu0 }
 0x16f   : > { %2149 = vst.msk [vmem:[%s3476_s22 + $0x30] sm:$0xf] %vm2136_vm0, %v2537_v28  ;;  %v2296_v0 = vsel %vm2169_vm1, %v2253_v8, 0.0  ;;  %v2540_v25 = vpack.c.bf16 %v2591_v22, %v2591_v22  ;;  %v2256_v11 = vmul.f32 %v2591_v22, %v2591_v22  ;;  %v2199_v53 = vsel %vm2169_vm1, %v2591_v22, 0.0 }
 0x170   : > { %v2297_v23 = vadd.f32 %v2296_v0, %v2295_v43  ;;  %v1932_v41 = vpop.f32.mrf.mxu0 }
 0x171   : > { %2152 = vst.msk [vmem:[%s3476_s22 + $0x3c] sm:$0xf] %vm2136_vm0, %v2540_v25  ;;  %v2538_v48 = vpack.c.bf16 %v1932_v41, %v1932_v41  ;;  %v2195_v42 = vsel %vm2169_vm1, %v1932_v41, 0.0  ;;  %v2254_v51 = vmul.f32 %v1932_v41, %v1932_v41  ;;  %v2302_v63 = vsel %vm2169_vm1, %v2256_v11, 0.0 }
 0x172   : > { %v2196_v55 = vadd.f32 %v2195_v42, %v2194_v46 }
 0x173   : > { %2150 = vst.msk [vmem:[%s3476_s22 + $0x34] sm:$0xf] %vm2136_vm0, %v2538_v48  ;;  %v2298_v54 = vsel %vm2169_vm1, %v2254_v51, 0.0 }
 0x174   : > { %v2198_v52 = vadd.f32 %v2197_v30, %v2196_v55  ;;  %v2299_v61 = vadd.f32 %v2298_v54, %v2297_v23 }
 0x176   : > { %v2200_v49 = vadd.f32 %v2199_v53, %v2198_v52  ;;  %v2301_v62 = vadd.f32 %v2300_v59, %v2299_v61 }
 0x178   : > { %v2303_v34 = vadd.f32 %v2302_v63, %v2301_v62 }
 0x17e   : > { %v2594_v27 = vpop.f32.mrf.mxu1 }
 0x17f   : > { %v2543_v2 = vpack.c.bf16 %v2594_v27, %v2594_v27  ;;  %v2259_v32 = vmul.f32 %v2594_v27, %v2594_v27  ;;  %v2205_v13 = vsel %vm2169_vm1, %v2594_v27, 0.0 }
 0x180   : > { %v1945_v60 = vpop.f32.mrf.mxu1 }
 0x181   : > { %2155 = vst.msk [vmem:[%s3476_s22 + $0x48] sm:$0xf] %vm2136_vm0, %v2543_v2  ;;  %v2541_v9 = vpack.c.bf16 %v1945_v60, %v1945_v60  ;;  %v2201_v24 = vsel %vm2169_vm1, %v1945_v60, 0.0  ;;  %v2257_v1 = vmul.f32 %v1945_v60, %v1945_v60  ;;  %v2308_v31 = vsel %vm2169_vm1, %v2259_v32, 0.0 }
 0x182   : > { %v2595_v44 = vpop.f32.mrf.mxu1  ;;  %v2202_v58 = vadd.f32 %v2201_v24, %v2200_v49 }
 0x183   : > { %2153 = vst.msk [vmem:[%s3476_s22 + $0x40] sm:$0xf] %vm2136_vm0, %v2541_v9  ;;  %v2304_v17 = vsel %vm2169_vm1, %v2257_v1, 0.0  ;;  %v2544_v4 = vpack.c.bf16 %v2595_v44, %v2595_v44  ;;  %v2260_v26 = vmul.f32 %v2595_v44, %v2595_v44  ;;  %v2207_v47 = vsel %vm2169_vm1, %v2595_v44, 0.0 }
 0x184   : > { %v1948_v16 = vpop.f32.mrf.mxu1  ;;  %v2305_v33 = vadd.f32 %v2304_v17, %v2303_v34 }
 0x185   : > { %2156 = vst.msk [vmem:[%s3476_s22 + $0x4c] sm:$0xf] %vm2136_vm0, %v2544_v4  ;;  %v2542_v29 = vpack.c.bf16 %v1948_v16, %v1948_v16  ;;  %v2203_v35 = vsel %vm2169_vm1, %v1948_v16, 0.0  ;;  %v2258_v7 = vmul.f32 %v1948_v16, %v1948_v16  ;;  %v2310_v3 = vsel %vm2169_vm1, %v2260_v26, 0.0 }
 0x186   : > { %v2204_v12 = vadd.f32 %v2203_v35, %v2202_v58 }
 0x187   : > { %2154 = vst.msk [vmem:[%s3476_s22 + $0x44] sm:$0xf] %vm2136_vm0, %v2542_v29  ;;  %v2306_v19 = vsel %vm2169_vm1, %v2258_v7, 0.0 }
 0x188   : > { %v2206_v5 = vadd.f32 %v2205_v13, %v2204_v12  ;;  %v2307_v37 = vadd.f32 %v2306_v19, %v2305_v33 }
 0x18a   : > { %v2309_v50 = vadd.f32 %v2308_v31, %v2307_v37  ;;  %v2208_v15 = vadd.f32 %v2207_v47, %v2206_v5 }
 0x18c   : > { %v2311_v20 = vadd.f32 %v2310_v3, %v2309_v50 }
 0x19a   : > { %v2598_v10 = vpop.f32.mrf.mxu1 }
 0x19b   : > { %v2547_v56 = vpack.c.bf16 %v2598_v10, %v2598_v10  ;;  %v2263_v48 = vmul.f32 %v2598_v10, %v2598_v10  ;;  %v2213_v11 = vsel %vm2169_vm1, %v2598_v10, 0.0 }
 0x19c   : > { %v1961_v6 = vpop.f32.mrf.mxu1 }
 0x19d   : > { %2159 = vst.msk [vmem:[%s3476_s22 + $0x58] sm:$0xf] %vm2136_vm0, %v2547_v56  ;;  %v2545_v57 = vpack.c.bf16 %v1961_v6, %v1961_v6  ;;  %v2261_v43 = vmul.f32 %v1961_v6, %v1961_v6  ;;  %v2209_v14 = vsel %vm2169_vm1, %v1961_v6, 0.0  ;;  %v2316_v61 = vsel %vm2169_vm1, %v2263_v48, 0.0 }
 0x19e   : > { %v2599_v40 = vpop.f32.mrf.mxu1  ;;  %v2210_v18 = vadd.f32 %v2209_v14, %v2208_v15 }
 0x19f   : > { %2157 = vst.msk [vmem:[%s3476_s22 + $0x50] sm:$0xf] %vm2136_vm0, %v2545_v57  ;;  %v2548_v39 = vpack.c.bf16 %v2599_v40, %v2599_v40  ;;  %v2312_v45 = vsel %vm2169_vm1, %v2261_v43, 0.0  ;;  %v2264_v59 = vmul.f32 %v2599_v40, %v2599_v40  ;;  %v2215_v49 = vsel %vm2169_vm1, %v2599_v40, 0.0 }
 0x1a0   : > { %v1964_v21 = vpop.f32.mrf.mxu1  ;;  %v2313_v22 = vadd.f32 %v2312_v45, %v2311_v20 }
 0x1a1   : > { %2160 = vst.msk [vmem:[%s3476_s22 + $0x5c] sm:$0xf] %vm2136_vm0, %v2548_v39  ;;  %v2546_v38 = vpack.c.bf16 %v1964_v21, %v1964_v21  ;;  %v2262_v8 = vmul.f32 %v1964_v21, %v1964_v21  ;;  %v2211_v25 = vsel %vm2169_vm1, %v1964_v21, 0.0  ;;  %v2318_v63 = vsel %vm2169_vm1, %v2264_v59, 0.0 }
 0x1a2   : > { %v2212_v41 = vadd.f32 %v2211_v25, %v2210_v18 }
 0x1a3   : > { %2158 = vst.msk [vmem:[%s3476_s22 + $0x54] sm:$0xf] %vm2136_vm0, %v2546_v38  ;;  %v2314_v42 = vsel %vm2169_vm1, %v2262_v8, 0.0 }
 0x1a4   : > { %v2315_v55 = vadd.f32 %v2314_v42, %v2313_v22  ;;  %v2214_v52 = vadd.f32 %v2213_v11, %v2212_v41 }
 0x1a6   : > { %v2317_v53 = vadd.f32 %v2316_v61, %v2315_v55  ;;  %v2216_v62 = vadd.f32 %v2215_v49, %v2214_v52 }
 0x1a8   : > { %v2319_v27 = vadd.f32 %v2318_v63, %v2317_v53 }
 0x1b1   : > { %v2602_v28 = vpop.f32.mrf.mxu1 }
 0x1b2   : > { %v2551_v46 = vpack.c.bf16 %v2602_v28, %v2602_v28  ;;  %v2267_v17 = vmul.f32 %v2602_v28, %v2602_v28  ;;  %v2221_v33 = vsel %vm2169_vm1, %v2602_v28, 0.0 }
 0x1b3   : > { %v1977_v0 = vpop.f32.mrf.mxu1 }
 0x1b4   : > { %2163 = vst.msk [vmem:[%s3476_s22 + $0x68] sm:$0xf] %vm2136_vm0, %v2551_v46  ;;  %v2549_v23 = vpack.c.bf16 %v1977_v0, %v1977_v0  ;;  %v2265_v34 = vmul.f32 %v1977_v0, %v1977_v0  ;;  %v2217_v2 = vsel %vm2169_vm1, %v1977_v0, 0.0  ;;  %v2324_v29 = vsel %vm2169_vm1, %v2267_v17, 0.0 }
 0x1b5   : > { %v2603_v36 = vpop.f32.mrf.mxu1  ;;  %v2218_v60 = vadd.f32 %v2217_v2, %v2216_v62 }
 0x1b6   : > { %2161 = vst.msk [vmem:[%s3476_s22 + $0x60] sm:$0xf] %vm2136_vm0, %v2549_v23  ;;  %v2552_v51 = vpack.c.bf16 %v2603_v36, %v2603_v36  ;;  %v2320_v9 = vsel %vm2169_vm1, %v2265_v34, 0.0  ;;  %v2268_v35 = vmul.f32 %v2603_v36, %v2603_v36  ;;  %v2223_v12 = vsel %vm2169_vm1, %v2603_v36, 0.0 }
 0x1b7   : > { %v1980_v30 = vpop.f32.mrf.mxu1  ;;  %v2321_v1 = vadd.f32 %v2320_v9, %v2319_v27 }
 0x1b8   : > { %2164 = vst.msk [vmem:[%s3476_s22 + $0x6c] sm:$0xf] %vm2136_vm0, %v2552_v51  ;;  %v2550_v54 = vpack.c.bf16 %v1980_v30, %v1980_v30  ;;  %v2266_v24 = vmul.f32 %v1980_v30, %v1980_v30  ;;  %v2219_v44 = vsel %vm2169_vm1, %v1980_v30, 0.0  ;;  %v2326_v5 = vsel %vm2169_vm1, %v2268_v35, 0.0 }
 0x1b9   : > { %v2220_v58 = vadd.f32 %v2219_v44, %v2218_v60 }
 0x1ba   : > { %2162 = vst.msk [vmem:[%s3476_s22 + $0x64] sm:$0xf] %vm2136_vm0, %v2550_v54  ;;  %v2322_v4 = vsel %vm2169_vm1, %v2266_v24, 0.0 }
 0x1bb   : > { %v2323_v16 = vadd.f32 %v2322_v4, %v2321_v1  ;;  %v2222_v32 = vadd.f32 %v2221_v33, %v2220_v58 }
 0x1bd   : > { %v2325_v7 = vadd.f32 %v2324_v29, %v2323_v16  ;;  %v2224_v19 = vadd.f32 %v2223_v12, %v2222_v32 }
 0x1bf   : > { %v2327_v50 = vadd.f32 %v2326_v5, %v2325_v7 }
 0x1cc   : > { %v2606_v13 = vpop.f32.mrf.mxu1 }
 0x1cd   : > { %v2555_v37 = vpack.c.bf16 %v2606_v13, %v2606_v13  ;;  %v2271_v47 = vmul.f32 %v2606_v13, %v2606_v13  ;;  %v2229_v14 = vsel %vm2169_vm1, %v2606_v13, 0.0 }
 0x1ce   : > { %v1993_v31 = vpop.f32.mrf.mxu1 }
 0x1cf   : > { %2167 = vst.msk [vmem:[%s3476_s22 + $0x78] sm:$0xf] %vm2136_vm0, %v2555_v37  ;;  %v2553_v10 = vpack.c.bf16 %v1993_v31, %v1993_v31  ;;  %v2225_v56 = vsel %vm2169_vm1, %v1993_v31, 0.0  ;;  %v2269_v6 = vmul.f32 %v1993_v31, %v1993_v31  ;;  %v2332_v46 = vsel %vm2169_vm1, %v2271_v47, 0.0 }
 0x1d0   : > { %v2226_v57 = vadd.f32 %v2225_v56, %v2224_v19  ;;  %v2607_v40 = vpop.f32.mrf.mxu1 }
 0x1d1   : > { %2165 = vst.msk [vmem:[%s3476_s22 + $0x70] sm:$0xf] %vm2136_vm0, %v2553_v10  ;;  %v2328_v39 = vsel %vm2169_vm1, %v2269_v6, 0.0  ;;  %v2556_v21 = vpack.c.bf16 %v2607_v40, %v2607_v40  ;;  %v2272_v18 = vmul.f32 %v2607_v40, %v2607_v40  ;;  %v2231_v22 = vsel %vm2169_vm1, %v2607_v40, 0.0 }
 0x1d2   : > { %v2329_v38 = vadd.f32 %v2328_v39, %v2327_v50  ;;  %v1996_v26 = vpop.f32.mrf.mxu1 }
 0x1d3   : > { %2168 = vst.msk [vmem:[%s3476_s22 + $0x7c] sm:$0xf] %vm2136_vm0, %v2556_v21  ;;  %v2554_v15 = vpack.c.bf16 %v1996_v26, %v1996_v26  ;;  %v2227_v3 = vsel %vm2169_vm1, %v1996_v26, 0.0  ;;  %v2270_v43 = vmul.f32 %v1996_v26, %v1996_v26  ;;  %v2334_v23 = vsel %vm2169_vm1, %v2272_v18, 0.0 }
 0x1d4   : > { %v2228_v20 = vadd.f32 %v2227_v3, %v2226_v57 }
 0x1d5   : > { %2166 = vst.msk [vmem:[%s3476_s22 + $0x74] sm:$0xf] %vm2136_vm0, %v2554_v15  ;;  %v2330_v28 = vsel %vm2169_vm1, %v2270_v43, 0.0 }
 0x1d6   : > { %v2230_v45 = vadd.f32 %v2229_v14, %v2228_v20  ;;  %v2331_v8 = vadd.f32 %v2330_v28, %v2329_v38 }
 0x1d8   : > { %v2232_v0 = vadd.f32 %v2231_v22, %v2230_v45  ;;  %v2333_v25 = vadd.f32 %v2332_v46, %v2331_v8 }
 0x1da   : > { %v2233_v41 = vrot.slane %v2232_v0, 4  ;;  %v2335_v36 = vadd.f32 %v2334_v23, %v2333_v25 }
 0x1dc   : > { %v2234_v48 = vadd.f32 %v2233_v41, %v2232_v0  ;;  %v2336_v42 = vrot.slane %v2335_v36, 4 }
 0x1de   : > { %v2235_v51 = vrot.slane %v2234_v48, 2  ;;  %v2337_v55 = vadd.f32 %v2336_v42, %v2335_v36 }
 0x1e0   : > { %v2236_v30 = vadd.f32 %v2235_v51, %v2234_v48  ;;  %v2338_v11 = vrot.slane %v2337_v55, 2 }
 0x1e2   : > { %v2237_v54 = vrot.slane %v2236_v30, 1  ;;  %v2339_v52 = vadd.f32 %v2338_v11, %v2337_v55 }
 0x1e4   : > { %v2238_v61 = vadd.f32 %v2237_v54, %v2236_v30  ;;  %v2340_v59 = vrot.slane %v2339_v52, 1 }
 0x1e6   : > { %2240 = vst.msk [vmem:[%s181_s26] sm:$0x1] %vm2239_vm2, %v2238_v61  ;;  %v2341_v53 = vadd.f32 %v2340_v59, %v2339_v52 }
 0x1e8   : > { %2342 = vst.msk [vmem:[%s181_s26 + $0x1] sm:$0x1] %vm2239_vm2, %v2341_v53 }
 0x1e9 PF: > { %s14_s12 = sadd.s32 1, %s2627_s12  }
 0x1ea   : > { %p11_p4 = scmp.ge.s32.totalorder %s14_s12, 4  }
 0x1ec   :  { %13 = sbr.rel (!%p11_p4) target bundleno = 1 (0x1), region = 71 }

// kernel: inception_forward.11
= control target key start
LH: loop header
LB: loop body
LE: loop exit
PB: predicated region body
PF: predicated region fallthrough
CT: control target
= control target key end

     0   :  { %11 = vsyncpa [#allocation3], 0  ;;  %s2031_s0 = inlined_call_operand.vmem [shape: bf16[512,8], index: 0, kind: input, shape index: {}]   ;;  %s2032_s1 = inlined_call_operand.vmem [shape: bf16[512,8], index: 1, kind: input, shape index: {}]   ;;  %s2033_s2 = inlined_call_operand.vmem [shape: bf16[512,8], index: 2, kind: input, shape index: {}]   ;;  %s2034_s3 = inlined_call_operand.vmem [shape: bf16[512,8], index: 3, kind: input, shape index: {}]   ;;  %s2035_s4 = inlined_call_operand.vmem [shape: f32[1,32], index: 4, kind: input, shape index: {}]   ;;  %s2036_s5 = inlined_call_operand.vmem [shape: f32[1,32], index: 5, kind: input, shape index: {}]   ;;  %s2037_s6 = inlined_call_operand.hbm [shape: f32[512,32], index: 6, kind: output, shape index: {}]  }
   0x1   :  { %13 = vsyncpa [#allocation3 + $0x1], 0  ;;  %s1575_s21 = smov 0   ;;  %s1577_s22 = smov 0  }
   0x2   :  { %s1579_s23 = smov 0   ;;  %s1581_s24 = smov 0  }
   0x3 LB: > { %s1596_s25 = sadd.s32 4294967295, %s1533_s24   ;;  %s1281_s26 = sadd.s32 4294967294, %s1533_s24   ;;  %s1533_s24 = sphi %s1581_s24, %s2043_s24   ;;  %s1529_s23 = sphi %s1579_s23, %s2042_s23   ;;  %s1525_s22 = sphi %s1577_s22, %s2041_s22   ;;  %s1521_s21 = sphi %s1575_s21, %s2040_s21  }
   0x4   : > { %s1600_s27 = sadd.s32 1, %s1533_s24   ;;  %s172_s28 = sadd.s32 1, %s1529_s23 }
   0x5   : > { %s169_s29 = ssub.s32 %s1533_s24, %s1600_s27  ;;  %p182_p0 = scmp.ne.s32.totalorder %s1529_s23, %s1525_s22 }
   0x6   : > { %p170_p1 = scmp.eq.s32.totalorder %s169_s29, 0  ;;  %p183_p2 = scmp.eq.s32.totalorder %s1596_s25, 1 }
   0x7   : > { %p188_p3 = scmp.ne.s32.totalorder %s1525_s22, %s1521_s21  ;;  %p189_p4 = scmp.eq.s32.totalorder %s1281_s26, 1 }
   0x8   : > { %s1611_s30 = scalar_select %p170_p1, %s1529_s23, %s172_s28  }
   0x9   : > { %p1613_p5 = por %p183_p2, %p182_p0  ;;  %p1617_p6 = por %p189_p4, %p188_p3 }
   0xa   : > { %p1284_p7 = scmp.ge.s32.totalorder %s1533_s24, 1  ;;  %p249_p8 = scmp.lt.s32.totalorder %s1533_s24, 3 }
   0xc   : > { %p250_p9 = pnand %p1284_p7, %p249_p8 }
   0xd   : > { %s1286_s9 = sshll.u32 (!%p250_p9), %s1596_s25, 5  ;;  %s1535_s14 = smov (!%p250_p9), 8  }
   0xe   : > { %253 = sbr.rel (%p250_p9) target bundleno = 258 (0x102), region = 44  ;;  %p295_p10 = scmp.lt.s32.totalorder (!%p250_p9), %s1286_s9, 63 }
   0xf   : > { %s1536_s26 = smov (!%p250_p9), 16   ;;  %s1365_s19 = sshll.u32 (!%p250_p9), %s1596_s25, 12 }
  0x10   : > { %s1976_s28 = scalar_lea.hbm (!%p250_p9), %s2037_s6, %s1365_s19 }
  0x13   : > { %s2045_s9 = smov (!%p295_p10, %s1286_s9), 63  ;;  %vm863_vm0 = vcmask 64512   ;;  %vm912_vm1 = vcmask 130048   ;;  %vm945_vm2 = vcmask 195584   ;;  %vm1136_vm3 = vcmask 261120  }
  0x14   : > { %s1624_s10 = sshll.u32 %s2045_s9, 2 }
  0x15   : > { %s1630_s13 = scalar_lea.vmem %s2032_s1, %s1624_s10  ;;  %s1654_s17 = scalar_lea.vmem %s2033_s2, %s1624_s10 }
  0x16   : > { %v1409_v0 = vld [vmem:[%s1630_s13 + $0x10] sm:$0xff]   ;;  %v1410_v1 = vld [vmem:[%s1630_s13] sm:$0xff]   ;;  %v1411_v2 = vld [vmem:[%s1630_s13 + $0x18] sm:$0xff]   ;;  %s1676_s20 = scalar_lea.vmem %s2034_s3, %s1624_s10  ;;  %s1698_s9 = scalar_lea.vmem %s2031_s0, %s1624_s10 }
  0x17   : > { %611 = vrot.lane.b32.xlu1 %v1409_v0, %s1535_s14  ;;  %607 = vrot.lane.b32.xlu0 %v1410_v1, %s1535_s14  ;;  %v1412_v3 = vld [vmem:[%s1630_s13 + $0x8] sm:$0xff]   ;;  %v1414_v5 = vld [vmem:[%s1630_s13 + $0x20] sm:$0xff]   ;;  %s1537_s10 = smov 24  }
  0x18   : > { %v1413_v4 = vld [vmem:[%s1630_s13 + $0x28] sm:$0xff]   ;;  %v1415_v6 = vld [vmem:[%s1630_s13 + $0x38] sm:$0xff]   ;;  %v1416_v7 = vld [vmem:[%s1630_s13 + $0x30] sm:$0xff]  }
  0x19   : > { %v1417_v8 = vld [vmem:[%s1630_s13 + $0x48] sm:$0xff]   ;;  %v1418_v9 = vld [vmem:[%s1630_s13 + $0x40] sm:$0xff]   ;;  %v1419_v10 = vld [vmem:[%s1630_s13 + $0x58] sm:$0xff]  }
  0x1a   : > { %v1420_v11 = vld [vmem:[%s1630_s13 + $0x50] sm:$0xff]   ;;  %v1421_v12 = vld [vmem:[%s1630_s13 + $0x68] sm:$0xff]   ;;  %v1422_v13 = vld [vmem:[%s1630_s13 + $0x60] sm:$0xff]  }
  0x1b   : > { %613 = vrot.lane.b32.xlu1 %v1411_v2, %s1535_s14  ;;  %609 = vrot.lane.b32.xlu0 %v1412_v3, %s1535_s14  ;;  %v1423_v14 = vld [vmem:[%s1630_s13 + $0x78] sm:$0xff]   ;;  %v1424_v15 = vld [vmem:[%s1630_s13 + $0x70] sm:$0xff]   ;;  %s291_s13 = sand.u32 1, %s1525_s22  }
  0x1c   : > { %v1425_v16 = vld [vmem:[%s1654_s17 + $0x8] sm:$0xff]   ;;  %v1426_v17 = vld [vmem:[%s1654_s17] sm:$0xff]   ;;  %v1427_v18 = vld [vmem:[%s1654_s17 + $0x18] sm:$0xff]   ;;  %s1990_s29 = scalar_lea.sflag [#allocation3], %s291_s13 }
  0x1d   : > { %v1428_v19 = vld [vmem:[%s1654_s17 + $0x10] sm:$0xff]   ;;  %v1429_v20 = vld [vmem:[%s1654_s17 + $0x28] sm:$0xff]   ;;  %v1430_v21 = vld [vmem:[%s1654_s17 + $0x20] sm:$0xff]  }
  0x1e   : > { %v1431_v22 = vld [vmem:[%s1654_s17 + $0x38] sm:$0xff]   ;;  %v1432_v23 = vld [vmem:[%s1654_s17 + $0x30] sm:$0xff]   ;;  %v1433_v24 = vld [vmem:[%s1654_s17 + $0x48] sm:$0xff]  }
  0x1f   : > { %617 = vrot.lane.b32.xlu1 %v1413_v4, %s1535_s14  ;;  %615 = vrot.lane.b32.xlu0 %v1414_v5, %s1535_s14  ;;  %v1434_v25 = vld [vmem:[%s1654_s17 + $0x40] sm:$0xff]   ;;  %v1435_v26 = vld [vmem:[%s1654_s17 + $0x58] sm:$0xff]  }
  0x20   : > { %v1436_v27 = vld [vmem:[%s1654_s17 + $0x50] sm:$0xff]   ;;  %v1437_v28 = vld [vmem:[%s1654_s17 + $0x68] sm:$0xff]   ;;  %v1438_v29 = vld [vmem:[%s1654_s17 + $0x60] sm:$0xff]  }
  0x21   : > { %v1439_v30 = vld [vmem:[%s1654_s17 + $0x78] sm:$0xff]   ;;  %v1440_v31 = vld [vmem:[%s1654_s17 + $0x70] sm:$0xff]   ;;  %v1441_v32 = vld [vmem:[%s1676_s20 + $0x8] sm:$0xff]   ;;  %s1285_s17 = sshll.u32 %s291_s13, 8 }
  0x22   : > { %v1442_v33 = vld [vmem:[%s1676_s20] sm:$0xff]   ;;  %v1443_v34 = vld [vmem:[%s1676_s20 + $0x18] sm:$0xff]   ;;  %v1444_v35 = vld [vmem:[%s1676_s20 + $0x10] sm:$0xff]   ;;  %s1837_s18 = scalar_lea.vmem [#allocation2], %s1285_s17 }
  0x23   : > { %621 = vrot.lane.b32.xlu1 %v1415_v6, %s1535_s14  ;;  %619 = vrot.lane.b32.xlu0 %v1416_v7, %s1535_s14  ;;  %v1445_v36 = vld [vmem:[%s1676_s20 + $0x28] sm:$0xff]   ;;  %v1446_v37 = vld [vmem:[%s1676_s20 + $0x20] sm:$0xff]  }
  0x24   : > { %v1447_v38 = vld [vmem:[%s1676_s20 + $0x38] sm:$0xff]   ;;  %v1448_v39 = vld [vmem:[%s1676_s20 + $0x30] sm:$0xff]   ;;  %v1449_v40 = vld [vmem:[%s1676_s20 + $0x48] sm:$0xff]  }
  0x25   : > { %v1450_v41 = vld [vmem:[%s1676_s20 + $0x40] sm:$0xff]   ;;  %v1451_v42 = vld [vmem:[%s1676_s20 + $0x58] sm:$0xff]   ;;  %v1452_v43 = vld [vmem:[%s1676_s20 + $0x50] sm:$0xff]  }
  0x26   : > { %v1453_v44 = vld [vmem:[%s1676_s20 + $0x68] sm:$0xff]   ;;  %v1454_v45 = vld [vmem:[%s1676_s20 + $0x60] sm:$0xff]   ;;  %v1455_v46 = vld [vmem:[%s1676_s20 + $0x78] sm:$0xff]  }
  0x27   : > { %625 = vrot.lane.b32.xlu1 %v1417_v8, %s1535_s14  ;;  %623 = vrot.lane.b32.xlu0 %v1418_v9, %s1535_s14  ;;  %v1456_v47 = vld [vmem:[%s1676_s20 + $0x70] sm:$0xff]   ;;  %v1463_v56 = vld [vmem:[%s1698_s9 + $0x38] sm:$0xff]   ;;  %s1183_s20 = sshll.u32 %s1837_s18, 4  ;;  %s1978_s20 = int_to_ptr.vmem [resolvable:$true] %s1183_s20 }
  0x28   : > { %v1457_v48 = vld [vmem:[%s1698_s9 + $0x10] sm:$0xff]   ;;  %v1465_v61 = vld [vmem:[%s1698_s9 + $0x48] sm:$0xff]   ;;  %v1466_v63 = vld [vmem:[%s1698_s9 + $0x40] sm:$0xff]  }
  0x29   : > { %v1464_v57 = vld [vmem:[%s1698_s9 + $0x30] sm:$0xff]   ;;  %v1467_v3 = vld [vmem:[%s1698_s9 + $0x58] sm:$0xff]   ;;  %v1469_v9 = vld [vmem:[%s1698_s9 + $0x68] sm:$0xff]  }
  0x2a   : > { %v1468_v5 = vld [vmem:[%s1698_s9 + $0x50] sm:$0xff]  }
  0x2b   : > { %629 = vrot.lane.b32.xlu1 %v1419_v10, %s1535_s14  ;;  %627 = vrot.lane.b32.xlu0 %v1420_v11, %s1535_s14  ;;  %v1470_v11 = vld [vmem:[%s1698_s9 + $0x60] sm:$0xff]  }
  0x2f   : > { %633 = vrot.lane.b32.xlu1 %v1421_v12, %s1535_s14  ;;  %631 = vrot.lane.b32.xlu0 %v1422_v13, %s1535_s14 }
  0x33   : > { %637 = vrot.lane.b32.xlu1 %v1423_v14, %s1535_s14  ;;  %635 = vrot.lane.b32.xlu0 %v1424_v15, %s1535_s14  ;;  %v1471_v15 = vld [vmem:[%s1698_s9 + $0x78] sm:$0xff]  }
  0x37   : > { %721 = vrot.lane.b32.xlu1 %v1425_v16, %s1536_s26  ;;  %719 = vrot.lane.b32.xlu0 %v1426_v17, %s1536_s26  ;;  %v1472_v17 = vld [vmem:[%s1698_s9 + $0x70] sm:$0xff]  }
  0x3b   : > { %725 = vrot.lane.b32.xlu1 %v1427_v18, %s1536_s26  ;;  %723 = vrot.lane.b32.xlu0 %v1428_v19, %s1536_s26 }
  0x3f   : > { %729 = vrot.lane.b32.xlu1 %v1429_v20, %s1536_s26  ;;  %727 = vrot.lane.b32.xlu0 %v1430_v21, %s1536_s26 }
  0x43   : > { %733 = vrot.lane.b32.xlu1 %v1431_v22, %s1536_s26  ;;  %731 = vrot.lane.b32.xlu0 %v1432_v23, %s1536_s26 }
  0x47   : > { %737 = vrot.lane.b32.xlu1 %v1433_v24, %s1536_s26  ;;  %735 = vrot.lane.b32.xlu0 %v1434_v25, %s1536_s26 }
  0x4b   : > { %741 = vrot.lane.b32.xlu1 %v1435_v26, %s1536_s26  ;;  %739 = vrot.lane.b32.xlu0 %v1436_v27, %s1536_s26 }
  0x4f   : > { %745 = vrot.lane.b32.xlu1 %v1437_v28, %s1536_s26  ;;  %743 = vrot.lane.b32.xlu0 %v1438_v29, %s1536_s26 }
  0x53   : > { %749 = vrot.lane.b32.xlu1 %v1439_v30, %s1536_s26  ;;  %747 = vrot.lane.b32.xlu0 %v1440_v31, %s1536_s26 }
  0x57   : > { %833 = vrot.lane.b32.xlu1 %v1441_v32, %s1537_s10  ;;  %831 = vrot.lane.b32.xlu0 %v1442_v33, %s1537_s10 }
  0x5b   : > { %837 = vrot.lane.b32.xlu1 %v1443_v34, %s1537_s10  ;;  %835 = vrot.lane.b32.xlu0 %v1444_v35, %s1537_s10 }
  0x5f   : > { %841 = vrot.lane.b32.xlu1 %v1445_v36, %s1537_s10  ;;  %839 = vrot.lane.b32.xlu0 %v1446_v37, %s1537_s10  ;;  %v1458_v36 = vld [vmem:[%s1698_s9] sm:$0xff]   ;;  %v1459_v37 = vld [vmem:[%s1698_s9 + $0x18] sm:$0xff]  }
  0x63   : > { %845 = vrot.lane.b32.xlu1 %v1447_v38, %s1537_s10  ;;  %843 = vrot.lane.b32.xlu0 %v1448_v39, %s1537_s10  ;;  %v1460_v38 = vld [vmem:[%s1698_s9 + $0x8] sm:$0xff]  }
  0x64   : > { %v1461_v39 = vld [vmem:[%s1698_s9 + $0x28] sm:$0xff]  }
  0x67   : > { %849 = vrot.lane.b32.xlu1 %v1449_v40, %s1537_s10  ;;  %847 = vrot.lane.b32.xlu0 %v1450_v41, %s1537_s10  ;;  %v1462_v40 = vld [vmem:[%s1698_s9 + $0x20] sm:$0xff]   ;;  %s1473_s9 = scalar_lea.vmem %s1978_s20, 4096 }
  0x68   : > { %p1474_p11 = scmp.ne.s32.totalorder %s1978_s20, %s1473_s9 }
  0x6a   : > { %p1475_p12 = pnand %p1474_p11, %p1613_p5 }
  0x6b   : > { %853 = vrot.lane.b32.xlu1 %v1451_v42, %s1537_s10  ;;  %851 = vrot.lane.b32.xlu0 %v1452_v43, %s1537_s10 }
  0x6c   : > { %p1476_p13 = pneg %p1475_p12 }
  0x6f   : > { %857 = vrot.lane.b32.xlu1 %v1453_v44, %s1537_s10  ;;  %855 = vrot.lane.b32.xlu0 %v1454_v45, %s1537_s10 }
  0x73   : > { %861 = vrot.lane.b32.xlu1 %v1455_v46, %s1537_s10  ;;  %859 = vrot.lane.b32.xlu0 %v1456_v47, %s1537_s10  ;;  %s1538_s10 = smov [#allocation2]  }
  0x74   : > { %s1477_s11 = sshll.u32 %s1538_s10, 4  ;;  %s1478_s11 = int_to_ptr.vmem [resolvable:$false] %s1477_s11 }
  0x75   : > { %s1479_s12 = scalar_lea.vmem %s1478_s11, 8192  ;;  %p1480_p0 = scmp.lt.s32.totalorder %s1978_s20, %s1478_s11 }
  0x76   : > { %p1481_p1 = scmp.lt.s32.totalorder %s1479_s12, %s1473_s9 }
  0x78   : > { %p1482_p2 = por %p1481_p1, %p1480_p0 }
  0x7a   : > { %p1483_p3 = pnand %p1482_p2, %p1476_p13 }
  0x89   : > { %v612_v49 = vpop.permute.xlu1 %611  ;;  %v608_v51 = vpop.permute.xlu0 %607 }
  0x8a   : > { %v1732_v50 = vsel %vm863_vm0, %v1457_v48, %v612_v49  ;;  %v866_v43 = vsel %vm863_vm0, %v1458_v36, %v608_v51 }
  0x8d   : > { %v614_v52 = vpop.permute.xlu1 %613  ;;  %v610_v53 = vpop.permute.xlu0 %609 }
  0x8e   : > { %v875_v44 = vsel %vm863_vm0, %v1459_v37, %v614_v52  ;;  %v869_v45 = vsel %vm863_vm0, %v1460_v38, %v610_v53 }
  0x91   : > { %v618_v54 = vpop.permute.xlu1 %617  ;;  %v616_v55 = vpop.permute.xlu0 %615 }
  0x92   : > { %v881_v46 = vsel %vm863_vm0, %v1461_v39, %v618_v54  ;;  %v878_v47 = vsel %vm863_vm0, %v1462_v40, %v616_v55 }
  0x95   : > { %v622_v58 = vpop.permute.xlu1 %621  ;;  %v620_v60 = vpop.permute.xlu0 %619 }
  0x96   : > { %v1737_v59 = vsel %vm863_vm0, %v1463_v56, %v622_v58  ;;  %v884_v62 = vsel %vm863_vm0, %v1464_v57, %v620_v60 }
  0x99   : > { %v626_v0 = vpop.permute.xlu1 %625  ;;  %v624_v2 = vpop.permute.xlu0 %623 }
  0x9a   : > { %v893_v1 = vsel %vm863_vm0, %v1465_v61, %v626_v0  ;;  %v890_v4 = vsel %vm863_vm0, %v1466_v63, %v624_v2 }
  0x9d   : > { %v630_v6 = vpop.permute.xlu1 %629  ;;  %v628_v8 = vpop.permute.xlu0 %627 }
  0x9e   : > { %v1747_v7 = vsel %vm863_vm0, %v1467_v3, %v630_v6  ;;  %v896_v10 = vsel %vm863_vm0, %v1468_v5, %v628_v8  ;;  %v1808_v3 = vld [vmem:[%s2036_s5] ss:$0 sm:$0xff] }
  0xa1   : > { %v634_v12 = vpop.permute.xlu1 %633  ;;  %v632_v14 = vpop.permute.xlu0 %631 }
  0xa2   : > { %v905_v13 = vsel %vm863_vm0, %v1469_v9, %v634_v12  ;;  %v902_v16 = vsel %vm863_vm0, %v1470_v11, %v632_v14 }
  0xa5   : > { %v638_v18 = vpop.permute.xlu1 %637  ;;  %v636_v20 = vpop.permute.xlu0 %635 }
  0xa6   : > { %v911_v19 = vsel %vm863_vm0, %v1471_v15, %v638_v18  ;;  %v1758_v21 = vsel %vm863_vm0, %v1472_v17, %v636_v20 }
  0xa9   : > { %v722_v22 = vpop.permute.xlu1 %721  ;;  %v720_v23 = vpop.permute.xlu0 %719 }
  0xaa   : > { %v916_v48 = vsel %vm912_vm1, %v869_v45, %v722_v22  ;;  %v914_v49 = vsel %vm912_vm1, %v866_v43, %v720_v23 }
  0xad   : > { %v726_v24 = vpop.permute.xlu1 %725  ;;  %v724_v25 = vpop.permute.xlu0 %723 }
  0xae   : > { %v920_v56 = vsel %vm912_vm1, %v875_v44, %v726_v24  ;;  %v918_v51 = vsel %vm912_vm1, %v1732_v50, %v724_v25  ;;  %v1790_v50 = vld [vmem:[%s2035_s4] ss:$0 sm:$0xff] }
  0xb1   : > { %v730_v26 = vpop.permute.xlu1 %729  ;;  %v728_v27 = vpop.permute.xlu0 %727 }
  0xb2   : > { %v924_v52 = vsel %vm912_vm1, %v881_v46, %v730_v26  ;;  %v922_v53 = vsel %vm912_vm1, %v878_v47, %v728_v27 }
  0xb5   : > { %v734_v28 = vpop.permute.xlu1 %733  ;;  %v732_v29 = vpop.permute.xlu0 %731 }
  0xb6   : > { %v1779_v54 = vsel %vm912_vm1, %v1737_v59, %v734_v28  ;;  %v1782_v55 = vsel %vm912_vm1, %v884_v62, %v732_v29 }
  0xb9   : > { %v738_v30 = vpop.permute.xlu1 %737  ;;  %v736_v31 = vpop.permute.xlu0 %735 }
  0xba   : > { %v1785_v58 = vsel %vm912_vm1, %v893_v1, %v738_v30  ;;  %v1795_v63 = vsel %vm912_vm1, %v890_v4, %v736_v31 }
  0xbd   : > { %v742_v32 = vpop.permute.xlu1 %741  ;;  %v740_v33 = vpop.permute.xlu0 %739 }
  0xbe   : > { %v1800_v1 = vsel %vm912_vm1, %v1747_v7, %v742_v32  ;;  %v1803_v2 = vsel %vm912_vm1, %v896_v10, %v740_v33 }
  0xc1   : > { %v746_v34 = vpop.permute.xlu1 %745  ;;  %v744_v35 = vpop.permute.xlu0 %743 }
  0xc2   : > { %v1811_v4 = vsel %vm912_vm1, %v905_v13, %v746_v34  ;;  %v1814_v8 = vsel %vm912_vm1, %v902_v16, %v744_v35 }
  0xc5   : > { %v750_v41 = vpop.permute.xlu1 %749  ;;  %v748_v42 = vpop.permute.xlu0 %747 }
  0xc6   : > { %v1821_v11 = vsel %vm912_vm1, %v911_v19, %v750_v41  ;;  %v1830_v22 = vsel %vm912_vm1, %v1758_v21, %v748_v42 }
  0xc9   : > { %v834_v57 = vpop.permute.xlu1 %833  ;;  %v832_v61 = vpop.permute.xlu0 %831 }
  0xca   : > { %v950_v60 = vsel %vm945_vm2, %v916_v48, %v834_v57  ;;  %v947_v62 = vsel %vm945_vm2, %v914_v49, %v832_v61 }
  0xcb   : > { %v996_v59 = vunpack.c.l.bf16 %v950_v60  ;;  %v997_v0 = vunpack.c.h.bf16 %v950_v60  ;;  %v994_v5 = vunpack.c.l.bf16 %v947_v62  ;;  %v995_v6 = vunpack.c.h.bf16 %v947_v62 }
  0xcd   : > { %v1035_v7 = vmul.f32 %v1790_v50, %v996_v59  ;;  %v1036_v9 = vmul.f32 %v1790_v50, %v997_v0  ;;  %v838_v10 = vpop.permute.xlu1 %837  ;;  %v1033_v12 = vmul.f32 %v1790_v50, %v994_v5  ;;  %v1034_v14 = vmul.f32 %v1790_v50, %v995_v6  ;;  %v836_v15 = vpop.permute.xlu0 %835 }
  0xce   : > { %v956_v13 = vsel %vm945_vm2, %v920_v56, %v838_v10  ;;  %v953_v24 = vsel %vm945_vm2, %v918_v51, %v836_v15 }
  0xcf   : > { %v1074_v16 = vadd.f32 %v1808_v3, %v1035_v7  ;;  %v1075_v17 = vadd.f32 %v1808_v3, %v1036_v9  ;;  %v1000_v18 = vunpack.c.l.bf16 %v956_v13  ;;  %v1001_v20 = vunpack.c.h.bf16 %v956_v13 }
  0xd0   : > { %v1072_v19 = vadd.f32 %v1808_v3, %v1033_v12  ;;  %v1073_v23 = vadd.f32 %v1808_v3, %v1034_v14  ;;  %v998_v32 = vunpack.c.l.bf16 %v953_v24  ;;  %v999_v33 = vunpack.c.h.bf16 %v953_v24 }
  0xd1   : > { %v1106_v25 = vmax.f32 %v1074_v16, 0.0  ;;  %v1107_v26 = vmax.f32 %v1075_v17, 0.0  ;;  %v1039_v27 = vmul.f32 %v1790_v50, %v1000_v18  ;;  %v1040_v28 = vmul.f32 %v1790_v50, %v1001_v20  ;;  %v842_v29 = vpop.permute.xlu1 %841  ;;  %v840_v34 = vpop.permute.xlu0 %839 }
  0xd2   : > { %v1104_v30 = vmax.f32 %v1072_v19, 0.0  ;;  %v1105_v31 = vmax.f32 %v1073_v23, 0.0  ;;  %v962_v36 = vsel %vm945_vm2, %v924_v52, %v842_v29  ;;  %v959_v37 = vsel %vm945_vm2, %v922_v53, %v840_v34 }
  0xd3   : > { %1139 = vst.msk [vmem:[%s1837_s18 + $0x10] sm:$0xff] %vm1136_vm3, %v1106_v25  ;;  %1140 = vst.msk [vmem:[%s1837_s18 + $0x18] sm:$0xff] %vm1136_vm3, %v1107_v26  ;;  %v1078_v21 = vadd.f32 %v1808_v3, %v1039_v27  ;;  %v1079_v35 = vadd.f32 %v1808_v3, %v1040_v28  ;;  %v1037_v38 = vmul.f32 %v1790_v50, %v998_v32  ;;  %v1004_v40 = vunpack.c.l.bf16 %v962_v36 }
  0xd4   : > { %1137 = vst.msk [vmem:[%s1837_s18] sm:$0xff] %vm1136_vm3, %v1104_v30  ;;  %1138 = vst.msk [vmem:[%s1837_s18 + $0x8] sm:$0xff] %vm1136_vm3, %v1105_v31  ;;  %v1038_v39 = vmul.f32 %v1790_v50, %v999_v33  ;;  %v1005_v41 = vunpack.c.h.bf16 %v962_v36  ;;  %v1002_v44 = vunpack.c.l.bf16 %v959_v37  ;;  %v1003_v45 = vunpack.c.h.bf16 %v959_v37 }
  0xd5   : > { %v1110_v42 = vmax.f32 %v1078_v21, 0.0  ;;  %v1111_v43 = vmax.f32 %v1079_v35, 0.0  ;;  %v846_v46 = vpop.permute.xlu1 %845  ;;  %v1076_v47 = vadd.f32 %v1808_v3, %v1037_v38  ;;  %v1043_v49 = vmul.f32 %v1790_v50, %v1004_v40  ;;  %v844_v51 = vpop.permute.xlu0 %843 }
  0xd6   : > { %v1077_v48 = vadd.f32 %v1808_v3, %v1038_v39  ;;  %v1044_v56 = vmul.f32 %v1790_v50, %v1005_v41  ;;  %v1041_v52 = vmul.f32 %v1790_v50, %v1002_v44  ;;  %v1042_v53 = vmul.f32 %v1790_v50, %v1003_v45 }
  0xd7   : > { %1143 = vst.msk [vmem:[%s1837_s18 + $0x30] sm:$0xff] %vm1136_vm3, %v1110_v42  ;;  %1144 = vst.msk [vmem:[%s1837_s18 + $0x38] sm:$0xff] %vm1136_vm3, %v1111_v43  ;;  %v968_v57 = vsel %vm945_vm2, %v1779_v54, %v846_v46  ;;  %v965_v60 = vsel %vm945_vm2, %v1782_v55, %v844_v51  ;;  %v1108_v61 = vmax.f32 %v1076_v47, 0.0  ;;  %v1082_v0 = vadd.f32 %v1808_v3, %v1043_v49 }
  0xd8   : > { %v1109_v59 = vmax.f32 %v1077_v48, 0.0  ;;  %v1083_v62 = vadd.f32 %v1808_v3, %v1044_v56  ;;  %v1080_v5 = vadd.f32 %v1808_v3, %v1041_v52  ;;  %v1081_v6 = vadd.f32 %v1808_v3, %v1042_v53 }
  0xd9   : > { %v1008_v7 = vunpack.c.l.bf16 %v968_v57  ;;  %v1009_v9 = vunpack.c.h.bf16 %v968_v57  ;;  %v850_v10 = vpop.permute.xlu1 %849  ;;  %1141 = vst.msk [vmem:[%s1837_s18 + $0x20] sm:$0xff] %vm1136_vm3, %v1108_v61  ;;  %v1114_v54 = vmax.f32 %v1082_v0, 0.0  ;;  %v1006_v12 = vunpack.c.l.bf16 %v965_v60  ;;  %v848_v13 = vpop.permute.xlu0 %847 }
  0xda   : > { %1142 = vst.msk [vmem:[%s1837_s18 + $0x28] sm:$0xff] %vm1136_vm3, %v1109_v59  ;;  %v1115_v55 = vmax.f32 %v1083_v62, 0.0  ;;  %v1007_v14 = vunpack.c.h.bf16 %v965_v60  ;;  %v1112_v15 = vmax.f32 %v1080_v5, 0.0  ;;  %v1113_v16 = vmax.f32 %v1081_v6, 0.0 }
  0xdb   : > { %v1047_v17 = vmul.f32 %v1790_v50, %v1008_v7  ;;  %v1048_v18 = vmul.f32 %v1790_v50, %v1009_v9  ;;  %1147 = vst.msk [vmem:[%s1837_s18 + $0x50] sm:$0xff] %vm1136_vm3, %v1114_v54  ;;  %v1045_v20 = vmul.f32 %v1790_v50, %v1006_v12  ;;  %v974_v23 = vsel %vm945_vm2, %v1785_v58, %v850_v10 }
  0xdc   : > { %1148 = vst.msk [vmem:[%s1837_s18 + $0x58] sm:$0xff] %vm1136_vm3, %v1115_v55  ;;  %v1046_v19 = vmul.f32 %v1790_v50, %v1007_v14  ;;  %v971_v24 = vsel %vm945_vm2, %v1795_v63, %v848_v13  ;;  %1145 = vst.msk [vmem:[%s1837_s18 + $0x40] sm:$0xff] %vm1136_vm3, %v1112_v15  ;;  %v1012_v27 = vunpack.c.l.bf16 %v974_v23  ;;  %v1013_v28 = vunpack.c.h.bf16 %v974_v23 }
  0xdd   : > { %1146 = vst.msk [vmem:[%s1837_s18 + $0x48] sm:$0xff] %vm1136_vm3, %v1113_v16  ;;  %v1086_v25 = vadd.f32 %v1808_v3, %v1047_v17  ;;  %v1087_v26 = vadd.f32 %v1808_v3, %v1048_v18  ;;  %v854_v29 = vpop.permute.xlu1 %853  ;;  %v1084_v30 = vadd.f32 %v1808_v3, %v1045_v20  ;;  %v1010_v31 = vunpack.c.l.bf16 %v971_v24  ;;  %v852_v63 = vpop.permute.xlu0 %851 }
  0xde   : > { %v1085_v58 = vadd.f32 %v1808_v3, %v1046_v19  ;;  %v1011_v32 = vunpack.c.h.bf16 %v971_v24  ;;  %v1051_v21 = vmul.f32 %v1790_v50, %v1012_v27  ;;  %v1052_v35 = vmul.f32 %v1790_v50, %v1013_v28 }
  0xdf   : > { %v1118_v33 = vmax.f32 %v1086_v25, 0.0  ;;  %v1119_v34 = vmax.f32 %v1087_v26, 0.0  ;;  %v1116_v36 = vmax.f32 %v1084_v30, 0.0  ;;  %v1049_v38 = vmul.f32 %v1790_v50, %v1010_v31 }
  0xe0   : > { %v1117_v37 = vmax.f32 %v1085_v58, 0.0  ;;  %v1050_v39 = vmul.f32 %v1790_v50, %v1011_v32  ;;  %v1090_v40 = vadd.f32 %v1808_v3, %v1051_v21  ;;  %v1091_v41 = vadd.f32 %v1808_v3, %v1052_v35 }
  0xe1   : > { %1151 = vst.msk [vmem:[%s1837_s18 + $0x70] sm:$0xff] %vm1136_vm3, %v1118_v33  ;;  %1152 = vst.msk [vmem:[%s1837_s18 + $0x78] sm:$0xff] %vm1136_vm3, %v1119_v34  ;;  %v980_v42 = vsel %vm945_vm2, %v1800_v1, %v854_v29  ;;  %v977_v43 = vsel %vm945_vm2, %v1803_v2, %v852_v63  ;;  %v858_v44 = vpop.permute.xlu1 %857  ;;  %v1088_v45 = vadd.f32 %v1808_v3, %v1049_v38  ;;  %v856_v49 = vpop.permute.xlu0 %855 }
  0xe2   : > { %1149 = vst.msk [vmem:[%s1837_s18 + $0x60] sm:$0xff] %vm1136_vm3, %v1116_v36  ;;  %1150 = vst.msk [vmem:[%s1837_s18 + $0x68] sm:$0xff] %vm1136_vm3, %v1117_v37  ;;  %v1089_v46 = vadd.f32 %v1808_v3, %v1050_v39  ;;  %v1016_v47 = vunpack.c.l.bf16 %v980_v42  ;;  %v1017_v48 = vunpack.c.h.bf16 %v980_v42  ;;  %v1122_v1 = vmax.f32 %v1090_v40, 0.0 }
  0xe3   : > { %v1123_v56 = vmax.f32 %v1091_v41, 0.0  ;;  %v1014_v51 = vunpack.c.l.bf16 %v977_v43  ;;  %v1015_v2 = vunpack.c.h.bf16 %v977_v43  ;;  %v1120_v52 = vmax.f32 %v1088_v45, 0.0 }
  0xe4   : > { %v1121_v53 = vmax.f32 %v1089_v46, 0.0  ;;  %v1055_v57 = vmul.f32 %v1790_v50, %v1016_v47  ;;  %v1056_v60 = vmul.f32 %v1790_v50, %v1017_v48  ;;  %1155 = vst.msk [vmem:[%s1837_s18 + $0x90] sm:$0xff] %vm1136_vm3, %v1122_v1  ;;  %v986_v0 = vsel %vm945_vm2, %v1811_v4, %v858_v44 }
  0xe5   : > { %1156 = vst.msk [vmem:[%s1837_s18 + $0x98] sm:$0xff] %vm1136_vm3, %v1123_v56  ;;  %v1053_v61 = vmul.f32 %v1790_v50, %v1014_v51  ;;  %v1054_v59 = vmul.f32 %v1790_v50, %v1015_v2  ;;  %v983_v62 = vsel %vm945_vm2, %v1814_v8, %v856_v49  ;;  %1153 = vst.msk [vmem:[%s1837_s18 + $0x80] sm:$0xff] %vm1136_vm3, %v1120_v52  ;;  %v1020_v7 = vunpack.c.l.bf16 %v986_v0  ;;  %v862_v12 = vpop.permute.xlu1 %861  ;;  %v860_v8 = vpop.permute.xlu0 %859 }
  0xe6   : > { %1154 = vst.msk [vmem:[%s1837_s18 + $0x88] sm:$0xff] %vm1136_vm3, %v1121_v53  ;;  %v1094_v5 = vadd.f32 %v1808_v3, %v1055_v57  ;;  %v1095_v6 = vadd.f32 %v1808_v3, %v1056_v60  ;;  %v1021_v9 = vunpack.c.h.bf16 %v986_v0  ;;  %v1018_v4 = vunpack.c.l.bf16 %v983_v62 }
  0xe7   : > { %v1092_v10 = vadd.f32 %v1808_v3, %v1053_v61  ;;  %v1093_v54 = vadd.f32 %v1808_v3, %v1054_v59  ;;  %v1019_v55 = vunpack.c.h.bf16 %v983_v62  ;;  %v1059_v15 = vmul.f32 %v1790_v50, %v1020_v7 }
  0xe8   : > { %v1126_v14 = vmax.f32 %v1094_v5, 0.0  ;;  %v1127_v13 = vmax.f32 %v1095_v6, 0.0  ;;  %v1060_v16 = vmul.f32 %v1790_v50, %v1021_v9  ;;  %v1057_v20 = vmul.f32 %v1790_v50, %v1018_v4 }
  0xe9   : > { %v1124_v17 = vmax.f32 %v1092_v10, 0.0  ;;  %v1125_v18 = vmax.f32 %v1093_v54, 0.0  ;;  %v1058_v19 = vmul.f32 %v1790_v50, %v1019_v55  ;;  %v1098_v23 = vadd.f32 %v1808_v3, %v1059_v15 }
  0xea   : > { %1159 = vst.msk [vmem:[%s1837_s18 + $0xb0] sm:$0xff] %vm1136_vm3, %v1126_v14  ;;  %1160 = vst.msk [vmem:[%s1837_s18 + $0xb8] sm:$0xff] %vm1136_vm3, %v1127_v13  ;;  %v1099_v24 = vadd.f32 %v1808_v3, %v1060_v16  ;;  %v992_v25 = vsel %vm945_vm2, %v1821_v11, %v862_v12  ;;  %v989_v26 = vsel %vm945_vm2, %v1830_v22, %v860_v8 }
  0xeb   : > { %1157 = vst.msk [vmem:[%s1837_s18 + $0xa0] sm:$0xff] %vm1136_vm3, %v1124_v17  ;;  %1158 = vst.msk [vmem:[%s1837_s18 + $0xa8] sm:$0xff] %vm1136_vm3, %v1125_v18  ;;  %v1096_v27 = vadd.f32 %v1808_v3, %v1057_v20  ;;  %v1097_v28 = vadd.f32 %v1808_v3, %v1058_v19  ;;  %v1024_v29 = vunpack.c.l.bf16 %v992_v25  ;;  %v1025_v30 = vunpack.c.h.bf16 %v992_v25 }
  0xec   : > { %v1130_v58 = vmax.f32 %v1098_v23, 0.0  ;;  %v1131_v11 = vmax.f32 %v1099_v24, 0.0  ;;  %v1022_v31 = vunpack.c.l.bf16 %v989_v26  ;;  %v1023_v32 = vunpack.c.h.bf16 %v989_v26 }
  0xed   : > { %v1128_v22 = vmax.f32 %v1096_v27, 0.0  ;;  %v1129_v63 = vmax.f32 %v1097_v28, 0.0  ;;  %v1063_v33 = vmul.f32 %v1790_v50, %v1024_v29  ;;  %v1064_v34 = vmul.f32 %v1790_v50, %v1025_v30 }
  0xee   : > { %1163 = vst.msk [vmem:[%s1837_s18 + $0xd0] sm:$0xff] %vm1136_vm3, %v1130_v58  ;;  %1164 = vst.msk [vmem:[%s1837_s18 + $0xd8] sm:$0xff] %vm1136_vm3, %v1131_v11  ;;  %v1061_v21 = vmul.f32 %v1790_v50, %v1022_v31  ;;  %v1062_v35 = vmul.f32 %v1790_v50, %v1023_v32 }
  0xef   : > { %1161 = vst.msk [vmem:[%s1837_s18 + $0xc0] sm:$0xff] %vm1136_vm3, %v1128_v22  ;;  %1162 = vst.msk [vmem:[%s1837_s18 + $0xc8] sm:$0xff] %vm1136_vm3, %v1129_v63  ;;  %v1102_v36 = vadd.f32 %v1808_v3, %v1063_v33  ;;  %v1103_v37 = vadd.f32 %v1808_v3, %v1064_v34 }
  0xf0   : > { %v1100_v38 = vadd.f32 %v1808_v3, %v1061_v21  ;;  %v1101_v39 = vadd.f32 %v1808_v3, %v1062_v35 }
  0xf1   : > { %v1134_v50 = vmax.f32 %v1102_v36, 0.0  ;;  %v1135_v40 = vmax.f32 %v1103_v37, 0.0 }
  0xf2   : > { %v1132_v41 = vmax.f32 %v1100_v38, 0.0  ;;  %v1133_v42 = vmax.f32 %v1101_v39, 0.0 }
  0xf3   : > { %1167 = vst.msk [vmem:[%s1837_s18 + $0xf0] sm:$0xff] %vm1136_vm3, %v1134_v50  ;;  %1168 = vst.msk [vmem:[%s1837_s18 + $0xf8] sm:$0xff] %vm1136_vm3, %v1135_v40 }
  0xf4   : > { %1165 = vst.msk [vmem:[%s1837_s18 + $0xe0] sm:$0xff] %vm1136_vm3, %v1132_v41  ;;  %1166 = vst.msk [vmem:[%s1837_s18 + $0xe8] sm:$0xff] %vm1136_vm3, %v1133_v42 }
  0xf5   : > { %1486 = shalt.err (!%p1483_p3)
}
  0xf6   : > { %s1487_s13 = scalar_lea.hbm %s1976_s28, 4096  ;;  %s1491_s17 = scalar_lea.hbm %s2037_s6, 8192 }
  0xf7   : > { %p1488_p4 = scmp.ne.s32.totalorder %s1976_s28, %s1487_s13  ;;  %p1492_p9 = scmp.lt.s32.totalorder %s1976_s28, %s2037_s6 }
  0xf8   : > { %p1493_p10 = scmp.lt.s32.totalorder %s1491_s17, %s1487_s13 }
  0xf9   : > { %p1489_p7 = pnand %p1488_p4, %p1613_p5 }
  0xfa   : > { %p1494_p11 = por %p1493_p10, %p1492_p9 }
  0xfb   : > { %p1490_p8 = pneg %p1489_p7 }
  0xfd   : > { %p1495_p12 = pnand %p1494_p11, %p1490_p8 }
  0xff   : > { %1498 = shalt.err (!%p1495_p12)
}
 0x100   : > { %s1539_s25 = smov 128  }
 0x101   : > { %1366 = dma.vmem_to_hbm [thread:$0]  (%p1613_p5), %s1978_s20, 4096, %s1976_s28, %s1990_s29, %s1539_s25, %s1539_s25, %s1535_s14  }
 0x102 PF: > { %p1372_p13 = scmp.ge.s32.totalorder %s1533_s24, 2  ;;  %s1198_s26 = sand.u32 1, %s1521_s21  }
 0x103   : > { %s1199_s9 = scalar_lea.sflag [#allocation3], %s1198_s26 }
 0x104   : > { %p1369_p0 = pnand %p1372_p13, %p1617_p6 }
 0x106   : > { %p1370_p1 = pneg %p1369_p0 }
 0x108   : > { %1516 = dma.done.wait (%p1370_p1), %s1199_s9, 4096  }
 0x109   : > { %1518 = vsyncadd (%p1370_p1), %s1199_s9, 4294963200  ;;  %p16_p2 = scmp.ge.s32.totalorder %s1600_s27, 4   ;;  %s2040_s21 = smov %s1525_s22 }
 0x10a   : > { %s2041_s22 = smov %s1529_s23  ;;  %s2042_s23 = smov %s1611_s30 }
 0x10b   : > { %s2043_s24 = smov %s1600_s27  ;;  %18 = sbr.rel (!%p16_p2) target bundleno = 3 (0x3), region = 88 }
 0x110   :  { %1204 = vsyncpa [#allocation3], 1 }
 0x111   :  { %1206 = vsyncpa [#allocation3 + $0x1], 1 }

// kernel: inception_forward.7
= control target key start
LH: loop header
LB: loop body
LE: loop exit
PB: predicated region body
PF: predicated region fallthrough
CT: control target
= control target key end

     0   :  { %s5133_s18 = smov 0   ;;  %s7087_s0 = inlined_call_operand.vmem [shape: bf16[2,16,16,4], index: 0, kind: input, shape index: {}]   ;;  %s7088_s1 = inlined_call_operand.vmem [shape: f32[1,4], index: 1, kind: input, shape index: {}]   ;;  %s7089_s2 = inlined_call_operand.vmem [shape: f32[1,4], index: 2, kind: input, shape index: {}]   ;;  %s7090_s3 = inlined_call_operand.vmem [shape: bf16[3,3,4,8], index: 3, kind: input, shape index: {}]   ;;  %s7091_s4 = inlined_call_operand.vmem [shape: bf16[2,256,8], index: 4, kind: output, shape index: {0}]   ;;  %s7092_s5 = inlined_call_operand.vmem [shape: f32[2,2,8], index: 5, kind: output, shape index: {1}]  }
   0x1 LB: > { %s4140_s19 = sadd.s32 4294967295, %s5100_s18   ;;  %p4144_p0 = scmp.ge.s32.totalorder %s5100_s18, 1  ;;  %s5100_s18 = sphi %s5133_s18, %s16_s18  }
   0x2   : > { %p190_p1 = scmp.lt.s32.totalorder %s5100_s18, 3 }
   0x4   : > { %p191_p2 = pnand %p4144_p0, %p190_p1 }
   0x6   : > { %194 = sbr.rel (%p191_p2) target bundleno = 683 (0x2ab), region = 36 }
   0xb   : > { %v4184_v0 = vld [vmem:[%s7090_s3 + $0x2] sm:$0x3]  ;;  %vm1545_vm0 = vcmask 1041408   ;;  %vm427_vm1 = vcmask 27648   ;;  %vm430_vm2 = vcmask 24576   ;;  %v5102_v2 = vmov 0  }
   0xc   : > { %5048 = vmatprep.subr.msk.bf16.mxu0 %vm1545_vm0, %v4184_v0  ;;  %5049 = vmatprep.subr.msk.bf16.mxu1 %vm1545_vm0, %v4184_v0  ;;  %v1547_v1 = vsel %vm1545_vm0, %v4184_v0, 0  ;;  %428 = vst.msk [vmem:[#allocation2] sm:$0xf] %vm427_vm1, %v5102_v2  ;;  %429 = vst.msk [vmem:[#allocation2 + $0x4] sm:$0xf] %vm427_vm1, %v5102_v2  ;;  %p222_p3 = scmp.lt.s32.totalorder %s4140_s19, 1 }
   0xd   : > { %431 = vst.msk [vmem:[#allocation2 + $0x8] sm:$0x1] %vm430_vm2, %v5102_v2  ;;  %434 = vst.msk [vmem:[#allocation2 + $0x14] sm:$0x1] %vm430_vm2, %v5102_v2  ;;  %4741 = vmatpush3.bf16.msra.mxu0 %v1547_v1  ;;  %5047 = vmatpush3.bf16.msra.mxu1 %v1547_v1  ;;  %v1058_v3 = vld [vmem:[%s7090_s3] sm:$0x3] }
   0xe   : > { %432 = vst.msk [vmem:[#allocation2 + $0xc] sm:$0xf] %vm427_vm1, %v5102_v2  ;;  %433 = vst.msk [vmem:[#allocation2 + $0x10] sm:$0xf] %vm427_vm1, %v5102_v2  ;;  %s7293_s19 = smov (!%p222_p3, %s4140_s19), 1  ;;  %5050 = vmatprep.subr.msk.bf16.mxu1 %vm1545_vm0, %v1058_v3  ;;  %vm1496_vm5 = vcmask 31744  }
   0xf   : > { %435 = vst.msk [vmem:[#allocation2 + $0x18] sm:$0xf] %vm427_vm1, %v5102_v2  ;;  %436 = vst.msk [vmem:[#allocation2 + $0x1c] sm:$0xf] %vm427_vm1, %v5102_v2  ;;  %v5213_v4 = vld [vmem:[%s7090_s3 + $0x4] sm:$0x3] }
  0x10   : > { %437 = vst.msk [vmem:[#allocation2 + $0x20] sm:$0x1] %vm430_vm2, %v5102_v2  ;;  %440 = vst.msk [vmem:[#allocation2 + $0x2c] sm:$0x1] %vm430_vm2, %v5102_v2  ;;  %5051 = vmatprep.subr.msk.bf16.mxu0 %vm1545_vm0, %v5213_v4  ;;  %s4442_s26 = sshll.u32 %s7293_s19, 7  ;;  %v5237_v18 = vsel %vm1545_vm0, %v1058_v3, 0 }
  0x11   : > { %438 = vst.msk [vmem:[#allocation2 + $0x24] sm:$0xf] %vm427_vm1, %v5102_v2  ;;  %439 = vst.msk [vmem:[#allocation2 + $0x28] sm:$0xf] %vm427_vm1, %v5102_v2  ;;  %vm1059_vm3 = vsmask.f32 3328  ;;  %s5224_s29 = scalar_lea.vmem %s7087_s0, %s4442_s26  ;;  %s6800_s9 = scalar_lea.vmem %s7091_s4, %s4442_s26 }
  0x12   : > { %441 = vst.msk [vmem:[#allocation2 + $0x30] sm:$0xf] %vm427_vm1, %v5102_v2  ;;  %442 = vst.msk [vmem:[#allocation2 + $0x34] sm:$0xf] %vm427_vm1, %v5102_v2  ;;  %vm1060_vm4 = vsmask.f32 7440 }
  0x13   : > { %443 = vst.msk [vmem:[#allocation2 + $0x38] sm:$0x1] %vm430_vm2, %v5102_v2  ;;  %446 = vst.msk [vmem:[#allocation2 + $0x44] sm:$0x1] %vm430_vm2, %v5102_v2  ;;  %v5229_v5 = vld [vmem:[%s7088_s1] ss:$0 sm:$0xff] }
  0x14   : > { %444 = vst.msk [vmem:[#allocation2 + $0x3c] sm:$0xf] %vm427_vm1, %v5102_v2  ;;  %445 = vst.msk [vmem:[#allocation2 + $0x40] sm:$0xf] %vm427_vm1, %v5102_v2  ;;  %v1004_v6 = vld [vmem:[#allocation2] sm:$0xf] }
  0x15   : > { %447 = vst.msk [vmem:[#allocation2 + $0x48] sm:$0xf] %vm427_vm1, %v5102_v2  ;;  %448 = vst.msk [vmem:[#allocation2 + $0x4c] sm:$0xf] %vm427_vm1, %v5102_v2  ;;  %v1005_v7 = vld [vmem:[#allocation2 + $0x4] sm:$0xf] }
  0x16   : > { %449 = vst.msk [vmem:[#allocation2 + $0x50] sm:$0x1] %vm430_vm2, %v5102_v2  ;;  %452 = vst.msk [vmem:[#allocation2 + $0x5c] sm:$0x1] %vm430_vm2, %v5102_v2  ;;  %v5231_v8 = vld [vmem:[#allocation2 + $0x8] sm:$0x1] }
  0x17   : > { %450 = vst.msk [vmem:[#allocation2 + $0x54] sm:$0xf] %vm427_vm1, %v5102_v2  ;;  %451 = vst.msk [vmem:[#allocation2 + $0x58] sm:$0xf] %vm427_vm1, %v5102_v2  ;;  %v1063_v9 = vshrl.u32 %v1004_v6, 16  ;;  %v1066_v10 = vshll.u32 %v1004_v6, 16 }
  0x18   : > { %453 = vst.msk [vmem:[#allocation2 + $0x60] sm:$0xf] %vm427_vm1, %v5102_v2  ;;  %454 = vst.msk [vmem:[#allocation2 + $0x64] sm:$0xf] %vm427_vm1, %v5102_v2  ;;  %v1072_v11 = vshll.u32 %v1005_v7, 16  ;;  %v1076_v12 = vshrl.u32 %v1005_v7, 16 }
  0x19   : > { %455 = vst.msk [vmem:[#allocation2 + $0x68] sm:$0x1] %vm430_vm2, %v5102_v2  ;;  %458 = vst.msk [vmem:[#allocation2 + $0x74] sm:$0x1] %vm430_vm2, %v5102_v2  ;;  %v4509_v13 = vld [vmem:[%s5224_s29] sm:$0xff]   ;;  %v4578_v14 = vld [vmem:[%s5224_s29 + $0x38] sm:$0xff]  }
  0x1a   : > { %456 = vst.msk [vmem:[#allocation2 + $0x6c] sm:$0xf] %vm427_vm1, %v5102_v2  ;;  %457 = vst.msk [vmem:[#allocation2 + $0x70] sm:$0xf] %vm427_vm1, %v5102_v2  ;;  %v1082_v15 = vshll.u32 %v5231_v8, 16  ;;  %v4510_v16 = vunpack.c.l.bf16 %v4509_v13  ;;  %v4511_v17 = vunpack.c.h.bf16 %v4509_v13  ;;  %v1065_v19 = vrot.slane %v1063_v9, 4 }
  0x1b   : > { %459 = vst.msk [vmem:[#allocation2 + $0x78] sm:$0xf] %vm427_vm1, %v5102_v2  ;;  %460 = vst.msk [vmem:[#allocation2 + $0x7c] sm:$0xf] %vm427_vm1, %v5102_v2  ;;  %vm563_vm6 = vsmask.f32 256  ;;  %v4538_v27 = vunpack.c.l.bf16 %v4578_v14  ;;  %v4539_v31 = vunpack.c.h.bf16 %v4578_v14 }
  0x1c   : > { %461 = vst.msk [vmem:[#allocation2 + $0x80] sm:$0x1] %vm430_vm2, %v5102_v2  ;;  %464 = vst.msk [vmem:[#allocation2 + $0x8c] sm:$0x1] %vm430_vm2, %v5102_v2  ;;  %vm564_vm7 = vsmask.f32 4368  ;;  %v309_v25 = vmul.f32 %v4510_v16, %v5229_v5  ;;  %v310_v26 = vmul.f32 %v4511_v17, %v5229_v5 }
  0x1d   : > { %462 = vst.msk [vmem:[#allocation2 + $0x84] sm:$0xf] %vm427_vm1, %v5102_v2  ;;  %463 = vst.msk [vmem:[#allocation2 + $0x88] sm:$0xf] %vm427_vm1, %v5102_v2  ;;  %v1068_v20 = vrot.slane %v1066_v10, 5  ;;  %v1074_v21 = vrot.slane %v1072_v11, 5  ;;  %v323_v36 = vmul.f32 %v4538_v27, %v5229_v5  ;;  %v324_v40 = vmul.f32 %v4539_v31, %v5229_v5 }
  0x1e   : > { %465 = vst.msk [vmem:[#allocation2 + $0x90] sm:$0xf] %vm427_vm1, %v5102_v2  ;;  %466 = vst.msk [vmem:[#allocation2 + $0x94] sm:$0xf] %vm427_vm1, %v5102_v2  ;;  %v1078_v22 = vrot.slane %v1076_v12, 4  ;;  %v1084_v24 = vrot.slane %v1082_v15, 5 }
  0x1f   : > { %467 = vst.msk [vmem:[#allocation2 + $0x98] sm:$0x1] %vm430_vm2, %v5102_v2  ;;  %470 = vst.msk [vmem:[#allocation2 + $0xa4] sm:$0x1] %vm430_vm2, %v5102_v2  ;;  %v5242_v23 = vld [vmem:[%s7089_s2] ss:$0 sm:$0xff]  ;;  %v1069_v29 = vor.u32 %v1068_v20, %v1065_v19 }
  0x20   : > { %468 = vst.msk [vmem:[#allocation2 + $0x9c] sm:$0xf] %vm427_vm1, %v5102_v2  ;;  %469 = vst.msk [vmem:[#allocation2 + $0xa0] sm:$0xf] %vm427_vm1, %v5102_v2  ;;  %vm888_vm8 = vsmask.f32 7938  ;;  %v1079_v30 = vor.u32 %v1078_v22, %v1074_v21  ;;  %v347_v34 = vadd.f32 %v5242_v23, %v309_v25  ;;  %v348_v35 = vadd.f32 %v5242_v23, %v310_v26 }
  0x21   : > { %471 = vst.msk [vmem:[#allocation2 + $0xa8] sm:$0xf] %vm427_vm1, %v5102_v2  ;;  %472 = vst.msk [vmem:[#allocation2 + $0xac] sm:$0xf] %vm427_vm1, %v5102_v2  ;;  %v4579_v28 = vld [vmem:[%s5224_s29 + $0x40] sm:$0xff]   ;;  %v1070_v38 = vrot.slane %v1069_v29, 4  ;;  %v361_v44 = vadd.f32 %v5242_v23, %v323_v36  ;;  %v362_v49 = vadd.f32 %v5242_v23, %v324_v40 }
  0x22   : > { %473 = vst.msk [vmem:[#allocation2 + $0xb0] sm:$0x1] %vm430_vm2, %v5102_v2  ;;  %476 = vst.msk [vmem:[#allocation2 + $0xbc] sm:$0x1] %vm430_vm2, %v5102_v2  ;;  %v4542_v32 = vunpack.c.l.bf16 %v4579_v28  ;;  %v4543_v37 = vunpack.c.h.bf16 %v4579_v28  ;;  %v1080_v39 = vrot.slane %v1079_v30, 4  ;;  %v379_v42 = vmax.f32 %v347_v34, 0.0 }
  0x23   : > { %474 = vst.msk [vmem:[#allocation2 + $0xb4] sm:$0xf] %vm427_vm1, %v5102_v2  ;;  %475 = vst.msk [vmem:[#allocation2 + $0xb8] sm:$0xf] %vm427_vm1, %v5102_v2  ;;  %v380_v43 = vmax.f32 %v348_v35, 0.0  ;;  %v4572_v46 = vld [vmem:[%s5224_s29 + $0x8] sm:$0xff]  }
  0x24   : > { %477 = vst.msk [vmem:[#allocation2 + $0xc0] sm:$0xf] %vm427_vm1, %v5102_v2  ;;  %478 = vst.msk [vmem:[#allocation2 + $0xc4] sm:$0xf] %vm427_vm1, %v5102_v2  ;;  %v325_v41 = vmul.f32 %v4542_v32, %v5229_v5  ;;  %v326_v45 = vmul.f32 %v4543_v37, %v5229_v5  ;;  %v4444_v52 = vpack.c.bf16 %v379_v42, %v379_v42  ;;  %v393_v54 = vmax.f32 %v361_v44, 0.0  ;;  %v4573_v44 = vld [vmem:[%s5224_s29 + $0x10] sm:$0xff]  }
  0x25   : > { %479 = vst.msk [vmem:[#allocation2 + $0xc8] sm:$0x1] %vm430_vm2, %v5102_v2  ;;  %482 = vst.msk [vmem:[#allocation2 + $0xd4] sm:$0x1] %vm430_vm2, %v5102_v2  ;;  %v4445_v53 = vpack.c.bf16 %v380_v43, %v380_v43  ;;  %v394_v55 = vmax.f32 %v362_v49, 0.0  ;;  %v4514_v58 = vunpack.c.l.bf16 %v4572_v46  ;;  %v4515_v11 = vunpack.c.h.bf16 %v4572_v46  ;;  %s4149_s26 = sshll.u32 %s7293_s19, 1 }
  0x26   : > { %480 = vst.msk [vmem:[#allocation2 + $0xcc] sm:$0xf] %vm427_vm1, %v5102_v2  ;;  %481 = vst.msk [vmem:[#allocation2 + $0xd0] sm:$0xf] %vm427_vm1, %v5102_v2  ;;  %v363_v50 = vadd.f32 %v5242_v23, %v325_v41  ;;  %v364_v56 = vadd.f32 %v5242_v23, %v326_v45  ;;  %v567_v59 = vshrl.u32 %v4444_v52, 16  ;;  %v570_v60 = vshll.u32 %v4444_v52, 16  ;;  %s235_s12 = scalar_lea.vmem %s7092_s5, %s4149_s26 }
  0x27   : > { %vm5249_vm9 = vmor %vm1059_vm3, %vm1060_vm4  ;;  %v575_v61 = vshrl.u32 %v4445_v53, 16  ;;  %v578_v62 = vshll.u32 %v4445_v53, 16  ;;  %v4458_v0 = vpack.c.bf16 %v393_v54, %v393_v54  ;;  %v4459_v1 = vpack.c.bf16 %v394_v55, %v394_v55  ;;  %v890_v10 = vld [vmem:[#allocation2 + $0xc] sm:$0xf]  ;;  %v896_v14 = vld [vmem:[#allocation2 + $0x14] sm:$0x1] }
  0x28   : > { %v1075_v47 = vsel %vm5249_vm9, %v1070_v38, %v1074_v21  ;;  %v1085_v48 = vsel %vm5249_vm9, %v1080_v39, %v1084_v24  ;;  %v395_v57 = vmax.f32 %v363_v50, 0.0  ;;  %vm5271_vm10 = vmor %vm563_vm6, %vm564_vm7  ;;  %v396_v2 = vmax.f32 %v364_v56, 0.0  ;;  %v941_v32 = vld [vmem:[#allocation2 + $0x60] sm:$0xf]  ;;  %v945_v34 = vld [vmem:[#allocation2 + $0x68] sm:$0x1] }
  0x29   : > { %v4185_v51 = vcombine.low %v1075_v47, %v1085_v48  ;;  %v569_v6 = vrot.slane %v567_v59, 7  ;;  %v577_v7 = vrot.slane %v575_v61, 7  ;;  %vm5277_vm11 = vmand %vm427_vm1, %vm888_vm8  ;;  %v311_v12 = vmul.f32 %v4514_v58, %v5229_v5  ;;  %v948_v48 = vld [vmem:[#allocation2 + $0x6c] sm:$0xf]  ;;  %v952_v55 = vld [vmem:[#allocation2 + $0x74] sm:$0x1] }
  0x2a   : > { %v4460_v3 = vpack.c.bf16 %v395_v57, %v395_v57  ;;  %vm5284_vm12 = vmand %vm430_vm2, %vm563_vm6  ;;  %v686_v15 = vshrl.u32 %v4458_v0, 16  ;;  %v689_v16 = vshll.u32 %v4458_v0, 16  ;;  %v694_v17 = vshrl.u32 %v4459_v1, 16  ;;  %v4580_v54 = vld [vmem:[%s5224_s29 + $0x48] sm:$0xff]  }
  0x2b   : > { %4742 = vmatprep.mubr.msk.bf16.mxu0 %vm1496_vm5, %v4185_v51  ;;  %v697_v19 = vshll.u32 %v4459_v1, 16  ;;  %v572_v20 = vor.u32 %v570_v60, %v569_v6  ;;  %v573_v21 = vrot.slane %v569_v6, 4  ;;  %v580_v22 = vor.u32 %v578_v62, %v577_v7 }
  0x2c   : > { %v582_v24 = vrot.slane %v577_v7, 4  ;;  %v688_v25 = vrot.slane %v686_v15, 7  ;;  %v696_v26 = vrot.slane %v694_v17, 7  ;;  %v4461_v27 = vpack.c.bf16 %v396_v2, %v396_v2 }
  0x2d   : > { %v703_v28 = vshrl.u32 %v4460_v3, 16  ;;  %v581_v29 = vsel %vm5271_vm10, %v573_v21, %v580_v22  ;;  %v891_v30 = vsel %vm5277_vm11, %v572_v20, %v890_v10  ;;  %v706_v35 = vshll.u32 %v4460_v3, 16 }
  0x2e   : > { %v897_v31 = vsel %vm5284_vm12, %v582_v24, %v896_v14  ;;  %892 = vst [vmem:[#allocation2 + $0xc] sm:$0xf] %v891_v30  ;;  %893 = vst.msk [vmem:[#allocation2 + $0x10] sm:$0xf] %vm427_vm1, %v581_v29  ;;  %v691_v36 = vor.u32 %v689_v16, %v688_v25  ;;  %v692_v37 = vrot.slane %v688_v25, 4  ;;  %v699_v38 = vor.u32 %v697_v19, %v696_v26 }
  0x2f   : > { %898 = vst [vmem:[#allocation2 + $0x14] sm:$0x1] %v897_v31  ;;  %v701_v39 = vrot.slane %v696_v26, 4  ;;  %v705_v40 = vrot.slane %v703_v28, 7  ;;  %v711_v41 = vshrl.u32 %v4461_v27, 16  ;;  %v714_v42 = vshll.u32 %v4461_v27, 16 }
  0x30   : > { %v312_v43 = vmul.f32 %v4515_v11, %v5229_v5  ;;  %v700_v45 = vsel %vm5271_vm10, %v692_v37, %v699_v38  ;;  %v942_v46 = vsel %vm5277_vm11, %v691_v36, %v941_v32  ;;  %v349_v49 = vadd.f32 %v5242_v23, %v311_v12 }
  0x31   : > { %v946_v47 = vsel %vm5284_vm12, %v701_v39, %v945_v34  ;;  %943 = vst [vmem:[#allocation2 + $0x60] sm:$0xf] %v942_v46  ;;  %944 = vst.msk [vmem:[#allocation2 + $0x64] sm:$0xf] %vm427_vm1, %v700_v45  ;;  %v708_v50 = vor.u32 %v706_v35, %v705_v40  ;;  %v709_v51 = vrot.slane %v705_v40, 4  ;;  %v713_v52 = vrot.slane %v711_v41, 7 }
  0x32   : > { %947 = vst [vmem:[#allocation2 + $0x68] sm:$0x1] %v946_v47  ;;  %v350_v53 = vadd.f32 %v5242_v23, %v312_v43  ;;  %v5309_v56 = vsel %vm1545_vm0, %v5213_v4, 0  ;;  %v381_v57 = vmax.f32 %v349_v49, 0.0  ;;  %v4518_v58 = vunpack.c.l.bf16 %v4573_v44 }
  0x33   : > { %v4519_v59 = vunpack.c.h.bf16 %v4573_v44  ;;  %v716_v60 = vor.u32 %v714_v42, %v713_v52  ;;  %v718_v61 = vrot.slane %v713_v52, 4  ;;  %v949_v62 = vsel %vm5277_vm11, %v708_v50, %v948_v48 }
  0x34   : > { %v382_v0 = vmax.f32 %v350_v53, 0.0  ;;  %950 = vst [vmem:[#allocation2 + $0x6c] sm:$0xf] %v949_v62  ;;  %v5314_v2 = vpack.c.bf16 %v381_v57, %v381_v57  ;;  %v313_v3 = vmul.f32 %v4518_v58, %v5229_v5  ;;  %v4546_v6 = vunpack.c.l.bf16 %v4580_v54 }
  0x35   : > { %v1007_v7 = vld [vmem:[#allocation2 + $0xc] sm:$0xf]  ;;  %v5317_v4 = vld [vmem:[#allocation2 + $0x10] sm:$0xf]  ;;  %v717_v11 = vsel %vm5271_vm10, %v709_v51, %v716_v60  ;;  %v953_v12 = vsel %vm5284_vm12, %v718_v61, %v952_v55  ;;  %v314_v14 = vmul.f32 %v4519_v59, %v5229_v5  ;;  %v4547_v15 = vunpack.c.h.bf16 %v4580_v54 }
  0x36   : > { %v1009_v10 = vld [vmem:[#allocation2 + $0x14] sm:$0x1]  ;;  %v1087_v16 = vshrl.u32 %v1007_v7, 16  ;;  %v1090_v17 = vshll.u32 %v1007_v7, 16  ;;  %v1096_v19 = vshll.u32 %v5317_v4, 16  ;;  %v1100_v20 = vshrl.u32 %v5317_v4, 16 }
  0x37   : > { %951 = vst.msk [vmem:[#allocation2 + $0x70] sm:$0xf] %vm427_vm1, %v717_v11  ;;  %954 = vst [vmem:[#allocation2 + $0x74] sm:$0x1] %v953_v12  ;;  %v1106_v21 = vshll.u32 %v1009_v10, 16  ;;  %v5328_v24 = vpack.c.bf16 %v382_v0, %v382_v0  ;;  %v584_v25 = vshrl.u32 %v5314_v2, 16  ;;  %v5332_v36 = vadd.f32 %v5242_v23, %v313_v3 }
  0x38   : > { %v1089_v26 = vrot.slane %v1087_v16, 4  ;;  %v1092_v27 = vrot.slane %v1090_v17, 5  ;;  %v1098_v28 = vrot.slane %v1096_v19, 5  ;;  %v1102_v29 = vrot.slane %v1100_v20, 4  ;;  %v1028_v30 = vld [vmem:[#allocation2 + $0x60] sm:$0xf] }
  0x39   : > { %v1108_v31 = vrot.slane %v1106_v21, 5  ;;  %v1029_v32 = vld [vmem:[#allocation2 + $0x64] sm:$0xf]  ;;  %v1030_v34 = vld [vmem:[#allocation2 + $0x68] sm:$0x1]  ;;  %v1255_v35 = vshrl.u32 %v1028_v30, 16  ;;  %v327_v37 = vmul.f32 %v4546_v6, %v5229_v5  ;;  %v352_v46 = vadd.f32 %v5242_v23, %v314_v14 }
  0x3a   : > { %v1093_v38 = vor.u32 %v1092_v27, %v1089_v26  ;;  %v1103_v39 = vor.u32 %v1102_v29, %v1098_v28  ;;  %v1258_v40 = vshll.u32 %v1028_v30, 16  ;;  %v1264_v41 = vshll.u32 %v1029_v32, 16 }
  0x3b   : > { %v1257_v42 = vrot.slane %v1255_v35, 4  ;;  %v1268_v43 = vshrl.u32 %v1029_v32, 16  ;;  %v1274_v44 = vshll.u32 %v1030_v34, 16  ;;  %v1031_v45 = vld [vmem:[#allocation2 + $0x6c] sm:$0xf]  ;;  %v328_v55 = vmul.f32 %v4547_v15, %v5229_v5 }
  0x3c   : > { %v1094_v47 = vrot.slane %v1093_v38, 4  ;;  %v1104_v48 = vrot.slane %v1103_v39, 4  ;;  %v1260_v49 = vrot.slane %v1258_v40, 5  ;;  %v1266_v50 = vrot.slane %v1264_v41, 5  ;;  %v903_v41 = vld [vmem:[#allocation2 + $0x20] sm:$0x1] }
  0x3d   : > { %v1270_v51 = vrot.slane %v1268_v43, 4  ;;  %v1276_v52 = vrot.slane %v1274_v44, 5  ;;  %v365_v57 = vadd.f32 %v5242_v23, %v327_v37  ;;  %v1279_v61 = vshrl.u32 %v1031_v45, 16 }
  0x3e   : > { %v1032_v53 = vld [vmem:[#allocation2 + $0x70] sm:$0xf]  ;;  %v1033_v54 = vld [vmem:[#allocation2 + $0x74] sm:$0x1]  ;;  %v1099_v58 = vsel %vm5249_vm9, %v1094_v47, %v1098_v28  ;;  %v1109_v59 = vsel %vm5249_vm9, %v1104_v48, %v1108_v31  ;;  %v1261_v60 = vor.u32 %v1260_v49, %v1257_v42  ;;  %v1282_v3 = vshll.u32 %v1031_v45, 16 }
  0x3f   : > { %v5342_v62 = vcombine.low %v1099_v58, %v1109_v59  ;;  %v1271_v0 = vor.u32 %v1270_v51, %v1266_v50  ;;  %v1288_v6 = vshll.u32 %v1032_v53, 16  ;;  %v1281_v10 = vrot.slane %v1279_v61, 4  ;;  %v899_v31 = vld [vmem:[#allocation2 + $0x18] sm:$0xf] }
  0x40   : > { %v1262_v7 = vrot.slane %v1261_v60, 4  ;;  %v1292_v11 = vshrl.u32 %v1032_v53, 16  ;;  %v1298_v12 = vshll.u32 %v1033_v54, 16  ;;  %v1284_v15 = vrot.slane %v1282_v3, 5  ;;  %v4298_v60 = vld [vmem:[%s7090_s3 + $0x6] sm:$0x3] }
  0x41   : > { %7137 = vst [vmem:[#allocation3_spill] sm:$0xff] %v5342_v62  ;;  %4743 = vmatmul.mubr.msk.bf16.vlgmr.msra.gmra.mxu0 %vm1496_vm5, %v5342_v62  ;;  %v1272_v14 = vrot.slane %v1271_v0, 4  ;;  %v1290_v16 = vrot.slane %v1288_v6, 5  ;;  %v586_v17 = vrot.slane %v584_v25, 7  ;;  %v587_v26 = vshll.u32 %v5314_v2, 16 }
  0x42   : > { %v1267_v19 = vsel %vm5249_vm9, %v1262_v7, %v1266_v50  ;;  %v1294_v20 = vrot.slane %v1292_v11, 4  ;;  %v1300_v21 = vrot.slane %v1298_v12, 5  ;;  %4809 = vmatpush3.bf16.msra.mxu0 %v5309_v56  ;;  %v1285_v28 = vor.u32 %v1284_v15, %v1281_v10  ;;  %v4581_v50 = vld [vmem:[%s5224_s29 + $0x50] sm:$0xff]   ;;  %v906_v10 = vld [vmem:[#allocation2 + $0x24] sm:$0xf] }
  0x43   : > { %v1277_v27 = vsel %vm5249_vm9, %v1272_v14, %v1276_v52  ;;  %v590_v29 = vrot.slane %v586_v17, 4  ;;  %v592_v30 = vshrl.u32 %v5328_v24, 16  ;;  %v589_v34 = vor.u32 %v587_v26, %v586_v17  ;;  %v910_v17 = vld [vmem:[#allocation2 + $0x2c] sm:$0x1] }
  0x44   : > { %v5353_v32 = vcombine.low %v1267_v19, %v1277_v27  ;;  %v1295_v25 = vor.u32 %v1294_v20, %v1290_v16  ;;  %v595_v35 = vshll.u32 %v5328_v24, 16  ;;  %v1286_v37 = vrot.slane %v1285_v28, 4 }
  0x45   : > { %v594_v38 = vrot.slane %v592_v30, 7  ;;  %v383_v56 = vmax.f32 %v5332_v36, 0.0  ;;  %v384_v39 = vmax.f32 %v352_v46, 0.0  ;;  %v900_v40 = vsel %vm5277_vm11, %v589_v34, %v899_v31 }
  0x46   : > { %7138 = vst [vmem:[#allocation4_spill] sm:$0xff] %v5353_v32  ;;  %4758 = vmatprep.mubr.msk.bf16.mxu1 %vm1496_vm5, %v5353_v32  ;;  %v1296_v2 = vrot.slane %v1295_v25, 4  ;;  %v366_v42 = vadd.f32 %v5242_v23, %v328_v55  ;;  %v397_v43 = vmax.f32 %v365_v57, 0.0  ;;  %v1291_v24 = vsel %vm5249_vm9, %v1286_v37, %v1290_v16  ;;  %901 = vst [vmem:[#allocation2 + $0x18] sm:$0xf] %v900_v40 }
  0x47   : > { %v597_v44 = vor.u32 %v595_v35, %v594_v38  ;;  %v599_v45 = vrot.slane %v594_v38, 4  ;;  %v4448_v36 = vpack.c.bf16 %v383_v56, %v383_v56  ;;  %v4449_v47 = vpack.c.bf16 %v384_v39, %v384_v39  ;;  %v4574_v39 = vld [vmem:[%s5224_s29 + $0x18] sm:$0xff]  }
  0x48   : > { %v1301_v46 = vsel %vm5249_vm9, %v1296_v2, %v1300_v21  ;;  %v398_v48 = vmax.f32 %v366_v42, 0.0  ;;  %v4462_v49 = vpack.c.bf16 %v397_v43, %v397_v43  ;;  %v4550_v6 = vunpack.c.l.bf16 %v4581_v50  ;;  %v4316_v2 = vld [vmem:[%s7090_s3 + $0x8] sm:$0x3] }
  0x49   : > { %v5367_v51 = vcombine.low %v1291_v24, %v1301_v46  ;;  %v598_v52 = vsel %vm5271_vm10, %v590_v29, %v597_v44  ;;  %v904_v53 = vsel %vm5284_vm12, %v599_v45, %v903_v41  ;;  %v601_v54 = vshrl.u32 %v4448_v36, 16  ;;  %v955_v29 = vld [vmem:[#allocation2 + $0x78] sm:$0xf]  ;;  %5053 = vmatprep.subr.msk.bf16.mxu0 %vm1545_vm0, %v4316_v2 }
  0x4a   : > { %902 = vst.msk [vmem:[#allocation2 + $0x1c] sm:$0xf] %vm427_vm1, %v598_v52  ;;  %905 = vst [vmem:[#allocation2 + $0x20] sm:$0x1] %v904_v53  ;;  %v604_v55 = vshll.u32 %v4448_v36, 16  ;;  %v609_v57 = vshrl.u32 %v4449_v47, 16  ;;  %v4463_v59 = vpack.c.bf16 %v398_v48, %v398_v48  ;;  %v4551_v14 = vunpack.c.h.bf16 %v4581_v50 }
  0x4b   : > { %7139 = vst [vmem:[#allocation5_spill] sm:$0xff] %v5367_v51  ;;  %v612_v58 = vshll.u32 %v4449_v47, 16  ;;  %4759 = vmatmul.mubr.msk.bf16.vlgmr.msra.gmra.mxu1 %vm1496_vm5, %v5367_v51  ;;  %v603_v61 = vrot.slane %v601_v54, 7  ;;  %v720_v0 = vshrl.u32 %v4462_v49, 16  ;;  %v723_v3 = vshll.u32 %v4462_v49, 16  ;;  %v5410_v54 = vld [vmem:[%s5224_s29 + $0x20] sm:$0xff]  }
  0x4c   : > { %4775 = vmatpush3.bf16.msra.mxu1 %v5237_v18  ;;  %v611_v7 = vrot.slane %v609_v57, 7  ;;  %v728_v11 = vshrl.u32 %v4463_v59, 16  ;;  %v731_v12 = vshll.u32 %v4463_v59, 16  ;;  %v329_v20 = vmul.f32 %v4550_v6, %v5229_v5  ;;  %v959_v48 = vld [vmem:[#allocation2 + $0x80] sm:$0x1] }
  0x4d   : > { %v606_v15 = vor.u32 %v604_v55, %v603_v61  ;;  %v607_v16 = vrot.slane %v603_v61, 4  ;;  %v722_v19 = vrot.slane %v720_v0, 7  ;;  %5052 = vmatprep.subr.msk.bf16.mxu1 %vm1545_vm0, %v4298_v60  ;;  %v1010_v21 = vld [vmem:[#allocation2 + $0x18] sm:$0xf]  ;;  %v330_v18 = vmul.f32 %v4551_v14, %v5229_v5 }
  0x4e   : > { %v614_v26 = vor.u32 %v612_v58, %v611_v7  ;;  %v616_v27 = vrot.slane %v611_v7, 4  ;;  %v730_v28 = vrot.slane %v728_v11, 7  ;;  %v1111_v30 = vshrl.u32 %v1010_v21, 16 }
  0x4f   : > { %v1114_v31 = vshll.u32 %v1010_v21, 16  ;;  %v907_v25 = vsel %vm5277_vm11, %v606_v15, %v906_v10  ;;  %v725_v34 = vor.u32 %v723_v3, %v722_v19  ;;  %v726_v38 = vrot.slane %v722_v19, 4 }
  0x50   : > { %v615_v35 = vsel %vm5271_vm10, %v607_v16, %v614_v26  ;;  %908 = vst [vmem:[#allocation2 + $0x24] sm:$0xf] %v907_v25  ;;  %v911_v37 = vsel %vm5284_vm12, %v616_v27, %v910_v17  ;;  %v733_v56 = vor.u32 %v731_v12, %v730_v28  ;;  %v1113_v42 = vrot.slane %v1111_v30, 4 }
  0x51   : > { %v5393_v40 = vld [vmem:[#allocation2 + $0x1c] sm:$0xf]  ;;  %v5395_v41 = vld [vmem:[#allocation2 + $0x20] sm:$0x1]  ;;  %v1116_v43 = vrot.slane %v1114_v31, 5  ;;  %v956_v24 = vsel %vm5277_vm11, %v725_v34, %v955_v29  ;;  %v367_v44 = vadd.f32 %v5242_v23, %v329_v20  ;;  %v735_v50 = vrot.slane %v730_v28, 4 }
  0x52   : > { %909 = vst.msk [vmem:[#allocation2 + $0x28] sm:$0xf] %vm427_vm1, %v615_v35  ;;  %912 = vst [vmem:[#allocation2 + $0x2c] sm:$0x1] %v911_v37  ;;  %v1120_v45 = vshll.u32 %v5393_v40, 16  ;;  %v1124_v36 = vshrl.u32 %v5393_v40, 16  ;;  %v734_v47 = vsel %vm5271_vm10, %v726_v38, %v733_v56  ;;  %v368_v52 = vadd.f32 %v5242_v23, %v330_v18 }
  0x53   : > { %v1130_v46 = vshll.u32 %v5395_v41, 16  ;;  %957 = vst [vmem:[#allocation2 + $0x78] sm:$0xf] %v956_v24  ;;  %v1117_v49 = vor.u32 %v1116_v43, %v1113_v42  ;;  %958 = vst.msk [vmem:[#allocation2 + $0x7c] sm:$0xf] %vm427_vm1, %v734_v47  ;;  %v399_v53 = vmax.f32 %v367_v44, 0.0  ;;  %v4522_v59 = vunpack.c.l.bf16 %v4574_v39 }
  0x54   : > { %v1122_v55 = vrot.slane %v1120_v45, 5  ;;  %v1126_v57 = vrot.slane %v1124_v36, 4  ;;  %v960_v61 = vsel %vm5284_vm12, %v735_v50, %v959_v48  ;;  %v400_v0 = vmax.f32 %v368_v52, 0.0 }
  0x55   : > { %v1132_v58 = vrot.slane %v1130_v46, 5  ;;  %v1118_v60 = vrot.slane %v1117_v49, 4  ;;  %v4464_v3 = vpack.c.bf16 %v399_v53, %v399_v53  ;;  %961 = vst [vmem:[#allocation2 + $0x80] sm:$0x1] %v960_v61  ;;  %v4523_v7 = vunpack.c.h.bf16 %v4574_v39 }
  0x56   : > { %v1127_v6 = vor.u32 %v1126_v57, %v1122_v55  ;;  %v315_v10 = vmul.f32 %v4522_v59, %v5229_v5  ;;  %v4526_v11 = vunpack.c.l.bf16 %v5410_v54  ;;  %v4465_v15 = vpack.c.bf16 %v400_v0, %v400_v0  ;;  %v962_v0 = vld [vmem:[#allocation2 + $0x84] sm:$0xf] }
  0x57   : > { %v1123_v12 = vsel %vm5249_vm9, %v1118_v60, %v1122_v55  ;;  %v5418_v14 = vld [vmem:[#allocation2 + $0x24] sm:$0xf]  ;;  %v737_v16 = vshrl.u32 %v4464_v3, 16  ;;  %v740_v17 = vshll.u32 %v4464_v3, 16  ;;  %v316_v27 = vmul.f32 %v4523_v7, %v5229_v5 }
  0x58   : > { %v1128_v19 = vrot.slane %v1127_v6, 4  ;;  %v1135_v26 = vshrl.u32 %v5418_v14, 16  ;;  %v5427_v28 = vadd.f32 %v5242_v23, %v315_v10  ;;  %v1138_v29 = vshll.u32 %v5418_v14, 16 }
  0x59   : > { %v5420_v20 = vld [vmem:[#allocation2 + $0x28] sm:$0xf]  ;;  %v5422_v21 = vld [vmem:[#allocation2 + $0x2c] sm:$0x1]  ;;  %v739_v50 = vrot.slane %v737_v16, 7  ;;  %v745_v57 = vshrl.u32 %v4465_v15, 16 }
  0x5a   : > { %v1144_v18 = vshll.u32 %v5420_v20, 16  ;;  %v1148_v30 = vshrl.u32 %v5420_v20, 16  ;;  %v1154_v31 = vshll.u32 %v5422_v21, 16  ;;  %v1034_v25 = vld [vmem:[#allocation2 + $0x78] sm:$0xf]  ;;  %v1133_v34 = vsel %vm5249_vm9, %v1128_v19, %v1132_v58 }
  0x5b   : > { %v1137_v35 = vrot.slane %v1135_v26, 4  ;;  %v1035_v37 = vld [vmem:[#allocation2 + $0x7c] sm:$0xf]  ;;  %v1303_v38 = vshrl.u32 %v1034_v25, 16  ;;  %v1306_v56 = vshll.u32 %v1034_v25, 16  ;;  %v5435_v39 = vcombine.low %v1123_v12, %v1133_v34 }
  0x5c   : > { %v1140_v2 = vrot.slane %v1138_v29, 5  ;;  %v1146_v42 = vrot.slane %v1144_v18, 5  ;;  %v1150_v43 = vrot.slane %v1148_v30, 4  ;;  %v1156_v24 = vrot.slane %v1154_v31, 5  ;;  %v1036_v48 = vld [vmem:[#allocation2 + $0x80] sm:$0x1] }
  0x5d   : > { %7140 = vst [vmem:[#allocation6_spill] sm:$0xff] %v5435_v39  ;;  %v1305_v44 = vrot.slane %v1303_v38, 4  ;;  %v1308_v45 = vrot.slane %v1306_v56, 5  ;;  %v1312_v36 = vshll.u32 %v1035_v37, 16  ;;  %4746 = vmatprep.mubr.msk.bf16.mxu0 %vm1496_vm5, %v5435_v39  ;;  %v1316_v49 = vshrl.u32 %v1035_v37, 16  ;;  %v4582_v18 = vld [vmem:[%s5224_s29 + $0x58] sm:$0xff]  }
  0x5e   : > { %v1141_v46 = vor.u32 %v1140_v2, %v1137_v35  ;;  %v1151_v47 = vor.u32 %v1150_v43, %v1146_v42  ;;  %v1322_v55 = vshll.u32 %v1036_v48, 16  ;;  %v742_v61 = vor.u32 %v740_v17, %v739_v50  ;;  %v966_v29 = vld [vmem:[#allocation2 + $0x8c] sm:$0x1] }
  0x5f   : > { %v1309_v52 = vor.u32 %v1308_v45, %v1305_v44  ;;  %v1314_v53 = vrot.slane %v1312_v36, 5  ;;  %v1318_v60 = vrot.slane %v1316_v49, 4  ;;  %v743_v7 = vrot.slane %v739_v50, 4  ;;  %v5465_v44 = vld [vmem:[%s5224_s29 + $0x60] sm:$0xff]  }
  0x60   : > { %v1142_v58 = vrot.slane %v1141_v46, 4  ;;  %v1152_v59 = vrot.slane %v1151_v47, 4  ;;  %v1324_v6 = vrot.slane %v1322_v55, 5  ;;  %v747_v10 = vrot.slane %v745_v57, 7 }
  0x61   : > { %v1310_v3 = vrot.slane %v1309_v52, 4  ;;  %v1319_v19 = vor.u32 %v1318_v60, %v1314_v53  ;;  %v748_v26 = vshll.u32 %v4465_v15, 16  ;;  %v963_v25 = vsel %vm5277_vm11, %v742_v61, %v962_v0  ;;  %v913_v0 = vld [vmem:[#allocation2 + $0x30] sm:$0xf] }
  0x62   : > { %v1147_v12 = vsel %vm5249_vm9, %v1142_v58, %v1146_v42  ;;  %v1157_v16 = vsel %vm5249_vm9, %v1152_v59, %v1156_v24  ;;  %v752_v31 = vrot.slane %v747_v10, 4  ;;  %964 = vst [vmem:[#allocation2 + $0x84] sm:$0xf] %v963_v25  ;;  %v354_v37 = vadd.f32 %v5242_v23, %v316_v27 }
  0x63   : > { %v5444_v30 = vcombine.low %v1147_v12, %v1157_v16  ;;  %v1315_v17 = vsel %vm5249_vm9, %v1310_v3, %v1314_v53  ;;  %v1320_v34 = vrot.slane %v1319_v19, 4  ;;  %v750_v35 = vor.u32 %v748_v26, %v747_v10 }
  0x64   : > { %v385_v38 = vmax.f32 %v5427_v28, 0.0  ;;  %v967_v15 = vsel %vm5284_vm12, %v752_v31, %v966_v29  ;;  %v4527_v56 = vunpack.c.h.bf16 %v5410_v54  ;;  %v317_v2 = vmul.f32 %v4526_v11, %v5229_v5  ;;  %v917_v29 = vld [vmem:[#allocation2 + $0x38] sm:$0x1] }
  0x65   : > { %7141 = vst [vmem:[#allocation7_spill] sm:$0xff] %v5444_v30  ;;  %4747 = vmatmul.mubr.msk.bf16.gmra.mxu0 %vm1496_vm5, %v5444_v30  ;;  %v4554_v42 = vunpack.c.l.bf16 %v4582_v18  ;;  %v1325_v43 = vsel %vm5249_vm9, %v1320_v34, %v1324_v6  ;;  %v751_v27 = vsel %vm5271_vm10, %v743_v7, %v750_v35  ;;  %968 = vst [vmem:[#allocation2 + $0x8c] sm:$0x1] %v967_v15  ;;  %v386_v28 = vmax.f32 %v354_v37, 0.0 }
  0x66   : > { %v4450_v24 = vpack.c.bf16 %v385_v38, %v385_v38  ;;  %v5467_v45 = vcombine.low %v1315_v17, %v1325_v43  ;;  %965 = vst.msk [vmem:[#allocation2 + $0x88] sm:$0xf] %vm427_vm1, %v751_v27  ;;  %v318_v36 = vmul.f32 %v4527_v56, %v5229_v5  ;;  %v355_v54 = vadd.f32 %v5242_v23, %v317_v2 }
  0x67   : > { %v4555_v11 = vunpack.c.h.bf16 %v4582_v18  ;;  %v4451_v46 = vpack.c.bf16 %v386_v28, %v386_v28  ;;  %v331_v49 = vmul.f32 %v4554_v42, %v5229_v5  ;;  %v4558_v55 = vunpack.c.l.bf16 %v5465_v44 }
  0x68   : > { %7142 = vst [vmem:[#allocation8_spill] sm:$0xff] %v5467_v45  ;;  %v618_v47 = vshrl.u32 %v4450_v24, 16  ;;  %v621_v48 = vshll.u32 %v4450_v24, 16  ;;  %4762 = vmatprep.mubr.msk.bf16.mxu1 %vm1496_vm5, %v5467_v45  ;;  %v356_v50 = vadd.f32 %v5242_v23, %v318_v36  ;;  %v387_v52 = vmax.f32 %v355_v54, 0.0 }
  0x69   : > { %v332_v53 = vmul.f32 %v4555_v11, %v5229_v5  ;;  %v626_v58 = vshrl.u32 %v4451_v46, 16  ;;  %v629_v59 = vshll.u32 %v4451_v46, 16  ;;  %v369_v60 = vadd.f32 %v5242_v23, %v331_v49  ;;  %v5479_v61 = vld [vmem:[#allocation2 + $0x84] sm:$0xf] }
  0x6a   : > { %v620_v57 = vrot.slane %v618_v47, 7  ;;  %v388_v3 = vmax.f32 %v356_v50, 0.0  ;;  %v4452_v6 = vpack.c.bf16 %v387_v52, %v387_v52  ;;  %v4559_v10 = vunpack.c.h.bf16 %v5465_v44 }
  0x6b   : > { %v370_v7 = vadd.f32 %v5242_v23, %v332_v53  ;;  %v1327_v12 = vshrl.u32 %v5479_v61, 16  ;;  %v1330_v16 = vshll.u32 %v5479_v61, 16  ;;  %v628_v17 = vrot.slane %v626_v58, 7 }
  0x6c   : > { %v623_v19 = vor.u32 %v621_v48, %v620_v57  ;;  %v624_v26 = vrot.slane %v620_v57, 4  ;;  %v5485_v18 = vld [vmem:[#allocation2 + $0x8c] sm:$0x1]  ;;  %v4453_v31 = vpack.c.bf16 %v388_v3, %v388_v3  ;;  %v635_v25 = vshrl.u32 %v4452_v6, 16  ;;  %v920_v48 = vld [vmem:[#allocation2 + $0x3c] sm:$0xf] }
  0x6d   : > { %v638_v34 = vshll.u32 %v4452_v6, 16  ;;  %v5487_v35 = vld [vmem:[#allocation2 + $0x88] sm:$0xf]  ;;  %v1329_v37 = vrot.slane %v1327_v12, 4  ;;  %v1332_v38 = vrot.slane %v1330_v16, 5  ;;  %v1346_v15 = vshll.u32 %v5485_v18, 16 }
  0x6e   : > { %v914_v56 = vsel %vm5277_vm11, %v623_v19, %v913_v0  ;;  %v1336_v2 = vshll.u32 %v5487_v35, 16  ;;  %v1340_v42 = vshrl.u32 %v5487_v35, 16  ;;  %v631_v43 = vor.u32 %v629_v59, %v628_v17  ;;  %v924_v59 = vld [vmem:[#allocation2 + $0x44] sm:$0x1]  ;;  %v5500_v6 = vld [vmem:[%s5224_s29 + $0x28] sm:$0xff]  }
  0x6f   : > { %v633_v27 = vrot.slane %v628_v17, 4  ;;  %915 = vst [vmem:[#allocation2 + $0x30] sm:$0xf] %v914_v56  ;;  %v1333_v28 = vor.u32 %v1332_v38, %v1329_v37  ;;  %v1348_v24 = vrot.slane %v1346_v15, 5  ;;  %v637_v44 = vrot.slane %v635_v25, 7 }
  0x70   : > { %v643_v36 = vshrl.u32 %v4453_v31, 16  ;;  %v1338_v54 = vrot.slane %v1336_v2, 5  ;;  %v1342_v11 = vrot.slane %v1340_v42, 4  ;;  %v632_v46 = vsel %vm5271_vm10, %v624_v26, %v631_v43 }
  0x71   : > { %v918_v47 = vsel %vm5284_vm12, %v633_v27, %v917_v29  ;;  %v1334_v49 = vrot.slane %v1333_v28, 4  ;;  %916 = vst.msk [vmem:[#allocation2 + $0x34] sm:$0xf] %vm427_vm1, %v632_v46  ;;  %v640_v50 = vor.u32 %v638_v34, %v637_v44  ;;  %v641_v52 = vrot.slane %v637_v44, 4 }
  0x72   : > { %919 = vst [vmem:[#allocation2 + $0x38] sm:$0x1] %v918_v47  ;;  %v645_v53 = vrot.slane %v643_v36, 7  ;;  %v1343_v57 = vor.u32 %v1342_v11, %v1338_v54  ;;  %v646_v58 = vshll.u32 %v4453_v31, 16  ;;  %v401_v0 = vmax.f32 %v369_v60, 0.0 }
  0x73   : > { %v402_v3 = vmax.f32 %v370_v7, 0.0  ;;  %v1339_v12 = vsel %vm5249_vm9, %v1334_v49, %v1338_v54  ;;  %v921_v19 = vsel %vm5277_vm11, %v640_v50, %v920_v48  ;;  %v333_v26 = vmul.f32 %v4558_v55, %v5229_v5 }
  0x74   : > { %v650_v16 = vrot.slane %v645_v53, 4  ;;  %v1344_v29 = vrot.slane %v1343_v57, 4  ;;  %v648_v17 = vor.u32 %v646_v58, %v645_v53  ;;  %922 = vst [vmem:[#allocation2 + $0x3c] sm:$0xf] %v921_v19  ;;  %v4466_v25 = vpack.c.bf16 %v401_v0, %v401_v0  ;;  %v969_v53 = vld [vmem:[#allocation2 + $0x90] sm:$0xf] }
  0x75   : > { %v4467_v34 = vpack.c.bf16 %v402_v3, %v402_v3  ;;  %v334_v7 = vmul.f32 %v4559_v10, %v5229_v5  ;;  %v5513_v37 = vadd.f32 %v5242_v23, %v333_v26  ;;  %v4530_v38 = vunpack.c.l.bf16 %v5500_v6 }
  0x76   : > { %v5507_v31 = vld [vmem:[#allocation2 + $0x30] sm:$0xf]  ;;  %v925_v60 = vsel %vm5284_vm12, %v650_v16, %v924_v59  ;;  %v1349_v55 = vsel %vm5249_vm9, %v1344_v29, %v1348_v24  ;;  %v649_v2 = vsel %vm5271_vm10, %v641_v52, %v648_v17  ;;  %v754_v5 = vshrl.u32 %v4466_v25, 16 }
  0x77   : > { %v1159_v15 = vshrl.u32 %v5507_v31, 16  ;;  %v1162_v56 = vshll.u32 %v5507_v31, 16  ;;  %926 = vst [vmem:[#allocation2 + $0x44] sm:$0x1] %v925_v60  ;;  %v5522_v42 = vcombine.low %v1339_v12, %v1349_v55  ;;  %923 = vst.msk [vmem:[#allocation2 + $0x40] sm:$0xf] %vm427_vm1, %v649_v2  ;;  %v372_v36 = vadd.f32 %v5242_v23, %v334_v7 }
  0x78   : > { %v757_v10 = vshll.u32 %v4466_v25, 16  ;;  %v762_v43 = vshrl.u32 %v4467_v34, 16  ;;  %v5525_v27 = vld [vmem:[#allocation2 + $0x34] sm:$0xf]  ;;  %v4531_v54 = vunpack.c.h.bf16 %v5500_v6  ;;  %v756_v48 = vrot.slane %v754_v5, 7 }
  0x79   : > { %7143 = vst [vmem:[#allocation9_spill] sm:$0xff] %v5522_v42  ;;  %v5527_v28 = vld [vmem:[#allocation2 + $0x38] sm:$0x1]  ;;  %v1161_v24 = vrot.slane %v1159_v15, 4  ;;  %v1164_v44 = vrot.slane %v1162_v56, 5  ;;  %4763 = vmatmul.mubr.msk.bf16.gmra.mxu1 %vm1496_vm5, %v5522_v42  ;;  %v1168_v11 = vshll.u32 %v5525_v27, 16 }
  0x7a   : > { %v1172_v46 = vshrl.u32 %v5525_v27, 16  ;;  %v1178_v47 = vshll.u32 %v5527_v28, 16  ;;  %v764_v50 = vrot.slane %v762_v43, 7  ;;  %v765_v52 = vshll.u32 %v4467_v34, 16  ;;  %v973_v7 = vld [vmem:[#allocation2 + $0x98] sm:$0x1] }
  0x7b   : > { %v1165_v49 = vor.u32 %v1164_v44, %v1161_v24  ;;  %v403_v57 = vmax.f32 %v5513_v37, 0.0  ;;  %v1170_v58 = vrot.slane %v1168_v11, 5  ;;  %v5537_v0 = vld [vmem:[#allocation2 + $0x3c] sm:$0xf]  ;;  %v759_v3 = vor.u32 %v757_v10, %v756_v48  ;;  %v5580_v6 = vld [vmem:[%s7089_s2] ss:$0 sm:$0xff] }
  0x7c   : > { %v1174_v23 = vrot.slane %v1172_v46, 4  ;;  %v1180_v59 = vrot.slane %v1178_v47, 5  ;;  %v1183_v16 = vshrl.u32 %v5537_v0, 16  ;;  %v1186_v19 = vshll.u32 %v5537_v0, 16  ;;  %7146 = vst [vmem:[#allocation12_spill] sm:$0xff] %v5580_v6 }
  0x7d   : > { %v1166_v12 = vrot.slane %v1165_v49, 4  ;;  %v760_v26 = vrot.slane %v756_v48, 4  ;;  %v767_v25 = vor.u32 %v765_v52, %v764_v50  ;;  %v769_v34 = vrot.slane %v764_v50, 4 }
  0x7e   : > { %v1175_v29 = vor.u32 %v1174_v23, %v1170_v58  ;;  %v5541_v17 = vld [vmem:[#allocation2 + $0x44] sm:$0x1]  ;;  %v970_v60 = vsel %vm5277_vm11, %v759_v3, %v969_v53  ;;  %v5547_v55 = vld [vmem:[#allocation2 + $0x40] sm:$0xf]  ;;  %v1185_v15 = vrot.slane %v1183_v16, 4  ;;  %v1188_v56 = vrot.slane %v1186_v19, 5 }
  0x7f   : > { %v1171_v37 = vsel %vm5249_vm9, %v1166_v12, %v1170_v58  ;;  %v1202_v2 = vshll.u32 %v5541_v17, 16  ;;  %971 = vst [vmem:[#allocation2 + $0x90] sm:$0xf] %v970_v60  ;;  %v1192_v10 = vshll.u32 %v5547_v55, 16  ;;  %v1196_v43 = vshrl.u32 %v5547_v55, 16  ;;  %v5570_v12 = vld [vmem:[%s5224_s29 + $0x30] sm:$0xff]  }
  0x80   : > { %v1176_v5 = vrot.slane %v1175_v29, 4  ;;  %v768_v24 = vsel %vm5271_vm10, %v760_v26, %v767_v25  ;;  %v1189_v44 = vor.u32 %v1188_v56, %v1185_v15  ;;  %v974_v46 = vsel %vm5284_vm12, %v769_v34, %v973_v7  ;;  %v5564_v3 = vld [vmem:[%s7088_s1] ss:$0 sm:$0xff] }
  0x81   : > { %v1204_v11 = vrot.slane %v1202_v2, 5  ;;  %972 = vst.msk [vmem:[#allocation2 + $0x94] sm:$0xf] %vm427_vm1, %v768_v24  ;;  %v404_v47 = vmax.f32 %v372_v36, 0.0  ;;  %v1194_v49 = vrot.slane %v1192_v10, 5  ;;  %v1198_v50 = vrot.slane %v1196_v43, 4 }
  0x82   : > { %v1181_v48 = vsel %vm5249_vm9, %v1176_v5, %v1180_v59  ;;  %975 = vst [vmem:[#allocation2 + $0x98] sm:$0x1] %v974_v46  ;;  %v4468_v52 = vpack.c.bf16 %v403_v57, %v403_v57  ;;  %v1190_v58 = vrot.slane %v1189_v44, 4  ;;  %7145 = vst [vmem:[#allocation11_spill] sm:$0xff] %v5564_v3  ;;  %v319_v36 = vmul.f32 %v5564_v3, %v4530_v38  ;;  %v976_v5 = vld [vmem:[#allocation2 + $0x9c] sm:$0xf] }
  0x83   : > { %v5559_v53 = vcombine.low %v1171_v37, %v1181_v48  ;;  %v4469_v23 = vpack.c.bf16 %v404_v47, %v404_v47  ;;  %v1199_v59 = vor.u32 %v1198_v50, %v1194_v49  ;;  %v320_v57 = vmul.f32 %v5564_v3, %v4531_v54  ;;  %v980_v47 = vld [vmem:[#allocation2 + $0xa4] sm:$0x1] }
  0x84   : > { %v771_v16 = vshrl.u32 %v4468_v52, 16  ;;  %v774_v19 = vshll.u32 %v4468_v52, 16  ;;  %v1195_v26 = vsel %vm5249_vm9, %v1190_v58, %v1194_v49  ;;  %v357_v38 = vadd.f32 %v5580_v6, %v319_v36 }
  0x85   : > { %7144 = vst [vmem:[#allocation10_spill] sm:$0xff] %v5559_v53  ;;  %4750 = vmatprep.mubr.msk.bf16.mxu0 %vm1496_vm5, %v5559_v53  ;;  %v779_v29 = vshrl.u32 %v4469_v23, 16  ;;  %v782_v25 = vshll.u32 %v4469_v23, 16  ;;  %v1200_v34 = vrot.slane %v1199_v59, 4  ;;  %v358_v54 = vadd.f32 %v5580_v6, %v320_v57 }
  0x86   : > { %v5583_v60 = vld [vmem:[#allocation2 + $0x90] sm:$0xf]  ;;  %v773_v7 = vrot.slane %v771_v16, 7  ;;  %v4534_v37 = vunpack.c.l.bf16 %v5570_v12  ;;  %v389_v10 = vmax.f32 %v357_v38, 0.0  ;;  %v4584_v38 = vld [vmem:[%s5224_s29 + $0x68] sm:$0xff]   ;;  %vm2018_vm13 = vcmask 1042432  }
  0x87   : > { %v1351_v15 = vshrl.u32 %v5583_v60, 16  ;;  %v1354_v56 = vshll.u32 %v5583_v60, 16  ;;  %v781_v2 = vrot.slane %v779_v29, 7  ;;  %v1205_v43 = vsel %vm5249_vm9, %v1200_v34, %v1204_v11 }
  0x88   : > { %v5591_v24 = vld [vmem:[#allocation2 + $0x94] sm:$0xf]  ;;  %v776_v44 = vor.u32 %v774_v19, %v773_v7  ;;  %v777_v46 = vrot.slane %v773_v7, 4  ;;  %v390_v48 = vmax.f32 %v358_v54, 0.0  ;;  %v5593_v49 = vcombine.low %v1195_v26, %v1205_v43 }
  0x89   : > { %v5595_v50 = vld [vmem:[#allocation2 + $0x98] sm:$0x1]  ;;  %v1353_v52 = vrot.slane %v1351_v15, 4  ;;  %v1356_v58 = vrot.slane %v1354_v56, 5  ;;  %v1360_v23 = vshll.u32 %v5591_v24, 16  ;;  %v1364_v36 = vshrl.u32 %v5591_v24, 16 }
  0x8a   : > { %7147 = vst [vmem:[#allocation13_spill] sm:$0xff] %v5593_v49  ;;  %v1370_v59 = vshll.u32 %v5595_v50, 16  ;;  %v784_v11 = vor.u32 %v782_v25, %v781_v2  ;;  %v786_v16 = vrot.slane %v781_v2, 4  ;;  %4751 = vmatmul.mubr.msk.bf16.gmra.mxu0 %vm1496_vm5, %v5593_v49  ;;  %v977_v26 = vsel %vm5277_vm11, %v776_v44, %v976_v5 }
  0x8b   : > { %v1357_v19 = vor.u32 %v1356_v58, %v1353_v52  ;;  %v1362_v57 = vrot.slane %v1360_v23, 5  ;;  %v4454_v29 = vpack.c.bf16 %v389_v10, %v389_v10  ;;  %v1366_v34 = vrot.slane %v1364_v36, 4  ;;  %978 = vst [vmem:[#allocation2 + $0x9c] sm:$0xf] %v977_v26 }
  0x8c   : > { %v1372_v7 = vrot.slane %v1370_v59, 5  ;;  %v785_v54 = vsel %vm5271_vm10, %v777_v46, %v784_v11  ;;  %v981_v25 = vsel %vm5284_vm12, %v786_v16, %v980_v47  ;;  %v4455_v56 = vpack.c.bf16 %v390_v48, %v390_v48  ;;  %v927_v59 = vld [vmem:[#allocation2 + $0x48] sm:$0xf] }
  0x8d   : > { %v1358_v15 = vrot.slane %v1357_v19, 4  ;;  %979 = vst.msk [vmem:[#allocation2 + $0xa0] sm:$0xf] %vm427_vm1, %v785_v54  ;;  %982 = vst [vmem:[#allocation2 + $0xa4] sm:$0x1] %v981_v25  ;;  %v652_v2 = vshrl.u32 %v4454_v29, 16  ;;  %v1367_v52 = vor.u32 %v1366_v34, %v1362_v57  ;;  %v4535_v5 = vunpack.c.h.bf16 %v5570_v12 }
  0x8e   : > { %v655_v43 = vshll.u32 %v4454_v29, 16  ;;  %v321_v10 = vmul.f32 %v5564_v3, %v4534_v37  ;;  %v4562_v44 = vunpack.c.l.bf16 %v4584_v38  ;;  %v660_v23 = vshrl.u32 %v4455_v56, 16 }
  0x8f   : > { %v1363_v46 = vsel %vm5249_vm9, %v1358_v15, %v1362_v57  ;;  %v654_v58 = vrot.slane %v652_v2, 7  ;;  %v663_v36 = vshll.u32 %v4455_v56, 16  ;;  %v1368_v47 = vrot.slane %v1367_v52, 4 }
  0x90   : > { %v322_v11 = vmul.f32 %v5564_v3, %v4535_v5  ;;  %v359_v48 = vadd.f32 %v5580_v6, %v321_v10  ;;  %v4563_v16 = vunpack.c.h.bf16 %v4584_v38  ;;  %v662_v29 = vrot.slane %v660_v23, 7 }
  0x91   : > { %v657_v19 = vor.u32 %v655_v43, %v654_v58  ;;  %v658_v26 = vrot.slane %v654_v58, 4  ;;  %v335_v12 = vmul.f32 %v5564_v3, %v4562_v44  ;;  %v1373_v37 = vsel %vm5249_vm9, %v1368_v47, %v1372_v7  ;;  %v931_v43 = vld [vmem:[#allocation2 + $0x50] sm:$0x1] }
  0x92   : > { %v360_v57 = vadd.f32 %v5580_v6, %v322_v11  ;;  %v391_v34 = vmax.f32 %v359_v48, 0.0  ;;  %v336_v54 = vmul.f32 %v5564_v3, %v4563_v16  ;;  %v5621_v25 = vcombine.low %v1363_v46, %v1373_v37  ;;  %v5623_v15 = vld [vmem:[#allocation2 + $0x9c] sm:$0xf] }
  0x93   : > { %v665_v56 = vor.u32 %v663_v36, %v662_v29  ;;  %v667_v2 = vrot.slane %v662_v29, 4  ;;  %v928_v38 = vsel %vm5277_vm11, %v657_v19, %v927_v59  ;;  %v1375_v7 = vshrl.u32 %v5623_v15, 16  ;;  %v5645_v19 = vld [vmem:[%s5224_s29 + $0x70] sm:$0xff]  }
  0x94   : > { %7148 = vst [vmem:[#allocation14_spill] sm:$0xff] %v5621_v25  ;;  %v5627_v52 = vld [vmem:[#allocation2 + $0xa0] sm:$0xf]  ;;  %v5629_v5 = vld [vmem:[#allocation2 + $0xa4] sm:$0x1]  ;;  %v1378_v10 = vshll.u32 %v5623_v15, 16  ;;  %v4456_v44 = vpack.c.bf16 %v391_v34, %v391_v34  ;;  %v373_v46 = vadd.f32 %v5580_v6, %v335_v12  ;;  %4766 = vmatprep.mubr.msk.bf16.mxu1 %vm1496_vm5, %v5621_v25 }
  0x95   : > { %929 = vst [vmem:[#allocation2 + $0x48] sm:$0xf] %v928_v38  ;;  %v1384_v58 = vshll.u32 %v5627_v52, 16  ;;  %v1388_v23 = vshrl.u32 %v5627_v52, 16  ;;  %v1394_v36 = vshll.u32 %v5629_v5, 16  ;;  %v666_v47 = vsel %vm5271_vm10, %v658_v26, %v665_v56 }
  0x96   : > { %v1377_v59 = vrot.slane %v1375_v7, 4  ;;  %v1380_v11 = vrot.slane %v1378_v10, 5  ;;  %930 = vst.msk [vmem:[#allocation2 + $0x4c] sm:$0xf] %vm427_vm1, %v666_v47  ;;  %v932_v48 = vsel %vm5284_vm12, %v667_v2, %v931_v43  ;;  %v392_v16 = vmax.f32 %v360_v57, 0.0 }
  0x97   : > { %v1386_v29 = vrot.slane %v1384_v58, 5  ;;  %v1390_v12 = vrot.slane %v1388_v23, 4  ;;  %v1396_v37 = vrot.slane %v1394_v36, 5  ;;  %933 = vst [vmem:[#allocation2 + $0x50] sm:$0x1] %v932_v48  ;;  %v669_v34 = vshrl.u32 %v4456_v44, 16 }
  0x98   : > { %v1381_v38 = vor.u32 %v1380_v11, %v1377_v59  ;;  %v4457_v22 = vpack.c.bf16 %v392_v16, %v392_v16  ;;  %v672_v1 = vshll.u32 %v4456_v44, 16  ;;  %v374_v26 = vadd.f32 %v5580_v6, %v336_v54  ;;  %v934_v43 = vld [vmem:[#allocation2 + $0x54] sm:$0xf] }
  0x99   : > { %v1391_v56 = vor.u32 %v1390_v12, %v1386_v29  ;;  %v671_v7 = vrot.slane %v669_v34, 7  ;;  %v405_v10 = vmax.f32 %v373_v46, 0.0  ;;  %v4566_v47 = vunpack.c.l.bf16 %v5645_v19  ;;  %v938_v34 = vld [vmem:[#allocation2 + $0x5c] sm:$0x1] }
  0x9a   : > { %v1382_v25 = vrot.slane %v1381_v38, 4  ;;  %v677_v2 = vshrl.u32 %v4457_v22, 16  ;;  %v680_v57 = vshll.u32 %v4457_v22, 16  ;;  %v406_v42 = vmax.f32 %v374_v26, 0.0 }
  0x9b   : > { %v1392_v58 = vrot.slane %v1391_v56, 4  ;;  %v674_v36 = vor.u32 %v672_v1, %v671_v7  ;;  %v675_v48 = vrot.slane %v671_v7, 4  ;;  %v4470_v59 = vpack.c.bf16 %v405_v10, %v405_v10 }
  0x9c   : > { %v5649_v23 = vld [vmem:[#allocation2 + $0x48] sm:$0xf]  ;;  %v1387_v44 = vsel %vm5249_vm9, %v1382_v25, %v1386_v29  ;;  %v679_v11 = vrot.slane %v677_v2, 7  ;;  %v4471_v1 = vpack.c.bf16 %v406_v42, %v406_v42  ;;  %vm2019_vm14 = vcmask 1046532  }
  0x9d   : > { %v1207_v54 = vshrl.u32 %v5649_v23, 16  ;;  %v1210_v46 = vshll.u32 %v5649_v23, 16  ;;  %v1397_v16 = vsel %vm5249_vm9, %v1392_v58, %v1396_v37  ;;  %v5657_v22 = vld [vmem:[#allocation2 + $0x4c] sm:$0xf]  ;;  %v935_v12 = vsel %vm5277_vm11, %v674_v36, %v934_v43  ;;  %vm5706_vm15 = vmor %vm2018_vm13, %vm2019_vm14 }
  0x9e   : > { %v788_v38 = vshrl.u32 %v4470_v59, 16  ;;  %v5661_v26 = vcombine.low %v1387_v44, %v1397_v16  ;;  %v5663_v56 = vld [vmem:[#allocation2 + $0x50] sm:$0x1]  ;;  %v1216_v7 = vshll.u32 %v5657_v22, 16  ;;  %936 = vst [vmem:[#allocation2 + $0x54] sm:$0xf] %v935_v12  ;;  %v682_v2 = vor.u32 %v680_v57, %v679_v11 }
  0x9f   : > { %v1209_v25 = vrot.slane %v1207_v54, 4  ;;  %v1212_v29 = vrot.slane %v1210_v46, 5  ;;  %v1220_v10 = vshrl.u32 %v5657_v22, 16  ;;  %v1226_v37 = vshll.u32 %v5663_v56, 16  ;;  %v983_v12 = vld [vmem:[#allocation2 + $0xa8] sm:$0xf] }
  0xa0   : > { %7149 = vst [vmem:[#allocation15_spill] sm:$0xff] %v5661_v26  ;;  %v684_v58 = vrot.slane %v679_v11, 4  ;;  %4767 = vmatmul.mubr.msk.bf16.gmra.mxu1 %vm1496_vm5, %v5661_v26  ;;  %v1218_v43 = vrot.slane %v1216_v7, 5  ;;  %v790_v36 = vrot.slane %v788_v38, 7  ;;  %v791_v44 = vshll.u32 %v4470_v59, 16 }
  0xa1   : > { %v1213_v42 = vor.u32 %v1212_v29, %v1209_v25  ;;  %v1222_v16 = vrot.slane %v1220_v10, 4  ;;  %v1228_v45 = vrot.slane %v1226_v37, 5  ;;  %v683_v54 = vsel %vm5271_vm10, %v675_v48, %v682_v2 }
  0xa2   : > { %v939_v46 = vsel %vm5284_vm12, %v684_v58, %v938_v34  ;;  %937 = vst.msk [vmem:[#allocation2 + $0x58] sm:$0xf] %vm427_vm1, %v683_v54  ;;  %v793_v57 = vor.u32 %v791_v44, %v790_v36  ;;  %v794_v11 = vrot.slane %v790_v36, 4  ;;  %v796_v26 = vshrl.u32 %v4471_v1, 16  ;;  %v5690_v44 = vld [vmem:[#allocation2] sm:$0xf] }
  0xa3   : > { %v1214_v51 = vrot.slane %v1213_v42, 4  ;;  %940 = vst [vmem:[#allocation2 + $0x5c] sm:$0x1] %v939_v46  ;;  %v1223_v25 = vor.u32 %v1222_v16, %v1218_v43  ;;  %v799_v29 = vshll.u32 %v4471_v1, 16  ;;  %v4567_v59 = vunpack.c.h.bf16 %v5645_v19 }
  0xa4   : > { %v337_v38 = vmul.f32 %v5564_v3, %v4566_v47  ;;  %v798_v7 = vrot.slane %v796_v26, 7  ;;  %v984_v34 = vsel %vm5277_vm11, %v793_v57, %v983_v12  ;;  %v987_v26 = vld [vmem:[#allocation2 + $0xb0] sm:$0x1]  ;;  %v4249_v16 = vrot.slane %v5690_v44, 9 }
  0xa5   : > { %v1219_v48 = vsel %vm5249_vm9, %v1214_v51, %v1218_v43  ;;  %v1224_v10 = vrot.slane %v1223_v25, 4  ;;  %v5681_v37 = vld [vmem:[#allocation2 + $0x54] sm:$0xf]  ;;  %985 = vst [vmem:[#allocation2 + $0xa8] sm:$0xf] %v984_v34  ;;  %v338_v2 = vmul.f32 %v5564_v3, %v4567_v59  ;;  %v7153_v3 = vrot.slane %v5231_v8, 5 }
  0xa6   : > { %v375_v1 = vadd.f32 %v5580_v6, %v337_v38  ;;  %v1231_v19 = vshrl.u32 %v5681_v37, 16  ;;  %v1234_v47 = vshll.u32 %v5681_v37, 16  ;;  %v801_v58 = vor.u32 %v799_v29, %v798_v7 }
  0xa7   : > { %v803_v51 = vrot.slane %v798_v7, 4  ;;  %v1229_v42 = vsel %vm5249_vm9, %v1224_v10, %v1228_v45  ;;  %v376_v43 = vadd.f32 %v5580_v6, %v338_v2  ;;  %v5710_v7 = vld [vmem:[#allocation2 + $0x4] sm:$0xf]  ;;  %vm3950_vm2 = vcmask 57344  }
  0xa8   : > { %v407_v36 = vmax.f32 %v375_v1, 0.0  ;;  %v5693_v54 = vcombine.low %v1219_v48, %v1229_v42  ;;  %v1233_v46 = vrot.slane %v1231_v19, 4  ;;  %v1236_v12 = vrot.slane %v1234_v47, 5  ;;  %v5074_v19 = vld [vmem:[#allocation2 + $0x14] sm:$0x1] }
  0xa9   : > { %v802_v57 = vsel %vm5271_vm10, %v794_v11, %v801_v58  ;;  %v5697_v25 = vld [vmem:[#allocation2 + $0x58] sm:$0xf]  ;;  %v988_v45 = vsel %vm5284_vm12, %v803_v51, %v987_v26  ;;  %v408_v59 = vmax.f32 %v376_v43, 0.0  ;;  %v2023_v11 = vrot.slane %v5710_v7, 5 }
  0xaa   : > { %7150 = vst [vmem:[#allocation16_spill] sm:$0xff] %v5693_v54  ;;  %v5699_v29 = vld [vmem:[#allocation2 + $0x5c] sm:$0x1]  ;;  %986 = vst.msk [vmem:[#allocation2 + $0xac] sm:$0xf] %vm427_vm1, %v802_v57  ;;  %v4472_v38 = vpack.c.bf16 %v407_v36, %v407_v36  ;;  %4754 = vmatprep.mubr.msk.bf16.mxu0 %vm1496_vm5, %v5693_v54  ;;  %v1237_v34 = vor.u32 %v1236_v12, %v1233_v46  ;;  %v1240_v10 = vshll.u32 %v5697_v25, 16 }
  0xab   : > { %v1244_v2 = vshrl.u32 %v5697_v25, 16  ;;  %v1250_v1 = vshll.u32 %v5699_v29, 16  ;;  %989 = vst [vmem:[#allocation2 + $0xb0] sm:$0x1] %v988_v45  ;;  %v2033_v47 = vrot.slane %v5074_v19, 5  ;;  %v4473_v58 = vpack.c.bf16 %v408_v59, %v408_v59 }
  0xac   : > { %v805_v51 = vshrl.u32 %v4472_v38, 16  ;;  %v808_v26 = vshll.u32 %v4472_v38, 16  ;;  %v1238_v42 = vrot.slane %v1237_v34, 4  ;;  %v1242_v43 = vrot.slane %v1240_v10, 5  ;;  %v5718_v57 = vld [vmem:[#allocation2 + $0xa8] sm:$0xf] }
  0xad   : > { %v1246_v36 = vrot.slane %v1244_v2, 4  ;;  %v2024_v46 = vsel %vm5706_vm15, %v4249_v16, %v2023_v11  ;;  %v1399_v12 = vshrl.u32 %v5718_v57, 16  ;;  %v1402_v32 = vshll.u32 %v5718_v57, 16  ;;  %v990_v59 = vld [vmem:[#allocation2 + $0xb4] sm:$0xf] }
  0xae   : > { %v807_v54 = vrot.slane %v805_v51, 7  ;;  %v813_v49 = vshrl.u32 %v4473_v58, 16  ;;  %v1252_v53 = vrot.slane %v1250_v1, 5  ;;  %v816_v19 = vshll.u32 %v4473_v58, 16 }
  0xaf   : > { %v1247_v45 = vor.u32 %v1246_v36, %v1242_v43  ;;  %v2025_v30 = vrot.slane %v2023_v11, 4  ;;  %v1243_v38 = vsel %vm5249_vm9, %v1238_v42, %v1242_v43  ;;  %v1401_v34 = vrot.slane %v1399_v12, 4 }
  0xb0   : > { %v1404_v10 = vrot.slane %v1402_v32, 5  ;;  %v810_v2 = vor.u32 %v808_v26, %v807_v54  ;;  %v811_v16 = vrot.slane %v807_v54, 4  ;;  %v815_v6 = vrot.slane %v813_v49, 7  ;;  %v994_v26 = vld [vmem:[#allocation2 + $0xbc] sm:$0x1] }
  0xb1   : > { %v1248_v39 = vrot.slane %v1247_v45, 4  ;;  %v5726_v62 = vld [vmem:[#allocation2 + $0xac] sm:$0xf]  ;;  %v2027_v51 = vsel %vm5706_vm15, %v2025_v30, %v7153_v3 }
  0xb2   : > { %v5732_v1 = vld [vmem:[#allocation2 + $0xb0] sm:$0x1]  ;;  %v1405_v58 = vor.u32 %v1404_v10, %v1401_v34  ;;  %v1408_v11 = vshll.u32 %v5726_v62, 16  ;;  %v1412_v42 = vshrl.u32 %v5726_v62, 16  ;;  %v991_v32 = vsel %vm5277_vm11, %v810_v2, %v990_v59 }
  0xb3   : > { %v1253_v54 = vsel %vm5249_vm9, %v1248_v39, %v1252_v53  ;;  %v1418_v49 = vshll.u32 %v5732_v1, 16  ;;  %v818_v8 = vor.u32 %v816_v19, %v815_v6  ;;  %v820_v43 = vrot.slane %v815_v6, 4  ;;  %992 = vst [vmem:[#allocation2 + $0xb4] sm:$0xf] %v991_v32  ;;  %v5750_v6 = vld [vmem:[#allocation2 + $0xc] sm:$0xf] }
  0xb4   : > { %v5741_v30 = vcombine.low %v1243_v38, %v1253_v54  ;;  %v1406_v3 = vrot.slane %v1405_v58, 4  ;;  %v1410_v36 = vrot.slane %v1408_v11, 5  ;;  %v1414_v12 = vrot.slane %v1412_v42, 4 }
  0xb5   : > { %v819_v45 = vsel %vm5271_vm10, %v811_v16, %v818_v8  ;;  %v995_v59 = vsel %vm5284_vm12, %v820_v43, %v994_v26  ;;  %v4266_v34 = vcombine.low %v2024_v46, %v2027_v51  ;;  %v1420_v53 = vrot.slane %v1418_v49, 5  ;;  %v5758_v46 = vld [vmem:[#allocation2 + $0x18] sm:$0xf] }
  0xb6   : > { %4755 = vmatmul.mubr.msk.bf16.gmra.mxu0 %vm1496_vm5, %v5741_v30  ;;  %v1415_v39 = vor.u32 %v1414_v12, %v1410_v36  ;;  %993 = vst.msk [vmem:[#allocation2 + $0xb8] sm:$0xf] %vm427_vm1, %v819_v45  ;;  %996 = vst [vmem:[#allocation2 + $0xbc] sm:$0x1] %v995_v59  ;;  %v4250_v19 = vrot.slane %v5750_v6, 9  ;;  %v7154_v38 = vrot.slane %v5317_v4, 5  ;;  %v1411_v2 = vsel %vm5249_vm9, %v1406_v3, %v1410_v36 }
  0xb7   : > { %4810 = vmatprep.mubr.msk.bf16.mxu0 %vm1496_vm5, %v4266_v34  ;;  %v4251_v16 = vrot.slane %v5758_v46, 9  ;;  %v2037_v32 = vrot.slane %v5393_v40, 5  ;;  %v2040_v54 = vrot.slane %v5395_v41, 5  ;;  %v4252_v49 = vrot.slane %v5418_v14, 9  ;;  %v5077_v14 = vld [vmem:[%s7090_s3 + $0x8] sm:$0x3] }
  0xb8   : > { %v2032_v10 = vrot.slane %v7154_v38, 4  ;;  %v1416_v51 = vrot.slane %v1415_v39, 4  ;;  %v7155_v58 = vmov %v7154_v38  ;;  %v2044_v36 = vrot.slane %v5420_v20, 5  ;;  %v5793_v20 = vld [vmem:[%s7090_s3 + $0xc] sm:$0x3] }
  0xb9   : > { %v2031_v11 = vsel %vm5706_vm15, %v4250_v19, %v7155_v58  ;;  %v2038_v4 = vsel %vm5706_vm15, %v4251_v16, %v2037_v32  ;;  %v2039_v3 = vrot.slane %v2037_v32, 4  ;;  %v2047_v41 = vrot.slane %v5422_v21, 5 }
  0xba   : > { %v2034_v42 = vsel %vm5706_vm15, %v2032_v10, %v2033_v47  ;;  %v1421_v8 = vsel %vm5249_vm9, %v1416_v51, %v1420_v53  ;;  %v5774_v43 = vld [vmem:[#allocation2 + $0xb4] sm:$0xf]  ;;  %v2666_v45 = vsel %vm1545_vm0, %v5077_v14, 0  ;;  %v2046_v34 = vrot.slane %v2044_v36, 4 }
  0xbb   : > { %v5768_v26 = vcombine.low %v2031_v11, %v2034_v42  ;;  %v5779_v47 = vcombine.low %v1411_v2, %v1421_v8  ;;  %v1423_v40 = vshrl.u32 %v5774_v43, 16  ;;  %v1426_v12 = vshll.u32 %v5774_v43, 16 }
  0xbc   : > { %v2041_v59 = vsel %vm5706_vm15, %v2039_v3, %v2040_v54  ;;  %v2045_v10 = vsel %vm5706_vm15, %v4252_v49, %v2044_v36  ;;  %v2048_v58 = vsel %vm5706_vm15, %v2046_v34, %v2047_v41  ;;  %v4253_v42 = vrot.slane %v5507_v31, 9 }
  0xbd   : > { %7156 = vst [vmem:[#allocation17_spill] sm:$0xff] %v5779_v47  ;;  %4770 = vmatprep.mubr.msk.bf16.mxu1 %vm1496_vm5, %v5779_v47  ;;  %v5797_v39 = vld [vmem:[#allocation2 + $0xb8] sm:$0xf]  ;;  %v5799_v21 = vld [vmem:[#allocation2 + $0xbc] sm:$0x1]  ;;  %v1425_v53 = vrot.slane %v1423_v40, 4  ;;  %v5801_v38 = vcombine.low %v2038_v4, %v2041_v59  ;;  %v5819_v3 = vcombine.low %v2045_v10, %v2048_v58 }
  0xbe   : > { %v1428_v19 = vrot.slane %v1426_v12, 5  ;;  %v1432_v2 = vshll.u32 %v5797_v39, 16  ;;  %v1436_v16 = vshrl.u32 %v5797_v39, 16  ;;  %v1442_v51 = vshll.u32 %v5799_v21, 16  ;;  %4811 = vmatmul.mubr.msk.bf16.vlgmr.msra.gmra.mxu0 %vm1496_vm5, %v5768_v26 }
  0xbf   : > { %4877 = vmatpush3.bf16.msra.mxu0 %v2666_v45  ;;  %4814 = vmatprep.mubr.msk.bf16.mxu0 %vm1496_vm5, %v5801_v38  ;;  %v2051_v32 = vrot.slane %v5525_v27, 5  ;;  %v2054_v8 = vrot.slane %v5527_v28, 5  ;;  %v4254_v14 = vrot.slane %v5537_v0, 9  ;;  %v2058_v45 = vrot.slane %v5547_v55, 5 }
  0xc0   : > { %v1429_v11 = vor.u32 %v1428_v19, %v1425_v53  ;;  %v1434_v54 = vrot.slane %v1432_v2, 5  ;;  %v1438_v49 = vrot.slane %v1436_v16, 4  ;;  %5055 = vmatprep.subr.msk.bf16.mxu0 %vm1545_vm0, %v5793_v20  ;;  %v1444_v41 = vrot.slane %v1442_v51, 5 }
  0xc1   : > { %v2052_v36 = vsel %vm5706_vm15, %v4253_v42, %v2051_v32  ;;  %v2053_v40 = vrot.slane %v2051_v32, 4  ;;  %v2061_v34 = vrot.slane %v5541_v17, 5  ;;  %v2065_v53 = vrot.slane %v5657_v22, 5 }
  0xc2   : > { %v1430_v4 = vrot.slane %v1429_v11, 4  ;;  %v1439_v12 = vor.u32 %v1438_v49, %v1434_v54  ;;  %v2060_v2 = vrot.slane %v2058_v45, 4  ;;  %v4255_v16 = vrot.slane %v5649_v23, 9 }
  0xc3   : > { %v2055_v28 = vsel %vm5706_vm15, %v2053_v40, %v2054_v8  ;;  %v2067_v51 = vrot.slane %v2065_v53, 4  ;;  %v2068_v58 = vrot.slane %v5663_v56, 5  ;;  %v5837_v11 = vcombine.low %v5649_v23, %v5657_v22 }
  0xc4   : > { %v1435_v59 = vsel %vm5249_vm9, %v1430_v4, %v1434_v54  ;;  %v1440_v19 = vrot.slane %v1439_v12, 4  ;;  %v5831_v10 = vcombine.low %v2052_v36, %v2055_v28  ;;  %v4217_v17 = vcombine.low %v5690_v44, %v5710_v7  ;;  %v5860_v7 = vld [vmem:[#allocation2 + $0x64] sm:$0xf]  ;;  %v5079_v12 = vld [vmem:[#allocation2 + $0x68] sm:$0x1] }
  0xc5   : > { %v2072_v32 = vrot.slane %v5697_v25, 5  ;;  %v2059_v23 = vsel %vm5706_vm15, %v4254_v14, %v2058_v45  ;;  %v2062_v22 = vsel %vm5706_vm15, %v2060_v2, %v2061_v34  ;;  %v2066_v56 = vsel %vm5706_vm15, %v4255_v16, %v2065_v53  ;;  %v5870_v45 = vld [vmem:[#allocation2 + $0x60] sm:$0xf]  ;;  %v5081_v34 = vld [vmem:[#allocation2 + $0x10] sm:$0xf] }
  0xc6   : > { %v1445_v42 = vsel %vm5249_vm9, %v1440_v19, %v1444_v41  ;;  %4815 = vmatmul.mubr.msk.bf16.gmra.mxu0 %vm1496_vm5, %v5819_v3  ;;  %v2069_v44 = vsel %vm5706_vm15, %v2067_v51, %v2068_v58  ;;  %v2079_v49 = vrot.slane %v5860_v7, 5  ;;  %v5864_v8 = vcombine.low %v2059_v23, %v2062_v22  ;;  %v5082_v19 = vld [vmem:[#allocation2 + $0x1c] sm:$0xf]  ;;  %v5885_v51 = vld [vmem:[#allocation2 + $0x70] sm:$0xf] }
  0xc7   : > { %v5846_v54 = vcombine.low %v1435_v59, %v1445_v42  ;;  %4818 = vmatprep.mubr.msk.bf16.mxu0 %vm1496_vm5, %v5831_v10  ;;  %v4256_v4 = vrot.slane %v5681_v37, 9  ;;  %v2074_v36 = vrot.slane %v2072_v32, 4  ;;  %v2075_v40 = vrot.slane %v5699_v29, 5  ;;  %v5904_v22 = vld [vmem:[%s7090_s3 + $0xa] sm:$0x3] }
  0xc8   : > { %7158 = vst [vmem:[#allocation19_spill] sm:$0xff] %v5864_v8  ;;  %v2082_v41 = vrot.slane %v5079_v12, 5  ;;  %v5868_v14 = vcombine.low %v2066_v56, %v2069_v44  ;;  %v4257_v59 = vrot.slane %v5870_v45, 9  ;;  %v2081_v28 = vrot.slane %v2079_v49, 4  ;;  %v5910_v44 = vld [vmem:[#allocation2 + $0x6c] sm:$0xf] }
  0xc9   : > { %7157 = vst [vmem:[#allocation18_spill] sm:$0xff] %v5846_v54  ;;  %4771 = vmatmul.mubr.msk.bf16.gmra.mxu1 %vm1496_vm5, %v5846_v54  ;;  %v5874_v53 = vcombine.low %v5750_v6, %v5081_v34  ;;  %v5877_v2 = vcombine.low %v5758_v46, %v5082_v19  ;;  %v2073_v29 = vsel %vm5706_vm15, %v4256_v4, %v2072_v32  ;;  %v2086_v58 = vrot.slane %v5885_v51, 5  ;;  %v5084_v6 = vld [vmem:[%s7090_s3 + $0x6] sm:$0x3]  ;;  %v5898_v32 = vld [vmem:[#allocation2 + $0x7c] sm:$0xf] }
  0xca   : > { %4776 = vmatprep.mubr.msk.bf16.mxu1 %vm1496_vm5, %v4217_v17  ;;  %7159 = vst [vmem:[#allocation20_spill] sm:$0xff] %v5868_v14  ;;  %v2076_v16 = vsel %vm5706_vm15, %v2074_v36, %v2075_v40  ;;  %v2438_v46 = vsel %vm1545_vm0, %v5084_v6, 0  ;;  %v2080_v42 = vsel %vm5706_vm15, %v4257_v59, %v2079_v49  ;;  %v2083_v17 = vsel %vm5706_vm15, %v2081_v28, %v2082_v41  ;;  %v5087_v4 = vld [vmem:[#allocation2 + $0x74] sm:$0x1]  ;;  %v5913_v40 = vld [vmem:[#allocation2 + $0x78] sm:$0xf] }
  0xcb   : > { %v2093_v23 = vrot.slane %v5898_v32, 5  ;;  %v5908_v56 = vcombine.low %v2073_v29, %v2076_v16  ;;  %v4258_v49 = vrot.slane %v5910_v44, 9  ;;  %v2089_v36 = vrot.slane %v5087_v4, 5  ;;  %v5089_v28 = vld [vmem:[#allocation2 + $0x80] sm:$0x1] }
  0xcc   : > { %v4259_v12 = vrot.slane %v5913_v40, 9  ;;  %v5918_v41 = vcombine.low %v2080_v42, %v2083_v17  ;;  %v2088_v59 = vrot.slane %v2086_v58, 4  ;;  %v2096_v34 = vrot.slane %v5089_v28, 5  ;;  %v5090_v42 = vld [vmem:[#allocation2 + $0x24] sm:$0xf] }
  0xcd   : > { %v4262_v19 = vrot.slane %v5623_v15, 9  ;;  %v2095_v29 = vrot.slane %v2093_v23, 4  ;;  %v2114_v16 = vrot.slane %v5627_v52, 5  ;;  %v2117_v6 = vrot.slane %v5629_v5, 5  ;;  %v5091_v17 = vld [vmem:[#allocation2 + $0x28] sm:$0xf] }
  0xce   : > { %4819 = vmatmul.mubr.msk.bf16.gmra.mxu0 %vm1496_vm5, %v5864_v8  ;;  %7160 = vst [vmem:[#allocation21_spill] sm:$0xff] %v5918_v41  ;;  %v5925_v4 = vcombine.low %v5623_v15, %v5627_v52  ;;  %v5933_v28 = vcombine.low %v5090_v42, %v5091_v17  ;;  %v2087_v52 = vsel %vm5706_vm15, %v4258_v49, %v2086_v58  ;;  %v2100_v17 = vrot.slane %v5487_v35, 5 }
  0xcf   : > { %4822 = vmatprep.mubr.msk.bf16.mxu0 %vm1496_vm5, %v5868_v14  ;;  %v5937_v14 = vcombine.low %v5507_v31, %v5525_v27  ;;  %v2115_v5 = vsel %vm5706_vm15, %v4262_v19, %v2114_v16  ;;  %v2116_v15 = vrot.slane %v2114_v16, 4  ;;  %v2090_v8 = vsel %vm5706_vm15, %v2088_v59, %v2089_v36  ;;  %v4586_v31 = vld [vmem:[%s5224_s29 + $0x78] sm:$0xff]  }
  0xd0   : > { %v2094_v42 = vsel %vm5706_vm15, %v4259_v12, %v2093_v23  ;;  %v2097_v27 = vsel %vm5706_vm15, %v2095_v29, %v2096_v34  ;;  %v2107_v19 = vrot.slane %v5591_v24, 5  ;;  %v5960_v49 = vcombine.low %v5774_v43, %v5797_v39 }
  0xd1   : > { %4777 = vmatmul.mubr.msk.bf16.vlgmr.msra.gmra.mxu1 %vm1496_vm5, %v5874_v53  ;;  %v2118_v58 = vsel %vm5706_vm15, %v2116_v15, %v2117_v6  ;;  %v5966_v35 = vcombine.low %v2087_v52, %v2090_v8  ;;  %v4260_v23 = vrot.slane %v5479_v61, 9  ;;  %v4570_v12 = vunpack.c.l.bf16 %v4586_v31 }
  0xd2   : > { %4843 = vmatpush3.bf16.msra.mxu1 %v2438_v46  ;;  %4780 = vmatprep.mubr.msk.bf16.mxu1 %vm1496_vm5, %v5877_v2  ;;  %v5931_v46 = vcombine.low %v5718_v57, %v5726_v62  ;;  %v5962_v36 = vcombine.low %v2115_v5, %v2118_v58  ;;  %v4571_v59 = vunpack.c.h.bf16 %v4586_v31  ;;  %v5971_v34 = vcombine.low %v2094_v42, %v2097_v27  ;;  %v7161_v58 = vld [vmem:[#allocation11_spill] sm:$0xff]  ;;  %v7162_v31 = vld [vmem:[#allocation12_spill] sm:$0xff] }
  0xd3   : > { %5054 = vmatprep.subr.msk.bf16.mxu1 %vm1545_vm0, %v5904_v22  ;;  %v2102_v29 = vrot.slane %v2100_v17, 4  ;;  %v2103_v16 = vrot.slane %v5485_v18, 5  ;;  %v4261_v6 = vrot.slane %v5583_v60, 9  ;;  %v2109_v5 = vrot.slane %v2107_v19, 4 }
  0xd4   : > { %v2110_v15 = vrot.slane %v5595_v50, 5  ;;  %v339_v8 = vmul.f32 %v7161_v58, %v4570_v12  ;;  %v340_v52 = vmul.f32 %v7161_v58, %v4571_v59  ;;  %v5980_v61 = vcombine.low %v5537_v0, %v5547_v55 }
  0xd5   : > { %v2101_v18 = vsel %vm5706_vm15, %v4260_v23, %v2100_v17  ;;  %v2104_v50 = vsel %vm5706_vm15, %v2102_v29, %v2103_v16  ;;  %v2108_v0 = vsel %vm5706_vm15, %v4261_v6, %v2107_v19  ;;  %v2121_v59 = vrot.slane %v5726_v62, 5 }
  0xd6   : > { %4823 = vmatmul.mubr.msk.bf16.gmra.mxu0 %vm1496_vm5, %v5908_v56  ;;  %v378_v42 = vadd.f32 %v7162_v31, %v340_v52  ;;  %v2111_v55 = vsel %vm5706_vm15, %v2109_v5, %v2110_v15  ;;  %v6001_v29 = vcombine.low %v2101_v18, %v2104_v50  ;;  %v2124_v62 = vrot.slane %v5732_v1, 5  ;;  %v997_v50 = vld [vmem:[#allocation2 + $0xc0] sm:$0xf] }
  0xd7   : > { %4826 = vmatprep.mubr.msk.bf16.mxu0 %vm1496_vm5, %v5918_v41  ;;  %v377_v41 = vadd.f32 %v7162_v31, %v339_v8  ;;  %v6003_v16 = vcombine.low %v2108_v0, %v2111_v55  ;;  %v2123_v15 = vrot.slane %v2121_v59, 4  ;;  %v6009_v8 = vcombine.low %v5681_v37, %v5697_v25 }
  0xd8   : > { %v410_v12 = vmax.f32 %v378_v42, 0.0  ;;  %v6013_v42 = vcombine.low %v5870_v45, %v5860_v7  ;;  %v2128_v18 = vrot.slane %v5797_v39, 5  ;;  %v2131_v63 = vrot.slane %v5799_v21, 5 }
  0xd9   : > { %4781 = vmatmul.mubr.msk.bf16.gmra.mxu1 %vm1496_vm5, %v5933_v28  ;;  %v409_v27 = vmax.f32 %v377_v41, 0.0  ;;  %v4263_v41 = vrot.slane %v5718_v57, 9  ;;  %v1001_v57 = vld [vmem:[#allocation2 + $0xc8] sm:$0x1]  ;;  %v2125_v7 = vsel %vm5706_vm15, %v2123_v15, %v2124_v62  ;;  %v6041_v9 = vcombine.low %v5910_v44, %v5885_v51 }
  0xda   : > { %4784 = vmatprep.mubr.msk.bf16.mxu1 %vm1496_vm5, %v5937_v14  ;;  %v4475_v23 = vpack.c.bf16 %v410_v12, %v410_v12  ;;  %v6045_v13 = vcombine.low %v5913_v40, %v5898_v32  ;;  %v5092_v32 = vld [vmem:[#allocation2 + $0x84] sm:$0xf]  ;;  %v5093_v44 = vld [vmem:[#allocation2 + $0x88] sm:$0xf] }
  0xdb   : > { %v4474_v17 = vpack.c.bf16 %v409_v27, %v409_v27  ;;  %v2122_v55 = vsel %vm5706_vm15, %v4263_v41, %v2121_v59  ;;  %v4264_v59 = vrot.slane %v5774_v43, 9  ;;  %v6061_v40 = vcombine.low %v5092_v32, %v5093_v44  ;;  %v7173_v44 = vld [vmem:[#allocation14_spill] sm:$0xff] }
  0xdc   : > { %v830_v58 = vshrl.u32 %v4475_v23, 16  ;;  %v833_v5 = vshll.u32 %v4475_v23, 16  ;;  %v6035_v12 = vcombine.low %v2122_v55, %v2125_v7  ;;  %v6065_v23 = vcombine.low %v5583_v60, %v5591_v24  ;;  %v6080_v60 = vld [vmem:[%s7090_s3 + $0x10] sm:$0x3]  ;;  %v6121_v55 = vld [vmem:[%s7090_s3 + $0xe] sm:$0x3] }
  0xdd   : > { %v822_v19 = vshrl.u32 %v4474_v17, 16  ;;  %v825_v6 = vshll.u32 %v4474_v17, 16  ;;  %v2130_v17 = vrot.slane %v2128_v18, 4  ;;  %v2129_v43 = vsel %vm5706_vm15, %v4264_v59, %v2128_v18  ;;  %v7164_v24 = vld [vmem:[#allocation6_spill] sm:$0xff]  ;;  %v7171_v7 = vld [vmem:[#allocation8_spill] sm:$0xff] }
  0xde   : > { %4827 = vmatmul.mubr.msk.bf16.gmra.mxu0 %vm1496_vm5, %v5966_v35  ;;  %v832_v31 = vrot.slane %v830_v58, 7  ;;  %v7165_v58 = vld [vmem:[#allocation7_spill] sm:$0xff]  ;;  %v3312_v33 = vsel %vm1545_vm0, %v6121_v55, 0 }
  0xdf   : > { %4830 = vmatprep.mubr.msk.bf16.mxu0 %vm1496_vm5, %v5971_v34  ;;  %v824_v52 = vrot.slane %v822_v19, 7  ;;  %v2132_v21 = vsel %vm5706_vm15, %v2130_v17, %v2131_v63  ;;  %v7163_v19 = vld [vmem:[#allocation3_spill] sm:$0xff] }
  0xe0   : > { %v835_v37 = vor.u32 %v833_v5, %v832_v31  ;;  %v837_v25 = vrot.slane %v832_v31, 4  ;;  %v6059_v51 = vcombine.low %v2129_v43, %v2132_v21  ;;  %v7166_v31 = vld [vmem:[#allocation10_spill] sm:$0xff] }
  0xe1   : > { %4785 = vmatmul.mubr.msk.bf16.gmra.mxu1 %vm1496_vm5, %v5980_v61  ;;  %v827_v1 = vor.u32 %v825_v6, %v824_v52  ;;  %v828_v0 = vrot.slane %v824_v52, 4  ;;  %v3084_v6 = vsel %vm1545_vm0, %v5793_v20, 0 }
  0xe2   : > { %4788 = vmatprep.mubr.msk.bf16.mxu1 %vm1496_vm5, %v5837_v11  ;;  %v1002_v27 = vsel %vm5284_vm12, %v837_v25, %v1001_v57  ;;  %v7167_v57 = vld [vmem:[#allocation13_spill] sm:$0xff]  ;;  %v2878_v25 = vsel %vm1545_vm0, %v5904_v22, 0 }
  0xe3   : > { %v836_v39 = vsel %vm5271_vm10, %v828_v0, %v835_v37  ;;  %v998_v45 = vsel %vm5277_vm11, %v827_v1, %v997_v50  ;;  %1003 = vst [vmem:[#allocation2 + $0xc8] sm:$0x1] %v1002_v27  ;;  %v7168_v37 = vld [vmem:[#allocation16_spill] sm:$0xff]  ;;  %v7170_v22 = vld [vmem:[#allocation5_spill] sm:$0xff] }
  0xe4   : > { %999 = vst [vmem:[#allocation2 + $0xc0] sm:$0xf] %v998_v45  ;;  %1000 = vst.msk [vmem:[#allocation2 + $0xc4] sm:$0xf] %vm427_vm1, %v836_v39  ;;  %v7172_v39 = vld [vmem:[#allocation9_spill] sm:$0xff]  ;;  %vm3880_vm1 = vcmask 64512  }
  0xe6   : > { %4831 = vmatmul.mubr.msk.bf16.gmra.mxu0 %vm1496_vm5, %v6001_v29 }
  0xe7   : > { %4834 = vmatprep.mubr.msk.bf16.mxu0 %vm1496_vm5, %v6003_v16 }
  0xe9   : > { %4789 = vmatmul.mubr.msk.bf16.gmra.mxu1 %vm1496_vm5, %v6009_v8 }
  0xea   : > { %4792 = vmatprep.mubr.msk.bf16.mxu1 %vm1496_vm5, %v6013_v42  ;;  %v1054_v62 = vld [vmem:[#allocation2 + $0xc8] sm:$0x1] }
  0xeb   : > { %v6090_v5 = vld [vmem:[#allocation2 + $0xc4] sm:$0xf]  ;;  %v6095_v41 = vld [vmem:[#allocation2 + $0xc0] sm:$0xf]  ;;  %v2867_v50 = vrot.slane %v1054_v62, 5 }
  0xec   : > { %v2864_v20 = vrot.slane %v6090_v5, 5  ;;  %v4334_v15 = vrot.slane %v6095_v41, 9  ;;  %v2634_v45 = vshrl.u32 %v6095_v41, 16  ;;  %v2637_v27 = vshll.u32 %v6095_v41, 16 }
  0xed   : > { %v2643_v59 = vshll.u32 %v6090_v5, 16  ;;  %v2647_v17 = vshrl.u32 %v6090_v5, 16 }
  0xee   : > { %4835 = vmatmul.mubr.msk.bf16.gmra.mxu0 %vm1496_vm5, %v5962_v36  ;;  %v2866_v52 = vrot.slane %v2864_v20, 4  ;;  %v2865_v18 = vsel %vm5706_vm15, %v4334_v15, %v2864_v20  ;;  %v2636_v63 = vrot.slane %v2634_v45, 4  ;;  %v2639_v43 = vrot.slane %v2637_v27, 5  ;;  %v6177_v45 = vld [vmem:[#allocation2 + $0xcc] sm:$0xf] }
  0xef   : > { %4838 = vmatprep.mubr.msk.bf16.mxu0 %vm1496_vm5, %v6035_v12  ;;  %v2645_v21 = vrot.slane %v2643_v59, 5  ;;  %v2649_v32 = vrot.slane %v2647_v17, 4  ;;  %v2653_v15 = vshll.u32 %v1054_v62, 16  ;;  %v6179_v27 = vld [vmem:[#allocation2 + $0xd0] sm:$0xf]  ;;  %v3280_v59 = vshrl.u32 %v6177_v45, 16 }
  0xf0   : > { %v2868_v1 = vsel %vm5706_vm15, %v2866_v52, %v2867_v50  ;;  %v3283_v17 = vshll.u32 %v6177_v45, 16 }
  0xf1   : > { %4793 = vmatmul.mubr.msk.bf16.gmra.mxu1 %vm1496_vm5, %v6041_v9  ;;  %v6108_v0 = vcombine.low %v2865_v18, %v2868_v1  ;;  %v2650_v20 = vor.u32 %v2649_v32, %v2645_v21  ;;  %v2655_v50 = vrot.slane %v2653_v15, 5  ;;  %v6195_v15 = vld [vmem:[#allocation2 + $0xd4] sm:$0x1] }
  0xf2   : > { %4796 = vmatprep.mubr.msk.bf16.mxu1 %vm1496_vm5, %v6045_v13  ;;  %v3285_v32 = vrot.slane %v3283_v17, 5 }
  0xf3   : > { %v2651_v18 = vrot.slane %v2650_v20, 4 }
  0xf5   : > { %v2656_v62 = vsel %vm5249_vm9, %v2651_v18, %v2655_v50 }
  0xf6   : > { %4839 = vmatmul.mubr.msk.bf16.gmra.mxu0 %vm1496_vm5, %v6059_v51 }
  0xf7   : > { %4878 = vmatprep.mubr.msk.bf16.mxu0 %vm1496_vm5, %v7163_v19  ;;  %v7174_v19 = vld [vmem:[#allocation15_spill] sm:$0xff] }
  0xf9   : > { %4797 = vmatmul.mubr.msk.bf16.gmra.mxu1 %vm1496_vm5, %v6061_v40 }
  0xfa   : > { %4800 = vmatprep.mubr.msk.bf16.mxu1 %vm1496_vm5, %v6065_v23 }
  0xfe   : > { %4879 = vmatmul.mubr.msk.bf16.vlgmr.msra.gmra.mxu0 %vm1496_vm5, %v7164_v24 }
  0xff   : > { %4945 = vmatpush3.bf16.msra.mxu0 %v3084_v6  ;;  %4882 = vmatprep.mubr.msk.bf16.mxu0 %vm1496_vm5, %v7165_v58  ;;  %v2640_v6 = vor.u32 %v2639_v43, %v2636_v63  ;;  %v3289_v63 = vshll.u32 %v6179_v27, 16  ;;  %v3293_v43 = vshrl.u32 %v6179_v27, 16 }
 0x100   : > { %5057 = vmatprep.subr.msk.bf16.mxu0 %vm1545_vm0, %v6080_v60 }
 0x101   : > { %4801 = vmatmul.mubr.msk.bf16.gmra.mxu1 %vm1496_vm5, %v5925_v4  ;;  %v2641_v52 = vrot.slane %v2640_v6, 4  ;;  %v3291_v6 = vrot.slane %v3289_v63, 5  ;;  %v3295_v20 = vrot.slane %v3293_v43, 4 }
 0x102   : > { %4804 = vmatprep.mubr.msk.bf16.mxu1 %vm1496_vm5, %v5931_v46 }
 0x103   : > { %v2646_v1 = vsel %vm5249_vm9, %v2641_v52, %v2645_v21  ;;  %v3282_v21 = vrot.slane %v3280_v59, 4  ;;  %v3296_v52 = vor.u32 %v3295_v20, %v3291_v6 }
 0x105   : > { %v3297_v50 = vrot.slane %v3296_v52, 4  ;;  %v4354_v52 = vcombine.low %v6177_v45, %v6179_v27 }
 0x106   : > { %4883 = vmatmul.mubr.msk.bf16.gmra.mxu0 %vm1496_vm5, %v7166_v31 }
 0x107   : > { %4886 = vmatprep.mubr.msk.bf16.mxu0 %vm1496_vm5, %v7167_v57 }
 0x109   : > { %4805 = vmatmul.mubr.msk.bf16.gmra.mxu1 %vm1496_vm5, %v5960_v49 }
 0x10a   : > { %4844 = vmatprep.mubr.msk.bf16.mxu1 %vm1496_vm5, %v5874_v53  ;;  %v7169_v53 = vld [vmem:[#allocation4_spill] sm:$0xff] }
 0x10e   : > { %4887 = vmatmul.mubr.msk.bf16.gmra.mxu0 %vm1496_vm5, %v7168_v37 }
 0x10f   : > { %4890 = vmatprep.mubr.msk.bf16.mxu0 %vm1496_vm5, %v5741_v30 }
 0x111   : > { %4845 = vmatmul.mubr.msk.bf16.vlgmr.msra.gmra.mxu1 %vm1496_vm5, %v5877_v2 }
 0x112   : > { %4911 = vmatpush3.bf16.msra.mxu1 %v2878_v25  ;;  %4848 = vmatprep.mubr.msk.bf16.mxu1 %vm1496_vm5, %v5933_v28  ;;  %v6169_v25 = vcombine.low %v2646_v1, %v2656_v62  ;;  %v4299_v62 = vcombine.low %v6095_v41, %v6090_v5 }
 0x113   : > { %5056 = vmatprep.subr.msk.bf16.mxu1 %vm1545_vm0, %v6121_v55 }
 0x114   : > { %7175 = vst [vmem:[#allocation11_spill] sm:$0xff] %v6169_v25 }
 0x116   : > { %4891 = vmatmul.mubr.msk.bf16.gmra.mxu0 %vm1496_vm5, %v7169_v53 }
 0x117   : > { %4894 = vmatprep.mubr.msk.bf16.mxu0 %vm1496_vm5, %v7170_v22 }
 0x119   : > { %4849 = vmatmul.mubr.msk.bf16.gmra.mxu1 %vm1496_vm5, %v5937_v14 }
 0x11a   : > { %4852 = vmatprep.mubr.msk.bf16.mxu1 %vm1496_vm5, %v5980_v61 }
 0x11e   : > { %4895 = vmatmul.mubr.msk.bf16.gmra.mxu0 %vm1496_vm5, %v7171_v7 }
 0x11f   : > { %4898 = vmatprep.mubr.msk.bf16.mxu0 %vm1496_vm5, %v7172_v39 }
 0x121   : > { %4853 = vmatmul.mubr.msk.bf16.gmra.mxu1 %vm1496_vm5, %v5837_v11 }
 0x122   : > { %4856 = vmatprep.mubr.msk.bf16.mxu1 %vm1496_vm5, %v6009_v8 }
 0x126   : > { %4899 = vmatmul.mubr.msk.bf16.gmra.mxu0 %vm1496_vm5, %v7173_v44 }
 0x127   : > { %4902 = vmatprep.mubr.msk.bf16.mxu0 %vm1496_vm5, %v7174_v19 }
 0x129   : > { %4857 = vmatmul.mubr.msk.bf16.gmra.mxu1 %vm1496_vm5, %v6013_v42 }
 0x12a   : > { %4860 = vmatprep.mubr.msk.bf16.mxu1 %vm1496_vm5, %v6041_v9 }
 0x12e   : > { %4903 = vmatmul.mubr.msk.bf16.gmra.mxu0 %vm1496_vm5, %v5779_v47 }
 0x12f   : > { %4906 = vmatprep.mubr.msk.bf16.mxu0 %vm1496_vm5, %v5846_v54 }
 0x131   : > { %4861 = vmatmul.mubr.msk.bf16.gmra.mxu1 %vm1496_vm5, %v6045_v13 }
 0x132   : > { %4864 = vmatprep.mubr.msk.bf16.mxu1 %vm1496_vm5, %v6061_v40 }
 0x136   : > { %4907 = vmatmul.mubr.msk.bf16.gmra.mxu0 %vm1496_vm5, %v6169_v25 }
 0x137   : > { %4946 = vmatprep.mubr.msk.bf16.mxu0 %vm1496_vm5, %v5877_v2  ;;  %v3524_v2 = vsel %vm1545_vm0, %v6080_v60, 0  ;;  %v3286_v60 = vor.u32 %v3285_v32, %v3282_v21  ;;  %vm3847_vm0 = vcmask 60416  }
 0x139   : > { %4865 = vmatmul.mubr.msk.bf16.gmra.mxu1 %vm1496_vm5, %v6065_v23  ;;  %v3287_v18 = vrot.slane %v3286_v60, 4 }
 0x13a   : > { %4868 = vmatprep.mubr.msk.bf16.mxu1 %vm1496_vm5, %v5925_v4 }
 0x13b   : > { %v3292_v59 = vsel %vm5249_vm9, %v3287_v18, %v3291_v6 }
 0x13e   : > { %4947 = vmatmul.mubr.msk.bf16.vlgmr.msra.gmra.mxu0 %vm1496_vm5, %v5933_v28  ;;  %v3299_v28 = vshll.u32 %v6195_v15, 16 }
 0x13f   : > { %5013 = vmatpush3.bf16.msra.mxu0 %v3524_v2  ;;  %4950 = vmatprep.mubr.msk.bf16.mxu0 %vm1496_vm5, %v5937_v14  ;;  %v6204_v14 = vpop.f32.mrf.mxu0 }
 0x140   : > { %v3301_v1 = vrot.slane %v3299_v28, 5 }
 0x141   : > { %4869 = vmatmul.mubr.msk.bf16.gmra.mxu1 %vm1496_vm5, %v5931_v46  ;;  %v6217_v5 = vpop.f32.mrf.mxu0 }
 0x142   : > { %4872 = vmatprep.mubr.msk.bf16.mxu1 %vm1496_vm5, %v5960_v49  ;;  %v3302_v17 = vsel %vm5249_vm9, %v3297_v50, %v3301_v1 }
 0x143   : > { %v6212_v63 = vcombine.low %v3292_v59, %v3302_v17 }
 0x145   : > { %7176 = vst [vmem:[#allocation12_spill] sm:$0xff] %v6212_v63 }
 0x146   : > { %4951 = vmatmul.mubr.msk.bf16.gmra.mxu0 %vm1496_vm5, %v5980_v61  ;;  %v6221_v61 = vpop.f32.mrf.mxu0 }
 0x147   : > { %4954 = vmatprep.mubr.msk.bf16.mxu0 %vm1496_vm5, %v5837_v11 }
 0x149   : > { %4873 = vmatmul.mubr.msk.bf16.gmra.mxu1 %vm1496_vm5, %v4299_v62 }
 0x14a   : > { %4912 = vmatprep.mubr.msk.bf16.mxu1 %vm1496_vm5, %v5768_v26  ;;  %v6231_v26 = vpop.f32.mrf.mxu0 }
 0x14c   : > { %v6235_v11 = vpop.f32.mrf.mxu0 }
 0x14e   : > { %4955 = vmatmul.mubr.msk.bf16.gmra.mxu0 %vm1496_vm5, %v6009_v8  ;;  %v6241_v8 = vpop.f32.mrf.mxu1  ;;  %v6245_v41 = vpop.f32.mrf.mxu0 }
 0x14f   : > { %4958 = vmatprep.mubr.msk.bf16.mxu0 %vm1496_vm5, %v6013_v42  ;;  %v7177_v42 = vld [vmem:[#allocation19_spill] sm:$0xff] }
 0x150   : > { %v6247_v55 = vpop.f32.mrf.mxu1 }
 0x151   : > { %4913 = vmatmul.mubr.msk.bf16.vlgmr.msra.gmra.mxu1 %vm1496_vm5, %v5801_v38 }
 0x152   : > { %4979 = vmatpush3.bf16.msra.mxu1 %v3312_v33  ;;  %4916 = vmatprep.mubr.msk.bf16.mxu1 %vm1496_vm5, %v5819_v3  ;;  %v6257_v43 = vpop.f32.mrf.mxu1 }
 0x154   : > { %v6263_v21 = vpop.f32.mrf.mxu1 }
 0x156   : > { %4959 = vmatmul.mubr.msk.bf16.gmra.mxu0 %vm1496_vm5, %v6041_v9  ;;  %v6251_v9 = vpop.f32.mrf.mxu0  ;;  %v6273_v32 = vpop.f32.mrf.mxu1 }
 0x157   : > { %4962 = vmatprep.mubr.msk.bf16.mxu0 %vm1496_vm5, %v6045_v13  ;;  %v7178_v13 = vld [vmem:[#allocation20_spill] sm:$0xff] }
 0x158   : > { %v6261_v2 = vpop.f32.mrf.mxu0  ;;  %v6279_v20 = vpop.f32.mrf.mxu1 }
 0x159   : > { %4917 = vmatmul.mubr.msk.bf16.gmra.mxu1 %vm1496_vm5, %v5831_v10  ;;  %7180 = vst [vmem:[#allocation3_spill] sm:$0xff] %v6279_v20 }
 0x15a   : > { %4920 = vmatprep.mubr.msk.bf16.mxu1 %vm1496_vm5, %v7177_v42 }
 0x15e   : > { %4963 = vmatmul.mubr.msk.bf16.gmra.mxu0 %vm1496_vm5, %v6061_v40  ;;  %v6267_v40 = vpop.f32.mrf.mxu0 }
 0x15f   : > { %4966 = vmatprep.mubr.msk.bf16.mxu0 %vm1496_vm5, %v6065_v23  ;;  %v7179_v23 = vld [vmem:[#allocation21_spill] sm:$0xff] }
 0x160   : > { %v6277_v6 = vpop.f32.mrf.mxu0 }
 0x161   : > { %4921 = vmatmul.mubr.msk.bf16.gmra.mxu1 %vm1496_vm5, %v7178_v13 }
 0x162   : > { %4924 = vmatprep.mubr.msk.bf16.mxu1 %vm1496_vm5, %v5908_v56 }
 0x166   : > { %4967 = vmatmul.mubr.msk.bf16.gmra.mxu0 %vm1496_vm5, %v5925_v4  ;;  %v6283_v4 = vpop.f32.mrf.mxu0 }
 0x167   : > { %4970 = vmatprep.mubr.msk.bf16.mxu0 %vm1496_vm5, %v5931_v46  ;;  %v6288_v46 = vpop.f32.mrf.mxu1 }
 0x168   : > { %7181 = vst [vmem:[#allocation6_spill] sm:$0xff] %v6288_v46  ;;  %v6292_v60 = vpop.f32.mrf.mxu0 }
 0x169   : > { %4925 = vmatmul.mubr.msk.bf16.gmra.mxu1 %vm1496_vm5, %v7179_v23  ;;  %v6296_v28 = vpop.f32.mrf.mxu1 }
 0x16a   : > { %4928 = vmatprep.mubr.msk.bf16.mxu1 %vm1496_vm5, %v5966_v35  ;;  %7182 = vst [vmem:[#allocation7_spill] sm:$0xff] %v6296_v28 }
 0x16b   : > { %v6307_v50 = vpop.f32.mrf.mxu1 }
 0x16c   : > { %7183 = vst [vmem:[#allocation10_spill] sm:$0xff] %v6307_v50 }
 0x16d   : > { %v6315_v59 = vpop.f32.mrf.mxu1 }
 0x16e   : > { %4971 = vmatmul.mubr.msk.bf16.gmra.mxu0 %vm1496_vm5, %v5960_v49  ;;  %7184 = vst [vmem:[#allocation13_spill] sm:$0xff] %v6315_v59 }
 0x16f   : > { %4974 = vmatprep.mubr.msk.bf16.mxu0 %vm1496_vm5, %v4299_v62  ;;  %v6323_v33 = vpop.f32.mrf.mxu1 }
 0x170   : > { %7185 = vst [vmem:[#allocation16_spill] sm:$0xff] %v6323_v33 }
 0x171   : > { %4929 = vmatmul.mubr.msk.bf16.gmra.mxu1 %vm1496_vm5, %v5971_v34  ;;  %v6327_v25 = vpop.f32.mrf.mxu1 }
 0x172   : > { %4932 = vmatprep.mubr.msk.bf16.mxu1 %vm1496_vm5, %v6001_v29  ;;  %7186 = vst [vmem:[#allocation4_spill] sm:$0xff] %v6327_v25 }
 0x176   : > { %v6298_v49 = vpop.f32.mrf.mxu0  ;;  %4975 = vmatmul.mubr.msk.bf16.gmra.mxu0 %vm1496_vm5, %v4354_v52 }
 0x177   : > { %5014 = vmatprep.mubr.msk.bf16.mxu0 %vm1496_vm5, %v5801_v38 }
 0x178   : > { %v6303_v18 = vpop.f32.mrf.mxu0 }
 0x179   : > { %4933 = vmatmul.mubr.msk.bf16.gmra.mxu1 %vm1496_vm5, %v6003_v16 }
 0x17a   : > { %4936 = vmatprep.mubr.msk.bf16.mxu1 %vm1496_vm5, %v5962_v36  ;;  %v6311_v1 = vpop.f32.mrf.mxu0 }
 0x17c   : > { %v6313_v62 = vpop.f32.mrf.mxu0 }
 0x17e   : > { %v4812_v17 = vpop.f32.mrf.mxu0  ;;  %5015 = vmatmul.mubr.msk.bf16.vlgmr.msra.gmra.mxu0 %vm1496_vm5, %v5819_v3 }
 0x17f   : > { %5018 = vmatprep.mubr.msk.bf16.mxu0 %vm1496_vm5, %v5831_v10 }
 0x180   : > { %v2268_v38 = vpop.f32.mrf.mxu0 }
 0x181   : > { %4937 = vmatmul.mubr.msk.bf16.gmra.mxu1 %vm1496_vm5, %v6035_v12 }
 0x182   : > { %4940 = vmatprep.mubr.msk.bf16.mxu1 %vm1496_vm5, %v6059_v51  ;;  %v4813_v52 = vpop.f32.mrf.mxu0 }
 0x184   : > { %v2271_v63 = vpop.f32.mrf.mxu0 }
 0x186   : > { %v4816_v59 = vpop.f32.mrf.mxu0  ;;  %5019 = vmatmul.mubr.msk.bf16.gmra.mxu0 %vm1496_vm5, %v7177_v42 }
 0x187   : > { %5022 = vmatprep.mubr.msk.bf16.mxu0 %vm1496_vm5, %v7178_v13 }
 0x188   : > { %v2284_v3 = vpop.f32.mrf.mxu0 }
 0x189   : > { %v6333_v10 = vpop.f32.mrf.mxu1  ;;  %4941 = vmatmul.mubr.msk.bf16.gmra.mxu1 %vm1496_vm5, %v6108_v0 }
 0x18a   : > { %7187 = vst [vmem:[#allocation5_spill] sm:$0xff] %v6333_v10  ;;  %4980 = vmatprep.mubr.msk.bf16.mxu1 %vm1496_vm5, %v7164_v24  ;;  %v4817_v33 = vpop.f32.mrf.mxu0 }
 0x18b   : > { %v6339_v50 = vpop.f32.mrf.mxu1 }
 0x18c   : > { %7188 = vst [vmem:[#allocation8_spill] sm:$0xff] %v6339_v50  ;;  %v2287_v25 = vpop.f32.mrf.mxu0 }
 0x18d   : > { %v6341_v54 = vpop.f32.mrf.mxu1 }
 0x18e   : > { %7189 = vst [vmem:[#allocation9_spill] sm:$0xff] %v6341_v54  ;;  %v4820_v28 = vpop.f32.mrf.mxu0  ;;  %5023 = vmatmul.mubr.msk.bf16.gmra.mxu0 %vm1496_vm5, %v5908_v56 }
 0x18f   : > { %v6345_v42 = vpop.f32.mrf.mxu1  ;;  %5026 = vmatprep.mubr.msk.bf16.mxu0 %vm1496_vm5, %v7179_v23 }
 0x190   : > { %7190 = vst [vmem:[#allocation14_spill] sm:$0xff] %v6345_v42  ;;  %v2300_v13 = vpop.f32.mrf.mxu0 }
 0x191   : > { %v4778_v10 = vpop.f32.mrf.mxu1  ;;  %4981 = vmatmul.mubr.msk.bf16.vlgmr.msra.gmra.mxu1 %vm1496_vm5, %v7165_v58 }
 0x192   : > { %v1884_v24 = vadd.f32 %v4778_v10, %v6204_v14  ;;  %4984 = vmatprep.mubr.msk.bf16.mxu1 %vm1496_vm5, %v7166_v31  ;;  %v4821_v54 = vpop.f32.mrf.mxu0 }
 0x193   : > { %v1875_v50 = vpop.f32.mrf.mxu1 }
 0x194   : > { %v1876_v46 = vadd.f32 %v1875_v50, %v6217_v5  ;;  %v2303_v56 = vpop.f32.mrf.mxu0  ;;  %v6355_v20 = vadd.f32 %v4812_v17, %v1884_v24 }
 0x195   : > { %v4779_v42 = vpop.f32.mrf.mxu1 }
 0x196   : > { %v1887_v23 = vadd.f32 %v4779_v42, %v6221_v61  ;;  %v4824_v47 = vpop.f32.mrf.mxu0  ;;  %5027 = vmatmul.mubr.msk.bf16.gmra.mxu0 %vm1496_vm5, %v5966_v35  ;;  %v6360_v58 = vadd.f32 %v2268_v38, %v1876_v46 }
 0x197   : > { %v1878_v14 = vpop.f32.mrf.mxu1  ;;  %5030 = vmatprep.mubr.msk.bf16.mxu0 %vm1496_vm5, %v5971_v34 }
 0x198   : > { %v1879_v31 = vadd.f32 %v1878_v14, %v6231_v26  ;;  %v2316_v10 = vpop.f32.mrf.mxu0  ;;  %v6365_v5 = vadd.f32 %v4813_v52, %v1887_v23 }
 0x199   : > { %v4782_v50 = vpop.f32.mrf.mxu1  ;;  %4985 = vmatmul.mubr.msk.bf16.gmra.mxu1 %vm1496_vm5, %v7167_v57 }
 0x19a   : > { %v1900_v61 = vadd.f32 %v4782_v50, %v6235_v11  ;;  %4988 = vmatprep.mubr.msk.bf16.mxu1 %vm1496_vm5, %v7168_v37  ;;  %v4825_v35 = vpop.f32.mrf.mxu0  ;;  %v6372_v46 = vadd.f32 %v2271_v63, %v1879_v31 }
 0x19b   : > { %v1891_v17 = vpop.f32.mrf.mxu1 }
 0x19c   : > { %v1892_v34 = vadd.f32 %v1891_v17, %v6245_v41  ;;  %v6375_v38 = vpop.f32.mrf.mxu0  ;;  %v6377_v26 = vadd.f32 %v4816_v59, %v1900_v61 }
 0x19d   : > { %v4783_v52 = vpop.f32.mrf.mxu1 }
 0x19e   : > { %v1903_v42 = vadd.f32 %v4783_v52, %v6251_v9  ;;  %v6380_v24 = vpop.f32.mrf.mxu0  ;;  %5031 = vmatmul.mubr.msk.bf16.gmra.mxu0 %vm1496_vm5, %v6001_v29  ;;  %v6384_v57 = vadd.f32 %v2284_v3, %v1892_v34 }
 0x19f   : > { %v1894_v37 = vpop.f32.mrf.mxu1  ;;  %5034 = vmatprep.mubr.msk.bf16.mxu0 %vm1496_vm5, %v6003_v16 }
 0x1a0   : > { %v1895_v63 = vadd.f32 %v1894_v37, %v6261_v2  ;;  %v6389_v11 = vpop.f32.mrf.mxu0  ;;  %v6391_v41 = vadd.f32 %v4817_v33, %v1903_v42 }
 0x1a1   : > { %v4786_v59 = vpop.f32.mrf.mxu1  ;;  %4989 = vmatmul.mubr.msk.bf16.gmra.mxu1 %vm1496_vm5, %v5741_v30 }
 0x1a2   : > { %v1916_v9 = vadd.f32 %v4786_v59, %v6267_v40  ;;  %4992 = vmatprep.mubr.msk.bf16.mxu1 %vm1496_vm5, %v7169_v53  ;;  %v4829_v29 = vpop.f32.mrf.mxu0  ;;  %v6398_v3 = vadd.f32 %v2287_v25, %v1895_v63  ;;  %v3510_v53 = vrot.slane %v6179_v27, 5 }
 0x1a3   : > { %v1907_v23 = vpop.f32.mrf.mxu1 }
 0x1a4   : > { %v1908_v16 = vadd.f32 %v1907_v23, %v6277_v6  ;;  %v6401_v2 = vpop.f32.mrf.mxu0  ;;  %v6403_v14 = vadd.f32 %v4820_v28, %v1916_v9  ;;  %v3512_v17 = vrot.slane %v3510_v53, 4 }
 0x1a5   : > { %v4787_v33 = vpop.f32.mrf.mxu1 }
 0x1a6   : > { %v1919_v31 = vadd.f32 %v4787_v33, %v6283_v4  ;;  %v6406_v50 = vpop.f32.mrf.mxu0  ;;  %5035 = vmatmul.mubr.msk.bf16.gmra.mxu0 %vm1496_vm5, %v5962_v36  ;;  %v6410_v30 = vadd.f32 %v2300_v13, %v1908_v16  ;;  %v4389_v13 = vrot.slane %v6177_v45, 9 }
 0x1a7   : > { %v1910_v25 = vpop.f32.mrf.mxu1  ;;  %5038 = vmatprep.mubr.msk.bf16.mxu0 %vm1496_vm5, %v6035_v12 }
 0x1a8   : > { %v1911_v40 = vadd.f32 %v1910_v25, %v6292_v60  ;;  %v2348_v6 = vpop.f32.mrf.mxu0  ;;  %v6416_v28 = vadd.f32 %v4821_v54, %v1919_v31  ;;  %v3513_v60 = vrot.slane %v6195_v15, 5  ;;  %v3511_v45 = vsel %vm5706_vm15, %v4389_v13, %v3510_v53  ;;  %v7191_v31 = vld [vmem:[#allocation17_spill] sm:$0xff]  ;;  %v7192_v25 = vld [vmem:[#allocation3_spill] sm:$0xff] }
 0x1a9   : > { %v4790_v61 = vpop.f32.mrf.mxu1  ;;  %4993 = vmatmul.mubr.msk.bf16.gmra.mxu1 %vm1496_vm5, %v7170_v22 }
 0x1aa   : > { %v1932_v4 = vadd.f32 %v4790_v61, %v6298_v49  ;;  %4996 = vmatprep.mubr.msk.bf16.mxu1 %vm1496_vm5, %v7171_v7  ;;  %v4833_v36 = vpop.f32.mrf.mxu0  ;;  %v6423_v27 = vadd.f32 %v2303_v56, %v1911_v40 }
 0x1ab   : > { %v1923_v12 = vpop.f32.mrf.mxu1 }
 0x1ac   : > { %v1924_v54 = vadd.f32 %v1923_v12, %v6303_v18  ;;  %v2351_v34 = vpop.f32.mrf.mxu0  ;;  %v6428_v52 = vadd.f32 %v4824_v47, %v1932_v4  ;;  %v3514_v47 = vsel %vm5706_vm15, %v3512_v17, %v3513_v60  ;;  %v7193_v4 = vld [vmem:[#allocation6_spill] sm:$0xff]  ;;  %v7194_v17 = vld [vmem:[#allocation7_spill] sm:$0xff] }
 0x1ad   : > { %v4791_v22 = vpop.f32.mrf.mxu1 }
 0x1ae   : > { %v1935_v49 = vadd.f32 %v4791_v22, %v6311_v1  ;;  %v4836_v42 = vpop.f32.mrf.mxu0  ;;  %5039 = vmatmul.mubr.msk.bf16.gmra.mxu0 %vm1496_vm5, %v6059_v51  ;;  %v6433_v7 = vadd.f32 %v2316_v10, %v1924_v54  ;;  %v4391_v10 = vcombine.low %v3511_v45, %v3514_v47 }
 0x1af   : > { %v1926_v56 = vpop.f32.mrf.mxu1  ;;  %5042 = vmatprep.mubr.msk.bf16.mxu0 %vm1496_vm5, %v6108_v0 }
 0x1b0   : > { %v1927_v15 = vadd.f32 %v1926_v56, %v6313_v62  ;;  %v2364_v18 = vpop.f32.mrf.mxu0  ;;  %v6442_v1 = vadd.f32 %v4825_v35, %v1935_v49  ;;  %v7195_v49 = vld [vmem:[#allocation18_spill] sm:$0xff] }
 0x1b1   : > { %v4794_v37 = vpop.f32.mrf.mxu1  ;;  %4997 = vmatmul.mubr.msk.bf16.gmra.mxu1 %vm1496_vm5, %v7172_v39  ;;  %v7196_v56 = vld [vmem:[#allocation10_spill] sm:$0xff] }
 0x1b2   : > { %v1948_v51 = vadd.f32 %v4794_v37, %v6241_v8  ;;  %5000 = vmatprep.mubr.msk.bf16.mxu1 %vm1496_vm5, %v7173_v44  ;;  %v4837_v0 = vpop.f32.mrf.mxu0  ;;  %v6450_v63 = vadd.f32 %v6375_v38, %v1927_v15  ;;  %v7198_v37 = vld [vmem:[#allocation13_spill] sm:$0xff] }
 0x1b3   : > { %v1939_v48 = vpop.f32.mrf.mxu1 }
 0x1b4   : > { %v1940_v62 = vadd.f32 %v1939_v48, %v6247_v55  ;;  %v2367_v59 = vpop.f32.mrf.mxu0  ;;  %v6454_v35 = vadd.f32 %v6380_v24, %v1948_v51 }
 0x1b5   : > { %v4795_v9 = vpop.f32.mrf.mxu1 }
 0x1b6   : > { %v1951_v39 = vadd.f32 %v4795_v9, %v6257_v43  ;;  %v4840_v23 = vpop.f32.mrf.mxu0  ;;  %5043 = vmatmul.mubr.msk.bf16.gmra.mxu0 %vm1496_vm5, %v4391_v10  ;;  %v6459_v44 = vadd.f32 %v6389_v11, %v1940_v62  ;;  %v7199_v62 = vld [vmem:[#allocation16_spill] sm:$0xff] }
 0x1b7   : > { %v1942_v8 = vpop.f32.mrf.mxu1 }
 0x1b8   : > { %v1943_v38 = vadd.f32 %v1942_v8, %v6263_v21  ;;  %v2380_v16 = vpop.f32.mrf.mxu0  ;;  %v6462_v33 = vadd.f32 %v4829_v29, %v1951_v39 }
 0x1b9   : > { %v4798_v55 = vpop.f32.mrf.mxu1  ;;  %5001 = vmatmul.mubr.msk.bf16.gmra.mxu1 %vm1496_vm5, %v7174_v19 }
 0x1ba   : > { %v1964_v24 = vadd.f32 %v4798_v55, %v6273_v32  ;;  %5004 = vmatprep.mubr.msk.bf16.mxu1 %vm1496_vm5, %v7191_v31  ;;  %v4841_v43 = vpop.f32.mrf.mxu0  ;;  %v6470_v53 = vadd.f32 %v6401_v2, %v1943_v38  ;;  %v7200_v55 = vld [vmem:[#allocation4_spill] sm:$0xff] }
 0x1bb   : > { %v1955_v11 = vpop.f32.mrf.mxu1 }
 0x1bc   : > { %v1956_v40 = vadd.f32 %v1955_v11, %v7192_v25  ;;  %v2383_v21 = vpop.f32.mrf.mxu0  ;;  %v6474_v29 = vadd.f32 %v6406_v50, %v1964_v24  ;;  %v7197_v50 = vld [vmem:[#allocation11_spill] sm:$0xff]  ;;  %v7201_v25 = vld [vmem:[#allocation12_spill] sm:$0xff] }
 0x1bd   : > { %v4799_v61 = vpop.f32.mrf.mxu1 }
 0x1be   : > { %v1967_v13 = vadd.f32 %v4799_v61, %v7193_v4  ;;  %v4880_v19 = vpop.f32.mrf.mxu0  ;;  %v6477_v12 = vadd.f32 %v2348_v6, %v1956_v40  ;;  %v7202_v40 = vld [vmem:[#allocation5_spill] sm:$0xff] }
 0x1bf   : > { %v1958_v32 = vpop.f32.mrf.mxu1 }
 0x1c0   : > { %v1959_v60 = vadd.f32 %v1958_v32, %v7194_v17  ;;  %v2702_v54 = vpop.f32.mrf.mxu0  ;;  %v6480_v22 = vadd.f32 %v4833_v36, %v1967_v13  ;;  %v7203_v32 = vld [vmem:[#allocation8_spill] sm:$0xff] }
 0x1c1   : > { %v4802_v2 = vpop.f32.mrf.mxu1  ;;  %5005 = vmatmul.mubr.msk.bf16.gmra.mxu1 %vm1496_vm5, %v7195_v49  ;;  %v7204_v49 = vld [vmem:[#allocation9_spill] sm:$0xff] }
 0x1c2   : > { %v1980_v45 = vadd.f32 %v4802_v2, %v7196_v56  ;;  %5008 = vmatprep.mubr.msk.bf16.mxu1 %vm1496_vm5, %v7197_v50  ;;  %v4881_v47 = vpop.f32.mrf.mxu0  ;;  %v6487_v15 = vadd.f32 %v2351_v34, %v1959_v60 }
 0x1c3   : > { %v1971_v6 = vpop.f32.mrf.mxu1 }
 0x1c4   : > { %v1972_v51 = vadd.f32 %v1971_v6, %v7198_v37  ;;  %v2705_v10 = vpop.f32.mrf.mxu0  ;;  %v6490_v48 = vadd.f32 %v4836_v42, %v1980_v45  ;;  %v7205_v6 = vld [vmem:[#allocation14_spill] sm:$0xff] }
 0x1c5   : > { %v4803_v36 = vpop.f32.mrf.mxu1 }
 0x1c6   : > { %v1983_v9 = vadd.f32 %v4803_v36, %v7199_v62  ;;  %v4884_v39 = vpop.f32.mrf.mxu0  ;;  %v6493_v8 = vadd.f32 %v2364_v18, %v1972_v51 }
 0x1c7   : > { %v1974_v38 = vpop.f32.mrf.mxu1 }
 0x1c8   : > { %v1975_v24 = vadd.f32 %v1974_v38, %v7200_v55  ;;  %v2718_v31 = vpop.f32.mrf.mxu0  ;;  %v6496_v11 = vadd.f32 %v4837_v0, %v1983_v9 }
 0x1c9   : > { %v4806_v34 = vpop.f32.mrf.mxu1  ;;  %5009 = vmatmul.mubr.msk.bf16.gmra.mxu1 %vm1496_vm5, %v7201_v25 }
 0x1ca   : > { %v1996_v61 = vadd.f32 %v4806_v34, %v7202_v40  ;;  %v4885_v42 = vpop.f32.mrf.mxu0  ;;  %v6501_v4 = vadd.f32 %v2367_v59, %v1975_v24 }
 0x1cb   : > { %v1987_v13 = vpop.f32.mrf.mxu1 }
 0x1cc   : > { %v1988_v17 = vadd.f32 %v1987_v13, %v7203_v32  ;;  %v2721_v18 = vpop.f32.mrf.mxu0  ;;  %v6504_v60 = vadd.f32 %v4840_v23, %v1996_v61 }
 0x1cd   : > { %v4807_v2 = vpop.f32.mrf.mxu1 }
 0x1ce   : > { %v1999_v56 = vadd.f32 %v4807_v2, %v7204_v49  ;;  %v4888_v0 = vpop.f32.mrf.mxu0  ;;  %v6507_v45 = vadd.f32 %v2380_v16, %v1988_v17 }
 0x1cf   : > { %v1990_v50 = vpop.f32.mrf.mxu1 }
 0x1d0   : > { %v1991_v37 = vadd.f32 %v1990_v50, %v7205_v6  ;;  %v2734_v51 = vpop.f32.mrf.mxu0  ;;  %v6510_v36 = vadd.f32 %v4841_v43, %v1999_v56 }
 0x1d1   : > { %v4846_v59 = vpop.f32.mrf.mxu1 }
 0x1d2   : > { %v2603_v62 = vadd.f32 %v4846_v59, %v6355_v20  ;;  %v4889_v9 = vpop.f32.mrf.mxu0  ;;  %v6513_v38 = vadd.f32 %v2383_v21, %v1991_v37 }
 0x1d3   : > { %v2474_v23 = vpop.f32.mrf.mxu1 }
 0x1d4   : > { %v2601_v55 = vadd.f32 %v2474_v23, %v6360_v58  ;;  %v2737_v24 = vpop.f32.mrf.mxu0  ;;  %v6516_v34 = vadd.f32 %v4880_v19, %v2603_v62 }
 0x1d5   : > { %v4847_v16 = vpop.f32.mrf.mxu1 }
 0x1d6   : > { %v2604_v25 = vadd.f32 %v4847_v16, %v6365_v5  ;;  %v4892_v40 = vpop.f32.mrf.mxu0  ;;  %v6519_v61 = vadd.f32 %v2702_v54, %v2601_v55 }
 0x1d7   : > { %v2477_v43 = vpop.f32.mrf.mxu1 }
 0x1d8   : > { %v2602_v13 = vadd.f32 %v2477_v43, %v6372_v46  ;;  %v2750_v32 = vpop.f32.mrf.mxu0  ;;  %v6522_v20 = vadd.f32 %v4881_v47, %v2604_v25 }
 0x1d9   : > { %v4850_v21 = vpop.f32.mrf.mxu1 }
 0x1da   : > { %v2607_v17 = vadd.f32 %v4850_v21, %v6377_v26  ;;  %v4893_v2 = vpop.f32.mrf.mxu0  ;;  %v6525_v58 = vadd.f32 %v2705_v10, %v2602_v13 }
 0x1db   : > { %v2490_v19 = vpop.f32.mrf.mxu1 }
 0x1dc   : > { %v2605_v49 = vadd.f32 %v2490_v19, %v6384_v57  ;;  %v2753_v56 = vpop.f32.mrf.mxu0  ;;  %v6528_v5 = vadd.f32 %v4884_v39, %v2607_v17 }
 0x1dd   : > { %v4851_v54 = vpop.f32.mrf.mxu1 }
 0x1de   : > { %v2608_v50 = vadd.f32 %v4851_v54, %v6391_v41  ;;  %v4896_v6 = vpop.f32.mrf.mxu0  ;;  %v6531_v46 = vadd.f32 %v2718_v31, %v2605_v49 }
 0x1df   : > { %v2493_v47 = vpop.f32.mrf.mxu1 }
 0x1e0   : > { %v2606_v37 = vadd.f32 %v2493_v47, %v6398_v3  ;;  %v2766_v59 = vpop.f32.mrf.mxu0  ;;  %v6534_v26 = vadd.f32 %v4885_v42, %v2608_v50 }
 0x1e1   : > { %v4854_v10 = vpop.f32.mrf.mxu1 }
 0x1e2   : > { %v2611_v62 = vadd.f32 %v4854_v10, %v6403_v14  ;;  %v4897_v23 = vpop.f32.mrf.mxu0  ;;  %v6537_v57 = vadd.f32 %v2721_v18, %v2606_v37 }
 0x1e3   : > { %v2506_v39 = vpop.f32.mrf.mxu1 }
 0x1e4   : > { %v2609_v55 = vadd.f32 %v2506_v39, %v6410_v30  ;;  %v2769_v16 = vpop.f32.mrf.mxu0  ;;  %v6540_v41 = vadd.f32 %v4888_v0, %v2611_v62 }
 0x1e5   : > { %v4855_v31 = vpop.f32.mrf.mxu1 }
 0x1e6   : > { %v2612_v25 = vadd.f32 %v4855_v31, %v6416_v28  ;;  %v4900_v43 = vpop.f32.mrf.mxu0  ;;  %v6543_v3 = vadd.f32 %v2734_v51, %v2609_v55 }
 0x1e7   : > { %v2509_v42 = vpop.f32.mrf.mxu1 }
 0x1e8   : > { %v2610_v13 = vadd.f32 %v2509_v42, %v6423_v27  ;;  %v2782_v21 = vpop.f32.mrf.mxu0  ;;  %v6546_v14 = vadd.f32 %v4889_v9, %v2612_v25 }
 0x1e9   : > { %v4858_v18 = vpop.f32.mrf.mxu1 }
 0x1ea   : > { %v2615_v17 = vadd.f32 %v4858_v18, %v6428_v52  ;;  %v4901_v19 = vpop.f32.mrf.mxu0  ;;  %v6549_v30 = vadd.f32 %v2737_v24, %v2610_v13 }
 0x1eb   : > { %v2522_v0 = vpop.f32.mrf.mxu1 }
 0x1ec   : > { %v2613_v49 = vadd.f32 %v2522_v0, %v6433_v7  ;;  %v2785_v54 = vpop.f32.mrf.mxu0  ;;  %v6552_v28 = vadd.f32 %v4892_v40, %v2615_v17 }
 0x1ed   : > { %v4859_v51 = vpop.f32.mrf.mxu1 }
 0x1ee   : > { %v2616_v50 = vadd.f32 %v4859_v51, %v6442_v1  ;;  %v4904_v47 = vpop.f32.mrf.mxu0  ;;  %v6555_v27 = vadd.f32 %v2750_v32, %v2613_v49 }
 0x1ef   : > { %v2525_v9 = vpop.f32.mrf.mxu1 }
 0x1f0   : > { %v2614_v37 = vadd.f32 %v2525_v9, %v6450_v63  ;;  %v2798_v10 = vpop.f32.mrf.mxu0  ;;  %v6558_v52 = vadd.f32 %v4893_v2, %v2616_v50 }
 0x1f1   : > { %v4862_v24 = vpop.f32.mrf.mxu1 }
 0x1f2   : > { %v2619_v62 = vadd.f32 %v4862_v24, %v6454_v35  ;;  %v4905_v39 = vpop.f32.mrf.mxu0  ;;  %v6561_v7 = vadd.f32 %v2753_v56, %v2614_v37 }
 0x1f3   : > { %v2538_v40 = vpop.f32.mrf.mxu1 }
 0x1f4   : > { %v2617_v55 = vadd.f32 %v2538_v40, %v6459_v44  ;;  %v2801_v31 = vpop.f32.mrf.mxu0  ;;  %v6564_v1 = vadd.f32 %v4896_v6, %v2619_v62 }
 0x1f5   : > { %v4863_v32 = vpop.f32.mrf.mxu1 }
 0x1f6   : > { %v2620_v25 = vadd.f32 %v4863_v32, %v6462_v33  ;;  %v4908_v42 = vpop.f32.mrf.mxu0  ;;  %v6567_v63 = vadd.f32 %v2766_v59, %v2617_v55 }
 0x1f7   : > { %v2541_v2 = vpop.f32.mrf.mxu1 }
 0x1f8   : > { %v2618_v13 = vadd.f32 %v2541_v2, %v6470_v53  ;;  %v2814_v18 = vpop.f32.mrf.mxu0  ;;  %v6570_v35 = vadd.f32 %v4897_v23, %v2620_v25 }
 0x1f9   : > { %v4866_v56 = vpop.f32.mrf.mxu1 }
 0x1fa   : > { %v2623_v17 = vadd.f32 %v4866_v56, %v6474_v29  ;;  %v4909_v0 = vpop.f32.mrf.mxu0  ;;  %v6573_v44 = vadd.f32 %v2769_v16, %v2618_v13 }
 0x1fb   : > { %v2554_v6 = vpop.f32.mrf.mxu1 }
 0x1fc   : > { %7206 = vst [vmem:[#allocation15_spill] sm:$0xff] %v6573_v44  ;;  %v2621_v49 = vadd.f32 %v2554_v6, %v6477_v12  ;;  %v2817_v51 = vpop.f32.mrf.mxu0  ;;  %v6576_v33 = vadd.f32 %v4900_v43, %v2623_v17 }
 0x1fd   : > { %v4867_v59 = vpop.f32.mrf.mxu1 }
 0x1fe   : > { %7207 = vst [vmem:[#allocation19_spill] sm:$0xff] %v6576_v33  ;;  %v2624_v50 = vadd.f32 %v4867_v59, %v6480_v22  ;;  %v6579_v9 = vpop.f32.mrf.mxu0  ;;  %v6581_v53 = vadd.f32 %v2782_v21, %v2621_v49 }
 0x1ff   : > { %v2557_v23 = vpop.f32.mrf.mxu1 }
 0x200   : > { %7208 = vst [vmem:[#allocation20_spill] sm:$0xff] %v6581_v53  ;;  %v2622_v37 = vadd.f32 %v2557_v23, %v6487_v15  ;;  %v6584_v29 = vpop.f32.mrf.mxu0  ;;  %v6586_v16 = vadd.f32 %v4901_v19, %v2624_v50 }
 0x201   : > { %v4870_v24 = vpop.f32.mrf.mxu1 }
 0x202   : > { %7209 = vst [vmem:[#allocation21_spill] sm:$0xff] %v6586_v16  ;;  %v2627_v12 = vadd.f32 %v4870_v24, %v6490_v48  ;;  %v6589_v62 = vpop.f32.mrf.mxu0  ;;  %v6591_v43 = vadd.f32 %v2785_v54, %v2622_v37 }
 0x203   : > { %v2570_v40 = vpop.f32.mrf.mxu1 }
 0x204   : > { %7210 = vst [vmem:[#allocation17_spill] sm:$0xff] %v6591_v43  ;;  %v2625_v22 = vadd.f32 %v2570_v40, %v6493_v8  ;;  %v6594_v55 = vpop.f32.mrf.mxu0  ;;  %v6596_v21 = vadd.f32 %v4904_v47, %v2627_v12 }
 0x205   : > { %v4871_v32 = vpop.f32.mrf.mxu1 }
 0x206   : > { %7211 = vst [vmem:[#allocation3_spill] sm:$0xff] %v6596_v21  ;;  %v2628_v15 = vadd.f32 %v4871_v32, %v6496_v11  ;;  %v6599_v25 = vpop.f32.mrf.mxu0  ;;  %v6601_v19 = vadd.f32 %v2798_v10, %v2625_v22 }
 0x207   : > { %v2573_v2 = vpop.f32.mrf.mxu1 }
 0x208   : > { %7212 = vst [vmem:[#allocation6_spill] sm:$0xff] %v6601_v19  ;;  %v2626_v48 = vadd.f32 %v2573_v2, %v6501_v4  ;;  %v6604_v13 = vpop.f32.mrf.mxu0  ;;  %v6606_v54 = vadd.f32 %v4905_v39, %v2628_v15 }
 0x209   : > { %v4874_v56 = vpop.f32.mrf.mxu1 }
 0x20a   : > { %7213 = vst [vmem:[#allocation7_spill] sm:$0xff] %v6606_v54  ;;  %v2631_v8 = vadd.f32 %v4874_v56, %v6504_v60  ;;  %v6609_v17 = vpop.f32.mrf.mxu0  ;;  %v6611_v47 = vadd.f32 %v2801_v31, %v2626_v48 }
 0x20b   : > { %v2586_v6 = vpop.f32.mrf.mxu1 }
 0x20c   : > { %7214 = vst [vmem:[#allocation18_spill] sm:$0xff] %v6611_v47  ;;  %v2629_v11 = vadd.f32 %v2586_v6, %v6507_v45  ;;  %v6614_v49 = vpop.f32.mrf.mxu0  ;;  %v6616_v10 = vadd.f32 %v4908_v42, %v2631_v8 }
 0x20d   : > { %v4875_v59 = vpop.f32.mrf.mxu1 }
 0x20e   : > { %7215 = vst [vmem:[#allocation10_spill] sm:$0xff] %v6616_v10  ;;  %v2632_v4 = vadd.f32 %v4875_v59, %v6510_v36  ;;  %v6619_v50 = vpop.f32.mrf.mxu0  ;;  %v6621_v39 = vadd.f32 %v2814_v18, %v2629_v11 }
 0x20f   : > { %v2589_v23 = vpop.f32.mrf.mxu1 }
 0x210   : > { %7216 = vst [vmem:[#allocation11_spill] sm:$0xff] %v6621_v39  ;;  %v2630_v60 = vadd.f32 %v2589_v23, %v6513_v38  ;;  %v6624_v37 = vpop.f32.mrf.mxu0  ;;  %v6626_v31 = vadd.f32 %v4909_v0, %v2632_v4 }
 0x211   : > { %v4914_v24 = vpop.f32.mrf.mxu1 }
 0x212   : > { %7217 = vst [vmem:[#allocation13_spill] sm:$0xff] %v6626_v31  ;;  %v6628_v45 = vpop.f32.mrf.mxu0  ;;  %v6630_v12 = vadd.f32 %v2817_v51, %v2630_v60 }
 0x213   : > { %v2914_v42 = vpop.f32.mrf.mxu1 }
 0x214   : > { %7218 = vst [vmem:[#allocation16_spill] sm:$0xff] %v6630_v12  ;;  %v6632_v40 = vpop.f32.mrf.mxu0 }
 0x215   : > { %v4915_v36 = vpop.f32.mrf.mxu1 }
 0x216   : > { %v6634_v22 = vpop.f32.mrf.mxu0 }
 0x217   : > { %v2917_v18 = vpop.f32.mrf.mxu1 }
 0x218   : > { %v6636_v32 = vpop.f32.mrf.mxu0 }
 0x219   : > { %v4918_v15 = vpop.f32.mrf.mxu1 }
 0x21a   : > { %v6638_v38 = vpop.f32.mrf.mxu0 }
 0x21b   : > { %v2930_v2 = vpop.f32.mrf.mxu1 }
 0x21c   : > { %v6640_v0 = vpop.f32.mrf.mxu0 }
 0x21d   : > { %7219 = vst [vmem:[#allocation4_spill] sm:$0xff] %v6640_v0  ;;  %v4919_v48 = vpop.f32.mrf.mxu1 }
 0x21e   : > { %v6642_v56 = vpop.f32.mrf.mxu0 }
 0x21f   : > { %7220 = vst [vmem:[#allocation12_spill] sm:$0xff] %v6642_v56  ;;  %v2933_v51 = vpop.f32.mrf.mxu1 }
 0x220   : > { %v6644_v8 = vpop.f32.mrf.mxu0 }
 0x221   : > { %7221 = vst [vmem:[#allocation5_spill] sm:$0xff] %v6644_v8  ;;  %v4922_v6 = vpop.f32.mrf.mxu1 }
 0x222   : > { %v6646_v11 = vpop.f32.mrf.mxu0 }
 0x223   : > { %7222 = vst [vmem:[#allocation8_spill] sm:$0xff] %v6646_v11  ;;  %v2946_v59 = vpop.f32.mrf.mxu1 }
 0x224   : > { %v6648_v4 = vpop.f32.mrf.mxu0 }
 0x225   : > { %7223 = vst [vmem:[#allocation9_spill] sm:$0xff] %v6648_v4  ;;  %v4923_v23 = vpop.f32.mrf.mxu1 }
 0x226   : > { %v6650_v60 = vpop.f32.mrf.mxu0 }
 0x227   : > { %7224 = vst [vmem:[#allocation14_spill] sm:$0xff] %v6650_v60  ;;  %v2949_v12 = vpop.f32.mrf.mxu1 }
 0x228   : > { %v6652_v31 = vpop.f32.mrf.mxu0 }
 0x229   : > { %7225 = vst [vmem:[#allocation22_spill] sm:$0xff] %v6652_v31  ;;  %v4926_v39 = vpop.f32.mrf.mxu1 }
 0x22a   : > { %v6654_v10 = vpop.f32.mrf.mxu0 }
 0x22b   : > { %7226 = vst [vmem:[#allocation23_spill] sm:$0xff] %v6654_v10  ;;  %v2962_v47 = vpop.f32.mrf.mxu1 }
 0x22c   : > { %v6656_v54 = vpop.f32.mrf.mxu0 }
 0x22d   : > { %7227 = vst [vmem:[#allocation24_spill] sm:$0xff] %v6656_v54  ;;  %v4927_v19 = vpop.f32.mrf.mxu1 }
 0x22e   : > { %v6658_v8 = vpop.f32.mrf.mxu0 }
 0x22f   : > { %7228 = vst [vmem:[#allocation25_spill] sm:$0xff] %v6658_v8  ;;  %v2965_v21 = vpop.f32.mrf.mxu1 }
 0x230   : > { %v6660_v11 = vpop.f32.mrf.mxu0 }
 0x231   : > { %7229 = vst [vmem:[#allocation26_spill] sm:$0xff] %v6660_v11  ;;  %v4930_v43 = vpop.f32.mrf.mxu1 }
 0x232   : > { %v6662_v4 = vpop.f32.mrf.mxu0 }
 0x233   : > { %7230 = vst [vmem:[#allocation27_spill] sm:$0xff] %v6662_v4  ;;  %v2978_v16 = vpop.f32.mrf.mxu1 }
 0x234   : > { %v6664_v60 = vpop.f32.mrf.mxu0 }
 0x235   : > { %7231 = vst [vmem:[#allocation28_spill] sm:$0xff] %v6664_v60  ;;  %v4931_v56 = vpop.f32.mrf.mxu1 }
 0x236   : > { %v6666_v31 = vpop.f32.mrf.mxu0 }
 0x237   : > { %7232 = vst [vmem:[#allocation29_spill] sm:$0xff] %v6666_v31  ;;  %v6668_v53 = vpop.f32.mrf.mxu1 }
 0x238   : > { %7233 = vst [vmem:[#allocation30_spill] sm:$0xff] %v6668_v53  ;;  %v6670_v10 = vpop.f32.mrf.mxu0 }
 0x239   : > { %7234 = vst [vmem:[#allocation31_spill] sm:$0xff] %v6670_v10  ;;  %v6672_v54 = vpop.f32.mrf.mxu1 }
 0x23a   : > { %7235 = vst [vmem:[#allocation32_spill] sm:$0xff] %v6672_v54  ;;  %v6674_v33 = vpop.f32.mrf.mxu0 }
 0x23b   : > { %7236 = vst [vmem:[#allocation33_spill] sm:$0xff] %v6674_v33  ;;  %v6676_v8 = vpop.f32.mrf.mxu1 }
 0x23c   : > { %7237 = vst [vmem:[#allocation34_spill] sm:$0xff] %v6676_v8  ;;  %v6678_v11 = vpop.f32.mrf.mxu0 }
 0x23d   : > { %7238 = vst [vmem:[#allocation35_spill] sm:$0xff] %v6678_v11  ;;  %v6680_v44 = vpop.f32.mrf.mxu1  ;;  %v3043_v11 = vadd.f32 %v4914_v24, %v6516_v34  ;;  %v3048_v34 = vadd.f32 %v4919_v48, %v6534_v26  ;;  %v7257_v48 = vld [vmem:[#allocation21_spill] sm:$0xff] }
 0x23e   : > { %7239 = vst [vmem:[#allocation36_spill] sm:$0xff] %v6680_v44  ;;  %v6682_v4 = vpop.f32.mrf.mxu0 }
 0x23f   : > { %7240 = vst [vmem:[#allocation37_spill] sm:$0xff] %v6682_v4  ;;  %v6684_v60 = vpop.f32.mrf.mxu1 }
 0x240   : > { %7241 = vst [vmem:[#allocation38_spill] sm:$0xff] %v6684_v60  ;;  %v6686_v0 = vpop.f32.mrf.mxu0 }
 0x241   : > { %7242 = vst [vmem:[#allocation39_spill] sm:$0xff] %v6686_v0  ;;  %v6688_v31 = vpop.f32.mrf.mxu1  ;;  %v3041_v0 = vadd.f32 %v2914_v42, %v6519_v61  ;;  %v3046_v61 = vadd.f32 %v2933_v51, %v6537_v57  ;;  %v3049_v42 = vadd.f32 %v2946_v59, %v6543_v3  ;;  %v3053_v57 = vadd.f32 %v2962_v47, %v6555_v27  ;;  %v7259_v51 = vld [vmem:[#allocation17_spill] sm:$0xff] }
 0x242   : > { %7243 = vst [vmem:[#allocation40_spill] sm:$0xff] %v6688_v31  ;;  %v6690_v53 = vpop.f32.mrf.mxu0  ;;  %v3044_v31 = vadd.f32 %v4915_v36, %v6522_v20  ;;  %v3051_v20 = vadd.f32 %v4922_v6, %v6540_v41  ;;  %v3056_v41 = vadd.f32 %v4927_v19, %v6558_v52  ;;  %v3054_v3 = vadd.f32 %v2965_v21, %v6561_v7 }
 0x243   : > { %7244 = vst [vmem:[#allocation41_spill] sm:$0xff] %v6690_v53  ;;  %v6692_v10 = vpop.f32.mrf.mxu1  ;;  %v3042_v53 = vadd.f32 %v2917_v18, %v6525_v58  ;;  %v3052_v58 = vadd.f32 %v4923_v23, %v6546_v14  ;;  %v3247_v26 = vadd.f32 %v6584_v29, %v3041_v0  ;;  %v6747_v27 = vadd.f32 %v6614_v49, %v3046_v61  ;;  %v7251_v49 = vld [vmem:[#allocation30_spill] sm:$0xff]  ;;  %v7256_v0 = vld [vmem:[#allocation12_spill] sm:$0xff] }
 0x244   : > { %7245 = vst [vmem:[#allocation42_spill] sm:$0xff] %v6692_v10  ;;  %v6694_v54 = vpop.f32.mrf.mxu0  ;;  %v6750_v52 = vadd.f32 %v6619_v50, %v3051_v20  ;;  %v6774_v47 = vadd.f32 %v6638_v38, %v3056_v41 }
 0x245   : > { %7246 = vst [vmem:[#allocation43_spill] sm:$0xff] %v6694_v54  ;;  %v6696_v33 = vpop.f32.mrf.mxu1  ;;  %v3047_v54 = vadd.f32 %v4918_v15, %v6528_v5  ;;  %v3050_v5 = vadd.f32 %v2949_v12, %v6549_v30  ;;  %v3248_v14 = vadd.f32 %v6594_v55, %v3042_v53  ;;  %v3059_v30 = vadd.f32 %v4930_v43, %v6564_v1  ;;  %v7254_v12 = vld [vmem:[#allocation20_spill] sm:$0xff] }
 0x246   : > { %v6698_v8 = vpop.f32.mrf.mxu0  ;;  %v6755_v1 = vadd.f32 %v6624_v37, %v3049_v42  ;;  %v6758_v53 = vadd.f32 %v6628_v45, %v3052_v58  ;;  %v3057_v43 = vadd.f32 %v2978_v16, %v6567_v63  ;;  %v3060_v55 = vadd.f32 %v4931_v56, %v6570_v35  ;;  %v7249_v63 = vld [vmem:[#allocation4_spill] sm:$0xff]  ;;  %v7250_v35 = vld [vmem:[#allocation15_spill] sm:$0xff]  ;;  %v7264_v42 = vld [vmem:[#allocation6_spill] sm:$0xff] }
 0x247   : > { %7247 = vst [vmem:[#allocation44_spill] sm:$0xff] %v6698_v8  ;;  %v6701_v44 = vpop.f32.mrf.mxu1  ;;  %v3045_v8 = vadd.f32 %v2930_v2, %v6531_v46  ;;  %v3055_v46 = vadd.f32 %v4926_v39, %v6552_v28  ;;  %v3253_v39 = vadd.f32 %v6599_v25, %v3047_v54  ;;  %v6763_v25 = vadd.f32 %v6632_v40, %v3050_v5  ;;  %v7252_v37 = vld [vmem:[#allocation19_spill] sm:$0xff]  ;;  %v7255_v40 = vld [vmem:[#allocation34_spill] sm:$0xff]  ;;  %v7258_v38 = vld [vmem:[#allocation36_spill] sm:$0xff] }
 0x248   : > { %v6703_v4 = vpop.f32.mrf.mxu0  ;;  %v6777_v16 = vadd.f32 %v7249_v63, %v3054_v3  ;;  %v3058_v50 = vadd.f32 %v7251_v49, %v7250_v35  ;;  %v3064_v56 = vadd.f32 %v7258_v38, %v7257_v48  ;;  %v7270_v49 = vld [vmem:[#allocation39_spill] sm:$0xff]  ;;  %v7273_v48 = vld [vmem:[#allocation14_spill] sm:$0xff] }
 0x249   : > { %7248 = vst [vmem:[#allocation45_spill] sm:$0xff] %v6703_v4  ;;  %v6707_v60 = vpop.f32.mrf.mxu1  ;;  %v3249_v4 = vadd.f32 %v6579_v9, %v3043_v11  ;;  %v3250_v9 = vadd.f32 %v6589_v62, %v3044_v31  ;;  %v6741_v29 = vadd.f32 %v6604_v13, %v3045_v8  ;;  %v6744_v62 = vadd.f32 %v6609_v17, %v3048_v34  ;;  %v7253_v31 = vld [vmem:[#allocation32_spill] sm:$0xff]  ;;  %v7260_v8 = vld [vmem:[#allocation38_spill] sm:$0xff]  ;;  %v7261_v11 = vld [vmem:[#allocation37_spill] sm:$0xff] }
 0x24a   : > { %v6710_v10 = vpop.f32.mrf.mxu0  ;;  %v6766_v19 = vadd.f32 %v6634_v22, %v3055_v46  ;;  %v6771_v17 = vadd.f32 %v6636_v32, %v3053_v57  ;;  %v3063_v45 = vadd.f32 %v7253_v31, %v7252_v37  ;;  %v3061_v22 = vadd.f32 %v7255_v40, %v7254_v12  ;;  %v7262_v34 = vld [vmem:[#allocation3_spill] sm:$0xff]  ;;  %v7263_v61 = vld [vmem:[#allocation40_spill] sm:$0xff]  ;;  %v7266_v57 = vld [vmem:[#allocation5_spill] sm:$0xff] }
 0x24b   : > { %v6715_v24 = vpop.f32.mrf.mxu1  ;;  %v6786_v32 = vadd.f32 %v7256_v0, %v3059_v30  ;;  %v3062_v6 = vadd.f32 %v7260_v8, %v7259_v51  ;;  %v3067_v20 = vadd.f32 %v7263_v61, %v7262_v34  ;;  %v7265_v58 = vld [vmem:[#allocation42_spill] sm:$0xff]  ;;  %v6807_v41 = vadd.f32 %v7266_v57, %v3057_v43  ;;  %v7268_v30 = vld [vmem:[#allocation7_spill] sm:$0xff]  ;;  %v7272_v0 = vld [vmem:[#allocation9_spill] sm:$0xff] }
 0x24c   : > { %v6722_v36 = vpop.f32.mrf.mxu0  ;;  %v3065_v5 = vadd.f32 %v7265_v58, %v7264_v42  ;;  %v7271_v12 = vld [vmem:[#allocation10_spill] sm:$0xff]  ;;  %v6825_v38 = vadd.f32 %v7273_v48, %v3063_v45  ;;  %v7277_v34 = vld [vmem:[#allocation41_spill] sm:$0xff] }
 0x24d   : > { %v6726_v18 = vpop.f32.mrf.mxu1  ;;  %v3071_v40 = vadd.f32 %v6707_v60, %v7271_v12  ;;  %v7274_v51 = vld [vmem:[#allocation22_spill] sm:$0xff]  ;;  %v7276_v60 = vld [vmem:[#allocation24_spill] sm:$0xff]  ;;  %v7278_v45 = vld [vmem:[#allocation25_spill] sm:$0xff] }
 0x24e   : > { %v6734_v15 = vpop.f32.mrf.mxu0  ;;  %v6832_v8 = vadd.f32 %v7274_v51, %v3061_v22  ;;  %v6842_v58 = vadd.f32 %v7278_v45, %v3067_v20 }
 0x24f   : > { %v6737_v28 = vpop.f32.mrf.mxu1 }
 0x250   : > { %v6752_v7 = vpop.f32.mrf.mxu0 }
 0x251   : > { %v4982_v21 = vpop.f32.mrf.mxu1 }
 0x252   : > { %v3477_v13 = vadd.f32 %v4982_v21, %v3249_v4  ;;  %v6768_v54 = vpop.f32.mrf.mxu0  ;;  %v3068_v21 = vadd.f32 %v6696_v33, %v7268_v30  ;;  %v7280_v30 = vld [vmem:[#allocation27_spill] sm:$0xff] }
 0x253   : > { %v3348_v2 = vpop.f32.mrf.mxu1 }
 0x254   : > { %v3689_v59 = vadd.f32 %v7261_v11, %v3477_v13  ;;  %v3475_v4 = vadd.f32 %v3348_v2, %v3247_v26  ;;  %v6793_v23 = vpop.f32.mrf.mxu0  ;;  %v7267_v26 = vld [vmem:[#allocation8_spill] sm:$0xff]  ;;  %v7269_v13 = vld [vmem:[#allocation18_spill] sm:$0xff]  ;;  %v7275_v11 = vld [vmem:[#allocation23_spill] sm:$0xff] }
 0x255   : > { %v4983_v46 = vpop.f32.mrf.mxu1  ;;  %v6810_v3 = vadd.f32 %v7267_v26, %v3060_v55  ;;  %v3066_v63 = vadd.f32 %v6701_v44, %v7269_v13  ;;  %v6822_v55 = vadd.f32 %v7272_v0, %v3058_v50  ;;  %v7281_v13 = vld [vmem:[#allocation28_spill] sm:$0xff] }
 0x256   : > { %v4478_v35 = vpack.c.bf16 %v3689_v59, %v3689_v59  ;;  %v3687_v37 = vadd.f32 %v7270_v49, %v3475_v4  ;;  %v6817_v31 = vpop.f32.mrf.mxu0  ;;  %v3478_v43 = vadd.f32 %v4983_v46, %v3250_v9  ;;  %v6835_v4 = vadd.f32 %v7275_v11, %v3064_v56  ;;  %v7279_v46 = vld [vmem:[#allocation26_spill] sm:$0xff] }
 0x257   : > { %v3351_v2 = vpop.f32.mrf.mxu1  ;;  %v6838_v9 = vadd.f32 %v7276_v60, %v3062_v6  ;;  %v6845_v57 = vadd.f32 %v7279_v46, %v3065_v5  ;;  %v6852_v6 = vadd.f32 %v7280_v30, %v3068_v21  ;;  %v7283_v5 = vld [vmem:[#allocation43_spill] sm:$0xff]  ;;  %v3954_v21 = vmul.f32 %v3689_v59, %v3689_v59  ;;  %v7287_v30 = vld [vmem:[#allocation45_spill] sm:$0xff] }
 0x258   : > { %3850 = vst.msk [vmem:[%s6800_s9 + $0x8] sm:$0xf] %vm3847_vm0, %v4478_v35  ;;  %v4476_v44 = vpack.c.bf16 %v3687_v37, %v3687_v37  ;;  %v6829_v33 = vpop.f32.mrf.mxu0  ;;  %v3690_v50 = vadd.f32 %v7277_v34, %v3478_v43  ;;  %v3476_v61 = vadd.f32 %v3351_v2, %v3248_v14  ;;  %v3952_v22 = vmul.f32 %v3687_v37, %v3687_v37  ;;  %v7282_v14 = vld [vmem:[#allocation11_spill] sm:$0xff]  ;;  %v7284_v2 = vld [vmem:[#allocation29_spill] sm:$0xff] }
 0x259   : > { %v4986_v42 = vpop.f32.mrf.mxu1  ;;  %v6855_v35 = vadd.f32 %v7281_v13, %v3066_v63  ;;  %v6859_v20 = vadd.f32 %v6715_v24, %v7282_v14  ;;  %v6863_v0 = vadd.f32 %v7284_v2, %v3071_v40  ;;  %v3881_v24 = vsel %vm3880_vm1, %v3687_v37, 0.0 }
 0x25a   : > { %3848 = vst.msk [vmem:[%s6800_s9] sm:$0xf] %vm3847_vm0, %v4476_v44  ;;  %v3481_v26 = vadd.f32 %v4986_v42, %v3253_v39  ;;  %v6849_v56 = vpop.f32.mrf.mxu0  ;;  %v4479_v49 = vpack.c.bf16 %v3690_v50, %v3690_v50  ;;  %v3688_v12 = vadd.f32 %v7283_v5, %v3476_v61  ;;  %v7285_v39 = vld [vmem:[#allocation13_spill] sm:$0xff]  ;;  %v7286_v44 = vld [vmem:[#allocation44_spill] sm:$0xff]  ;;  %v3984_v42 = vsel %vm3880_vm1, %v3952_v22, 0.0 }
 0x25b   : > { %v3364_v43 = vpop.f32.mrf.mxu1  ;;  %v6867_v48 = vadd.f32 %v6726_v18, %v7285_v39  ;;  %v3884_v18 = vsel %vm3880_vm1, %v3689_v59, 0.0  ;;  %v3987_v5 = vsel %vm3880_vm1, %v3954_v21, 0.0  ;;  %v3886_v2 = vsel %vm3880_vm1, %v3690_v50, 0.0 }
 0x25c   : > { %v3693_v63 = vadd.f32 %v7286_v44, %v3481_v26  ;;  %v3479_v51 = vadd.f32 %v3364_v43, %v6741_v29  ;;  %v6871_v11 = vpop.f32.mrf.mxu0  ;;  %3851 = vst.msk [vmem:[%s6800_s9 + $0xc] sm:$0xf] %vm3847_vm0, %v4479_v49  ;;  %v4477_v60 = vpack.c.bf16 %v3688_v12, %v3688_v12  ;;  %v3882_v40 = vsel %vm3880_vm1, %v3688_v12, 0.0 }
 0x25d   : > { %v3953_v34 = vmul.f32 %v3688_v12, %v3688_v12  ;;  %v4987_v61 = vpop.f32.mrf.mxu1  ;;  %v3883_v45 = vadd.f32 %v3882_v40, %v3881_v24  ;;  %v3955_v29 = vmul.f32 %v3690_v50, %v3690_v50 }
 0x25e   : > { %v4482_v46 = vpack.c.bf16 %v3693_v63, %v3693_v63  ;;  %v6879_v26 = vpop.f32.mrf.mxu0  ;;  %3849 = vst.msk [vmem:[%s6800_s9 + $0x4] sm:$0xf] %vm3847_vm0, %v4477_v60  ;;  %v3691_v13 = vadd.f32 %v7287_v30, %v3479_v51  ;;  %v3482_v14 = vadd.f32 %v4987_v61, %v6744_v62  ;;  %v3958_v61 = vmul.f32 %v3693_v63, %v3693_v63 }
 0x25f   : > { %v3985_v37 = vsel %vm3880_vm1, %v3953_v34, 0.0  ;;  %v3367_v49 = vpop.f32.mrf.mxu1  ;;  %v3885_v12 = vadd.f32 %v3884_v18, %v3883_v45 }
 0x260   : > { %v3986_v59 = vadd.f32 %v3985_v37, %v3984_v42  ;;  %3854 = vst.msk [vmem:[%s6800_s9 + $0x18] sm:$0xf] %vm3847_vm0, %v4482_v46  ;;  %v3480_v22 = vadd.f32 %v3367_v49, %v6747_v27  ;;  %v6890_v43 = vpop.f32.mrf.mxu0  ;;  %v4480_v39 = vpack.c.bf16 %v3691_v13, %v3691_v13  ;;  %v3956_v44 = vmul.f32 %v3691_v13, %v3691_v13 }
 0x261   : > { %v3694_v51 = vadd.f32 %v6710_v10, %v3482_v14  ;;  %v4990_v24 = vpop.f32.mrf.mxu1  ;;  %v3887_v60 = vadd.f32 %v3886_v2, %v3885_v12  ;;  %v3989_v27 = vsel %vm3880_vm1, %v3955_v29, 0.0  ;;  %v3888_v50 = vsel %vm3880_vm1, %v3691_v13, 0.0 }
 0x262   : > { %v3988_v62 = vadd.f32 %v3987_v5, %v3986_v59  ;;  %v3692_v21 = vadd.f32 %v6722_v36, %v3480_v22  ;;  %v3485_v40 = vadd.f32 %v4990_v24, %v6750_v52  ;;  %v6896_v34 = vpop.f32.mrf.mxu0  ;;  %3852 = vst.msk [vmem:[%s6800_s9 + $0x10] sm:$0xf] %vm3847_vm0, %v4480_v39  ;;  %v3991_v52 = vsel %vm3880_vm1, %v3956_v44, 0.0  ;;  %v7288_v22 = vld [vmem:[#allocation31_spill] sm:$0xff] }
 0x263   : > { %v4483_v18 = vpack.c.bf16 %v3694_v51, %v3694_v51  ;;  %v3380_v10 = vpop.f32.mrf.mxu1  ;;  %v3889_v42 = vadd.f32 %v3888_v50, %v3887_v60  ;;  %v6917_v2 = vadd.f32 %v7288_v22, %v6859_v20  ;;  %v3892_v39 = vsel %vm3880_vm1, %v3693_v63, 0.0 }
 0x264   : > { %v3990_v45 = vadd.f32 %v3989_v27, %v3988_v62  ;;  %v4481_v46 = vpack.c.bf16 %v3692_v21, %v3692_v21  ;;  %v3890_v37 = vsel %vm3880_vm1, %v3692_v21, 0.0  ;;  %v6903_v36 = vpop.f32.mrf.mxu0  ;;  %v3957_v29 = vmul.f32 %v3692_v21, %v3692_v21 }
 0x265   : > { %3855 = vst.msk [vmem:[%s6800_s9 + $0x1c] sm:$0xf] %vm3847_vm0, %v4483_v18  ;;  %v3697_v30 = vadd.f32 %v6734_v15, %v3485_v40  ;;  %v3483_v14 = vadd.f32 %v3380_v10, %v6755_v1  ;;  %v4991_v49 = vpop.f32.mrf.mxu1  ;;  %v3891_v5 = vadd.f32 %v3890_v37, %v3889_v42  ;;  %v3959_v44 = vmul.f32 %v3694_v51, %v3694_v51 }
 0x266   : > { %v3992_v13 = vadd.f32 %v3991_v52, %v3990_v45  ;;  %3853 = vst.msk [vmem:[%s6800_s9 + $0x14] sm:$0xf] %vm3847_vm0, %v4481_v46  ;;  %v3486_v12 = vadd.f32 %v4991_v49, %v6758_v53  ;;  %v6913_v59 = vpop.f32.mrf.mxu0  ;;  %v3993_v15 = vsel %vm3880_vm1, %v3957_v29, 0.0  ;;  %v7289_v53 = vld [vmem:[#allocation16_spill] sm:$0xff]  ;;  %v3995_v20 = vsel %vm3880_vm1, %v3958_v61, 0.0 }
 0x267   : > { %v4486_v1 = vpack.c.bf16 %v3697_v30, %v3697_v30  ;;  %v3383_v24 = vpop.f32.mrf.mxu1  ;;  %v3893_v62 = vadd.f32 %v3892_v39, %v3891_v5  ;;  %v3695_v21 = vadd.f32 %v6752_v7, %v3483_v14  ;;  %v3070_v27 = vadd.f32 %v6737_v28, %v7289_v53 }
 0x268   : > { %v3994_v60 = vadd.f32 %v3993_v15, %v3992_v13  ;;  %v3698_v40 = vadd.f32 %v6768_v54, %v3486_v12  ;;  %v3894_v50 = vsel %vm3880_vm1, %v3694_v51, 0.0  ;;  %v3484_v63 = vadd.f32 %v3383_v24, %v6763_v25  ;;  %v6930_v7 = vpop.f32.mrf.mxu0  ;;  %v7290_v54 = vld [vmem:[#allocation33_spill] sm:$0xff] }
 0x269   : > { %3858 = vst.msk [vmem:[%s6800_s9 + $0x28] sm:$0xf] %vm3847_vm0, %v4486_v1  ;;  %v4994_v18 = vpop.f32.mrf.mxu1  ;;  %v4484_v42 = vpack.c.bf16 %v3695_v21, %v3695_v21  ;;  %v3895_v45 = vadd.f32 %v3894_v50, %v3893_v62  ;;  %v6934_v46 = vadd.f32 %v7290_v54, %v6867_v48  ;;  %v3997_v28 = vsel %vm3880_vm1, %v3959_v44, 0.0  ;;  %v7291_v50 = vld [vmem:[#allocation35_spill] sm:$0xff] }
 0x26a   : > { %v3996_v10 = vadd.f32 %v3995_v20, %v3994_v60  ;;  %v3896_v61 = vsel %vm3880_vm1, %v3695_v21, 0.0  ;;  %v3960_v51 = vmul.f32 %v3695_v21, %v3695_v21  ;;  %v4487_v37 = vpack.c.bf16 %v3698_v40, %v3698_v40  ;;  %v6947_v24 = vpop.f32.mrf.mxu0 }
 0x26b   : > { %v3396_v52 = vpop.f32.mrf.mxu1  ;;  %3856 = vst.msk [vmem:[%s6800_s9 + $0x20] sm:$0xf] %vm3847_vm0, %v4484_v42  ;;  %v3897_v25 = vadd.f32 %v3896_v61, %v3895_v45  ;;  %v3696_v14 = vadd.f32 %v6793_v23, %v3484_v63  ;;  %v3489_v49 = vadd.f32 %v4994_v18, %v6766_v19  ;;  %v3962_v13 = vmul.f32 %v3697_v30, %v3697_v30 }
 0x26c   : > { %v3998_v29 = vadd.f32 %v3997_v28, %v3996_v10  ;;  %v3999_v5 = vsel %vm3880_vm1, %v3960_v51, 0.0  ;;  %3859 = vst.msk [vmem:[%s6800_s9 + $0x2c] sm:$0xf] %vm3847_vm0, %v4487_v37  ;;  %v3963_v48 = vmul.f32 %v3698_v40, %v3698_v40  ;;  %v3487_v12 = vadd.f32 %v3396_v52, %v6771_v17  ;;  %v6963_v28 = vpop.f32.mrf.mxu0 }
 0x26d   : > { %v4995_v22 = vpop.f32.mrf.mxu1  ;;  %v4485_v44 = vpack.c.bf16 %v3696_v14, %v3696_v14  ;;  %v3898_v15 = vsel %vm3880_vm1, %v3696_v14, 0.0  ;;  %v3961_v1 = vmul.f32 %v3696_v14, %v3696_v14  ;;  %v3701_v19 = vadd.f32 %v6817_v31, %v3489_v49 }
 0x26e   : > { %v4000_v39 = vadd.f32 %v3999_v5, %v3998_v29  ;;  %v3899_v23 = vadd.f32 %v3898_v15, %v3897_v25  ;;  %v3699_v62 = vadd.f32 %v6829_v33, %v3487_v12  ;;  %v3490_v60 = vadd.f32 %v4995_v22, %v6774_v47 }
 0x26f   : > { %v3399_v21 = vpop.f32.mrf.mxu1  ;;  %v3900_v53 = vsel %vm3880_vm1, %v3697_v30, 0.0  ;;  %3857 = vst.msk [vmem:[%s6800_s9 + $0x24] sm:$0xf] %vm3847_vm0, %v4485_v44  ;;  %v4001_v17 = vsel %vm3880_vm1, %v3961_v1, 0.0  ;;  %v6958_v63 = vadd.f32 %v7291_v50, %v3070_v27  ;;  %v4003_v18 = vsel %vm3880_vm1, %v3962_v13, 0.0 }
 0x270   : > { %v3488_v20 = vadd.f32 %v3399_v21, %v6777_v16  ;;  %v3901_v31 = vadd.f32 %v3900_v53, %v3899_v23  ;;  %v4002_v33 = vadd.f32 %v4001_v17, %v4000_v39  ;;  %v4490_v10 = vpack.c.bf16 %v3701_v19, %v3701_v19  ;;  %v6976_v39 = vpop.f32.mrf.mxu0 }
 0x271   : > { %v4998_v47 = vpop.f32.mrf.mxu1  ;;  %v3902_v42 = vsel %vm3880_vm1, %v3698_v40, 0.0  ;;  %v4005_v30 = vsel %vm3880_vm1, %v3963_v48, 0.0  ;;  %v4488_v45 = vpack.c.bf16 %v3699_v62, %v3699_v62  ;;  %v3964_v54 = vmul.f32 %v3699_v62, %v3699_v62 }
 0x272   : > { %v4004_v61 = vadd.f32 %v4003_v18, %v4002_v33  ;;  %3862 = vst.msk [vmem:[%s6800_s9 + $0x38] sm:$0xf] %vm3847_vm0, %v4490_v10  ;;  %v3903_v16 = vadd.f32 %v3902_v42, %v3901_v31  ;;  %v3702_v27 = vadd.f32 %v6849_v56, %v3490_v60  ;;  %v3700_v51 = vadd.f32 %v6871_v11, %v3488_v20  ;;  %v6991_v33 = vpop.f32.mrf.mxu0 }
 0x273   : > { %v3412_v37 = vpop.f32.mrf.mxu1  ;;  %v3966_v52 = vmul.f32 %v3701_v19, %v3701_v19  ;;  %3860 = vst.msk [vmem:[%s6800_s9 + $0x30] sm:$0xf] %vm3847_vm0, %v4488_v45  ;;  %v3904_v40 = vsel %vm3880_vm1, %v3699_v62, 0.0  ;;  %v3493_v25 = vadd.f32 %v4998_v47, %v6786_v32  ;;  %v4007_v13 = vsel %vm3880_vm1, %v3964_v54, 0.0 }
 0x274   : > { %v3491_v29 = vadd.f32 %v3412_v37, %v6807_v41  ;;  %v3905_v14 = vadd.f32 %v3904_v40, %v3903_v16  ;;  %v4006_v49 = vadd.f32 %v4005_v30, %v4004_v61  ;;  %v4491_v5 = vpack.c.bf16 %v3702_v27, %v3702_v27 }
 0x275   : > { %v4999_v56 = vpop.f32.mrf.mxu1  ;;  %v3967_v48 = vmul.f32 %v3702_v27, %v3702_v27  ;;  %v4489_v11 = vpack.c.bf16 %v3700_v51, %v3700_v51  ;;  %v3906_v12 = vsel %vm3880_vm1, %v3700_v51, 0.0  ;;  %v3965_v22 = vmul.f32 %v3700_v51, %v3700_v51 }
 0x276   : > { %v4008_v44 = vadd.f32 %v4007_v13, %v4006_v49  ;;  %3863 = vst.msk [vmem:[%s6800_s9 + $0x3c] sm:$0xf] %vm3847_vm0, %v4491_v5  ;;  %v3907_v32 = vadd.f32 %v3906_v12, %v3905_v14  ;;  %v3705_v41 = vadd.f32 %v6879_v26, %v3493_v25  ;;  %v3703_v15 = vadd.f32 %v6890_v43, %v3491_v29  ;;  %v7004_v29 = vpop.f32.mrf.mxu0 }
 0x277   : > { %v3415_v1 = vpop.f32.mrf.mxu1  ;;  %v3908_v23 = vsel %vm3880_vm1, %v3701_v19, 0.0  ;;  %3861 = vst.msk [vmem:[%s6800_s9 + $0x34] sm:$0xf] %vm3847_vm0, %v4489_v11  ;;  %v4009_v62 = vsel %vm3880_vm1, %v3965_v22, 0.0  ;;  %v3494_v60 = vadd.f32 %v4999_v56, %v6810_v3  ;;  %v4011_v53 = vsel %vm3880_vm1, %v3966_v52, 0.0 }
 0x278   : > { %v3492_v21 = vadd.f32 %v3415_v1, %v6822_v55  ;;  %v3909_v17 = vadd.f32 %v3908_v23, %v3907_v32  ;;  %v4010_v20 = vadd.f32 %v4009_v62, %v4008_v44  ;;  %v4494_v26 = vpack.c.bf16 %v3705_v41, %v3705_v41  ;;  %v3659_v23 = vpop.f32.mrf.mxu0 }
 0x279   : > { %v5002_v50 = vpop.f32.mrf.mxu1  ;;  %v3910_v43 = vsel %vm3880_vm1, %v3702_v27, 0.0  ;;  %v4013_v19 = vsel %vm3880_vm1, %v3967_v48, 0.0  ;;  %v4492_v18 = vpack.c.bf16 %v3703_v15, %v3703_v15  ;;  %v3968_v31 = vmul.f32 %v3703_v15, %v3703_v15 }
 0x27a   : > { %v4012_v10 = vadd.f32 %v4011_v53, %v4010_v20  ;;  %3866 = vst.msk [vmem:[%s6800_s9 + $0x48] sm:$0xf] %vm3847_vm0, %v4494_v26  ;;  %v3911_v3 = vadd.f32 %v3910_v43, %v3909_v17  ;;  %v3706_v55 = vadd.f32 %v6896_v34, %v3494_v60  ;;  %v3704_v47 = vadd.f32 %v6903_v36, %v3492_v21 }
 0x27b   : > { %v3428_v42 = vpop.f32.mrf.mxu1  ;;  %v3970_v30 = vmul.f32 %v3705_v41, %v3705_v41  ;;  %3864 = vst.msk [vmem:[%s6800_s9 + $0x40] sm:$0xf] %vm3847_vm0, %v4492_v18  ;;  %v3912_v45 = vsel %vm3880_vm1, %v3703_v15, 0.0  ;;  %v3497_v54 = vadd.f32 %v5002_v50, %v6825_v38  ;;  %v4015_v51 = vsel %vm3880_vm1, %v3968_v31, 0.0 }
 0x27c   : > { %v3495_v61 = vadd.f32 %v3428_v42, %v6832_v8  ;;  %v3913_v16 = vadd.f32 %v3912_v45, %v3911_v3  ;;  %v4014_v27 = vadd.f32 %v4013_v19, %v4012_v10  ;;  %v4495_v37 = vpack.c.bf16 %v3706_v55, %v3706_v55 }
 0x27d   : > { %v5003_v34 = vpop.f32.mrf.mxu1  ;;  %v3971_v52 = vmul.f32 %v3706_v55, %v3706_v55  ;;  %v4493_v36 = vpack.c.bf16 %v3704_v47, %v3704_v47  ;;  %v3914_v40 = vsel %vm3880_vm1, %v3704_v47, 0.0  ;;  %v3969_v25 = vmul.f32 %v3704_v47, %v3704_v47 }
 0x27e   : > { %v4016_v14 = vadd.f32 %v4015_v51, %v4014_v27  ;;  %3867 = vst.msk [vmem:[%s6800_s9 + $0x4c] sm:$0xf] %vm3847_vm0, %v4495_v37  ;;  %v3915_v38 = vadd.f32 %v3914_v40, %v3913_v16  ;;  %v3709_v8 = vadd.f32 %v6913_v59, %v3497_v54  ;;  %v3707_v49 = vadd.f32 %v6930_v7, %v3495_v61 }
 0x27f   : > { %v3431_v13 = vpop.f32.mrf.mxu1  ;;  %v3916_v5 = vsel %vm3880_vm1, %v3705_v41, 0.0  ;;  %3865 = vst.msk [vmem:[%s6800_s9 + $0x44] sm:$0xf] %vm3847_vm0, %v4493_v36  ;;  %v4017_v56 = vsel %vm3880_vm1, %v3969_v25, 0.0  ;;  %v3498_v48 = vadd.f32 %v5003_v34, %v6835_v4  ;;  %v4019_v12 = vsel %vm3880_vm1, %v3970_v30, 0.0 }
 0x280   : > { %v3496_v11 = vadd.f32 %v3431_v13, %v6838_v9  ;;  %v3917_v22 = vadd.f32 %v3916_v5, %v3915_v38  ;;  %v4018_v44 = vadd.f32 %v4017_v56, %v4016_v14  ;;  %v4498_v59 = vpack.c.bf16 %v3709_v8, %v3709_v8 }
 0x281   : > { %v5006_v32 = vpop.f32.mrf.mxu1  ;;  %v3918_v7 = vsel %vm3880_vm1, %v3706_v55, 0.0  ;;  %v4021_v41 = vsel %vm3880_vm1, %v3971_v52, 0.0  ;;  %v4496_v15 = vpack.c.bf16 %v3707_v49, %v3707_v49  ;;  %v3972_v1 = vmul.f32 %v3707_v49, %v3707_v49  ;;  %v5044_v55 = vpop.f32.mrf.mxu0 }
 0x282   : > { %v4020_v62 = vadd.f32 %v4019_v12, %v4018_v44  ;;  %3870 = vst.msk [vmem:[%s6800_s9 + $0x58] sm:$0xf] %vm3847_vm0, %v4498_v59  ;;  %v3919_v4 = vadd.f32 %v3918_v7, %v3917_v22  ;;  %v3710_v9 = vadd.f32 %v6947_v24, %v3498_v48  ;;  %v3708_v60 = vadd.f32 %v6963_v28, %v3496_v11 }
 0x283   : > { %v3444_v21 = vpop.f32.mrf.mxu1  ;;  %v3974_v53 = vmul.f32 %v3709_v8, %v3709_v8  ;;  %3868 = vst.msk [vmem:[%s6800_s9 + $0x50] sm:$0xf] %vm3847_vm0, %v4496_v15  ;;  %v3920_v17 = vsel %vm3880_vm1, %v3707_v49, 0.0  ;;  %v3501_v20 = vadd.f32 %v5006_v32, %v6842_v58  ;;  %v4023_v19 = vsel %vm3880_vm1, %v3972_v1, 0.0  ;;  %v3672_v25 = vpop.f32.mrf.mxu0 }
 0x284   : > { %v3499_v26 = vadd.f32 %v3444_v21, %v6845_v57  ;;  %v3921_v50 = vadd.f32 %v3920_v17, %v3919_v4  ;;  %v4022_v43 = vadd.f32 %v4021_v41, %v4020_v62  ;;  %v4499_v18 = vpack.c.bf16 %v3710_v9, %v3710_v9 }
 0x285   : > { %v5007_v24 = vpop.f32.mrf.mxu1  ;;  %v3975_v31 = vmul.f32 %v3710_v9, %v3710_v9  ;;  %v4497_v28 = vpack.c.bf16 %v3708_v60, %v3708_v60  ;;  %v3922_v10 = vsel %vm3880_vm1, %v3708_v60, 0.0  ;;  %v3973_v3 = vmul.f32 %v3708_v60, %v3708_v60  ;;  %v5045_v41 = vpop.f32.mrf.mxu0 }
 0x286   : > { %v4024_v47 = vadd.f32 %v4023_v19, %v4022_v43  ;;  %3871 = vst.msk [vmem:[%s6800_s9 + $0x5c] sm:$0xf] %vm3847_vm0, %v4499_v18  ;;  %v3923_v42 = vadd.f32 %v3922_v10, %v3921_v50  ;;  %v3713_v58 = vadd.f32 %v6976_v39, %v3501_v20  ;;  %v3711_v57 = vadd.f32 %v6991_v33, %v3499_v26 }
 0x287   : > { %v3447_v30 = vpop.f32.mrf.mxu1  ;;  %v3924_v45 = vsel %vm3880_vm1, %v3709_v8, 0.0  ;;  %3869 = vst.msk [vmem:[%s6800_s9 + $0x54] sm:$0xf] %vm3847_vm0, %v4497_v28  ;;  %v4025_v54 = vsel %vm3880_vm1, %v3973_v3, 0.0  ;;  %v3502_v61 = vadd.f32 %v5007_v24, %v6852_v6  ;;  %v4027_v27 = vsel %vm3880_vm1, %v3974_v53, 0.0  ;;  %v3675_v19 = vpop.f32.mrf.mxu0 }
 0x288   : > { %v3500_v16 = vadd.f32 %v3447_v30, %v6855_v35  ;;  %v3925_v51 = vadd.f32 %v3924_v45, %v3923_v42  ;;  %v4026_v37 = vadd.f32 %v4025_v54, %v4024_v47  ;;  %v4502_v39 = vpack.c.bf16 %v3713_v58, %v3713_v58 }
 0x289   : > { %v5010_v34 = vpop.f32.mrf.mxu1  ;;  %v3926_v33 = vsel %vm3880_vm1, %v3710_v9, 0.0  ;;  %v4029_v52 = vsel %vm3880_vm1, %v3975_v31, 0.0  ;;  %v4500_v36 = vpack.c.bf16 %v3711_v57, %v3711_v57  ;;  %v3976_v40 = vmul.f32 %v3711_v57, %v3711_v57 }
 0x28a   : > { %v4028_v14 = vadd.f32 %v4027_v27, %v4026_v37  ;;  %3874 = vst.msk [vmem:[%s6800_s9 + $0x68] sm:$0xf] %vm3847_vm0, %v4502_v39  ;;  %v3927_v6 = vadd.f32 %v3926_v33, %v3925_v51  ;;  %v3714_v35 = vadd.f32 %v7004_v29, %v3502_v61  ;;  %v3712_v38 = vadd.f32 %v3659_v23, %v3500_v16 }
 0x28b   : > { %v3460_v8 = vpop.f32.mrf.mxu1  ;;  %v3932_v49 = vsel %vm3880_vm1, %v3713_v58, 0.0  ;;  %3872 = vst.msk [vmem:[%s6800_s9 + $0x60] sm:$0xf] %vm3847_vm0, %v4500_v36  ;;  %v3928_v13 = vsel %vm3880_vm1, %v3711_v57, 0.0  ;;  %v3505_v5 = vadd.f32 %v5010_v34, %v6863_v0  ;;  %v3978_v48 = vmul.f32 %v3713_v58, %v3713_v58 }
 0x28c   : > { %v3503_v56 = vadd.f32 %v3460_v8, %v6917_v2  ;;  %v3929_v11 = vadd.f32 %v3928_v13, %v3927_v6  ;;  %v4030_v12 = vadd.f32 %v4029_v52, %v4028_v14  ;;  %v4503_v22 = vpack.c.bf16 %v3714_v35, %v3714_v35 }
 0x28d   : > { %v5011_v44 = vpop.f32.mrf.mxu1  ;;  %v4031_v29 = vsel %vm3880_vm1, %v3976_v40, 0.0  ;;  %v4501_v59 = vpack.c.bf16 %v3712_v38, %v3712_v38  ;;  %v3930_v32 = vsel %vm3880_vm1, %v3712_v38, 0.0  ;;  %v3977_v7 = vmul.f32 %v3712_v38, %v3712_v38 }
 0x28e   : > { %v4032_v15 = vadd.f32 %v4031_v29, %v4030_v12  ;;  %3875 = vst.msk [vmem:[%s6800_s9 + $0x6c] sm:$0xf] %vm3847_vm0, %v4503_v22  ;;  %v3931_v1 = vadd.f32 %v3930_v32, %v3929_v11  ;;  %v3717_v0 = vadd.f32 %v5044_v55, %v3505_v5  ;;  %v3715_v23 = vadd.f32 %v3672_v25, %v3503_v56 }
 0x28f   : > { %v3463_v2 = vpop.f32.mrf.mxu1  ;;  %v3979_v62 = vmul.f32 %v3714_v35, %v3714_v35  ;;  %3873 = vst.msk [vmem:[%s6800_s9 + $0x64] sm:$0xf] %vm3847_vm0, %v4501_v59  ;;  %v4033_v4 = vsel %vm3880_vm1, %v3977_v7, 0.0  ;;  %v3506_v9 = vadd.f32 %v5011_v44, %v6934_v46  ;;  %v4035_v20 = vsel %vm3880_vm1, %v3978_v48, 0.0 }
 0x290   : > { %v3504_v60 = vadd.f32 %v3463_v2, %v6958_v63  ;;  %v3933_v21 = vadd.f32 %v3932_v49, %v3931_v1  ;;  %v4034_v53 = vadd.f32 %v4033_v4, %v4032_v15  ;;  %v4506_v17 = vpack.c.bf16 %v3717_v0, %v3717_v0 }
 0x291   : > { %v3934_v26 = vsel %vm3880_vm1, %v3714_v35, 0.0  ;;  %v4504_v50 = vpack.c.bf16 %v3715_v23, %v3715_v23  ;;  %v3980_v43 = vmul.f32 %v3715_v23, %v3715_v23  ;;  %v3718_v31 = vadd.f32 %v5045_v41, %v3506_v9 }
 0x292   : > { %v4036_v18 = vadd.f32 %v4035_v20, %v4034_v53  ;;  %3878 = vst.msk [vmem:[%s6800_s9 + $0x78] sm:$0xf] %vm3847_vm0, %v4506_v17  ;;  %v3935_v24 = vadd.f32 %v3934_v26, %v3933_v21  ;;  %v3716_v46 = vadd.f32 %v3675_v19, %v3504_v60  ;;  %v4037_v28 = vsel %vm3880_vm1, %v3979_v62, 0.0 }
 0x293   : > { %3876 = vst.msk [vmem:[%s6800_s9 + $0x70] sm:$0xf] %vm3847_vm0, %v4504_v50  ;;  %v3936_v63 = vsel %vm3880_vm1, %v3715_v23, 0.0  ;;  %v3982_v10 = vmul.f32 %v3717_v0, %v3717_v0  ;;  %v4507_v47 = vpack.c.bf16 %v3718_v31, %v3718_v31  ;;  %v4039_v42 = vsel %vm3880_vm1, %v3980_v43, 0.0 }
 0x294   : > { %v3937_v3 = vadd.f32 %v3936_v63, %v3935_v24  ;;  %v4038_v55 = vadd.f32 %v4037_v28, %v4036_v18  ;;  %v4505_v58 = vpack.c.bf16 %v3716_v46, %v3716_v46  ;;  %v3938_v57 = vsel %vm3880_vm1, %v3716_v46, 0.0 }
 0x295   : > { %v3981_v30 = vmul.f32 %v3716_v46, %v3716_v46  ;;  %3879 = vst.msk [vmem:[%s6800_s9 + $0x7c] sm:$0xf] %vm3847_vm0, %v4507_v47  ;;  %v3940_v61 = vsel %vm3880_vm1, %v3717_v0, 0.0  ;;  %v3983_v16 = vmul.f32 %v3718_v31, %v3718_v31  ;;  %v4043_v39 = vsel %vm3880_vm1, %v3982_v10, 0.0 }
 0x296   : > { %v4040_v45 = vadd.f32 %v4039_v42, %v4038_v55  ;;  %v3939_v54 = vadd.f32 %v3938_v57, %v3937_v3  ;;  %3877 = vst.msk [vmem:[%s6800_s9 + $0x74] sm:$0xf] %vm3847_vm0, %v4505_v58  ;;  %v3942_v34 = vsel %vm3880_vm1, %v3718_v31, 0.0 }
 0x297   : > { %v4041_v27 = vsel %vm3880_vm1, %v3981_v30, 0.0  ;;  %v4045_v36 = vsel %vm3880_vm1, %v3983_v16, 0.0 }
 0x298   : > { %v3941_v51 = vadd.f32 %v3940_v61, %v3939_v54  ;;  %v4042_v37 = vadd.f32 %v4041_v27, %v4040_v45 }
 0x29a   : > { %v3943_v33 = vadd.f32 %v3942_v34, %v3941_v51  ;;  %v4044_v52 = vadd.f32 %v4043_v39, %v4042_v37 }
 0x29c   : > { %v3944_v40 = vrot.slane %v3943_v33, 4  ;;  %v4046_v25 = vadd.f32 %v4045_v36, %v4044_v52 }
 0x29e   : > { %v3945_v14 = vadd.f32 %v3944_v40, %v3943_v33  ;;  %v4047_v6 = vrot.slane %v4046_v25, 4 }
 0x2a0   : > { %v3946_v35 = vrot.slane %v3945_v14, 2  ;;  %v4048_v38 = vadd.f32 %v4047_v6, %v4046_v25 }
 0x2a2   : > { %v3947_v8 = vadd.f32 %v3946_v35, %v3945_v14  ;;  %v4049_v49 = vrot.slane %v4048_v38, 2 }
 0x2a4   : > { %v3948_v13 = vrot.slane %v3947_v8, 1  ;;  %v4050_v5 = vadd.f32 %v4049_v49, %v4048_v38 }
 0x2a6   : > { %v3949_v56 = vadd.f32 %v3948_v13, %v3947_v8  ;;  %v4051_v48 = vrot.slane %v4050_v5, 1 }
 0x2a8   : > { %3951 = vst.msk [vmem:[%s235_s12] sm:$0x1] %vm3950_vm2, %v3949_v56  ;;  %v4052_v11 = vadd.f32 %v4051_v48, %v4050_v5 }
 0x2aa   : > { %4053 = vst.msk [vmem:[%s235_s12 + $0x1] sm:$0x1] %vm3950_vm2, %v4052_v11 }
 0x2ab PF: > { %s16_s18 = sadd.s32 1, %s5100_s18  }
 0x2ac   : > { %p13_p4 = scmp.ge.s32.totalorder %s16_s18, 4  }
 0x2ae   :  { %15 = sbr.rel (!%p13_p4) target bundleno = 1 (0x1), region = 87 }

// kernel: inception_forward.9
= control target key start
LH: loop header
LB: loop body
LE: loop exit
PB: predicated region body
PF: predicated region fallthrough
CT: control target
= control target key end

     0   :  { %s5130_s18 = smov 0   ;;  %s7080_s0 = inlined_call_operand.vmem [shape: bf16[2,16,16,8], index: 0, kind: input, shape index: {}]   ;;  %s7081_s1 = inlined_call_operand.vmem [shape: f32[1,8], index: 1, kind: input, shape index: {}]   ;;  %s7082_s2 = inlined_call_operand.vmem [shape: f32[1,8], index: 2, kind: input, shape index: {}]   ;;  %s7083_s3 = inlined_call_operand.vmem [shape: bf16[3,3,8,8], index: 3, kind: input, shape index: {}]   ;;  %s7084_s4 = inlined_call_operand.vmem [shape: bf16[2,256,8], index: 4, kind: output, shape index: {0}]   ;;  %s7085_s5 = inlined_call_operand.vmem [shape: f32[2,2,8], index: 5, kind: output, shape index: {1}]  }
   0x1 LB: > { %s4137_s19 = sadd.s32 4294967295, %s5097_s18   ;;  %p4141_p0 = scmp.ge.s32.totalorder %s5097_s18, 1  ;;  %s5097_s18 = sphi %s5130_s18, %s16_s18  }
   0x2   : > { %p190_p1 = scmp.lt.s32.totalorder %s5097_s18, 3 }
   0x4   : > { %p191_p2 = pnand %p4141_p0, %p190_p1 }
   0x6   : > { %194 = sbr.rel (%p191_p2) target bundleno = 683 (0x2ab), region = 36 }
   0xb   : > { %v4181_v0 = vld [vmem:[%s7083_s3 + $0x4] sm:$0xf]  ;;  %vm1545_vm0 = vcmask 1043456   ;;  %vm427_vm1 = vcmask 60416   ;;  %vm430_vm2 = vcmask 57344   ;;  %v5099_v2 = vmov 0  }
   0xc   : > { %5045 = vmatprep.subr.msk.bf16.mxu0 %vm1545_vm0, %v4181_v0  ;;  %5046 = vmatprep.subr.msk.bf16.mxu1 %vm1545_vm0, %v4181_v0  ;;  %v1547_v1 = vsel %vm1545_vm0, %v4181_v0, 0  ;;  %428 = vst.msk [vmem:[#allocation2] sm:$0xf] %vm427_vm1, %v5099_v2  ;;  %429 = vst.msk [vmem:[#allocation2 + $0x4] sm:$0xf] %vm427_vm1, %v5099_v2  ;;  %p222_p3 = scmp.lt.s32.totalorder %s4137_s19, 1 }
   0xd   : > { %431 = vst.msk [vmem:[#allocation2 + $0x8] sm:$0x1] %vm430_vm2, %v5099_v2  ;;  %434 = vst.msk [vmem:[#allocation2 + $0x14] sm:$0x1] %vm430_vm2, %v5099_v2  ;;  %4738 = vmatpush3.bf16.msra.mxu0 %v1547_v1  ;;  %5044 = vmatpush3.bf16.msra.mxu1 %v1547_v1  ;;  %v1058_v3 = vld [vmem:[%s7083_s3] sm:$0xf] }
   0xe   : > { %432 = vst.msk [vmem:[#allocation2 + $0xc] sm:$0xf] %vm427_vm1, %v5099_v2  ;;  %433 = vst.msk [vmem:[#allocation2 + $0x10] sm:$0xf] %vm427_vm1, %v5099_v2  ;;  %s7286_s19 = smov (!%p222_p3, %s4137_s19), 1  ;;  %5047 = vmatprep.subr.msk.bf16.mxu1 %vm1545_vm0, %v1058_v3  ;;  %vm1496_vm5 = vcmask 64512  }
   0xf   : > { %435 = vst.msk [vmem:[#allocation2 + $0x18] sm:$0xf] %vm427_vm1, %v5099_v2  ;;  %436 = vst.msk [vmem:[#allocation2 + $0x1c] sm:$0xf] %vm427_vm1, %v5099_v2  ;;  %v5210_v4 = vld [vmem:[%s7083_s3 + $0x8] sm:$0xf] }
  0x10   : > { %437 = vst.msk [vmem:[#allocation2 + $0x20] sm:$0x1] %vm430_vm2, %v5099_v2  ;;  %440 = vst.msk [vmem:[#allocation2 + $0x2c] sm:$0x1] %vm430_vm2, %v5099_v2  ;;  %5048 = vmatprep.subr.msk.bf16.mxu0 %vm1545_vm0, %v5210_v4  ;;  %s4439_s26 = sshll.u32 %s7286_s19, 7  ;;  %v5234_v18 = vsel %vm1545_vm0, %v1058_v3, 0 }
  0x11   : > { %438 = vst.msk [vmem:[#allocation2 + $0x24] sm:$0xf] %vm427_vm1, %v5099_v2  ;;  %439 = vst.msk [vmem:[#allocation2 + $0x28] sm:$0xf] %vm427_vm1, %v5099_v2  ;;  %vm1059_vm3 = vsmask.f32 3328  ;;  %s5221_s29 = scalar_lea.vmem %s7080_s0, %s4439_s26  ;;  %s6791_s9 = scalar_lea.vmem %s7084_s4, %s4439_s26 }
  0x12   : > { %441 = vst.msk [vmem:[#allocation2 + $0x30] sm:$0xf] %vm427_vm1, %v5099_v2  ;;  %442 = vst.msk [vmem:[#allocation2 + $0x34] sm:$0xf] %vm427_vm1, %v5099_v2  ;;  %vm1060_vm4 = vsmask.f32 7440 }
  0x13   : > { %443 = vst.msk [vmem:[#allocation2 + $0x38] sm:$0x1] %vm430_vm2, %v5099_v2  ;;  %446 = vst.msk [vmem:[#allocation2 + $0x44] sm:$0x1] %vm430_vm2, %v5099_v2  ;;  %v5226_v5 = vld [vmem:[%s7081_s1] ss:$0 sm:$0xff] }
  0x14   : > { %444 = vst.msk [vmem:[#allocation2 + $0x3c] sm:$0xf] %vm427_vm1, %v5099_v2  ;;  %445 = vst.msk [vmem:[#allocation2 + $0x40] sm:$0xf] %vm427_vm1, %v5099_v2  ;;  %v1004_v6 = vld [vmem:[#allocation2] sm:$0xf] }
  0x15   : > { %447 = vst.msk [vmem:[#allocation2 + $0x48] sm:$0xf] %vm427_vm1, %v5099_v2  ;;  %448 = vst.msk [vmem:[#allocation2 + $0x4c] sm:$0xf] %vm427_vm1, %v5099_v2  ;;  %v1005_v7 = vld [vmem:[#allocation2 + $0x4] sm:$0xf] }
  0x16   : > { %449 = vst.msk [vmem:[#allocation2 + $0x50] sm:$0x1] %vm430_vm2, %v5099_v2  ;;  %452 = vst.msk [vmem:[#allocation2 + $0x5c] sm:$0x1] %vm430_vm2, %v5099_v2  ;;  %v5228_v8 = vld [vmem:[#allocation2 + $0x8] sm:$0x1] }
  0x17   : > { %450 = vst.msk [vmem:[#allocation2 + $0x54] sm:$0xf] %vm427_vm1, %v5099_v2  ;;  %451 = vst.msk [vmem:[#allocation2 + $0x58] sm:$0xf] %vm427_vm1, %v5099_v2  ;;  %v1063_v9 = vshrl.u32 %v1004_v6, 16  ;;  %v1066_v10 = vshll.u32 %v1004_v6, 16 }
  0x18   : > { %453 = vst.msk [vmem:[#allocation2 + $0x60] sm:$0xf] %vm427_vm1, %v5099_v2  ;;  %454 = vst.msk [vmem:[#allocation2 + $0x64] sm:$0xf] %vm427_vm1, %v5099_v2  ;;  %v1072_v11 = vshll.u32 %v1005_v7, 16  ;;  %v1076_v12 = vshrl.u32 %v1005_v7, 16 }
  0x19   : > { %455 = vst.msk [vmem:[#allocation2 + $0x68] sm:$0x1] %vm430_vm2, %v5099_v2  ;;  %458 = vst.msk [vmem:[#allocation2 + $0x74] sm:$0x1] %vm430_vm2, %v5099_v2  ;;  %v4506_v13 = vld [vmem:[%s5221_s29] sm:$0xff]   ;;  %v4575_v14 = vld [vmem:[%s5221_s29 + $0x38] sm:$0xff]  }
  0x1a   : > { %456 = vst.msk [vmem:[#allocation2 + $0x6c] sm:$0xf] %vm427_vm1, %v5099_v2  ;;  %457 = vst.msk [vmem:[#allocation2 + $0x70] sm:$0xf] %vm427_vm1, %v5099_v2  ;;  %v1082_v15 = vshll.u32 %v5228_v8, 16  ;;  %v4507_v16 = vunpack.c.l.bf16 %v4506_v13  ;;  %v4508_v17 = vunpack.c.h.bf16 %v4506_v13  ;;  %v1065_v19 = vrot.slane %v1063_v9, 4 }
  0x1b   : > { %459 = vst.msk [vmem:[#allocation2 + $0x78] sm:$0xf] %vm427_vm1, %v5099_v2  ;;  %460 = vst.msk [vmem:[#allocation2 + $0x7c] sm:$0xf] %vm427_vm1, %v5099_v2  ;;  %vm563_vm6 = vsmask.f32 256  ;;  %v4535_v27 = vunpack.c.l.bf16 %v4575_v14  ;;  %v4536_v31 = vunpack.c.h.bf16 %v4575_v14 }
  0x1c   : > { %461 = vst.msk [vmem:[#allocation2 + $0x80] sm:$0x1] %vm430_vm2, %v5099_v2  ;;  %464 = vst.msk [vmem:[#allocation2 + $0x8c] sm:$0x1] %vm430_vm2, %v5099_v2  ;;  %vm564_vm7 = vsmask.f32 4368  ;;  %v309_v25 = vmul.f32 %v4507_v16, %v5226_v5  ;;  %v310_v26 = vmul.f32 %v4508_v17, %v5226_v5 }
  0x1d   : > { %462 = vst.msk [vmem:[#allocation2 + $0x84] sm:$0xf] %vm427_vm1, %v5099_v2  ;;  %463 = vst.msk [vmem:[#allocation2 + $0x88] sm:$0xf] %vm427_vm1, %v5099_v2  ;;  %v1068_v20 = vrot.slane %v1066_v10, 5  ;;  %v1074_v21 = vrot.slane %v1072_v11, 5  ;;  %v323_v36 = vmul.f32 %v4535_v27, %v5226_v5  ;;  %v324_v40 = vmul.f32 %v4536_v31, %v5226_v5 }
  0x1e   : > { %465 = vst.msk [vmem:[#allocation2 + $0x90] sm:$0xf] %vm427_vm1, %v5099_v2  ;;  %466 = vst.msk [vmem:[#allocation2 + $0x94] sm:$0xf] %vm427_vm1, %v5099_v2  ;;  %v1078_v22 = vrot.slane %v1076_v12, 4  ;;  %v1084_v24 = vrot.slane %v1082_v15, 5 }
  0x1f   : > { %467 = vst.msk [vmem:[#allocation2 + $0x98] sm:$0x1] %vm430_vm2, %v5099_v2  ;;  %470 = vst.msk [vmem:[#allocation2 + $0xa4] sm:$0x1] %vm430_vm2, %v5099_v2  ;;  %v5239_v23 = vld [vmem:[%s7082_s2] ss:$0 sm:$0xff]  ;;  %v1069_v29 = vor.u32 %v1068_v20, %v1065_v19 }
  0x20   : > { %468 = vst.msk [vmem:[#allocation2 + $0x9c] sm:$0xf] %vm427_vm1, %v5099_v2  ;;  %469 = vst.msk [vmem:[#allocation2 + $0xa0] sm:$0xf] %vm427_vm1, %v5099_v2  ;;  %vm888_vm8 = vsmask.f32 7938  ;;  %v1079_v30 = vor.u32 %v1078_v22, %v1074_v21  ;;  %v347_v34 = vadd.f32 %v5239_v23, %v309_v25  ;;  %v348_v35 = vadd.f32 %v5239_v23, %v310_v26 }
  0x21   : > { %471 = vst.msk [vmem:[#allocation2 + $0xa8] sm:$0xf] %vm427_vm1, %v5099_v2  ;;  %472 = vst.msk [vmem:[#allocation2 + $0xac] sm:$0xf] %vm427_vm1, %v5099_v2  ;;  %v4576_v28 = vld [vmem:[%s5221_s29 + $0x40] sm:$0xff]   ;;  %v1070_v38 = vrot.slane %v1069_v29, 4  ;;  %v361_v44 = vadd.f32 %v5239_v23, %v323_v36  ;;  %v362_v49 = vadd.f32 %v5239_v23, %v324_v40 }
  0x22   : > { %473 = vst.msk [vmem:[#allocation2 + $0xb0] sm:$0x1] %vm430_vm2, %v5099_v2  ;;  %476 = vst.msk [vmem:[#allocation2 + $0xbc] sm:$0x1] %vm430_vm2, %v5099_v2  ;;  %v4539_v32 = vunpack.c.l.bf16 %v4576_v28  ;;  %v4540_v37 = vunpack.c.h.bf16 %v4576_v28  ;;  %v1080_v39 = vrot.slane %v1079_v30, 4  ;;  %v379_v42 = vmax.f32 %v347_v34, 0.0 }
  0x23   : > { %474 = vst.msk [vmem:[#allocation2 + $0xb4] sm:$0xf] %vm427_vm1, %v5099_v2  ;;  %475 = vst.msk [vmem:[#allocation2 + $0xb8] sm:$0xf] %vm427_vm1, %v5099_v2  ;;  %v380_v43 = vmax.f32 %v348_v35, 0.0  ;;  %v4569_v46 = vld [vmem:[%s5221_s29 + $0x8] sm:$0xff]  }
  0x24   : > { %477 = vst.msk [vmem:[#allocation2 + $0xc0] sm:$0xf] %vm427_vm1, %v5099_v2  ;;  %478 = vst.msk [vmem:[#allocation2 + $0xc4] sm:$0xf] %vm427_vm1, %v5099_v2  ;;  %v325_v41 = vmul.f32 %v4539_v32, %v5226_v5  ;;  %v326_v45 = vmul.f32 %v4540_v37, %v5226_v5  ;;  %v4441_v52 = vpack.c.bf16 %v379_v42, %v379_v42  ;;  %v393_v54 = vmax.f32 %v361_v44, 0.0  ;;  %v4570_v44 = vld [vmem:[%s5221_s29 + $0x10] sm:$0xff]  }
  0x25   : > { %479 = vst.msk [vmem:[#allocation2 + $0xc8] sm:$0x1] %vm430_vm2, %v5099_v2  ;;  %482 = vst.msk [vmem:[#allocation2 + $0xd4] sm:$0x1] %vm430_vm2, %v5099_v2  ;;  %v4442_v53 = vpack.c.bf16 %v380_v43, %v380_v43  ;;  %v394_v55 = vmax.f32 %v362_v49, 0.0  ;;  %v4511_v58 = vunpack.c.l.bf16 %v4569_v46  ;;  %v4512_v11 = vunpack.c.h.bf16 %v4569_v46  ;;  %s4146_s26 = sshll.u32 %s7286_s19, 1 }
  0x26   : > { %480 = vst.msk [vmem:[#allocation2 + $0xcc] sm:$0xf] %vm427_vm1, %v5099_v2  ;;  %481 = vst.msk [vmem:[#allocation2 + $0xd0] sm:$0xf] %vm427_vm1, %v5099_v2  ;;  %v363_v50 = vadd.f32 %v5239_v23, %v325_v41  ;;  %v364_v56 = vadd.f32 %v5239_v23, %v326_v45  ;;  %v567_v59 = vshrl.u32 %v4441_v52, 16  ;;  %v570_v60 = vshll.u32 %v4441_v52, 16  ;;  %s235_s12 = scalar_lea.vmem %s7085_s5, %s4146_s26 }
  0x27   : > { %vm5246_vm9 = vmor %vm1059_vm3, %vm1060_vm4  ;;  %v575_v61 = vshrl.u32 %v4442_v53, 16  ;;  %v578_v62 = vshll.u32 %v4442_v53, 16  ;;  %v4455_v0 = vpack.c.bf16 %v393_v54, %v393_v54  ;;  %v4456_v1 = vpack.c.bf16 %v394_v55, %v394_v55  ;;  %v890_v10 = vld [vmem:[#allocation2 + $0xc] sm:$0xf]  ;;  %v896_v14 = vld [vmem:[#allocation2 + $0x14] sm:$0x1] }
  0x28   : > { %v1075_v47 = vsel %vm5246_vm9, %v1070_v38, %v1074_v21  ;;  %v1085_v48 = vsel %vm5246_vm9, %v1080_v39, %v1084_v24  ;;  %v395_v57 = vmax.f32 %v363_v50, 0.0  ;;  %vm5268_vm10 = vmor %vm563_vm6, %vm564_vm7  ;;  %v396_v2 = vmax.f32 %v364_v56, 0.0  ;;  %v941_v32 = vld [vmem:[#allocation2 + $0x60] sm:$0xf]  ;;  %v945_v34 = vld [vmem:[#allocation2 + $0x68] sm:$0x1] }
  0x29   : > { %v4182_v51 = vcombine.low %v1075_v47, %v1085_v48  ;;  %v569_v6 = vrot.slane %v567_v59, 7  ;;  %v577_v7 = vrot.slane %v575_v61, 7  ;;  %vm5274_vm11 = vmand %vm427_vm1, %vm888_vm8  ;;  %v311_v12 = vmul.f32 %v4511_v58, %v5226_v5  ;;  %v948_v48 = vld [vmem:[#allocation2 + $0x6c] sm:$0xf]  ;;  %v952_v55 = vld [vmem:[#allocation2 + $0x74] sm:$0x1] }
  0x2a   : > { %v4457_v3 = vpack.c.bf16 %v395_v57, %v395_v57  ;;  %vm5281_vm12 = vmand %vm430_vm2, %vm563_vm6  ;;  %v686_v15 = vshrl.u32 %v4455_v0, 16  ;;  %v689_v16 = vshll.u32 %v4455_v0, 16  ;;  %v694_v17 = vshrl.u32 %v4456_v1, 16  ;;  %v4577_v54 = vld [vmem:[%s5221_s29 + $0x48] sm:$0xff]  }
  0x2b   : > { %4739 = vmatprep.mubr.msk.bf16.mxu0 %vm1496_vm5, %v4182_v51  ;;  %v697_v19 = vshll.u32 %v4456_v1, 16  ;;  %v572_v20 = vor.u32 %v570_v60, %v569_v6  ;;  %v573_v21 = vrot.slane %v569_v6, 4  ;;  %v580_v22 = vor.u32 %v578_v62, %v577_v7 }
  0x2c   : > { %v582_v24 = vrot.slane %v577_v7, 4  ;;  %v688_v25 = vrot.slane %v686_v15, 7  ;;  %v696_v26 = vrot.slane %v694_v17, 7  ;;  %v4458_v27 = vpack.c.bf16 %v396_v2, %v396_v2 }
  0x2d   : > { %v703_v28 = vshrl.u32 %v4457_v3, 16  ;;  %v581_v29 = vsel %vm5268_vm10, %v573_v21, %v580_v22  ;;  %v891_v30 = vsel %vm5274_vm11, %v572_v20, %v890_v10  ;;  %v706_v35 = vshll.u32 %v4457_v3, 16 }
  0x2e   : > { %v897_v31 = vsel %vm5281_vm12, %v582_v24, %v896_v14  ;;  %892 = vst [vmem:[#allocation2 + $0xc] sm:$0xf] %v891_v30  ;;  %893 = vst.msk [vmem:[#allocation2 + $0x10] sm:$0xf] %vm427_vm1, %v581_v29  ;;  %v691_v36 = vor.u32 %v689_v16, %v688_v25  ;;  %v692_v37 = vrot.slane %v688_v25, 4  ;;  %v699_v38 = vor.u32 %v697_v19, %v696_v26 }
  0x2f   : > { %898 = vst [vmem:[#allocation2 + $0x14] sm:$0x1] %v897_v31  ;;  %v701_v39 = vrot.slane %v696_v26, 4  ;;  %v705_v40 = vrot.slane %v703_v28, 7  ;;  %v711_v41 = vshrl.u32 %v4458_v27, 16  ;;  %v714_v42 = vshll.u32 %v4458_v27, 16 }
  0x30   : > { %v312_v43 = vmul.f32 %v4512_v11, %v5226_v5  ;;  %v700_v45 = vsel %vm5268_vm10, %v692_v37, %v699_v38  ;;  %v942_v46 = vsel %vm5274_vm11, %v691_v36, %v941_v32  ;;  %v349_v49 = vadd.f32 %v5239_v23, %v311_v12 }
  0x31   : > { %v946_v47 = vsel %vm5281_vm12, %v701_v39, %v945_v34  ;;  %943 = vst [vmem:[#allocation2 + $0x60] sm:$0xf] %v942_v46  ;;  %944 = vst.msk [vmem:[#allocation2 + $0x64] sm:$0xf] %vm427_vm1, %v700_v45  ;;  %v708_v50 = vor.u32 %v706_v35, %v705_v40  ;;  %v709_v51 = vrot.slane %v705_v40, 4  ;;  %v713_v52 = vrot.slane %v711_v41, 7 }
  0x32   : > { %947 = vst [vmem:[#allocation2 + $0x68] sm:$0x1] %v946_v47  ;;  %v350_v53 = vadd.f32 %v5239_v23, %v312_v43  ;;  %v5306_v56 = vsel %vm1545_vm0, %v5210_v4, 0  ;;  %v381_v57 = vmax.f32 %v349_v49, 0.0  ;;  %v4515_v58 = vunpack.c.l.bf16 %v4570_v44 }
  0x33   : > { %v4516_v59 = vunpack.c.h.bf16 %v4570_v44  ;;  %v716_v60 = vor.u32 %v714_v42, %v713_v52  ;;  %v718_v61 = vrot.slane %v713_v52, 4  ;;  %v949_v62 = vsel %vm5274_vm11, %v708_v50, %v948_v48 }
  0x34   : > { %v382_v0 = vmax.f32 %v350_v53, 0.0  ;;  %950 = vst [vmem:[#allocation2 + $0x6c] sm:$0xf] %v949_v62  ;;  %v5311_v2 = vpack.c.bf16 %v381_v57, %v381_v57  ;;  %v313_v3 = vmul.f32 %v4515_v58, %v5226_v5  ;;  %v4543_v6 = vunpack.c.l.bf16 %v4577_v54 }
  0x35   : > { %v1007_v7 = vld [vmem:[#allocation2 + $0xc] sm:$0xf]  ;;  %v5314_v4 = vld [vmem:[#allocation2 + $0x10] sm:$0xf]  ;;  %v717_v11 = vsel %vm5268_vm10, %v709_v51, %v716_v60  ;;  %v953_v12 = vsel %vm5281_vm12, %v718_v61, %v952_v55  ;;  %v314_v14 = vmul.f32 %v4516_v59, %v5226_v5  ;;  %v4544_v15 = vunpack.c.h.bf16 %v4577_v54 }
  0x36   : > { %v1009_v10 = vld [vmem:[#allocation2 + $0x14] sm:$0x1]  ;;  %v1087_v16 = vshrl.u32 %v1007_v7, 16  ;;  %v1090_v17 = vshll.u32 %v1007_v7, 16  ;;  %v1096_v19 = vshll.u32 %v5314_v4, 16  ;;  %v1100_v20 = vshrl.u32 %v5314_v4, 16 }
  0x37   : > { %951 = vst.msk [vmem:[#allocation2 + $0x70] sm:$0xf] %vm427_vm1, %v717_v11  ;;  %954 = vst [vmem:[#allocation2 + $0x74] sm:$0x1] %v953_v12  ;;  %v1106_v21 = vshll.u32 %v1009_v10, 16  ;;  %v5325_v24 = vpack.c.bf16 %v382_v0, %v382_v0  ;;  %v584_v25 = vshrl.u32 %v5311_v2, 16  ;;  %v5329_v36 = vadd.f32 %v5239_v23, %v313_v3 }
  0x38   : > { %v1089_v26 = vrot.slane %v1087_v16, 4  ;;  %v1092_v27 = vrot.slane %v1090_v17, 5  ;;  %v1098_v28 = vrot.slane %v1096_v19, 5  ;;  %v1102_v29 = vrot.slane %v1100_v20, 4  ;;  %v1028_v30 = vld [vmem:[#allocation2 + $0x60] sm:$0xf] }
  0x39   : > { %v1108_v31 = vrot.slane %v1106_v21, 5  ;;  %v1029_v32 = vld [vmem:[#allocation2 + $0x64] sm:$0xf]  ;;  %v1030_v34 = vld [vmem:[#allocation2 + $0x68] sm:$0x1]  ;;  %v1255_v35 = vshrl.u32 %v1028_v30, 16  ;;  %v327_v37 = vmul.f32 %v4543_v6, %v5226_v5  ;;  %v352_v46 = vadd.f32 %v5239_v23, %v314_v14 }
  0x3a   : > { %v1093_v38 = vor.u32 %v1092_v27, %v1089_v26  ;;  %v1103_v39 = vor.u32 %v1102_v29, %v1098_v28  ;;  %v1258_v40 = vshll.u32 %v1028_v30, 16  ;;  %v1264_v41 = vshll.u32 %v1029_v32, 16 }
  0x3b   : > { %v1257_v42 = vrot.slane %v1255_v35, 4  ;;  %v1268_v43 = vshrl.u32 %v1029_v32, 16  ;;  %v1274_v44 = vshll.u32 %v1030_v34, 16  ;;  %v1031_v45 = vld [vmem:[#allocation2 + $0x6c] sm:$0xf]  ;;  %v328_v55 = vmul.f32 %v4544_v15, %v5226_v5 }
  0x3c   : > { %v1094_v47 = vrot.slane %v1093_v38, 4  ;;  %v1104_v48 = vrot.slane %v1103_v39, 4  ;;  %v1260_v49 = vrot.slane %v1258_v40, 5  ;;  %v1266_v50 = vrot.slane %v1264_v41, 5  ;;  %v903_v41 = vld [vmem:[#allocation2 + $0x20] sm:$0x1] }
  0x3d   : > { %v1270_v51 = vrot.slane %v1268_v43, 4  ;;  %v1276_v52 = vrot.slane %v1274_v44, 5  ;;  %v365_v57 = vadd.f32 %v5239_v23, %v327_v37  ;;  %v1279_v61 = vshrl.u32 %v1031_v45, 16 }
  0x3e   : > { %v1032_v53 = vld [vmem:[#allocation2 + $0x70] sm:$0xf]  ;;  %v1033_v54 = vld [vmem:[#allocation2 + $0x74] sm:$0x1]  ;;  %v1099_v58 = vsel %vm5246_vm9, %v1094_v47, %v1098_v28  ;;  %v1109_v59 = vsel %vm5246_vm9, %v1104_v48, %v1108_v31  ;;  %v1261_v60 = vor.u32 %v1260_v49, %v1257_v42  ;;  %v1282_v3 = vshll.u32 %v1031_v45, 16 }
  0x3f   : > { %v5339_v62 = vcombine.low %v1099_v58, %v1109_v59  ;;  %v1271_v0 = vor.u32 %v1270_v51, %v1266_v50  ;;  %v1288_v6 = vshll.u32 %v1032_v53, 16  ;;  %v1281_v10 = vrot.slane %v1279_v61, 4  ;;  %v899_v31 = vld [vmem:[#allocation2 + $0x18] sm:$0xf] }
  0x40   : > { %v1262_v7 = vrot.slane %v1261_v60, 4  ;;  %v1292_v11 = vshrl.u32 %v1032_v53, 16  ;;  %v1298_v12 = vshll.u32 %v1033_v54, 16  ;;  %v1284_v15 = vrot.slane %v1282_v3, 5  ;;  %v4295_v60 = vld [vmem:[%s7083_s3 + $0xc] sm:$0xf] }
  0x41   : > { %7130 = vst [vmem:[#allocation3_spill] sm:$0xff] %v5339_v62  ;;  %4740 = vmatmul.mubr.msk.bf16.vlgmr.msra.gmra.mxu0 %vm1496_vm5, %v5339_v62  ;;  %v1272_v14 = vrot.slane %v1271_v0, 4  ;;  %v1290_v16 = vrot.slane %v1288_v6, 5  ;;  %v586_v17 = vrot.slane %v584_v25, 7  ;;  %v587_v26 = vshll.u32 %v5311_v2, 16 }
  0x42   : > { %v1267_v19 = vsel %vm5246_vm9, %v1262_v7, %v1266_v50  ;;  %v1294_v20 = vrot.slane %v1292_v11, 4  ;;  %v1300_v21 = vrot.slane %v1298_v12, 5  ;;  %4806 = vmatpush3.bf16.msra.mxu0 %v5306_v56  ;;  %v1285_v28 = vor.u32 %v1284_v15, %v1281_v10  ;;  %v4578_v50 = vld [vmem:[%s5221_s29 + $0x50] sm:$0xff]   ;;  %v906_v10 = vld [vmem:[#allocation2 + $0x24] sm:$0xf] }
  0x43   : > { %v1277_v27 = vsel %vm5246_vm9, %v1272_v14, %v1276_v52  ;;  %v590_v29 = vrot.slane %v586_v17, 4  ;;  %v592_v30 = vshrl.u32 %v5325_v24, 16  ;;  %v589_v34 = vor.u32 %v587_v26, %v586_v17  ;;  %v910_v17 = vld [vmem:[#allocation2 + $0x2c] sm:$0x1] }
  0x44   : > { %v5350_v32 = vcombine.low %v1267_v19, %v1277_v27  ;;  %v1295_v25 = vor.u32 %v1294_v20, %v1290_v16  ;;  %v595_v35 = vshll.u32 %v5325_v24, 16  ;;  %v1286_v37 = vrot.slane %v1285_v28, 4 }
  0x45   : > { %v594_v38 = vrot.slane %v592_v30, 7  ;;  %v383_v56 = vmax.f32 %v5329_v36, 0.0  ;;  %v384_v39 = vmax.f32 %v352_v46, 0.0  ;;  %v900_v40 = vsel %vm5274_vm11, %v589_v34, %v899_v31 }
  0x46   : > { %7131 = vst [vmem:[#allocation4_spill] sm:$0xff] %v5350_v32  ;;  %4755 = vmatprep.mubr.msk.bf16.mxu1 %vm1496_vm5, %v5350_v32  ;;  %v1296_v2 = vrot.slane %v1295_v25, 4  ;;  %v366_v42 = vadd.f32 %v5239_v23, %v328_v55  ;;  %v397_v43 = vmax.f32 %v365_v57, 0.0  ;;  %v1291_v24 = vsel %vm5246_vm9, %v1286_v37, %v1290_v16  ;;  %901 = vst [vmem:[#allocation2 + $0x18] sm:$0xf] %v900_v40 }
  0x47   : > { %v597_v44 = vor.u32 %v595_v35, %v594_v38  ;;  %v599_v45 = vrot.slane %v594_v38, 4  ;;  %v4445_v36 = vpack.c.bf16 %v383_v56, %v383_v56  ;;  %v4446_v47 = vpack.c.bf16 %v384_v39, %v384_v39  ;;  %v4571_v39 = vld [vmem:[%s5221_s29 + $0x18] sm:$0xff]  }
  0x48   : > { %v1301_v46 = vsel %vm5246_vm9, %v1296_v2, %v1300_v21  ;;  %v398_v48 = vmax.f32 %v366_v42, 0.0  ;;  %v4459_v49 = vpack.c.bf16 %v397_v43, %v397_v43  ;;  %v4547_v6 = vunpack.c.l.bf16 %v4578_v50  ;;  %v4313_v2 = vld [vmem:[%s7083_s3 + $0x10] sm:$0xf] }
  0x49   : > { %v5364_v51 = vcombine.low %v1291_v24, %v1301_v46  ;;  %v598_v52 = vsel %vm5268_vm10, %v590_v29, %v597_v44  ;;  %v904_v53 = vsel %vm5281_vm12, %v599_v45, %v903_v41  ;;  %v601_v54 = vshrl.u32 %v4445_v36, 16  ;;  %v955_v29 = vld [vmem:[#allocation2 + $0x78] sm:$0xf]  ;;  %5050 = vmatprep.subr.msk.bf16.mxu0 %vm1545_vm0, %v4313_v2 }
  0x4a   : > { %902 = vst.msk [vmem:[#allocation2 + $0x1c] sm:$0xf] %vm427_vm1, %v598_v52  ;;  %905 = vst [vmem:[#allocation2 + $0x20] sm:$0x1] %v904_v53  ;;  %v604_v55 = vshll.u32 %v4445_v36, 16  ;;  %v609_v57 = vshrl.u32 %v4446_v47, 16  ;;  %v4460_v59 = vpack.c.bf16 %v398_v48, %v398_v48  ;;  %v4548_v14 = vunpack.c.h.bf16 %v4578_v50 }
  0x4b   : > { %7132 = vst [vmem:[#allocation5_spill] sm:$0xff] %v5364_v51  ;;  %v612_v58 = vshll.u32 %v4446_v47, 16  ;;  %4756 = vmatmul.mubr.msk.bf16.vlgmr.msra.gmra.mxu1 %vm1496_vm5, %v5364_v51  ;;  %v603_v61 = vrot.slane %v601_v54, 7  ;;  %v720_v0 = vshrl.u32 %v4459_v49, 16  ;;  %v723_v3 = vshll.u32 %v4459_v49, 16  ;;  %v5407_v54 = vld [vmem:[%s5221_s29 + $0x20] sm:$0xff]  }
  0x4c   : > { %4772 = vmatpush3.bf16.msra.mxu1 %v5234_v18  ;;  %v611_v7 = vrot.slane %v609_v57, 7  ;;  %v728_v11 = vshrl.u32 %v4460_v59, 16  ;;  %v731_v12 = vshll.u32 %v4460_v59, 16  ;;  %v329_v20 = vmul.f32 %v4547_v6, %v5226_v5  ;;  %v959_v48 = vld [vmem:[#allocation2 + $0x80] sm:$0x1] }
  0x4d   : > { %v606_v15 = vor.u32 %v604_v55, %v603_v61  ;;  %v607_v16 = vrot.slane %v603_v61, 4  ;;  %v722_v19 = vrot.slane %v720_v0, 7  ;;  %5049 = vmatprep.subr.msk.bf16.mxu1 %vm1545_vm0, %v4295_v60  ;;  %v1010_v21 = vld [vmem:[#allocation2 + $0x18] sm:$0xf]  ;;  %v330_v18 = vmul.f32 %v4548_v14, %v5226_v5 }
  0x4e   : > { %v614_v26 = vor.u32 %v612_v58, %v611_v7  ;;  %v616_v27 = vrot.slane %v611_v7, 4  ;;  %v730_v28 = vrot.slane %v728_v11, 7  ;;  %v1111_v30 = vshrl.u32 %v1010_v21, 16 }
  0x4f   : > { %v1114_v31 = vshll.u32 %v1010_v21, 16  ;;  %v907_v25 = vsel %vm5274_vm11, %v606_v15, %v906_v10  ;;  %v725_v34 = vor.u32 %v723_v3, %v722_v19  ;;  %v726_v38 = vrot.slane %v722_v19, 4 }
  0x50   : > { %v615_v35 = vsel %vm5268_vm10, %v607_v16, %v614_v26  ;;  %908 = vst [vmem:[#allocation2 + $0x24] sm:$0xf] %v907_v25  ;;  %v911_v37 = vsel %vm5281_vm12, %v616_v27, %v910_v17  ;;  %v733_v56 = vor.u32 %v731_v12, %v730_v28  ;;  %v1113_v42 = vrot.slane %v1111_v30, 4 }
  0x51   : > { %v5390_v40 = vld [vmem:[#allocation2 + $0x1c] sm:$0xf]  ;;  %v5392_v41 = vld [vmem:[#allocation2 + $0x20] sm:$0x1]  ;;  %v1116_v43 = vrot.slane %v1114_v31, 5  ;;  %v956_v24 = vsel %vm5274_vm11, %v725_v34, %v955_v29  ;;  %v367_v44 = vadd.f32 %v5239_v23, %v329_v20  ;;  %v735_v50 = vrot.slane %v730_v28, 4 }
  0x52   : > { %909 = vst.msk [vmem:[#allocation2 + $0x28] sm:$0xf] %vm427_vm1, %v615_v35  ;;  %912 = vst [vmem:[#allocation2 + $0x2c] sm:$0x1] %v911_v37  ;;  %v1120_v45 = vshll.u32 %v5390_v40, 16  ;;  %v1124_v36 = vshrl.u32 %v5390_v40, 16  ;;  %v734_v47 = vsel %vm5268_vm10, %v726_v38, %v733_v56  ;;  %v368_v52 = vadd.f32 %v5239_v23, %v330_v18 }
  0x53   : > { %v1130_v46 = vshll.u32 %v5392_v41, 16  ;;  %957 = vst [vmem:[#allocation2 + $0x78] sm:$0xf] %v956_v24  ;;  %v1117_v49 = vor.u32 %v1116_v43, %v1113_v42  ;;  %958 = vst.msk [vmem:[#allocation2 + $0x7c] sm:$0xf] %vm427_vm1, %v734_v47  ;;  %v399_v53 = vmax.f32 %v367_v44, 0.0  ;;  %v4519_v59 = vunpack.c.l.bf16 %v4571_v39 }
  0x54   : > { %v1122_v55 = vrot.slane %v1120_v45, 5  ;;  %v1126_v57 = vrot.slane %v1124_v36, 4  ;;  %v960_v61 = vsel %vm5281_vm12, %v735_v50, %v959_v48  ;;  %v400_v0 = vmax.f32 %v368_v52, 0.0 }
  0x55   : > { %v1132_v58 = vrot.slane %v1130_v46, 5  ;;  %v1118_v60 = vrot.slane %v1117_v49, 4  ;;  %v4461_v3 = vpack.c.bf16 %v399_v53, %v399_v53  ;;  %961 = vst [vmem:[#allocation2 + $0x80] sm:$0x1] %v960_v61  ;;  %v4520_v7 = vunpack.c.h.bf16 %v4571_v39 }
  0x56   : > { %v1127_v6 = vor.u32 %v1126_v57, %v1122_v55  ;;  %v315_v10 = vmul.f32 %v4519_v59, %v5226_v5  ;;  %v4523_v11 = vunpack.c.l.bf16 %v5407_v54  ;;  %v4462_v15 = vpack.c.bf16 %v400_v0, %v400_v0  ;;  %v962_v0 = vld [vmem:[#allocation2 + $0x84] sm:$0xf] }
  0x57   : > { %v1123_v12 = vsel %vm5246_vm9, %v1118_v60, %v1122_v55  ;;  %v5415_v14 = vld [vmem:[#allocation2 + $0x24] sm:$0xf]  ;;  %v737_v16 = vshrl.u32 %v4461_v3, 16  ;;  %v740_v17 = vshll.u32 %v4461_v3, 16  ;;  %v316_v27 = vmul.f32 %v4520_v7, %v5226_v5 }
  0x58   : > { %v1128_v19 = vrot.slane %v1127_v6, 4  ;;  %v1135_v26 = vshrl.u32 %v5415_v14, 16  ;;  %v5424_v28 = vadd.f32 %v5239_v23, %v315_v10  ;;  %v1138_v29 = vshll.u32 %v5415_v14, 16 }
  0x59   : > { %v5417_v20 = vld [vmem:[#allocation2 + $0x28] sm:$0xf]  ;;  %v5419_v21 = vld [vmem:[#allocation2 + $0x2c] sm:$0x1]  ;;  %v739_v50 = vrot.slane %v737_v16, 7  ;;  %v745_v57 = vshrl.u32 %v4462_v15, 16 }
  0x5a   : > { %v1144_v18 = vshll.u32 %v5417_v20, 16  ;;  %v1148_v30 = vshrl.u32 %v5417_v20, 16  ;;  %v1154_v31 = vshll.u32 %v5419_v21, 16  ;;  %v1034_v25 = vld [vmem:[#allocation2 + $0x78] sm:$0xf]  ;;  %v1133_v34 = vsel %vm5246_vm9, %v1128_v19, %v1132_v58 }
  0x5b   : > { %v1137_v35 = vrot.slane %v1135_v26, 4  ;;  %v1035_v37 = vld [vmem:[#allocation2 + $0x7c] sm:$0xf]  ;;  %v1303_v38 = vshrl.u32 %v1034_v25, 16  ;;  %v1306_v56 = vshll.u32 %v1034_v25, 16  ;;  %v5432_v39 = vcombine.low %v1123_v12, %v1133_v34 }
  0x5c   : > { %v1140_v2 = vrot.slane %v1138_v29, 5  ;;  %v1146_v42 = vrot.slane %v1144_v18, 5  ;;  %v1150_v43 = vrot.slane %v1148_v30, 4  ;;  %v1156_v24 = vrot.slane %v1154_v31, 5  ;;  %v1036_v48 = vld [vmem:[#allocation2 + $0x80] sm:$0x1] }
  0x5d   : > { %7133 = vst [vmem:[#allocation6_spill] sm:$0xff] %v5432_v39  ;;  %v1305_v44 = vrot.slane %v1303_v38, 4  ;;  %v1308_v45 = vrot.slane %v1306_v56, 5  ;;  %v1312_v36 = vshll.u32 %v1035_v37, 16  ;;  %4743 = vmatprep.mubr.msk.bf16.mxu0 %vm1496_vm5, %v5432_v39  ;;  %v1316_v49 = vshrl.u32 %v1035_v37, 16  ;;  %v4579_v18 = vld [vmem:[%s5221_s29 + $0x58] sm:$0xff]  }
  0x5e   : > { %v1141_v46 = vor.u32 %v1140_v2, %v1137_v35  ;;  %v1151_v47 = vor.u32 %v1150_v43, %v1146_v42  ;;  %v1322_v55 = vshll.u32 %v1036_v48, 16  ;;  %v742_v61 = vor.u32 %v740_v17, %v739_v50  ;;  %v966_v29 = vld [vmem:[#allocation2 + $0x8c] sm:$0x1] }
  0x5f   : > { %v1309_v52 = vor.u32 %v1308_v45, %v1305_v44  ;;  %v1314_v53 = vrot.slane %v1312_v36, 5  ;;  %v1318_v60 = vrot.slane %v1316_v49, 4  ;;  %v743_v7 = vrot.slane %v739_v50, 4  ;;  %v5462_v44 = vld [vmem:[%s5221_s29 + $0x60] sm:$0xff]  }
  0x60   : > { %v1142_v58 = vrot.slane %v1141_v46, 4  ;;  %v1152_v59 = vrot.slane %v1151_v47, 4  ;;  %v1324_v6 = vrot.slane %v1322_v55, 5  ;;  %v747_v10 = vrot.slane %v745_v57, 7 }
  0x61   : > { %v1310_v3 = vrot.slane %v1309_v52, 4  ;;  %v1319_v19 = vor.u32 %v1318_v60, %v1314_v53  ;;  %v748_v26 = vshll.u32 %v4462_v15, 16  ;;  %v963_v25 = vsel %vm5274_vm11, %v742_v61, %v962_v0  ;;  %v913_v0 = vld [vmem:[#allocation2 + $0x30] sm:$0xf] }
  0x62   : > { %v1147_v12 = vsel %vm5246_vm9, %v1142_v58, %v1146_v42  ;;  %v1157_v16 = vsel %vm5246_vm9, %v1152_v59, %v1156_v24  ;;  %v752_v31 = vrot.slane %v747_v10, 4  ;;  %964 = vst [vmem:[#allocation2 + $0x84] sm:$0xf] %v963_v25  ;;  %v354_v37 = vadd.f32 %v5239_v23, %v316_v27 }
  0x63   : > { %v5441_v30 = vcombine.low %v1147_v12, %v1157_v16  ;;  %v1315_v17 = vsel %vm5246_vm9, %v1310_v3, %v1314_v53  ;;  %v1320_v34 = vrot.slane %v1319_v19, 4  ;;  %v750_v35 = vor.u32 %v748_v26, %v747_v10 }
  0x64   : > { %v385_v38 = vmax.f32 %v5424_v28, 0.0  ;;  %v967_v15 = vsel %vm5281_vm12, %v752_v31, %v966_v29  ;;  %v4524_v56 = vunpack.c.h.bf16 %v5407_v54  ;;  %v317_v2 = vmul.f32 %v4523_v11, %v5226_v5  ;;  %v917_v29 = vld [vmem:[#allocation2 + $0x38] sm:$0x1] }
  0x65   : > { %7134 = vst [vmem:[#allocation7_spill] sm:$0xff] %v5441_v30  ;;  %4744 = vmatmul.mubr.msk.bf16.gmra.mxu0 %vm1496_vm5, %v5441_v30  ;;  %v4551_v42 = vunpack.c.l.bf16 %v4579_v18  ;;  %v1325_v43 = vsel %vm5246_vm9, %v1320_v34, %v1324_v6  ;;  %v751_v27 = vsel %vm5268_vm10, %v743_v7, %v750_v35  ;;  %968 = vst [vmem:[#allocation2 + $0x8c] sm:$0x1] %v967_v15  ;;  %v386_v28 = vmax.f32 %v354_v37, 0.0 }
  0x66   : > { %v4447_v24 = vpack.c.bf16 %v385_v38, %v385_v38  ;;  %v5464_v45 = vcombine.low %v1315_v17, %v1325_v43  ;;  %965 = vst.msk [vmem:[#allocation2 + $0x88] sm:$0xf] %vm427_vm1, %v751_v27  ;;  %v318_v36 = vmul.f32 %v4524_v56, %v5226_v5  ;;  %v355_v54 = vadd.f32 %v5239_v23, %v317_v2 }
  0x67   : > { %v4552_v11 = vunpack.c.h.bf16 %v4579_v18  ;;  %v4448_v46 = vpack.c.bf16 %v386_v28, %v386_v28  ;;  %v331_v49 = vmul.f32 %v4551_v42, %v5226_v5  ;;  %v4555_v55 = vunpack.c.l.bf16 %v5462_v44 }
  0x68   : > { %7135 = vst [vmem:[#allocation8_spill] sm:$0xff] %v5464_v45  ;;  %v618_v47 = vshrl.u32 %v4447_v24, 16  ;;  %v621_v48 = vshll.u32 %v4447_v24, 16  ;;  %4759 = vmatprep.mubr.msk.bf16.mxu1 %vm1496_vm5, %v5464_v45  ;;  %v356_v50 = vadd.f32 %v5239_v23, %v318_v36  ;;  %v387_v52 = vmax.f32 %v355_v54, 0.0 }
  0x69   : > { %v332_v53 = vmul.f32 %v4552_v11, %v5226_v5  ;;  %v626_v58 = vshrl.u32 %v4448_v46, 16  ;;  %v629_v59 = vshll.u32 %v4448_v46, 16  ;;  %v369_v60 = vadd.f32 %v5239_v23, %v331_v49  ;;  %v5476_v61 = vld [vmem:[#allocation2 + $0x84] sm:$0xf] }
  0x6a   : > { %v620_v57 = vrot.slane %v618_v47, 7  ;;  %v388_v3 = vmax.f32 %v356_v50, 0.0  ;;  %v4449_v6 = vpack.c.bf16 %v387_v52, %v387_v52  ;;  %v4556_v10 = vunpack.c.h.bf16 %v5462_v44 }
  0x6b   : > { %v370_v7 = vadd.f32 %v5239_v23, %v332_v53  ;;  %v1327_v12 = vshrl.u32 %v5476_v61, 16  ;;  %v1330_v16 = vshll.u32 %v5476_v61, 16  ;;  %v628_v17 = vrot.slane %v626_v58, 7 }
  0x6c   : > { %v623_v19 = vor.u32 %v621_v48, %v620_v57  ;;  %v624_v26 = vrot.slane %v620_v57, 4  ;;  %v5482_v18 = vld [vmem:[#allocation2 + $0x8c] sm:$0x1]  ;;  %v4450_v31 = vpack.c.bf16 %v388_v3, %v388_v3  ;;  %v635_v25 = vshrl.u32 %v4449_v6, 16  ;;  %v920_v48 = vld [vmem:[#allocation2 + $0x3c] sm:$0xf] }
  0x6d   : > { %v638_v34 = vshll.u32 %v4449_v6, 16  ;;  %v5484_v35 = vld [vmem:[#allocation2 + $0x88] sm:$0xf]  ;;  %v1329_v37 = vrot.slane %v1327_v12, 4  ;;  %v1332_v38 = vrot.slane %v1330_v16, 5  ;;  %v1346_v15 = vshll.u32 %v5482_v18, 16 }
  0x6e   : > { %v914_v56 = vsel %vm5274_vm11, %v623_v19, %v913_v0  ;;  %v1336_v2 = vshll.u32 %v5484_v35, 16  ;;  %v1340_v42 = vshrl.u32 %v5484_v35, 16  ;;  %v631_v43 = vor.u32 %v629_v59, %v628_v17  ;;  %v924_v59 = vld [vmem:[#allocation2 + $0x44] sm:$0x1]  ;;  %v5497_v6 = vld [vmem:[%s5221_s29 + $0x28] sm:$0xff]  }
  0x6f   : > { %v633_v27 = vrot.slane %v628_v17, 4  ;;  %915 = vst [vmem:[#allocation2 + $0x30] sm:$0xf] %v914_v56  ;;  %v1333_v28 = vor.u32 %v1332_v38, %v1329_v37  ;;  %v1348_v24 = vrot.slane %v1346_v15, 5  ;;  %v637_v44 = vrot.slane %v635_v25, 7 }
  0x70   : > { %v643_v36 = vshrl.u32 %v4450_v31, 16  ;;  %v1338_v54 = vrot.slane %v1336_v2, 5  ;;  %v1342_v11 = vrot.slane %v1340_v42, 4  ;;  %v632_v46 = vsel %vm5268_vm10, %v624_v26, %v631_v43 }
  0x71   : > { %v918_v47 = vsel %vm5281_vm12, %v633_v27, %v917_v29  ;;  %v1334_v49 = vrot.slane %v1333_v28, 4  ;;  %916 = vst.msk [vmem:[#allocation2 + $0x34] sm:$0xf] %vm427_vm1, %v632_v46  ;;  %v640_v50 = vor.u32 %v638_v34, %v637_v44  ;;  %v641_v52 = vrot.slane %v637_v44, 4 }
  0x72   : > { %919 = vst [vmem:[#allocation2 + $0x38] sm:$0x1] %v918_v47  ;;  %v645_v53 = vrot.slane %v643_v36, 7  ;;  %v1343_v57 = vor.u32 %v1342_v11, %v1338_v54  ;;  %v646_v58 = vshll.u32 %v4450_v31, 16  ;;  %v401_v0 = vmax.f32 %v369_v60, 0.0 }
  0x73   : > { %v402_v3 = vmax.f32 %v370_v7, 0.0  ;;  %v1339_v12 = vsel %vm5246_vm9, %v1334_v49, %v1338_v54  ;;  %v921_v19 = vsel %vm5274_vm11, %v640_v50, %v920_v48  ;;  %v333_v26 = vmul.f32 %v4555_v55, %v5226_v5 }
  0x74   : > { %v650_v16 = vrot.slane %v645_v53, 4  ;;  %v1344_v29 = vrot.slane %v1343_v57, 4  ;;  %v648_v17 = vor.u32 %v646_v58, %v645_v53  ;;  %922 = vst [vmem:[#allocation2 + $0x3c] sm:$0xf] %v921_v19  ;;  %v4463_v25 = vpack.c.bf16 %v401_v0, %v401_v0  ;;  %v969_v53 = vld [vmem:[#allocation2 + $0x90] sm:$0xf] }
  0x75   : > { %v4464_v34 = vpack.c.bf16 %v402_v3, %v402_v3  ;;  %v334_v7 = vmul.f32 %v4556_v10, %v5226_v5  ;;  %v5510_v37 = vadd.f32 %v5239_v23, %v333_v26  ;;  %v4527_v38 = vunpack.c.l.bf16 %v5497_v6 }
  0x76   : > { %v5504_v31 = vld [vmem:[#allocation2 + $0x30] sm:$0xf]  ;;  %v925_v60 = vsel %vm5281_vm12, %v650_v16, %v924_v59  ;;  %v1349_v55 = vsel %vm5246_vm9, %v1344_v29, %v1348_v24  ;;  %v649_v2 = vsel %vm5268_vm10, %v641_v52, %v648_v17  ;;  %v754_v5 = vshrl.u32 %v4463_v25, 16 }
  0x77   : > { %v1159_v15 = vshrl.u32 %v5504_v31, 16  ;;  %v1162_v56 = vshll.u32 %v5504_v31, 16  ;;  %926 = vst [vmem:[#allocation2 + $0x44] sm:$0x1] %v925_v60  ;;  %v5519_v42 = vcombine.low %v1339_v12, %v1349_v55  ;;  %923 = vst.msk [vmem:[#allocation2 + $0x40] sm:$0xf] %vm427_vm1, %v649_v2  ;;  %v372_v36 = vadd.f32 %v5239_v23, %v334_v7 }
  0x78   : > { %v757_v10 = vshll.u32 %v4463_v25, 16  ;;  %v762_v43 = vshrl.u32 %v4464_v34, 16  ;;  %v5522_v27 = vld [vmem:[#allocation2 + $0x34] sm:$0xf]  ;;  %v4528_v54 = vunpack.c.h.bf16 %v5497_v6  ;;  %v756_v48 = vrot.slane %v754_v5, 7 }
  0x79   : > { %7136 = vst [vmem:[#allocation9_spill] sm:$0xff] %v5519_v42  ;;  %v5524_v28 = vld [vmem:[#allocation2 + $0x38] sm:$0x1]  ;;  %v1161_v24 = vrot.slane %v1159_v15, 4  ;;  %v1164_v44 = vrot.slane %v1162_v56, 5  ;;  %4760 = vmatmul.mubr.msk.bf16.gmra.mxu1 %vm1496_vm5, %v5519_v42  ;;  %v1168_v11 = vshll.u32 %v5522_v27, 16 }
  0x7a   : > { %v1172_v46 = vshrl.u32 %v5522_v27, 16  ;;  %v1178_v47 = vshll.u32 %v5524_v28, 16  ;;  %v764_v50 = vrot.slane %v762_v43, 7  ;;  %v765_v52 = vshll.u32 %v4464_v34, 16  ;;  %v973_v7 = vld [vmem:[#allocation2 + $0x98] sm:$0x1] }
  0x7b   : > { %v1165_v49 = vor.u32 %v1164_v44, %v1161_v24  ;;  %v403_v57 = vmax.f32 %v5510_v37, 0.0  ;;  %v1170_v58 = vrot.slane %v1168_v11, 5  ;;  %v5534_v0 = vld [vmem:[#allocation2 + $0x3c] sm:$0xf]  ;;  %v759_v3 = vor.u32 %v757_v10, %v756_v48  ;;  %v5577_v6 = vld [vmem:[%s7082_s2] ss:$0 sm:$0xff] }
  0x7c   : > { %v1174_v23 = vrot.slane %v1172_v46, 4  ;;  %v1180_v59 = vrot.slane %v1178_v47, 5  ;;  %v1183_v16 = vshrl.u32 %v5534_v0, 16  ;;  %v1186_v19 = vshll.u32 %v5534_v0, 16  ;;  %7139 = vst [vmem:[#allocation12_spill] sm:$0xff] %v5577_v6 }
  0x7d   : > { %v1166_v12 = vrot.slane %v1165_v49, 4  ;;  %v760_v26 = vrot.slane %v756_v48, 4  ;;  %v767_v25 = vor.u32 %v765_v52, %v764_v50  ;;  %v769_v34 = vrot.slane %v764_v50, 4 }
  0x7e   : > { %v1175_v29 = vor.u32 %v1174_v23, %v1170_v58  ;;  %v5538_v17 = vld [vmem:[#allocation2 + $0x44] sm:$0x1]  ;;  %v970_v60 = vsel %vm5274_vm11, %v759_v3, %v969_v53  ;;  %v5544_v55 = vld [vmem:[#allocation2 + $0x40] sm:$0xf]  ;;  %v1185_v15 = vrot.slane %v1183_v16, 4  ;;  %v1188_v56 = vrot.slane %v1186_v19, 5 }
  0x7f   : > { %v1171_v37 = vsel %vm5246_vm9, %v1166_v12, %v1170_v58  ;;  %v1202_v2 = vshll.u32 %v5538_v17, 16  ;;  %971 = vst [vmem:[#allocation2 + $0x90] sm:$0xf] %v970_v60  ;;  %v1192_v10 = vshll.u32 %v5544_v55, 16  ;;  %v1196_v43 = vshrl.u32 %v5544_v55, 16  ;;  %v5567_v12 = vld [vmem:[%s5221_s29 + $0x30] sm:$0xff]  }
  0x80   : > { %v1176_v5 = vrot.slane %v1175_v29, 4  ;;  %v768_v24 = vsel %vm5268_vm10, %v760_v26, %v767_v25  ;;  %v1189_v44 = vor.u32 %v1188_v56, %v1185_v15  ;;  %v974_v46 = vsel %vm5281_vm12, %v769_v34, %v973_v7  ;;  %v5561_v3 = vld [vmem:[%s7081_s1] ss:$0 sm:$0xff] }
  0x81   : > { %v1204_v11 = vrot.slane %v1202_v2, 5  ;;  %972 = vst.msk [vmem:[#allocation2 + $0x94] sm:$0xf] %vm427_vm1, %v768_v24  ;;  %v404_v47 = vmax.f32 %v372_v36, 0.0  ;;  %v1194_v49 = vrot.slane %v1192_v10, 5  ;;  %v1198_v50 = vrot.slane %v1196_v43, 4 }
  0x82   : > { %v1181_v48 = vsel %vm5246_vm9, %v1176_v5, %v1180_v59  ;;  %975 = vst [vmem:[#allocation2 + $0x98] sm:$0x1] %v974_v46  ;;  %v4465_v52 = vpack.c.bf16 %v403_v57, %v403_v57  ;;  %v1190_v58 = vrot.slane %v1189_v44, 4  ;;  %7138 = vst [vmem:[#allocation11_spill] sm:$0xff] %v5561_v3  ;;  %v319_v36 = vmul.f32 %v5561_v3, %v4527_v38  ;;  %v976_v5 = vld [vmem:[#allocation2 + $0x9c] sm:$0xf] }
  0x83   : > { %v5556_v53 = vcombine.low %v1171_v37, %v1181_v48  ;;  %v4466_v23 = vpack.c.bf16 %v404_v47, %v404_v47  ;;  %v1199_v59 = vor.u32 %v1198_v50, %v1194_v49  ;;  %v320_v57 = vmul.f32 %v5561_v3, %v4528_v54  ;;  %v980_v47 = vld [vmem:[#allocation2 + $0xa4] sm:$0x1] }
  0x84   : > { %v771_v16 = vshrl.u32 %v4465_v52, 16  ;;  %v774_v19 = vshll.u32 %v4465_v52, 16  ;;  %v1195_v26 = vsel %vm5246_vm9, %v1190_v58, %v1194_v49  ;;  %v357_v38 = vadd.f32 %v5577_v6, %v319_v36 }
  0x85   : > { %7137 = vst [vmem:[#allocation10_spill] sm:$0xff] %v5556_v53  ;;  %4747 = vmatprep.mubr.msk.bf16.mxu0 %vm1496_vm5, %v5556_v53  ;;  %v779_v29 = vshrl.u32 %v4466_v23, 16  ;;  %v782_v25 = vshll.u32 %v4466_v23, 16  ;;  %v1200_v34 = vrot.slane %v1199_v59, 4  ;;  %v358_v54 = vadd.f32 %v5577_v6, %v320_v57 }
  0x86   : > { %v5580_v60 = vld [vmem:[#allocation2 + $0x90] sm:$0xf]  ;;  %v773_v7 = vrot.slane %v771_v16, 7  ;;  %v4531_v37 = vunpack.c.l.bf16 %v5567_v12  ;;  %v389_v10 = vmax.f32 %v357_v38, 0.0  ;;  %v4581_v38 = vld [vmem:[%s5221_s29 + $0x68] sm:$0xff]   ;;  %vm2018_vm13 = vcmask 1042432  }
  0x87   : > { %v1351_v15 = vshrl.u32 %v5580_v60, 16  ;;  %v1354_v56 = vshll.u32 %v5580_v60, 16  ;;  %v781_v2 = vrot.slane %v779_v29, 7  ;;  %v1205_v43 = vsel %vm5246_vm9, %v1200_v34, %v1204_v11 }
  0x88   : > { %v5588_v24 = vld [vmem:[#allocation2 + $0x94] sm:$0xf]  ;;  %v776_v44 = vor.u32 %v774_v19, %v773_v7  ;;  %v777_v46 = vrot.slane %v773_v7, 4  ;;  %v390_v48 = vmax.f32 %v358_v54, 0.0  ;;  %v5590_v49 = vcombine.low %v1195_v26, %v1205_v43 }
  0x89   : > { %v5592_v50 = vld [vmem:[#allocation2 + $0x98] sm:$0x1]  ;;  %v1353_v52 = vrot.slane %v1351_v15, 4  ;;  %v1356_v58 = vrot.slane %v1354_v56, 5  ;;  %v1360_v23 = vshll.u32 %v5588_v24, 16  ;;  %v1364_v36 = vshrl.u32 %v5588_v24, 16 }
  0x8a   : > { %7140 = vst [vmem:[#allocation13_spill] sm:$0xff] %v5590_v49  ;;  %v1370_v59 = vshll.u32 %v5592_v50, 16  ;;  %v784_v11 = vor.u32 %v782_v25, %v781_v2  ;;  %v786_v16 = vrot.slane %v781_v2, 4  ;;  %4748 = vmatmul.mubr.msk.bf16.gmra.mxu0 %vm1496_vm5, %v5590_v49  ;;  %v977_v26 = vsel %vm5274_vm11, %v776_v44, %v976_v5 }
  0x8b   : > { %v1357_v19 = vor.u32 %v1356_v58, %v1353_v52  ;;  %v1362_v57 = vrot.slane %v1360_v23, 5  ;;  %v4451_v29 = vpack.c.bf16 %v389_v10, %v389_v10  ;;  %v1366_v34 = vrot.slane %v1364_v36, 4  ;;  %978 = vst [vmem:[#allocation2 + $0x9c] sm:$0xf] %v977_v26 }
  0x8c   : > { %v1372_v7 = vrot.slane %v1370_v59, 5  ;;  %v785_v54 = vsel %vm5268_vm10, %v777_v46, %v784_v11  ;;  %v981_v25 = vsel %vm5281_vm12, %v786_v16, %v980_v47  ;;  %v4452_v56 = vpack.c.bf16 %v390_v48, %v390_v48  ;;  %v927_v59 = vld [vmem:[#allocation2 + $0x48] sm:$0xf] }
  0x8d   : > { %v1358_v15 = vrot.slane %v1357_v19, 4  ;;  %979 = vst.msk [vmem:[#allocation2 + $0xa0] sm:$0xf] %vm427_vm1, %v785_v54  ;;  %982 = vst [vmem:[#allocation2 + $0xa4] sm:$0x1] %v981_v25  ;;  %v652_v2 = vshrl.u32 %v4451_v29, 16  ;;  %v1367_v52 = vor.u32 %v1366_v34, %v1362_v57  ;;  %v4532_v5 = vunpack.c.h.bf16 %v5567_v12 }
  0x8e   : > { %v655_v43 = vshll.u32 %v4451_v29, 16  ;;  %v321_v10 = vmul.f32 %v5561_v3, %v4531_v37  ;;  %v4559_v44 = vunpack.c.l.bf16 %v4581_v38  ;;  %v660_v23 = vshrl.u32 %v4452_v56, 16 }
  0x8f   : > { %v1363_v46 = vsel %vm5246_vm9, %v1358_v15, %v1362_v57  ;;  %v654_v58 = vrot.slane %v652_v2, 7  ;;  %v663_v36 = vshll.u32 %v4452_v56, 16  ;;  %v1368_v47 = vrot.slane %v1367_v52, 4 }
  0x90   : > { %v322_v11 = vmul.f32 %v5561_v3, %v4532_v5  ;;  %v359_v48 = vadd.f32 %v5577_v6, %v321_v10  ;;  %v4560_v16 = vunpack.c.h.bf16 %v4581_v38  ;;  %v662_v29 = vrot.slane %v660_v23, 7 }
  0x91   : > { %v657_v19 = vor.u32 %v655_v43, %v654_v58  ;;  %v658_v26 = vrot.slane %v654_v58, 4  ;;  %v335_v12 = vmul.f32 %v5561_v3, %v4559_v44  ;;  %v1373_v37 = vsel %vm5246_vm9, %v1368_v47, %v1372_v7  ;;  %v931_v43 = vld [vmem:[#allocation2 + $0x50] sm:$0x1] }
  0x92   : > { %v360_v57 = vadd.f32 %v5577_v6, %v322_v11  ;;  %v391_v34 = vmax.f32 %v359_v48, 0.0  ;;  %v336_v54 = vmul.f32 %v5561_v3, %v4560_v16  ;;  %v5618_v25 = vcombine.low %v1363_v46, %v1373_v37  ;;  %v5620_v15 = vld [vmem:[#allocation2 + $0x9c] sm:$0xf] }
  0x93   : > { %v665_v56 = vor.u32 %v663_v36, %v662_v29  ;;  %v667_v2 = vrot.slane %v662_v29, 4  ;;  %v928_v38 = vsel %vm5274_vm11, %v657_v19, %v927_v59  ;;  %v1375_v7 = vshrl.u32 %v5620_v15, 16  ;;  %v5642_v19 = vld [vmem:[%s5221_s29 + $0x70] sm:$0xff]  }
  0x94   : > { %7141 = vst [vmem:[#allocation14_spill] sm:$0xff] %v5618_v25  ;;  %v5624_v52 = vld [vmem:[#allocation2 + $0xa0] sm:$0xf]  ;;  %v5626_v5 = vld [vmem:[#allocation2 + $0xa4] sm:$0x1]  ;;  %v1378_v10 = vshll.u32 %v5620_v15, 16  ;;  %v4453_v44 = vpack.c.bf16 %v391_v34, %v391_v34  ;;  %v373_v46 = vadd.f32 %v5577_v6, %v335_v12  ;;  %4763 = vmatprep.mubr.msk.bf16.mxu1 %vm1496_vm5, %v5618_v25 }
  0x95   : > { %929 = vst [vmem:[#allocation2 + $0x48] sm:$0xf] %v928_v38  ;;  %v1384_v58 = vshll.u32 %v5624_v52, 16  ;;  %v1388_v23 = vshrl.u32 %v5624_v52, 16  ;;  %v1394_v36 = vshll.u32 %v5626_v5, 16  ;;  %v666_v47 = vsel %vm5268_vm10, %v658_v26, %v665_v56 }
  0x96   : > { %v1377_v59 = vrot.slane %v1375_v7, 4  ;;  %v1380_v11 = vrot.slane %v1378_v10, 5  ;;  %930 = vst.msk [vmem:[#allocation2 + $0x4c] sm:$0xf] %vm427_vm1, %v666_v47  ;;  %v932_v48 = vsel %vm5281_vm12, %v667_v2, %v931_v43  ;;  %v392_v16 = vmax.f32 %v360_v57, 0.0 }
  0x97   : > { %v1386_v29 = vrot.slane %v1384_v58, 5  ;;  %v1390_v12 = vrot.slane %v1388_v23, 4  ;;  %v1396_v37 = vrot.slane %v1394_v36, 5  ;;  %933 = vst [vmem:[#allocation2 + $0x50] sm:$0x1] %v932_v48  ;;  %v669_v34 = vshrl.u32 %v4453_v44, 16 }
  0x98   : > { %v1381_v38 = vor.u32 %v1380_v11, %v1377_v59  ;;  %v4454_v22 = vpack.c.bf16 %v392_v16, %v392_v16  ;;  %v672_v1 = vshll.u32 %v4453_v44, 16  ;;  %v374_v26 = vadd.f32 %v5577_v6, %v336_v54  ;;  %v934_v43 = vld [vmem:[#allocation2 + $0x54] sm:$0xf] }
  0x99   : > { %v1391_v56 = vor.u32 %v1390_v12, %v1386_v29  ;;  %v671_v7 = vrot.slane %v669_v34, 7  ;;  %v405_v10 = vmax.f32 %v373_v46, 0.0  ;;  %v4563_v47 = vunpack.c.l.bf16 %v5642_v19  ;;  %v938_v34 = vld [vmem:[#allocation2 + $0x5c] sm:$0x1] }
  0x9a   : > { %v1382_v25 = vrot.slane %v1381_v38, 4  ;;  %v677_v2 = vshrl.u32 %v4454_v22, 16  ;;  %v680_v57 = vshll.u32 %v4454_v22, 16  ;;  %v406_v42 = vmax.f32 %v374_v26, 0.0 }
  0x9b   : > { %v1392_v58 = vrot.slane %v1391_v56, 4  ;;  %v674_v36 = vor.u32 %v672_v1, %v671_v7  ;;  %v675_v48 = vrot.slane %v671_v7, 4  ;;  %v4467_v59 = vpack.c.bf16 %v405_v10, %v405_v10 }
  0x9c   : > { %v5646_v23 = vld [vmem:[#allocation2 + $0x48] sm:$0xf]  ;;  %v1387_v44 = vsel %vm5246_vm9, %v1382_v25, %v1386_v29  ;;  %v679_v11 = vrot.slane %v677_v2, 7  ;;  %v4468_v1 = vpack.c.bf16 %v406_v42, %v406_v42  ;;  %vm2019_vm14 = vcmask 1046532  }
  0x9d   : > { %v1207_v54 = vshrl.u32 %v5646_v23, 16  ;;  %v1210_v46 = vshll.u32 %v5646_v23, 16  ;;  %v1397_v16 = vsel %vm5246_vm9, %v1392_v58, %v1396_v37  ;;  %v5654_v22 = vld [vmem:[#allocation2 + $0x4c] sm:$0xf]  ;;  %v935_v12 = vsel %vm5274_vm11, %v674_v36, %v934_v43  ;;  %vm5703_vm15 = vmor %vm2018_vm13, %vm2019_vm14 }
  0x9e   : > { %v788_v38 = vshrl.u32 %v4467_v59, 16  ;;  %v5658_v26 = vcombine.low %v1387_v44, %v1397_v16  ;;  %v5660_v56 = vld [vmem:[#allocation2 + $0x50] sm:$0x1]  ;;  %v1216_v7 = vshll.u32 %v5654_v22, 16  ;;  %936 = vst [vmem:[#allocation2 + $0x54] sm:$0xf] %v935_v12  ;;  %v682_v2 = vor.u32 %v680_v57, %v679_v11 }
  0x9f   : > { %v1209_v25 = vrot.slane %v1207_v54, 4  ;;  %v1212_v29 = vrot.slane %v1210_v46, 5  ;;  %v1220_v10 = vshrl.u32 %v5654_v22, 16  ;;  %v1226_v37 = vshll.u32 %v5660_v56, 16  ;;  %v983_v12 = vld [vmem:[#allocation2 + $0xa8] sm:$0xf] }
  0xa0   : > { %7142 = vst [vmem:[#allocation15_spill] sm:$0xff] %v5658_v26  ;;  %v684_v58 = vrot.slane %v679_v11, 4  ;;  %4764 = vmatmul.mubr.msk.bf16.gmra.mxu1 %vm1496_vm5, %v5658_v26  ;;  %v1218_v43 = vrot.slane %v1216_v7, 5  ;;  %v790_v36 = vrot.slane %v788_v38, 7  ;;  %v791_v44 = vshll.u32 %v4467_v59, 16 }
  0xa1   : > { %v1213_v42 = vor.u32 %v1212_v29, %v1209_v25  ;;  %v1222_v16 = vrot.slane %v1220_v10, 4  ;;  %v1228_v45 = vrot.slane %v1226_v37, 5  ;;  %v683_v54 = vsel %vm5268_vm10, %v675_v48, %v682_v2 }
  0xa2   : > { %v939_v46 = vsel %vm5281_vm12, %v684_v58, %v938_v34  ;;  %937 = vst.msk [vmem:[#allocation2 + $0x58] sm:$0xf] %vm427_vm1, %v683_v54  ;;  %v793_v57 = vor.u32 %v791_v44, %v790_v36  ;;  %v794_v11 = vrot.slane %v790_v36, 4  ;;  %v796_v26 = vshrl.u32 %v4468_v1, 16  ;;  %v5687_v44 = vld [vmem:[#allocation2] sm:$0xf] }
  0xa3   : > { %v1214_v51 = vrot.slane %v1213_v42, 4  ;;  %940 = vst [vmem:[#allocation2 + $0x5c] sm:$0x1] %v939_v46  ;;  %v1223_v25 = vor.u32 %v1222_v16, %v1218_v43  ;;  %v799_v29 = vshll.u32 %v4468_v1, 16  ;;  %v4564_v59 = vunpack.c.h.bf16 %v5642_v19 }
  0xa4   : > { %v337_v38 = vmul.f32 %v5561_v3, %v4563_v47  ;;  %v798_v7 = vrot.slane %v796_v26, 7  ;;  %v984_v34 = vsel %vm5274_vm11, %v793_v57, %v983_v12  ;;  %v987_v26 = vld [vmem:[#allocation2 + $0xb0] sm:$0x1]  ;;  %v4246_v16 = vrot.slane %v5687_v44, 9 }
  0xa5   : > { %v1219_v48 = vsel %vm5246_vm9, %v1214_v51, %v1218_v43  ;;  %v1224_v10 = vrot.slane %v1223_v25, 4  ;;  %v5678_v37 = vld [vmem:[#allocation2 + $0x54] sm:$0xf]  ;;  %985 = vst [vmem:[#allocation2 + $0xa8] sm:$0xf] %v984_v34  ;;  %v338_v2 = vmul.f32 %v5561_v3, %v4564_v59  ;;  %v7146_v3 = vrot.slane %v5228_v8, 5 }
  0xa6   : > { %v375_v1 = vadd.f32 %v5577_v6, %v337_v38  ;;  %v1231_v19 = vshrl.u32 %v5678_v37, 16  ;;  %v1234_v47 = vshll.u32 %v5678_v37, 16  ;;  %v801_v58 = vor.u32 %v799_v29, %v798_v7 }
  0xa7   : > { %v803_v51 = vrot.slane %v798_v7, 4  ;;  %v1229_v42 = vsel %vm5246_vm9, %v1224_v10, %v1228_v45  ;;  %v376_v43 = vadd.f32 %v5577_v6, %v338_v2  ;;  %v5707_v7 = vld [vmem:[#allocation2 + $0x4] sm:$0xf] }
  0xa8   : > { %v407_v36 = vmax.f32 %v375_v1, 0.0  ;;  %v5690_v54 = vcombine.low %v1219_v48, %v1229_v42  ;;  %v1233_v46 = vrot.slane %v1231_v19, 4  ;;  %v1236_v12 = vrot.slane %v1234_v47, 5  ;;  %v5071_v19 = vld [vmem:[#allocation2 + $0x14] sm:$0x1] }
  0xa9   : > { %v802_v57 = vsel %vm5268_vm10, %v794_v11, %v801_v58  ;;  %v5694_v25 = vld [vmem:[#allocation2 + $0x58] sm:$0xf]  ;;  %v988_v45 = vsel %vm5281_vm12, %v803_v51, %v987_v26  ;;  %v408_v59 = vmax.f32 %v376_v43, 0.0  ;;  %v2023_v11 = vrot.slane %v5707_v7, 5 }
  0xaa   : > { %7143 = vst [vmem:[#allocation16_spill] sm:$0xff] %v5690_v54  ;;  %v5696_v29 = vld [vmem:[#allocation2 + $0x5c] sm:$0x1]  ;;  %986 = vst.msk [vmem:[#allocation2 + $0xac] sm:$0xf] %vm427_vm1, %v802_v57  ;;  %v4469_v38 = vpack.c.bf16 %v407_v36, %v407_v36  ;;  %4751 = vmatprep.mubr.msk.bf16.mxu0 %vm1496_vm5, %v5690_v54  ;;  %v1237_v34 = vor.u32 %v1236_v12, %v1233_v46  ;;  %v1240_v10 = vshll.u32 %v5694_v25, 16 }
  0xab   : > { %v1244_v2 = vshrl.u32 %v5694_v25, 16  ;;  %v1250_v1 = vshll.u32 %v5696_v29, 16  ;;  %989 = vst [vmem:[#allocation2 + $0xb0] sm:$0x1] %v988_v45  ;;  %v2033_v47 = vrot.slane %v5071_v19, 5  ;;  %v4470_v58 = vpack.c.bf16 %v408_v59, %v408_v59 }
  0xac   : > { %v805_v51 = vshrl.u32 %v4469_v38, 16  ;;  %v808_v26 = vshll.u32 %v4469_v38, 16  ;;  %v1238_v42 = vrot.slane %v1237_v34, 4  ;;  %v1242_v43 = vrot.slane %v1240_v10, 5  ;;  %v5715_v57 = vld [vmem:[#allocation2 + $0xa8] sm:$0xf] }
  0xad   : > { %v1246_v36 = vrot.slane %v1244_v2, 4  ;;  %v2024_v46 = vsel %vm5703_vm15, %v4246_v16, %v2023_v11  ;;  %v1399_v12 = vshrl.u32 %v5715_v57, 16  ;;  %v1402_v32 = vshll.u32 %v5715_v57, 16  ;;  %v990_v59 = vld [vmem:[#allocation2 + $0xb4] sm:$0xf] }
  0xae   : > { %v807_v54 = vrot.slane %v805_v51, 7  ;;  %v813_v49 = vshrl.u32 %v4470_v58, 16  ;;  %v1252_v53 = vrot.slane %v1250_v1, 5  ;;  %v816_v19 = vshll.u32 %v4470_v58, 16 }
  0xaf   : > { %v1247_v45 = vor.u32 %v1246_v36, %v1242_v43  ;;  %v2025_v30 = vrot.slane %v2023_v11, 4  ;;  %v1243_v38 = vsel %vm5246_vm9, %v1238_v42, %v1242_v43  ;;  %v1401_v34 = vrot.slane %v1399_v12, 4 }
  0xb0   : > { %v1404_v10 = vrot.slane %v1402_v32, 5  ;;  %v810_v2 = vor.u32 %v808_v26, %v807_v54  ;;  %v811_v16 = vrot.slane %v807_v54, 4  ;;  %v815_v6 = vrot.slane %v813_v49, 7  ;;  %v994_v26 = vld [vmem:[#allocation2 + $0xbc] sm:$0x1] }
  0xb1   : > { %v1248_v39 = vrot.slane %v1247_v45, 4  ;;  %v5723_v62 = vld [vmem:[#allocation2 + $0xac] sm:$0xf]  ;;  %v2027_v51 = vsel %vm5703_vm15, %v2025_v30, %v7146_v3 }
  0xb2   : > { %v5729_v1 = vld [vmem:[#allocation2 + $0xb0] sm:$0x1]  ;;  %v1405_v58 = vor.u32 %v1404_v10, %v1401_v34  ;;  %v1408_v11 = vshll.u32 %v5723_v62, 16  ;;  %v1412_v42 = vshrl.u32 %v5723_v62, 16  ;;  %v991_v32 = vsel %vm5274_vm11, %v810_v2, %v990_v59 }
  0xb3   : > { %v1253_v54 = vsel %vm5246_vm9, %v1248_v39, %v1252_v53  ;;  %v1418_v49 = vshll.u32 %v5729_v1, 16  ;;  %v818_v8 = vor.u32 %v816_v19, %v815_v6  ;;  %v820_v43 = vrot.slane %v815_v6, 4  ;;  %992 = vst [vmem:[#allocation2 + $0xb4] sm:$0xf] %v991_v32  ;;  %v5747_v6 = vld [vmem:[#allocation2 + $0xc] sm:$0xf] }
  0xb4   : > { %v5738_v30 = vcombine.low %v1243_v38, %v1253_v54  ;;  %v1406_v3 = vrot.slane %v1405_v58, 4  ;;  %v1410_v36 = vrot.slane %v1408_v11, 5  ;;  %v1414_v12 = vrot.slane %v1412_v42, 4 }
  0xb5   : > { %v819_v45 = vsel %vm5268_vm10, %v811_v16, %v818_v8  ;;  %v995_v59 = vsel %vm5281_vm12, %v820_v43, %v994_v26  ;;  %v4263_v34 = vcombine.low %v2024_v46, %v2027_v51  ;;  %v1420_v53 = vrot.slane %v1418_v49, 5  ;;  %v5755_v46 = vld [vmem:[#allocation2 + $0x18] sm:$0xf] }
  0xb6   : > { %4752 = vmatmul.mubr.msk.bf16.gmra.mxu0 %vm1496_vm5, %v5738_v30  ;;  %v1415_v39 = vor.u32 %v1414_v12, %v1410_v36  ;;  %993 = vst.msk [vmem:[#allocation2 + $0xb8] sm:$0xf] %vm427_vm1, %v819_v45  ;;  %996 = vst [vmem:[#allocation2 + $0xbc] sm:$0x1] %v995_v59  ;;  %v4247_v19 = vrot.slane %v5747_v6, 9  ;;  %v7147_v38 = vrot.slane %v5314_v4, 5  ;;  %v1411_v2 = vsel %vm5246_vm9, %v1406_v3, %v1410_v36 }
  0xb7   : > { %4807 = vmatprep.mubr.msk.bf16.mxu0 %vm1496_vm5, %v4263_v34  ;;  %v4248_v16 = vrot.slane %v5755_v46, 9  ;;  %v2037_v32 = vrot.slane %v5390_v40, 5  ;;  %v2040_v54 = vrot.slane %v5392_v41, 5  ;;  %v4249_v49 = vrot.slane %v5415_v14, 9  ;;  %v5074_v14 = vld [vmem:[%s7083_s3 + $0x10] sm:$0xf] }
  0xb8   : > { %v2032_v10 = vrot.slane %v7147_v38, 4  ;;  %v1416_v51 = vrot.slane %v1415_v39, 4  ;;  %v7148_v58 = vmov %v7147_v38  ;;  %v2044_v36 = vrot.slane %v5417_v20, 5  ;;  %v5790_v20 = vld [vmem:[%s7083_s3 + $0x18] sm:$0xf] }
  0xb9   : > { %v2031_v11 = vsel %vm5703_vm15, %v4247_v19, %v7148_v58  ;;  %v2038_v4 = vsel %vm5703_vm15, %v4248_v16, %v2037_v32  ;;  %v2039_v3 = vrot.slane %v2037_v32, 4  ;;  %v2047_v41 = vrot.slane %v5419_v21, 5 }
  0xba   : > { %v2034_v42 = vsel %vm5703_vm15, %v2032_v10, %v2033_v47  ;;  %v1421_v8 = vsel %vm5246_vm9, %v1416_v51, %v1420_v53  ;;  %v5771_v43 = vld [vmem:[#allocation2 + $0xb4] sm:$0xf]  ;;  %v2666_v45 = vsel %vm1545_vm0, %v5074_v14, 0  ;;  %v2046_v34 = vrot.slane %v2044_v36, 4 }
  0xbb   : > { %v5765_v26 = vcombine.low %v2031_v11, %v2034_v42  ;;  %v5776_v47 = vcombine.low %v1411_v2, %v1421_v8  ;;  %v1423_v40 = vshrl.u32 %v5771_v43, 16  ;;  %v1426_v12 = vshll.u32 %v5771_v43, 16 }
  0xbc   : > { %v2041_v59 = vsel %vm5703_vm15, %v2039_v3, %v2040_v54  ;;  %v2045_v10 = vsel %vm5703_vm15, %v4249_v49, %v2044_v36  ;;  %v2048_v58 = vsel %vm5703_vm15, %v2046_v34, %v2047_v41  ;;  %v4250_v42 = vrot.slane %v5504_v31, 9 }
  0xbd   : > { %7149 = vst [vmem:[#allocation17_spill] sm:$0xff] %v5776_v47  ;;  %4767 = vmatprep.mubr.msk.bf16.mxu1 %vm1496_vm5, %v5776_v47  ;;  %v5794_v39 = vld [vmem:[#allocation2 + $0xb8] sm:$0xf]  ;;  %v5796_v21 = vld [vmem:[#allocation2 + $0xbc] sm:$0x1]  ;;  %v1425_v53 = vrot.slane %v1423_v40, 4  ;;  %v5798_v38 = vcombine.low %v2038_v4, %v2041_v59  ;;  %v5816_v3 = vcombine.low %v2045_v10, %v2048_v58 }
  0xbe   : > { %v1428_v19 = vrot.slane %v1426_v12, 5  ;;  %v1432_v2 = vshll.u32 %v5794_v39, 16  ;;  %v1436_v16 = vshrl.u32 %v5794_v39, 16  ;;  %v1442_v51 = vshll.u32 %v5796_v21, 16  ;;  %4808 = vmatmul.mubr.msk.bf16.vlgmr.msra.gmra.mxu0 %vm1496_vm5, %v5765_v26 }
  0xbf   : > { %4874 = vmatpush3.bf16.msra.mxu0 %v2666_v45  ;;  %4811 = vmatprep.mubr.msk.bf16.mxu0 %vm1496_vm5, %v5798_v38  ;;  %v2051_v32 = vrot.slane %v5522_v27, 5  ;;  %v2054_v8 = vrot.slane %v5524_v28, 5  ;;  %v4251_v14 = vrot.slane %v5534_v0, 9  ;;  %v2058_v45 = vrot.slane %v5544_v55, 5 }
  0xc0   : > { %v1429_v11 = vor.u32 %v1428_v19, %v1425_v53  ;;  %v1434_v54 = vrot.slane %v1432_v2, 5  ;;  %v1438_v49 = vrot.slane %v1436_v16, 4  ;;  %5052 = vmatprep.subr.msk.bf16.mxu0 %vm1545_vm0, %v5790_v20  ;;  %v1444_v41 = vrot.slane %v1442_v51, 5 }
  0xc1   : > { %v2052_v36 = vsel %vm5703_vm15, %v4250_v42, %v2051_v32  ;;  %v2053_v40 = vrot.slane %v2051_v32, 4  ;;  %v2061_v34 = vrot.slane %v5538_v17, 5  ;;  %v2065_v53 = vrot.slane %v5654_v22, 5 }
  0xc2   : > { %v1430_v4 = vrot.slane %v1429_v11, 4  ;;  %v1439_v12 = vor.u32 %v1438_v49, %v1434_v54  ;;  %v2060_v2 = vrot.slane %v2058_v45, 4  ;;  %v4252_v16 = vrot.slane %v5646_v23, 9 }
  0xc3   : > { %v2055_v28 = vsel %vm5703_vm15, %v2053_v40, %v2054_v8  ;;  %v2067_v51 = vrot.slane %v2065_v53, 4  ;;  %v2068_v58 = vrot.slane %v5660_v56, 5  ;;  %v5834_v11 = vcombine.low %v5646_v23, %v5654_v22 }
  0xc4   : > { %v1435_v59 = vsel %vm5246_vm9, %v1430_v4, %v1434_v54  ;;  %v1440_v19 = vrot.slane %v1439_v12, 4  ;;  %v5828_v10 = vcombine.low %v2052_v36, %v2055_v28  ;;  %v4214_v17 = vcombine.low %v5687_v44, %v5707_v7  ;;  %v5857_v7 = vld [vmem:[#allocation2 + $0x64] sm:$0xf]  ;;  %v5076_v12 = vld [vmem:[#allocation2 + $0x68] sm:$0x1] }
  0xc5   : > { %v2072_v32 = vrot.slane %v5694_v25, 5  ;;  %v2059_v23 = vsel %vm5703_vm15, %v4251_v14, %v2058_v45  ;;  %v2062_v22 = vsel %vm5703_vm15, %v2060_v2, %v2061_v34  ;;  %v2066_v56 = vsel %vm5703_vm15, %v4252_v16, %v2065_v53  ;;  %v5867_v45 = vld [vmem:[#allocation2 + $0x60] sm:$0xf]  ;;  %v5078_v34 = vld [vmem:[#allocation2 + $0x10] sm:$0xf] }
  0xc6   : > { %v1445_v42 = vsel %vm5246_vm9, %v1440_v19, %v1444_v41  ;;  %4812 = vmatmul.mubr.msk.bf16.gmra.mxu0 %vm1496_vm5, %v5816_v3  ;;  %v2069_v44 = vsel %vm5703_vm15, %v2067_v51, %v2068_v58  ;;  %v2079_v49 = vrot.slane %v5857_v7, 5  ;;  %v5861_v8 = vcombine.low %v2059_v23, %v2062_v22  ;;  %v5079_v19 = vld [vmem:[#allocation2 + $0x1c] sm:$0xf]  ;;  %v5882_v51 = vld [vmem:[#allocation2 + $0x70] sm:$0xf] }
  0xc7   : > { %v5843_v54 = vcombine.low %v1435_v59, %v1445_v42  ;;  %4815 = vmatprep.mubr.msk.bf16.mxu0 %vm1496_vm5, %v5828_v10  ;;  %v4253_v4 = vrot.slane %v5678_v37, 9  ;;  %v2074_v36 = vrot.slane %v2072_v32, 4  ;;  %v2075_v40 = vrot.slane %v5696_v29, 5  ;;  %v5901_v22 = vld [vmem:[%s7083_s3 + $0x14] sm:$0xf] }
  0xc8   : > { %7151 = vst [vmem:[#allocation19_spill] sm:$0xff] %v5861_v8  ;;  %v2082_v41 = vrot.slane %v5076_v12, 5  ;;  %v5865_v14 = vcombine.low %v2066_v56, %v2069_v44  ;;  %v4254_v59 = vrot.slane %v5867_v45, 9  ;;  %v2081_v28 = vrot.slane %v2079_v49, 4  ;;  %v5907_v44 = vld [vmem:[#allocation2 + $0x6c] sm:$0xf] }
  0xc9   : > { %7150 = vst [vmem:[#allocation18_spill] sm:$0xff] %v5843_v54  ;;  %4768 = vmatmul.mubr.msk.bf16.gmra.mxu1 %vm1496_vm5, %v5843_v54  ;;  %v5871_v53 = vcombine.low %v5747_v6, %v5078_v34  ;;  %v5874_v2 = vcombine.low %v5755_v46, %v5079_v19  ;;  %v2073_v29 = vsel %vm5703_vm15, %v4253_v4, %v2072_v32  ;;  %v2086_v58 = vrot.slane %v5882_v51, 5  ;;  %v5081_v6 = vld [vmem:[%s7083_s3 + $0xc] sm:$0xf]  ;;  %v5895_v32 = vld [vmem:[#allocation2 + $0x7c] sm:$0xf] }
  0xca   : > { %4773 = vmatprep.mubr.msk.bf16.mxu1 %vm1496_vm5, %v4214_v17  ;;  %7152 = vst [vmem:[#allocation20_spill] sm:$0xff] %v5865_v14  ;;  %v2076_v16 = vsel %vm5703_vm15, %v2074_v36, %v2075_v40  ;;  %v2438_v46 = vsel %vm1545_vm0, %v5081_v6, 0  ;;  %v2080_v42 = vsel %vm5703_vm15, %v4254_v59, %v2079_v49  ;;  %v2083_v17 = vsel %vm5703_vm15, %v2081_v28, %v2082_v41  ;;  %v5084_v4 = vld [vmem:[#allocation2 + $0x74] sm:$0x1]  ;;  %v5910_v40 = vld [vmem:[#allocation2 + $0x78] sm:$0xf] }
  0xcb   : > { %v2093_v23 = vrot.slane %v5895_v32, 5  ;;  %v5905_v56 = vcombine.low %v2073_v29, %v2076_v16  ;;  %v4255_v49 = vrot.slane %v5907_v44, 9  ;;  %v2089_v36 = vrot.slane %v5084_v4, 5  ;;  %v5086_v28 = vld [vmem:[#allocation2 + $0x80] sm:$0x1] }
  0xcc   : > { %v4256_v12 = vrot.slane %v5910_v40, 9  ;;  %v5915_v41 = vcombine.low %v2080_v42, %v2083_v17  ;;  %v2088_v59 = vrot.slane %v2086_v58, 4  ;;  %v2096_v34 = vrot.slane %v5086_v28, 5  ;;  %v5087_v42 = vld [vmem:[#allocation2 + $0x24] sm:$0xf] }
  0xcd   : > { %v4259_v19 = vrot.slane %v5620_v15, 9  ;;  %v2095_v29 = vrot.slane %v2093_v23, 4  ;;  %v2114_v16 = vrot.slane %v5624_v52, 5  ;;  %v2117_v6 = vrot.slane %v5626_v5, 5  ;;  %v5088_v17 = vld [vmem:[#allocation2 + $0x28] sm:$0xf] }
  0xce   : > { %4816 = vmatmul.mubr.msk.bf16.gmra.mxu0 %vm1496_vm5, %v5861_v8  ;;  %7153 = vst [vmem:[#allocation21_spill] sm:$0xff] %v5915_v41  ;;  %v5922_v4 = vcombine.low %v5620_v15, %v5624_v52  ;;  %v5930_v28 = vcombine.low %v5087_v42, %v5088_v17  ;;  %v2087_v52 = vsel %vm5703_vm15, %v4255_v49, %v2086_v58  ;;  %v2100_v17 = vrot.slane %v5484_v35, 5 }
  0xcf   : > { %4819 = vmatprep.mubr.msk.bf16.mxu0 %vm1496_vm5, %v5865_v14  ;;  %v5934_v14 = vcombine.low %v5504_v31, %v5522_v27  ;;  %v2115_v5 = vsel %vm5703_vm15, %v4259_v19, %v2114_v16  ;;  %v2116_v15 = vrot.slane %v2114_v16, 4  ;;  %v2090_v8 = vsel %vm5703_vm15, %v2088_v59, %v2089_v36  ;;  %v4583_v31 = vld [vmem:[%s5221_s29 + $0x78] sm:$0xff]  }
  0xd0   : > { %v2094_v42 = vsel %vm5703_vm15, %v4256_v12, %v2093_v23  ;;  %v2097_v27 = vsel %vm5703_vm15, %v2095_v29, %v2096_v34  ;;  %v2107_v19 = vrot.slane %v5588_v24, 5  ;;  %v5957_v49 = vcombine.low %v5771_v43, %v5794_v39 }
  0xd1   : > { %4774 = vmatmul.mubr.msk.bf16.vlgmr.msra.gmra.mxu1 %vm1496_vm5, %v5871_v53  ;;  %v2118_v58 = vsel %vm5703_vm15, %v2116_v15, %v2117_v6  ;;  %v5963_v35 = vcombine.low %v2087_v52, %v2090_v8  ;;  %v4257_v23 = vrot.slane %v5476_v61, 9  ;;  %v4567_v12 = vunpack.c.l.bf16 %v4583_v31 }
  0xd2   : > { %4840 = vmatpush3.bf16.msra.mxu1 %v2438_v46  ;;  %4777 = vmatprep.mubr.msk.bf16.mxu1 %vm1496_vm5, %v5874_v2  ;;  %v5928_v46 = vcombine.low %v5715_v57, %v5723_v62  ;;  %v5959_v36 = vcombine.low %v2115_v5, %v2118_v58  ;;  %v4568_v59 = vunpack.c.h.bf16 %v4583_v31  ;;  %v5968_v34 = vcombine.low %v2094_v42, %v2097_v27  ;;  %v7154_v58 = vld [vmem:[#allocation11_spill] sm:$0xff]  ;;  %v7155_v31 = vld [vmem:[#allocation12_spill] sm:$0xff] }
  0xd3   : > { %5051 = vmatprep.subr.msk.bf16.mxu1 %vm1545_vm0, %v5901_v22  ;;  %v2102_v29 = vrot.slane %v2100_v17, 4  ;;  %v2103_v16 = vrot.slane %v5482_v18, 5  ;;  %v4258_v6 = vrot.slane %v5580_v60, 9  ;;  %v2109_v5 = vrot.slane %v2107_v19, 4 }
  0xd4   : > { %v2110_v15 = vrot.slane %v5592_v50, 5  ;;  %v339_v8 = vmul.f32 %v7154_v58, %v4567_v12  ;;  %v340_v52 = vmul.f32 %v7154_v58, %v4568_v59  ;;  %v5977_v61 = vcombine.low %v5534_v0, %v5544_v55 }
  0xd5   : > { %v2101_v18 = vsel %vm5703_vm15, %v4257_v23, %v2100_v17  ;;  %v2104_v50 = vsel %vm5703_vm15, %v2102_v29, %v2103_v16  ;;  %v2108_v0 = vsel %vm5703_vm15, %v4258_v6, %v2107_v19  ;;  %v2121_v59 = vrot.slane %v5723_v62, 5 }
  0xd6   : > { %4820 = vmatmul.mubr.msk.bf16.gmra.mxu0 %vm1496_vm5, %v5905_v56  ;;  %v378_v42 = vadd.f32 %v7155_v31, %v340_v52  ;;  %v2111_v55 = vsel %vm5703_vm15, %v2109_v5, %v2110_v15  ;;  %v5998_v29 = vcombine.low %v2101_v18, %v2104_v50  ;;  %v2124_v62 = vrot.slane %v5729_v1, 5  ;;  %v997_v50 = vld [vmem:[#allocation2 + $0xc0] sm:$0xf] }
  0xd7   : > { %4823 = vmatprep.mubr.msk.bf16.mxu0 %vm1496_vm5, %v5915_v41  ;;  %v377_v41 = vadd.f32 %v7155_v31, %v339_v8  ;;  %v6000_v16 = vcombine.low %v2108_v0, %v2111_v55  ;;  %v2123_v15 = vrot.slane %v2121_v59, 4  ;;  %v6006_v8 = vcombine.low %v5678_v37, %v5694_v25 }
  0xd8   : > { %v410_v12 = vmax.f32 %v378_v42, 0.0  ;;  %v6010_v42 = vcombine.low %v5867_v45, %v5857_v7  ;;  %v2128_v18 = vrot.slane %v5794_v39, 5  ;;  %v2131_v63 = vrot.slane %v5796_v21, 5 }
  0xd9   : > { %4778 = vmatmul.mubr.msk.bf16.gmra.mxu1 %vm1496_vm5, %v5930_v28  ;;  %v409_v27 = vmax.f32 %v377_v41, 0.0  ;;  %v4260_v41 = vrot.slane %v5715_v57, 9  ;;  %v1001_v57 = vld [vmem:[#allocation2 + $0xc8] sm:$0x1]  ;;  %v2125_v7 = vsel %vm5703_vm15, %v2123_v15, %v2124_v62  ;;  %v6038_v9 = vcombine.low %v5907_v44, %v5882_v51 }
  0xda   : > { %4781 = vmatprep.mubr.msk.bf16.mxu1 %vm1496_vm5, %v5934_v14  ;;  %v4472_v23 = vpack.c.bf16 %v410_v12, %v410_v12  ;;  %v6042_v13 = vcombine.low %v5910_v40, %v5895_v32  ;;  %v5089_v32 = vld [vmem:[#allocation2 + $0x84] sm:$0xf]  ;;  %v5090_v44 = vld [vmem:[#allocation2 + $0x88] sm:$0xf] }
  0xdb   : > { %v4471_v17 = vpack.c.bf16 %v409_v27, %v409_v27  ;;  %v2122_v55 = vsel %vm5703_vm15, %v4260_v41, %v2121_v59  ;;  %v4261_v59 = vrot.slane %v5771_v43, 9  ;;  %v6058_v40 = vcombine.low %v5089_v32, %v5090_v44  ;;  %v7166_v44 = vld [vmem:[#allocation14_spill] sm:$0xff] }
  0xdc   : > { %v830_v58 = vshrl.u32 %v4472_v23, 16  ;;  %v833_v5 = vshll.u32 %v4472_v23, 16  ;;  %v6032_v12 = vcombine.low %v2122_v55, %v2125_v7  ;;  %v6062_v23 = vcombine.low %v5580_v60, %v5588_v24  ;;  %v6077_v60 = vld [vmem:[%s7083_s3 + $0x20] sm:$0xf]  ;;  %v7157_v24 = vld [vmem:[#allocation6_spill] sm:$0xff] }
  0xdd   : > { %v822_v19 = vshrl.u32 %v4471_v17, 16  ;;  %v825_v6 = vshll.u32 %v4471_v17, 16  ;;  %v2130_v17 = vrot.slane %v2128_v18, 4  ;;  %v2129_v43 = vsel %vm5703_vm15, %v4261_v59, %v2128_v18  ;;  %v6118_v55 = vld [vmem:[%s7083_s3 + $0x1c] sm:$0xf]  ;;  %v7164_v7 = vld [vmem:[#allocation8_spill] sm:$0xff] }
  0xde   : > { %4824 = vmatmul.mubr.msk.bf16.gmra.mxu0 %vm1496_vm5, %v5963_v35  ;;  %v832_v31 = vrot.slane %v830_v58, 7  ;;  %v7158_v58 = vld [vmem:[#allocation7_spill] sm:$0xff]  ;;  %v3312_v33 = vsel %vm1545_vm0, %v6118_v55, 0 }
  0xdf   : > { %4827 = vmatprep.mubr.msk.bf16.mxu0 %vm1496_vm5, %v5968_v34  ;;  %v824_v52 = vrot.slane %v822_v19, 7  ;;  %v2132_v21 = vsel %vm5703_vm15, %v2130_v17, %v2131_v63  ;;  %v7156_v19 = vld [vmem:[#allocation3_spill] sm:$0xff] }
  0xe0   : > { %v835_v37 = vor.u32 %v833_v5, %v832_v31  ;;  %v837_v25 = vrot.slane %v832_v31, 4  ;;  %v6056_v51 = vcombine.low %v2129_v43, %v2132_v21  ;;  %v7159_v31 = vld [vmem:[#allocation10_spill] sm:$0xff] }
  0xe1   : > { %4782 = vmatmul.mubr.msk.bf16.gmra.mxu1 %vm1496_vm5, %v5977_v61  ;;  %v827_v1 = vor.u32 %v825_v6, %v824_v52  ;;  %v828_v0 = vrot.slane %v824_v52, 4  ;;  %v3084_v6 = vsel %vm1545_vm0, %v5790_v20, 0 }
  0xe2   : > { %4785 = vmatprep.mubr.msk.bf16.mxu1 %vm1496_vm5, %v5834_v11  ;;  %v1002_v27 = vsel %vm5281_vm12, %v837_v25, %v1001_v57  ;;  %v7160_v57 = vld [vmem:[#allocation13_spill] sm:$0xff]  ;;  %v2878_v25 = vsel %vm1545_vm0, %v5901_v22, 0 }
  0xe3   : > { %v836_v39 = vsel %vm5268_vm10, %v828_v0, %v835_v37  ;;  %v998_v45 = vsel %vm5274_vm11, %v827_v1, %v997_v50  ;;  %1003 = vst [vmem:[#allocation2 + $0xc8] sm:$0x1] %v1002_v27  ;;  %v7161_v37 = vld [vmem:[#allocation16_spill] sm:$0xff]  ;;  %v7163_v22 = vld [vmem:[#allocation5_spill] sm:$0xff] }
  0xe4   : > { %999 = vst [vmem:[#allocation2 + $0xc0] sm:$0xf] %v998_v45  ;;  %1000 = vst.msk [vmem:[#allocation2 + $0xc4] sm:$0xf] %vm427_vm1, %v836_v39  ;;  %v7165_v39 = vld [vmem:[#allocation9_spill] sm:$0xff] }
  0xe6   : > { %4828 = vmatmul.mubr.msk.bf16.gmra.mxu0 %vm1496_vm5, %v5998_v29 }
  0xe7   : > { %4831 = vmatprep.mubr.msk.bf16.mxu0 %vm1496_vm5, %v6000_v16 }
  0xe9   : > { %4786 = vmatmul.mubr.msk.bf16.gmra.mxu1 %vm1496_vm5, %v6006_v8 }
  0xea   : > { %4789 = vmatprep.mubr.msk.bf16.mxu1 %vm1496_vm5, %v6010_v42  ;;  %v1054_v62 = vld [vmem:[#allocation2 + $0xc8] sm:$0x1] }
  0xeb   : > { %v6087_v5 = vld [vmem:[#allocation2 + $0xc4] sm:$0xf]  ;;  %v6092_v41 = vld [vmem:[#allocation2 + $0xc0] sm:$0xf]  ;;  %v2867_v50 = vrot.slane %v1054_v62, 5 }
  0xec   : > { %v2864_v20 = vrot.slane %v6087_v5, 5  ;;  %v4331_v15 = vrot.slane %v6092_v41, 9  ;;  %v2634_v45 = vshrl.u32 %v6092_v41, 16  ;;  %v2637_v27 = vshll.u32 %v6092_v41, 16 }
  0xed   : > { %v2643_v59 = vshll.u32 %v6087_v5, 16  ;;  %v2647_v17 = vshrl.u32 %v6087_v5, 16 }
  0xee   : > { %4832 = vmatmul.mubr.msk.bf16.gmra.mxu0 %vm1496_vm5, %v5959_v36  ;;  %v2866_v52 = vrot.slane %v2864_v20, 4  ;;  %v2865_v18 = vsel %vm5703_vm15, %v4331_v15, %v2864_v20  ;;  %v2636_v63 = vrot.slane %v2634_v45, 4  ;;  %v2639_v43 = vrot.slane %v2637_v27, 5  ;;  %v6174_v45 = vld [vmem:[#allocation2 + $0xcc] sm:$0xf] }
  0xef   : > { %4835 = vmatprep.mubr.msk.bf16.mxu0 %vm1496_vm5, %v6032_v12  ;;  %v2645_v21 = vrot.slane %v2643_v59, 5  ;;  %v2649_v32 = vrot.slane %v2647_v17, 4  ;;  %v2653_v15 = vshll.u32 %v1054_v62, 16  ;;  %v6176_v27 = vld [vmem:[#allocation2 + $0xd0] sm:$0xf]  ;;  %v3280_v59 = vshrl.u32 %v6174_v45, 16 }
  0xf0   : > { %v2868_v1 = vsel %vm5703_vm15, %v2866_v52, %v2867_v50  ;;  %v3283_v17 = vshll.u32 %v6174_v45, 16 }
  0xf1   : > { %4790 = vmatmul.mubr.msk.bf16.gmra.mxu1 %vm1496_vm5, %v6038_v9  ;;  %v6105_v0 = vcombine.low %v2865_v18, %v2868_v1  ;;  %v2650_v20 = vor.u32 %v2649_v32, %v2645_v21  ;;  %v2655_v50 = vrot.slane %v2653_v15, 5  ;;  %v6192_v15 = vld [vmem:[#allocation2 + $0xd4] sm:$0x1] }
  0xf2   : > { %4793 = vmatprep.mubr.msk.bf16.mxu1 %vm1496_vm5, %v6042_v13  ;;  %v3285_v32 = vrot.slane %v3283_v17, 5 }
  0xf3   : > { %v2651_v18 = vrot.slane %v2650_v20, 4 }
  0xf5   : > { %v2656_v62 = vsel %vm5246_vm9, %v2651_v18, %v2655_v50 }
  0xf6   : > { %4836 = vmatmul.mubr.msk.bf16.gmra.mxu0 %vm1496_vm5, %v6056_v51 }
  0xf7   : > { %4875 = vmatprep.mubr.msk.bf16.mxu0 %vm1496_vm5, %v7156_v19  ;;  %v7167_v19 = vld [vmem:[#allocation15_spill] sm:$0xff] }
  0xf9   : > { %4794 = vmatmul.mubr.msk.bf16.gmra.mxu1 %vm1496_vm5, %v6058_v40 }
  0xfa   : > { %4797 = vmatprep.mubr.msk.bf16.mxu1 %vm1496_vm5, %v6062_v23 }
  0xfe   : > { %4876 = vmatmul.mubr.msk.bf16.vlgmr.msra.gmra.mxu0 %vm1496_vm5, %v7157_v24 }
  0xff   : > { %4942 = vmatpush3.bf16.msra.mxu0 %v3084_v6  ;;  %4879 = vmatprep.mubr.msk.bf16.mxu0 %vm1496_vm5, %v7158_v58  ;;  %v2640_v6 = vor.u32 %v2639_v43, %v2636_v63  ;;  %v3289_v63 = vshll.u32 %v6176_v27, 16  ;;  %v3293_v43 = vshrl.u32 %v6176_v27, 16 }
 0x100   : > { %5054 = vmatprep.subr.msk.bf16.mxu0 %vm1545_vm0, %v6077_v60 }
 0x101   : > { %4798 = vmatmul.mubr.msk.bf16.gmra.mxu1 %vm1496_vm5, %v5922_v4  ;;  %v2641_v52 = vrot.slane %v2640_v6, 4  ;;  %v3291_v6 = vrot.slane %v3289_v63, 5  ;;  %v3295_v20 = vrot.slane %v3293_v43, 4 }
 0x102   : > { %4801 = vmatprep.mubr.msk.bf16.mxu1 %vm1496_vm5, %v5928_v46 }
 0x103   : > { %v2646_v1 = vsel %vm5246_vm9, %v2641_v52, %v2645_v21  ;;  %v3282_v21 = vrot.slane %v3280_v59, 4  ;;  %v3296_v52 = vor.u32 %v3295_v20, %v3291_v6 }
 0x105   : > { %v3297_v50 = vrot.slane %v3296_v52, 4  ;;  %v4351_v52 = vcombine.low %v6174_v45, %v6176_v27 }
 0x106   : > { %4880 = vmatmul.mubr.msk.bf16.gmra.mxu0 %vm1496_vm5, %v7159_v31 }
 0x107   : > { %4883 = vmatprep.mubr.msk.bf16.mxu0 %vm1496_vm5, %v7160_v57 }
 0x109   : > { %4802 = vmatmul.mubr.msk.bf16.gmra.mxu1 %vm1496_vm5, %v5957_v49 }
 0x10a   : > { %4841 = vmatprep.mubr.msk.bf16.mxu1 %vm1496_vm5, %v5871_v53  ;;  %v7162_v53 = vld [vmem:[#allocation4_spill] sm:$0xff] }
 0x10e   : > { %4884 = vmatmul.mubr.msk.bf16.gmra.mxu0 %vm1496_vm5, %v7161_v37 }
 0x10f   : > { %4887 = vmatprep.mubr.msk.bf16.mxu0 %vm1496_vm5, %v5738_v30 }
 0x111   : > { %4842 = vmatmul.mubr.msk.bf16.vlgmr.msra.gmra.mxu1 %vm1496_vm5, %v5874_v2 }
 0x112   : > { %4908 = vmatpush3.bf16.msra.mxu1 %v2878_v25  ;;  %4845 = vmatprep.mubr.msk.bf16.mxu1 %vm1496_vm5, %v5930_v28  ;;  %v6166_v25 = vcombine.low %v2646_v1, %v2656_v62  ;;  %v4296_v62 = vcombine.low %v6092_v41, %v6087_v5 }
 0x113   : > { %5053 = vmatprep.subr.msk.bf16.mxu1 %vm1545_vm0, %v6118_v55 }
 0x114   : > { %7168 = vst [vmem:[#allocation11_spill] sm:$0xff] %v6166_v25 }
 0x116   : > { %4888 = vmatmul.mubr.msk.bf16.gmra.mxu0 %vm1496_vm5, %v7162_v53 }
 0x117   : > { %4891 = vmatprep.mubr.msk.bf16.mxu0 %vm1496_vm5, %v7163_v22 }
 0x119   : > { %4846 = vmatmul.mubr.msk.bf16.gmra.mxu1 %vm1496_vm5, %v5934_v14 }
 0x11a   : > { %4849 = vmatprep.mubr.msk.bf16.mxu1 %vm1496_vm5, %v5977_v61 }
 0x11e   : > { %4892 = vmatmul.mubr.msk.bf16.gmra.mxu0 %vm1496_vm5, %v7164_v7 }
 0x11f   : > { %4895 = vmatprep.mubr.msk.bf16.mxu0 %vm1496_vm5, %v7165_v39 }
 0x121   : > { %4850 = vmatmul.mubr.msk.bf16.gmra.mxu1 %vm1496_vm5, %v5834_v11 }
 0x122   : > { %4853 = vmatprep.mubr.msk.bf16.mxu1 %vm1496_vm5, %v6006_v8 }
 0x126   : > { %4896 = vmatmul.mubr.msk.bf16.gmra.mxu0 %vm1496_vm5, %v7166_v44 }
 0x127   : > { %4899 = vmatprep.mubr.msk.bf16.mxu0 %vm1496_vm5, %v7167_v19 }
 0x129   : > { %4854 = vmatmul.mubr.msk.bf16.gmra.mxu1 %vm1496_vm5, %v6010_v42 }
 0x12a   : > { %4857 = vmatprep.mubr.msk.bf16.mxu1 %vm1496_vm5, %v6038_v9 }
 0x12e   : > { %4900 = vmatmul.mubr.msk.bf16.gmra.mxu0 %vm1496_vm5, %v5776_v47 }
 0x12f   : > { %4903 = vmatprep.mubr.msk.bf16.mxu0 %vm1496_vm5, %v5843_v54 }
 0x131   : > { %4858 = vmatmul.mubr.msk.bf16.gmra.mxu1 %vm1496_vm5, %v6042_v13 }
 0x132   : > { %4861 = vmatprep.mubr.msk.bf16.mxu1 %vm1496_vm5, %v6058_v40 }
 0x136   : > { %4904 = vmatmul.mubr.msk.bf16.gmra.mxu0 %vm1496_vm5, %v6166_v25 }
 0x137   : > { %4943 = vmatprep.mubr.msk.bf16.mxu0 %vm1496_vm5, %v5874_v2  ;;  %v3524_v2 = vsel %vm1545_vm0, %v6077_v60, 0  ;;  %v3286_v60 = vor.u32 %v3285_v32, %v3282_v21 }
 0x139   : > { %4862 = vmatmul.mubr.msk.bf16.gmra.mxu1 %vm1496_vm5, %v6062_v23  ;;  %v3287_v18 = vrot.slane %v3286_v60, 4 }
 0x13a   : > { %4865 = vmatprep.mubr.msk.bf16.mxu1 %vm1496_vm5, %v5922_v4 }
 0x13b   : > { %v3292_v59 = vsel %vm5246_vm9, %v3287_v18, %v3291_v6 }
 0x13e   : > { %4944 = vmatmul.mubr.msk.bf16.vlgmr.msra.gmra.mxu0 %vm1496_vm5, %v5930_v28  ;;  %v3299_v28 = vshll.u32 %v6192_v15, 16 }
 0x13f   : > { %5010 = vmatpush3.bf16.msra.mxu0 %v3524_v2  ;;  %4947 = vmatprep.mubr.msk.bf16.mxu0 %vm1496_vm5, %v5934_v14  ;;  %v6201_v14 = vpop.f32.mrf.mxu0 }
 0x140   : > { %v3301_v1 = vrot.slane %v3299_v28, 5 }
 0x141   : > { %4866 = vmatmul.mubr.msk.bf16.gmra.mxu1 %vm1496_vm5, %v5928_v46  ;;  %v6214_v5 = vpop.f32.mrf.mxu0 }
 0x142   : > { %4869 = vmatprep.mubr.msk.bf16.mxu1 %vm1496_vm5, %v5957_v49  ;;  %v3302_v17 = vsel %vm5246_vm9, %v3297_v50, %v3301_v1 }
 0x143   : > { %v6209_v63 = vcombine.low %v3292_v59, %v3302_v17 }
 0x145   : > { %7169 = vst [vmem:[#allocation12_spill] sm:$0xff] %v6209_v63 }
 0x146   : > { %4948 = vmatmul.mubr.msk.bf16.gmra.mxu0 %vm1496_vm5, %v5977_v61  ;;  %v6218_v61 = vpop.f32.mrf.mxu0 }
 0x147   : > { %4951 = vmatprep.mubr.msk.bf16.mxu0 %vm1496_vm5, %v5834_v11 }
 0x149   : > { %4870 = vmatmul.mubr.msk.bf16.gmra.mxu1 %vm1496_vm5, %v4296_v62 }
 0x14a   : > { %4909 = vmatprep.mubr.msk.bf16.mxu1 %vm1496_vm5, %v5765_v26  ;;  %v6228_v26 = vpop.f32.mrf.mxu0 }
 0x14c   : > { %v6232_v11 = vpop.f32.mrf.mxu0 }
 0x14e   : > { %4952 = vmatmul.mubr.msk.bf16.gmra.mxu0 %vm1496_vm5, %v6006_v8  ;;  %v6238_v8 = vpop.f32.mrf.mxu1  ;;  %v6242_v41 = vpop.f32.mrf.mxu0 }
 0x14f   : > { %4955 = vmatprep.mubr.msk.bf16.mxu0 %vm1496_vm5, %v6010_v42  ;;  %v7170_v42 = vld [vmem:[#allocation19_spill] sm:$0xff] }
 0x150   : > { %v6244_v55 = vpop.f32.mrf.mxu1 }
 0x151   : > { %4910 = vmatmul.mubr.msk.bf16.vlgmr.msra.gmra.mxu1 %vm1496_vm5, %v5798_v38 }
 0x152   : > { %4976 = vmatpush3.bf16.msra.mxu1 %v3312_v33  ;;  %4913 = vmatprep.mubr.msk.bf16.mxu1 %vm1496_vm5, %v5816_v3  ;;  %v6254_v43 = vpop.f32.mrf.mxu1 }
 0x154   : > { %v6260_v21 = vpop.f32.mrf.mxu1 }
 0x156   : > { %4956 = vmatmul.mubr.msk.bf16.gmra.mxu0 %vm1496_vm5, %v6038_v9  ;;  %v6248_v9 = vpop.f32.mrf.mxu0  ;;  %v6270_v32 = vpop.f32.mrf.mxu1 }
 0x157   : > { %4959 = vmatprep.mubr.msk.bf16.mxu0 %vm1496_vm5, %v6042_v13  ;;  %v7171_v13 = vld [vmem:[#allocation20_spill] sm:$0xff] }
 0x158   : > { %v6258_v2 = vpop.f32.mrf.mxu0  ;;  %v6276_v20 = vpop.f32.mrf.mxu1 }
 0x159   : > { %4914 = vmatmul.mubr.msk.bf16.gmra.mxu1 %vm1496_vm5, %v5828_v10  ;;  %7173 = vst [vmem:[#allocation3_spill] sm:$0xff] %v6276_v20 }
 0x15a   : > { %4917 = vmatprep.mubr.msk.bf16.mxu1 %vm1496_vm5, %v7170_v42 }
 0x15e   : > { %4960 = vmatmul.mubr.msk.bf16.gmra.mxu0 %vm1496_vm5, %v6058_v40  ;;  %v6264_v40 = vpop.f32.mrf.mxu0 }
 0x15f   : > { %4963 = vmatprep.mubr.msk.bf16.mxu0 %vm1496_vm5, %v6062_v23  ;;  %v7172_v23 = vld [vmem:[#allocation21_spill] sm:$0xff] }
 0x160   : > { %v6274_v6 = vpop.f32.mrf.mxu0 }
 0x161   : > { %4918 = vmatmul.mubr.msk.bf16.gmra.mxu1 %vm1496_vm5, %v7171_v13 }
 0x162   : > { %4921 = vmatprep.mubr.msk.bf16.mxu1 %vm1496_vm5, %v5905_v56 }
 0x166   : > { %4964 = vmatmul.mubr.msk.bf16.gmra.mxu0 %vm1496_vm5, %v5922_v4  ;;  %v6280_v4 = vpop.f32.mrf.mxu0 }
 0x167   : > { %4967 = vmatprep.mubr.msk.bf16.mxu0 %vm1496_vm5, %v5928_v46  ;;  %v6285_v46 = vpop.f32.mrf.mxu1 }
 0x168   : > { %7174 = vst [vmem:[#allocation6_spill] sm:$0xff] %v6285_v46  ;;  %v6289_v60 = vpop.f32.mrf.mxu0 }
 0x169   : > { %4922 = vmatmul.mubr.msk.bf16.gmra.mxu1 %vm1496_vm5, %v7172_v23  ;;  %v6293_v28 = vpop.f32.mrf.mxu1 }
 0x16a   : > { %4925 = vmatprep.mubr.msk.bf16.mxu1 %vm1496_vm5, %v5963_v35  ;;  %7175 = vst [vmem:[#allocation7_spill] sm:$0xff] %v6293_v28 }
 0x16b   : > { %v6304_v50 = vpop.f32.mrf.mxu1 }
 0x16c   : > { %7176 = vst [vmem:[#allocation10_spill] sm:$0xff] %v6304_v50 }
 0x16d   : > { %v6312_v59 = vpop.f32.mrf.mxu1 }
 0x16e   : > { %4968 = vmatmul.mubr.msk.bf16.gmra.mxu0 %vm1496_vm5, %v5957_v49  ;;  %7177 = vst [vmem:[#allocation13_spill] sm:$0xff] %v6312_v59 }
 0x16f   : > { %4971 = vmatprep.mubr.msk.bf16.mxu0 %vm1496_vm5, %v4296_v62  ;;  %v6320_v33 = vpop.f32.mrf.mxu1 }
 0x170   : > { %7178 = vst [vmem:[#allocation16_spill] sm:$0xff] %v6320_v33 }
 0x171   : > { %4926 = vmatmul.mubr.msk.bf16.gmra.mxu1 %vm1496_vm5, %v5968_v34  ;;  %v6324_v25 = vpop.f32.mrf.mxu1 }
 0x172   : > { %4929 = vmatprep.mubr.msk.bf16.mxu1 %vm1496_vm5, %v5998_v29  ;;  %7179 = vst [vmem:[#allocation4_spill] sm:$0xff] %v6324_v25 }
 0x176   : > { %v6295_v49 = vpop.f32.mrf.mxu0  ;;  %4972 = vmatmul.mubr.msk.bf16.gmra.mxu0 %vm1496_vm5, %v4351_v52 }
 0x177   : > { %5011 = vmatprep.mubr.msk.bf16.mxu0 %vm1496_vm5, %v5798_v38 }
 0x178   : > { %v6300_v18 = vpop.f32.mrf.mxu0 }
 0x179   : > { %4930 = vmatmul.mubr.msk.bf16.gmra.mxu1 %vm1496_vm5, %v6000_v16 }
 0x17a   : > { %4933 = vmatprep.mubr.msk.bf16.mxu1 %vm1496_vm5, %v5959_v36  ;;  %v6308_v1 = vpop.f32.mrf.mxu0 }
 0x17c   : > { %v6310_v62 = vpop.f32.mrf.mxu0 }
 0x17e   : > { %v4809_v17 = vpop.f32.mrf.mxu0  ;;  %5012 = vmatmul.mubr.msk.bf16.vlgmr.msra.gmra.mxu0 %vm1496_vm5, %v5816_v3 }
 0x17f   : > { %5015 = vmatprep.mubr.msk.bf16.mxu0 %vm1496_vm5, %v5828_v10 }
 0x180   : > { %v2268_v38 = vpop.f32.mrf.mxu0 }
 0x181   : > { %4934 = vmatmul.mubr.msk.bf16.gmra.mxu1 %vm1496_vm5, %v6032_v12 }
 0x182   : > { %4937 = vmatprep.mubr.msk.bf16.mxu1 %vm1496_vm5, %v6056_v51  ;;  %v4810_v52 = vpop.f32.mrf.mxu0 }
 0x184   : > { %v2271_v63 = vpop.f32.mrf.mxu0 }
 0x186   : > { %v4813_v59 = vpop.f32.mrf.mxu0  ;;  %5016 = vmatmul.mubr.msk.bf16.gmra.mxu0 %vm1496_vm5, %v7170_v42 }
 0x187   : > { %5019 = vmatprep.mubr.msk.bf16.mxu0 %vm1496_vm5, %v7171_v13 }
 0x188   : > { %v2284_v3 = vpop.f32.mrf.mxu0 }
 0x189   : > { %v6330_v10 = vpop.f32.mrf.mxu1  ;;  %4938 = vmatmul.mubr.msk.bf16.gmra.mxu1 %vm1496_vm5, %v6105_v0 }
 0x18a   : > { %7180 = vst [vmem:[#allocation5_spill] sm:$0xff] %v6330_v10  ;;  %4977 = vmatprep.mubr.msk.bf16.mxu1 %vm1496_vm5, %v7157_v24  ;;  %v4814_v33 = vpop.f32.mrf.mxu0 }
 0x18b   : > { %v6336_v50 = vpop.f32.mrf.mxu1 }
 0x18c   : > { %7181 = vst [vmem:[#allocation8_spill] sm:$0xff] %v6336_v50  ;;  %v2287_v25 = vpop.f32.mrf.mxu0 }
 0x18d   : > { %v6338_v54 = vpop.f32.mrf.mxu1 }
 0x18e   : > { %7182 = vst [vmem:[#allocation9_spill] sm:$0xff] %v6338_v54  ;;  %v4817_v28 = vpop.f32.mrf.mxu0  ;;  %5020 = vmatmul.mubr.msk.bf16.gmra.mxu0 %vm1496_vm5, %v5905_v56 }
 0x18f   : > { %v6342_v42 = vpop.f32.mrf.mxu1  ;;  %5023 = vmatprep.mubr.msk.bf16.mxu0 %vm1496_vm5, %v7172_v23 }
 0x190   : > { %7183 = vst [vmem:[#allocation14_spill] sm:$0xff] %v6342_v42  ;;  %v2300_v13 = vpop.f32.mrf.mxu0 }
 0x191   : > { %v4775_v10 = vpop.f32.mrf.mxu1  ;;  %4978 = vmatmul.mubr.msk.bf16.vlgmr.msra.gmra.mxu1 %vm1496_vm5, %v7158_v58 }
 0x192   : > { %v1884_v24 = vadd.f32 %v4775_v10, %v6201_v14  ;;  %4981 = vmatprep.mubr.msk.bf16.mxu1 %vm1496_vm5, %v7159_v31  ;;  %v4818_v54 = vpop.f32.mrf.mxu0 }
 0x193   : > { %v1875_v50 = vpop.f32.mrf.mxu1 }
 0x194   : > { %v1876_v46 = vadd.f32 %v1875_v50, %v6214_v5  ;;  %v2303_v56 = vpop.f32.mrf.mxu0  ;;  %v6352_v20 = vadd.f32 %v4809_v17, %v1884_v24 }
 0x195   : > { %v4776_v42 = vpop.f32.mrf.mxu1 }
 0x196   : > { %v1887_v23 = vadd.f32 %v4776_v42, %v6218_v61  ;;  %v4821_v47 = vpop.f32.mrf.mxu0  ;;  %5024 = vmatmul.mubr.msk.bf16.gmra.mxu0 %vm1496_vm5, %v5963_v35  ;;  %v6357_v58 = vadd.f32 %v2268_v38, %v1876_v46 }
 0x197   : > { %v1878_v14 = vpop.f32.mrf.mxu1  ;;  %5027 = vmatprep.mubr.msk.bf16.mxu0 %vm1496_vm5, %v5968_v34 }
 0x198   : > { %v1879_v31 = vadd.f32 %v1878_v14, %v6228_v26  ;;  %v2316_v10 = vpop.f32.mrf.mxu0  ;;  %v6362_v5 = vadd.f32 %v4810_v52, %v1887_v23 }
 0x199   : > { %v4779_v50 = vpop.f32.mrf.mxu1  ;;  %4982 = vmatmul.mubr.msk.bf16.gmra.mxu1 %vm1496_vm5, %v7160_v57 }
 0x19a   : > { %v1900_v61 = vadd.f32 %v4779_v50, %v6232_v11  ;;  %4985 = vmatprep.mubr.msk.bf16.mxu1 %vm1496_vm5, %v7161_v37  ;;  %v4822_v35 = vpop.f32.mrf.mxu0  ;;  %v6369_v46 = vadd.f32 %v2271_v63, %v1879_v31 }
 0x19b   : > { %v1891_v17 = vpop.f32.mrf.mxu1 }
 0x19c   : > { %v1892_v34 = vadd.f32 %v1891_v17, %v6242_v41  ;;  %v6372_v38 = vpop.f32.mrf.mxu0  ;;  %v6374_v26 = vadd.f32 %v4813_v59, %v1900_v61 }
 0x19d   : > { %v4780_v52 = vpop.f32.mrf.mxu1 }
 0x19e   : > { %v1903_v42 = vadd.f32 %v4780_v52, %v6248_v9  ;;  %v6377_v24 = vpop.f32.mrf.mxu0  ;;  %5028 = vmatmul.mubr.msk.bf16.gmra.mxu0 %vm1496_vm5, %v5998_v29  ;;  %v6381_v57 = vadd.f32 %v2284_v3, %v1892_v34 }
 0x19f   : > { %v1894_v37 = vpop.f32.mrf.mxu1  ;;  %5031 = vmatprep.mubr.msk.bf16.mxu0 %vm1496_vm5, %v6000_v16 }
 0x1a0   : > { %v1895_v63 = vadd.f32 %v1894_v37, %v6258_v2  ;;  %v6386_v11 = vpop.f32.mrf.mxu0  ;;  %v6388_v41 = vadd.f32 %v4814_v33, %v1903_v42 }
 0x1a1   : > { %v4783_v59 = vpop.f32.mrf.mxu1  ;;  %4986 = vmatmul.mubr.msk.bf16.gmra.mxu1 %vm1496_vm5, %v5738_v30 }
 0x1a2   : > { %v1916_v9 = vadd.f32 %v4783_v59, %v6264_v40  ;;  %4989 = vmatprep.mubr.msk.bf16.mxu1 %vm1496_vm5, %v7162_v53  ;;  %v4826_v29 = vpop.f32.mrf.mxu0  ;;  %v6395_v3 = vadd.f32 %v2287_v25, %v1895_v63  ;;  %v3510_v53 = vrot.slane %v6176_v27, 5 }
 0x1a3   : > { %v1907_v23 = vpop.f32.mrf.mxu1 }
 0x1a4   : > { %v1908_v16 = vadd.f32 %v1907_v23, %v6274_v6  ;;  %v6398_v2 = vpop.f32.mrf.mxu0  ;;  %v6400_v14 = vadd.f32 %v4817_v28, %v1916_v9  ;;  %v3512_v17 = vrot.slane %v3510_v53, 4 }
 0x1a5   : > { %v4784_v33 = vpop.f32.mrf.mxu1 }
 0x1a6   : > { %v1919_v31 = vadd.f32 %v4784_v33, %v6280_v4  ;;  %v6403_v50 = vpop.f32.mrf.mxu0  ;;  %5032 = vmatmul.mubr.msk.bf16.gmra.mxu0 %vm1496_vm5, %v5959_v36  ;;  %v6407_v30 = vadd.f32 %v2300_v13, %v1908_v16  ;;  %v4386_v13 = vrot.slane %v6174_v45, 9 }
 0x1a7   : > { %v1910_v25 = vpop.f32.mrf.mxu1  ;;  %5035 = vmatprep.mubr.msk.bf16.mxu0 %vm1496_vm5, %v6032_v12 }
 0x1a8   : > { %v1911_v40 = vadd.f32 %v1910_v25, %v6289_v60  ;;  %v2348_v6 = vpop.f32.mrf.mxu0  ;;  %v6413_v28 = vadd.f32 %v4818_v54, %v1919_v31  ;;  %v3513_v60 = vrot.slane %v6192_v15, 5  ;;  %v3511_v45 = vsel %vm5703_vm15, %v4386_v13, %v3510_v53  ;;  %v7184_v31 = vld [vmem:[#allocation17_spill] sm:$0xff]  ;;  %v7185_v25 = vld [vmem:[#allocation3_spill] sm:$0xff] }
 0x1a9   : > { %v4787_v61 = vpop.f32.mrf.mxu1  ;;  %4990 = vmatmul.mubr.msk.bf16.gmra.mxu1 %vm1496_vm5, %v7163_v22 }
 0x1aa   : > { %v1932_v4 = vadd.f32 %v4787_v61, %v6295_v49  ;;  %4993 = vmatprep.mubr.msk.bf16.mxu1 %vm1496_vm5, %v7164_v7  ;;  %v4830_v36 = vpop.f32.mrf.mxu0  ;;  %v6420_v27 = vadd.f32 %v2303_v56, %v1911_v40 }
 0x1ab   : > { %v1923_v12 = vpop.f32.mrf.mxu1 }
 0x1ac   : > { %v1924_v54 = vadd.f32 %v1923_v12, %v6300_v18  ;;  %v2351_v34 = vpop.f32.mrf.mxu0  ;;  %v6425_v52 = vadd.f32 %v4821_v47, %v1932_v4  ;;  %v3514_v47 = vsel %vm5703_vm15, %v3512_v17, %v3513_v60  ;;  %v7186_v4 = vld [vmem:[#allocation6_spill] sm:$0xff]  ;;  %v7187_v17 = vld [vmem:[#allocation7_spill] sm:$0xff] }
 0x1ad   : > { %v4788_v22 = vpop.f32.mrf.mxu1 }
 0x1ae   : > { %v1935_v49 = vadd.f32 %v4788_v22, %v6308_v1  ;;  %v4833_v42 = vpop.f32.mrf.mxu0  ;;  %5036 = vmatmul.mubr.msk.bf16.gmra.mxu0 %vm1496_vm5, %v6056_v51  ;;  %v6430_v7 = vadd.f32 %v2316_v10, %v1924_v54  ;;  %v4388_v10 = vcombine.low %v3511_v45, %v3514_v47 }
 0x1af   : > { %v1926_v56 = vpop.f32.mrf.mxu1  ;;  %5039 = vmatprep.mubr.msk.bf16.mxu0 %vm1496_vm5, %v6105_v0 }
 0x1b0   : > { %v1927_v15 = vadd.f32 %v1926_v56, %v6310_v62  ;;  %v2364_v18 = vpop.f32.mrf.mxu0  ;;  %v6439_v1 = vadd.f32 %v4822_v35, %v1935_v49  ;;  %v7188_v49 = vld [vmem:[#allocation18_spill] sm:$0xff] }
 0x1b1   : > { %v4791_v37 = vpop.f32.mrf.mxu1  ;;  %4994 = vmatmul.mubr.msk.bf16.gmra.mxu1 %vm1496_vm5, %v7165_v39  ;;  %v7189_v56 = vld [vmem:[#allocation10_spill] sm:$0xff] }
 0x1b2   : > { %v1948_v51 = vadd.f32 %v4791_v37, %v6238_v8  ;;  %4997 = vmatprep.mubr.msk.bf16.mxu1 %vm1496_vm5, %v7166_v44  ;;  %v4834_v0 = vpop.f32.mrf.mxu0  ;;  %v6447_v63 = vadd.f32 %v6372_v38, %v1927_v15  ;;  %v7191_v37 = vld [vmem:[#allocation13_spill] sm:$0xff] }
 0x1b3   : > { %v1939_v48 = vpop.f32.mrf.mxu1 }
 0x1b4   : > { %v1940_v62 = vadd.f32 %v1939_v48, %v6244_v55  ;;  %v2367_v59 = vpop.f32.mrf.mxu0  ;;  %v6451_v35 = vadd.f32 %v6377_v24, %v1948_v51 }
 0x1b5   : > { %v4792_v9 = vpop.f32.mrf.mxu1 }
 0x1b6   : > { %v1951_v39 = vadd.f32 %v4792_v9, %v6254_v43  ;;  %v4837_v23 = vpop.f32.mrf.mxu0  ;;  %5040 = vmatmul.mubr.msk.bf16.gmra.mxu0 %vm1496_vm5, %v4388_v10  ;;  %v6456_v44 = vadd.f32 %v6386_v11, %v1940_v62  ;;  %v7192_v62 = vld [vmem:[#allocation16_spill] sm:$0xff] }
 0x1b7   : > { %v1942_v8 = vpop.f32.mrf.mxu1 }
 0x1b8   : > { %v1943_v38 = vadd.f32 %v1942_v8, %v6260_v21  ;;  %v2380_v16 = vpop.f32.mrf.mxu0  ;;  %v6459_v33 = vadd.f32 %v4826_v29, %v1951_v39 }
 0x1b9   : > { %v4795_v55 = vpop.f32.mrf.mxu1  ;;  %4998 = vmatmul.mubr.msk.bf16.gmra.mxu1 %vm1496_vm5, %v7167_v19 }
 0x1ba   : > { %v1964_v24 = vadd.f32 %v4795_v55, %v6270_v32  ;;  %5001 = vmatprep.mubr.msk.bf16.mxu1 %vm1496_vm5, %v7184_v31  ;;  %v4838_v43 = vpop.f32.mrf.mxu0  ;;  %v6467_v53 = vadd.f32 %v6398_v2, %v1943_v38  ;;  %v7193_v55 = vld [vmem:[#allocation4_spill] sm:$0xff] }
 0x1bb   : > { %v1955_v11 = vpop.f32.mrf.mxu1 }
 0x1bc   : > { %v1956_v40 = vadd.f32 %v1955_v11, %v7185_v25  ;;  %v2383_v21 = vpop.f32.mrf.mxu0  ;;  %v6471_v29 = vadd.f32 %v6403_v50, %v1964_v24  ;;  %v7190_v50 = vld [vmem:[#allocation11_spill] sm:$0xff]  ;;  %v7194_v25 = vld [vmem:[#allocation12_spill] sm:$0xff] }
 0x1bd   : > { %v4796_v61 = vpop.f32.mrf.mxu1 }
 0x1be   : > { %v1967_v13 = vadd.f32 %v4796_v61, %v7186_v4  ;;  %v4877_v19 = vpop.f32.mrf.mxu0  ;;  %v6474_v12 = vadd.f32 %v2348_v6, %v1956_v40  ;;  %v7195_v40 = vld [vmem:[#allocation5_spill] sm:$0xff] }
 0x1bf   : > { %v1958_v32 = vpop.f32.mrf.mxu1 }
 0x1c0   : > { %v1959_v60 = vadd.f32 %v1958_v32, %v7187_v17  ;;  %v2702_v54 = vpop.f32.mrf.mxu0  ;;  %v6477_v22 = vadd.f32 %v4830_v36, %v1967_v13  ;;  %v7196_v32 = vld [vmem:[#allocation8_spill] sm:$0xff] }
 0x1c1   : > { %v4799_v2 = vpop.f32.mrf.mxu1  ;;  %5002 = vmatmul.mubr.msk.bf16.gmra.mxu1 %vm1496_vm5, %v7188_v49  ;;  %v7197_v49 = vld [vmem:[#allocation9_spill] sm:$0xff] }
 0x1c2   : > { %v1980_v45 = vadd.f32 %v4799_v2, %v7189_v56  ;;  %5005 = vmatprep.mubr.msk.bf16.mxu1 %vm1496_vm5, %v7190_v50  ;;  %v4878_v47 = vpop.f32.mrf.mxu0  ;;  %v6484_v15 = vadd.f32 %v2351_v34, %v1959_v60 }
 0x1c3   : > { %v1971_v6 = vpop.f32.mrf.mxu1 }
 0x1c4   : > { %v1972_v51 = vadd.f32 %v1971_v6, %v7191_v37  ;;  %v2705_v10 = vpop.f32.mrf.mxu0  ;;  %v6487_v48 = vadd.f32 %v4833_v42, %v1980_v45  ;;  %v7198_v6 = vld [vmem:[#allocation14_spill] sm:$0xff] }
 0x1c5   : > { %v4800_v36 = vpop.f32.mrf.mxu1 }
 0x1c6   : > { %v1983_v9 = vadd.f32 %v4800_v36, %v7192_v62  ;;  %v4881_v39 = vpop.f32.mrf.mxu0  ;;  %v6490_v8 = vadd.f32 %v2364_v18, %v1972_v51 }
 0x1c7   : > { %v1974_v38 = vpop.f32.mrf.mxu1 }
 0x1c8   : > { %v1975_v24 = vadd.f32 %v1974_v38, %v7193_v55  ;;  %v2718_v31 = vpop.f32.mrf.mxu0  ;;  %v6493_v11 = vadd.f32 %v4834_v0, %v1983_v9 }
 0x1c9   : > { %v4803_v34 = vpop.f32.mrf.mxu1  ;;  %5006 = vmatmul.mubr.msk.bf16.gmra.mxu1 %vm1496_vm5, %v7194_v25 }
 0x1ca   : > { %v1996_v61 = vadd.f32 %v4803_v34, %v7195_v40  ;;  %v4882_v42 = vpop.f32.mrf.mxu0  ;;  %v6498_v4 = vadd.f32 %v2367_v59, %v1975_v24 }
 0x1cb   : > { %v1987_v13 = vpop.f32.mrf.mxu1 }
 0x1cc   : > { %v1988_v17 = vadd.f32 %v1987_v13, %v7196_v32  ;;  %v2721_v18 = vpop.f32.mrf.mxu0  ;;  %v6501_v60 = vadd.f32 %v4837_v23, %v1996_v61 }
 0x1cd   : > { %v4804_v2 = vpop.f32.mrf.mxu1 }
 0x1ce   : > { %v1999_v56 = vadd.f32 %v4804_v2, %v7197_v49  ;;  %v4885_v0 = vpop.f32.mrf.mxu0  ;;  %v6504_v45 = vadd.f32 %v2380_v16, %v1988_v17 }
 0x1cf   : > { %v1990_v50 = vpop.f32.mrf.mxu1 }
 0x1d0   : > { %v1991_v37 = vadd.f32 %v1990_v50, %v7198_v6  ;;  %v2734_v51 = vpop.f32.mrf.mxu0  ;;  %v6507_v36 = vadd.f32 %v4838_v43, %v1999_v56 }
 0x1d1   : > { %v4843_v59 = vpop.f32.mrf.mxu1 }
 0x1d2   : > { %v2603_v62 = vadd.f32 %v4843_v59, %v6352_v20  ;;  %v4886_v9 = vpop.f32.mrf.mxu0  ;;  %v6510_v38 = vadd.f32 %v2383_v21, %v1991_v37 }
 0x1d3   : > { %v2474_v23 = vpop.f32.mrf.mxu1 }
 0x1d4   : > { %v2601_v55 = vadd.f32 %v2474_v23, %v6357_v58  ;;  %v2737_v24 = vpop.f32.mrf.mxu0  ;;  %v6513_v34 = vadd.f32 %v4877_v19, %v2603_v62 }
 0x1d5   : > { %v4844_v16 = vpop.f32.mrf.mxu1 }
 0x1d6   : > { %v2604_v25 = vadd.f32 %v4844_v16, %v6362_v5  ;;  %v4889_v40 = vpop.f32.mrf.mxu0  ;;  %v6516_v61 = vadd.f32 %v2702_v54, %v2601_v55 }
 0x1d7   : > { %v2477_v43 = vpop.f32.mrf.mxu1 }
 0x1d8   : > { %v2602_v13 = vadd.f32 %v2477_v43, %v6369_v46  ;;  %v2750_v32 = vpop.f32.mrf.mxu0  ;;  %v6519_v20 = vadd.f32 %v4878_v47, %v2604_v25 }
 0x1d9   : > { %v4847_v21 = vpop.f32.mrf.mxu1 }
 0x1da   : > { %v2607_v17 = vadd.f32 %v4847_v21, %v6374_v26  ;;  %v4890_v2 = vpop.f32.mrf.mxu0  ;;  %v6522_v58 = vadd.f32 %v2705_v10, %v2602_v13 }
 0x1db   : > { %v2490_v19 = vpop.f32.mrf.mxu1 }
 0x1dc   : > { %v2605_v49 = vadd.f32 %v2490_v19, %v6381_v57  ;;  %v2753_v56 = vpop.f32.mrf.mxu0  ;;  %v6525_v5 = vadd.f32 %v4881_v39, %v2607_v17 }
 0x1dd   : > { %v4848_v54 = vpop.f32.mrf.mxu1 }
 0x1de   : > { %v2608_v50 = vadd.f32 %v4848_v54, %v6388_v41  ;;  %v4893_v6 = vpop.f32.mrf.mxu0  ;;  %v6528_v46 = vadd.f32 %v2718_v31, %v2605_v49 }
 0x1df   : > { %v2493_v47 = vpop.f32.mrf.mxu1 }
 0x1e0   : > { %v2606_v37 = vadd.f32 %v2493_v47, %v6395_v3  ;;  %v2766_v59 = vpop.f32.mrf.mxu0  ;;  %v6531_v26 = vadd.f32 %v4882_v42, %v2608_v50 }
 0x1e1   : > { %v4851_v10 = vpop.f32.mrf.mxu1 }
 0x1e2   : > { %v2611_v62 = vadd.f32 %v4851_v10, %v6400_v14  ;;  %v4894_v23 = vpop.f32.mrf.mxu0  ;;  %v6534_v57 = vadd.f32 %v2721_v18, %v2606_v37 }
 0x1e3   : > { %v2506_v39 = vpop.f32.mrf.mxu1 }
 0x1e4   : > { %v2609_v55 = vadd.f32 %v2506_v39, %v6407_v30  ;;  %v2769_v16 = vpop.f32.mrf.mxu0  ;;  %v6537_v41 = vadd.f32 %v4885_v0, %v2611_v62 }
 0x1e5   : > { %v4852_v31 = vpop.f32.mrf.mxu1 }
 0x1e6   : > { %v2612_v25 = vadd.f32 %v4852_v31, %v6413_v28  ;;  %v4897_v43 = vpop.f32.mrf.mxu0  ;;  %v6540_v3 = vadd.f32 %v2734_v51, %v2609_v55 }
 0x1e7   : > { %v2509_v42 = vpop.f32.mrf.mxu1 }
 0x1e8   : > { %v2610_v13 = vadd.f32 %v2509_v42, %v6420_v27  ;;  %v2782_v21 = vpop.f32.mrf.mxu0  ;;  %v6543_v14 = vadd.f32 %v4886_v9, %v2612_v25 }
 0x1e9   : > { %v4855_v18 = vpop.f32.mrf.mxu1 }
 0x1ea   : > { %v2615_v17 = vadd.f32 %v4855_v18, %v6425_v52  ;;  %v4898_v19 = vpop.f32.mrf.mxu0  ;;  %v6546_v30 = vadd.f32 %v2737_v24, %v2610_v13 }
 0x1eb   : > { %v2522_v0 = vpop.f32.mrf.mxu1 }
 0x1ec   : > { %v2613_v49 = vadd.f32 %v2522_v0, %v6430_v7  ;;  %v2785_v54 = vpop.f32.mrf.mxu0  ;;  %v6549_v28 = vadd.f32 %v4889_v40, %v2615_v17 }
 0x1ed   : > { %v4856_v51 = vpop.f32.mrf.mxu1 }
 0x1ee   : > { %v2616_v50 = vadd.f32 %v4856_v51, %v6439_v1  ;;  %v4901_v47 = vpop.f32.mrf.mxu0  ;;  %v6552_v27 = vadd.f32 %v2750_v32, %v2613_v49 }
 0x1ef   : > { %v2525_v9 = vpop.f32.mrf.mxu1 }
 0x1f0   : > { %v2614_v37 = vadd.f32 %v2525_v9, %v6447_v63  ;;  %v2798_v10 = vpop.f32.mrf.mxu0  ;;  %v6555_v52 = vadd.f32 %v4890_v2, %v2616_v50 }
 0x1f1   : > { %v4859_v24 = vpop.f32.mrf.mxu1 }
 0x1f2   : > { %v2619_v62 = vadd.f32 %v4859_v24, %v6451_v35  ;;  %v4902_v39 = vpop.f32.mrf.mxu0  ;;  %v6558_v7 = vadd.f32 %v2753_v56, %v2614_v37 }
 0x1f3   : > { %v2538_v40 = vpop.f32.mrf.mxu1 }
 0x1f4   : > { %v2617_v55 = vadd.f32 %v2538_v40, %v6456_v44  ;;  %v2801_v31 = vpop.f32.mrf.mxu0  ;;  %v6561_v1 = vadd.f32 %v4893_v6, %v2619_v62 }
 0x1f5   : > { %v4860_v32 = vpop.f32.mrf.mxu1 }
 0x1f6   : > { %v2620_v25 = vadd.f32 %v4860_v32, %v6459_v33  ;;  %v4905_v42 = vpop.f32.mrf.mxu0  ;;  %v6564_v63 = vadd.f32 %v2766_v59, %v2617_v55 }
 0x1f7   : > { %v2541_v2 = vpop.f32.mrf.mxu1 }
 0x1f8   : > { %v2618_v13 = vadd.f32 %v2541_v2, %v6467_v53  ;;  %v2814_v18 = vpop.f32.mrf.mxu0  ;;  %v6567_v35 = vadd.f32 %v4894_v23, %v2620_v25 }
 0x1f9   : > { %v4863_v56 = vpop.f32.mrf.mxu1 }
 0x1fa   : > { %v2623_v17 = vadd.f32 %v4863_v56, %v6471_v29  ;;  %v4906_v0 = vpop.f32.mrf.mxu0  ;;  %v6570_v44 = vadd.f32 %v2769_v16, %v2618_v13 }
 0x1fb   : > { %v2554_v6 = vpop.f32.mrf.mxu1 }
 0x1fc   : > { %7199 = vst [vmem:[#allocation15_spill] sm:$0xff] %v6570_v44  ;;  %v2621_v49 = vadd.f32 %v2554_v6, %v6474_v12  ;;  %v2817_v51 = vpop.f32.mrf.mxu0  ;;  %v6573_v33 = vadd.f32 %v4897_v43, %v2623_v17 }
 0x1fd   : > { %v4864_v59 = vpop.f32.mrf.mxu1 }
 0x1fe   : > { %7200 = vst [vmem:[#allocation19_spill] sm:$0xff] %v6573_v33  ;;  %v2624_v50 = vadd.f32 %v4864_v59, %v6477_v22  ;;  %v6576_v9 = vpop.f32.mrf.mxu0  ;;  %v6578_v53 = vadd.f32 %v2782_v21, %v2621_v49 }
 0x1ff   : > { %v2557_v23 = vpop.f32.mrf.mxu1 }
 0x200   : > { %7201 = vst [vmem:[#allocation20_spill] sm:$0xff] %v6578_v53  ;;  %v2622_v37 = vadd.f32 %v2557_v23, %v6484_v15  ;;  %v6581_v29 = vpop.f32.mrf.mxu0  ;;  %v6583_v16 = vadd.f32 %v4898_v19, %v2624_v50 }
 0x201   : > { %v4867_v24 = vpop.f32.mrf.mxu1 }
 0x202   : > { %7202 = vst [vmem:[#allocation21_spill] sm:$0xff] %v6583_v16  ;;  %v2627_v12 = vadd.f32 %v4867_v24, %v6487_v48  ;;  %v6586_v62 = vpop.f32.mrf.mxu0  ;;  %v6588_v43 = vadd.f32 %v2785_v54, %v2622_v37 }
 0x203   : > { %v2570_v40 = vpop.f32.mrf.mxu1 }
 0x204   : > { %7203 = vst [vmem:[#allocation17_spill] sm:$0xff] %v6588_v43  ;;  %v2625_v22 = vadd.f32 %v2570_v40, %v6490_v8  ;;  %v6591_v55 = vpop.f32.mrf.mxu0  ;;  %v6593_v21 = vadd.f32 %v4901_v47, %v2627_v12 }
 0x205   : > { %v4868_v32 = vpop.f32.mrf.mxu1 }
 0x206   : > { %7204 = vst [vmem:[#allocation3_spill] sm:$0xff] %v6593_v21  ;;  %v2628_v15 = vadd.f32 %v4868_v32, %v6493_v11  ;;  %v6596_v25 = vpop.f32.mrf.mxu0  ;;  %v6598_v19 = vadd.f32 %v2798_v10, %v2625_v22 }
 0x207   : > { %v2573_v2 = vpop.f32.mrf.mxu1 }
 0x208   : > { %7205 = vst [vmem:[#allocation6_spill] sm:$0xff] %v6598_v19  ;;  %v2626_v48 = vadd.f32 %v2573_v2, %v6498_v4  ;;  %v6601_v13 = vpop.f32.mrf.mxu0  ;;  %v6603_v54 = vadd.f32 %v4902_v39, %v2628_v15 }
 0x209   : > { %v4871_v56 = vpop.f32.mrf.mxu1 }
 0x20a   : > { %7206 = vst [vmem:[#allocation7_spill] sm:$0xff] %v6603_v54  ;;  %v2631_v8 = vadd.f32 %v4871_v56, %v6501_v60  ;;  %v6606_v17 = vpop.f32.mrf.mxu0  ;;  %v6608_v47 = vadd.f32 %v2801_v31, %v2626_v48 }
 0x20b   : > { %v2586_v6 = vpop.f32.mrf.mxu1 }
 0x20c   : > { %7207 = vst [vmem:[#allocation18_spill] sm:$0xff] %v6608_v47  ;;  %v2629_v11 = vadd.f32 %v2586_v6, %v6504_v45  ;;  %v6611_v49 = vpop.f32.mrf.mxu0  ;;  %v6613_v10 = vadd.f32 %v4905_v42, %v2631_v8 }
 0x20d   : > { %v4872_v59 = vpop.f32.mrf.mxu1 }
 0x20e   : > { %7208 = vst [vmem:[#allocation10_spill] sm:$0xff] %v6613_v10  ;;  %v2632_v4 = vadd.f32 %v4872_v59, %v6507_v36  ;;  %v6616_v50 = vpop.f32.mrf.mxu0  ;;  %v6618_v39 = vadd.f32 %v2814_v18, %v2629_v11 }
 0x20f   : > { %v2589_v23 = vpop.f32.mrf.mxu1 }
 0x210   : > { %7209 = vst [vmem:[#allocation11_spill] sm:$0xff] %v6618_v39  ;;  %v2630_v60 = vadd.f32 %v2589_v23, %v6510_v38  ;;  %v6621_v37 = vpop.f32.mrf.mxu0  ;;  %v6623_v31 = vadd.f32 %v4906_v0, %v2632_v4 }
 0x211   : > { %v4911_v24 = vpop.f32.mrf.mxu1 }
 0x212   : > { %7210 = vst [vmem:[#allocation13_spill] sm:$0xff] %v6623_v31  ;;  %v6625_v45 = vpop.f32.mrf.mxu0  ;;  %v6627_v12 = vadd.f32 %v2817_v51, %v2630_v60 }
 0x213   : > { %v2914_v42 = vpop.f32.mrf.mxu1 }
 0x214   : > { %7211 = vst [vmem:[#allocation16_spill] sm:$0xff] %v6627_v12  ;;  %v6629_v40 = vpop.f32.mrf.mxu0 }
 0x215   : > { %v4912_v36 = vpop.f32.mrf.mxu1 }
 0x216   : > { %v6631_v22 = vpop.f32.mrf.mxu0 }
 0x217   : > { %v2917_v18 = vpop.f32.mrf.mxu1 }
 0x218   : > { %v6633_v32 = vpop.f32.mrf.mxu0 }
 0x219   : > { %7212 = vst [vmem:[#allocation4_spill] sm:$0xff] %v6633_v32  ;;  %v4915_v15 = vpop.f32.mrf.mxu1 }
 0x21a   : > { %v6635_v38 = vpop.f32.mrf.mxu0 }
 0x21b   : > { %7213 = vst [vmem:[#allocation12_spill] sm:$0xff] %v6635_v38  ;;  %v2930_v2 = vpop.f32.mrf.mxu1 }
 0x21c   : > { %v6637_v0 = vpop.f32.mrf.mxu0 }
 0x21d   : > { %7214 = vst [vmem:[#allocation5_spill] sm:$0xff] %v6637_v0  ;;  %v4916_v48 = vpop.f32.mrf.mxu1 }
 0x21e   : > { %v6639_v56 = vpop.f32.mrf.mxu0 }
 0x21f   : > { %7215 = vst [vmem:[#allocation8_spill] sm:$0xff] %v6639_v56  ;;  %v2933_v51 = vpop.f32.mrf.mxu1 }
 0x220   : > { %v6641_v8 = vpop.f32.mrf.mxu0 }
 0x221   : > { %7216 = vst [vmem:[#allocation9_spill] sm:$0xff] %v6641_v8  ;;  %v4919_v6 = vpop.f32.mrf.mxu1 }
 0x222   : > { %v6643_v11 = vpop.f32.mrf.mxu0 }
 0x223   : > { %7217 = vst [vmem:[#allocation14_spill] sm:$0xff] %v6643_v11  ;;  %v2946_v59 = vpop.f32.mrf.mxu1 }
 0x224   : > { %v6645_v4 = vpop.f32.mrf.mxu0 }
 0x225   : > { %7218 = vst [vmem:[#allocation22_spill] sm:$0xff] %v6645_v4  ;;  %v4920_v23 = vpop.f32.mrf.mxu1 }
 0x226   : > { %v6647_v60 = vpop.f32.mrf.mxu0 }
 0x227   : > { %7219 = vst [vmem:[#allocation23_spill] sm:$0xff] %v6647_v60  ;;  %v2949_v12 = vpop.f32.mrf.mxu1 }
 0x228   : > { %v6649_v31 = vpop.f32.mrf.mxu0 }
 0x229   : > { %7220 = vst [vmem:[#allocation24_spill] sm:$0xff] %v6649_v31  ;;  %v4923_v39 = vpop.f32.mrf.mxu1 }
 0x22a   : > { %v6651_v10 = vpop.f32.mrf.mxu0 }
 0x22b   : > { %7221 = vst [vmem:[#allocation25_spill] sm:$0xff] %v6651_v10  ;;  %v2962_v47 = vpop.f32.mrf.mxu1 }
 0x22c   : > { %v6653_v54 = vpop.f32.mrf.mxu0 }
 0x22d   : > { %7222 = vst [vmem:[#allocation26_spill] sm:$0xff] %v6653_v54  ;;  %v4924_v19 = vpop.f32.mrf.mxu1 }
 0x22e   : > { %v6655_v8 = vpop.f32.mrf.mxu0 }
 0x22f   : > { %7223 = vst [vmem:[#allocation27_spill] sm:$0xff] %v6655_v8  ;;  %v2965_v21 = vpop.f32.mrf.mxu1 }
 0x230   : > { %v6657_v11 = vpop.f32.mrf.mxu0 }
 0x231   : > { %7224 = vst [vmem:[#allocation28_spill] sm:$0xff] %v6657_v11  ;;  %v4927_v43 = vpop.f32.mrf.mxu1 }
 0x232   : > { %v6659_v4 = vpop.f32.mrf.mxu0 }
 0x233   : > { %7225 = vst [vmem:[#allocation29_spill] sm:$0xff] %v6659_v4  ;;  %v2978_v16 = vpop.f32.mrf.mxu1 }
 0x234   : > { %v6661_v60 = vpop.f32.mrf.mxu0 }
 0x235   : > { %7226 = vst [vmem:[#allocation30_spill] sm:$0xff] %v6661_v60  ;;  %v4928_v56 = vpop.f32.mrf.mxu1 }
 0x236   : > { %v6663_v31 = vpop.f32.mrf.mxu0 }
 0x237   : > { %7227 = vst [vmem:[#allocation31_spill] sm:$0xff] %v6663_v31  ;;  %v6665_v53 = vpop.f32.mrf.mxu1 }
 0x238   : > { %7228 = vst [vmem:[#allocation32_spill] sm:$0xff] %v6665_v53  ;;  %v6667_v10 = vpop.f32.mrf.mxu0 }
 0x239   : > { %7229 = vst [vmem:[#allocation33_spill] sm:$0xff] %v6667_v10  ;;  %v6669_v54 = vpop.f32.mrf.mxu1 }
 0x23a   : > { %7230 = vst [vmem:[#allocation34_spill] sm:$0xff] %v6669_v54  ;;  %v6671_v33 = vpop.f32.mrf.mxu0 }
 0x23b   : > { %7231 = vst [vmem:[#allocation35_spill] sm:$0xff] %v6671_v33  ;;  %v2994_v8 = vpop.f32.mrf.mxu1 }
 0x23c   : > { %v6673_v44 = vpop.f32.mrf.mxu0 }
 0x23d   : > { %7232 = vst [vmem:[#allocation36_spill] sm:$0xff] %v6673_v44  ;;  %v6675_v11 = vpop.f32.mrf.mxu1  ;;  %v3043_v44 = vadd.f32 %v4911_v24, %v6513_v34  ;;  %v3048_v34 = vadd.f32 %v4916_v48, %v6531_v26 }
 0x23e   : > { %7233 = vst [vmem:[#allocation37_spill] sm:$0xff] %v6675_v11  ;;  %v6677_v4 = vpop.f32.mrf.mxu0 }
 0x23f   : > { %7234 = vst [vmem:[#allocation38_spill] sm:$0xff] %v6677_v4  ;;  %v2997_v0 = vpop.f32.mrf.mxu1 }
 0x240   : > { %v6679_v60 = vpop.f32.mrf.mxu0 }
 0x241   : > { %7235 = vst [vmem:[#allocation39_spill] sm:$0xff] %v6679_v60  ;;  %v6681_v38 = vpop.f32.mrf.mxu1  ;;  %v3041_v60 = vadd.f32 %v2914_v42, %v6516_v61  ;;  %v3046_v61 = vadd.f32 %v2933_v51, %v6534_v57  ;;  %v3049_v42 = vadd.f32 %v2946_v59, %v6540_v3  ;;  %v3053_v57 = vadd.f32 %v2962_v47, %v6552_v27  ;;  %v7242_v47 = vld [vmem:[#allocation4_spill] sm:$0xff]  ;;  %v7253_v59 = vld [vmem:[#allocation17_spill] sm:$0xff] }
 0x242   : > { %7236 = vst [vmem:[#allocation40_spill] sm:$0xff] %v6681_v38  ;;  %v6683_v31 = vpop.f32.mrf.mxu0  ;;  %v3044_v38 = vadd.f32 %v4912_v36, %v6519_v20  ;;  %v3051_v20 = vadd.f32 %v4919_v6, %v6537_v41  ;;  %v3056_v41 = vadd.f32 %v4924_v19, %v6555_v52  ;;  %v3054_v3 = vadd.f32 %v2965_v21, %v6558_v7 }
 0x243   : > { %7237 = vst [vmem:[#allocation41_spill] sm:$0xff] %v6683_v31  ;;  %v6685_v53 = vpop.f32.mrf.mxu1  ;;  %v3042_v31 = vadd.f32 %v2917_v18, %v6522_v58  ;;  %v3052_v58 = vadd.f32 %v4920_v23, %v6543_v14  ;;  %v3247_v26 = vadd.f32 %v6581_v29, %v3041_v60  ;;  %v6740_v27 = vadd.f32 %v6611_v49, %v3046_v61 }
 0x244   : > { %7238 = vst [vmem:[#allocation42_spill] sm:$0xff] %v6685_v53  ;;  %v6687_v10 = vpop.f32.mrf.mxu0  ;;  %v6743_v52 = vadd.f32 %v6616_v50, %v3051_v20  ;;  %v6764_v49 = vadd.f32 %v7242_v47, %v3053_v57 }
 0x245   : > { %7239 = vst [vmem:[#allocation43_spill] sm:$0xff] %v6687_v10  ;;  %v6689_v54 = vpop.f32.mrf.mxu1  ;;  %v3047_v10 = vadd.f32 %v4915_v15, %v6525_v5  ;;  %v3050_v5 = vadd.f32 %v2949_v12, %v6546_v30  ;;  %v3248_v14 = vadd.f32 %v6591_v55, %v3042_v31  ;;  %v3059_v30 = vadd.f32 %v4927_v43, %v6561_v1  ;;  %v7247_v31 = vld [vmem:[#allocation19_spill] sm:$0xff]  ;;  %v7252_v51 = vld [vmem:[#allocation37_spill] sm:$0xff] }
 0x246   : > { %v6691_v33 = vpop.f32.mrf.mxu0  ;;  %v6748_v1 = vadd.f32 %v6621_v37, %v3049_v42  ;;  %v6751_v43 = vadd.f32 %v6625_v45, %v3052_v58  ;;  %v3060_v55 = vadd.f32 %v4928_v56, %v6567_v35  ;;  %v7245_v35 = vld [vmem:[#allocation15_spill] sm:$0xff]  ;;  %v7248_v45 = vld [vmem:[#allocation34_spill] sm:$0xff]  ;;  %v7251_v56 = vld [vmem:[#allocation21_spill] sm:$0xff] }
 0x247   : > { %7240 = vst [vmem:[#allocation44_spill] sm:$0xff] %v6691_v33  ;;  %v6694_v11 = vpop.f32.mrf.mxu1  ;;  %v3045_v33 = vadd.f32 %v2930_v2, %v6528_v46  ;;  %v3055_v46 = vadd.f32 %v4923_v39, %v6549_v28  ;;  %v3253_v28 = vadd.f32 %v6596_v25, %v3047_v10  ;;  %v6756_v25 = vadd.f32 %v6629_v40, %v3050_v5  ;;  %v7243_v10 = vld [vmem:[#allocation12_spill] sm:$0xff]  ;;  %v7254_v23 = vld [vmem:[#allocation38_spill] sm:$0xff] }
 0x248   : > { %v6696_v4 = vpop.f32.mrf.mxu0  ;;  %v6767_v50 = vadd.f32 %v7243_v10, %v3056_v41  ;;  %v7246_v39 = vld [vmem:[#allocation32_spill] sm:$0xff]  ;;  %v3063_v40 = vadd.f32 %v7248_v45, %v7247_v31  ;;  %v3064_v6 = vadd.f32 %v7252_v51, %v7251_v56  ;;  %v7257_v58 = vld [vmem:[#allocation6_spill] sm:$0xff] }
 0x249   : > { %7241 = vst [vmem:[#allocation45_spill] sm:$0xff] %v6696_v4  ;;  %v6700_v32 = vpop.f32.mrf.mxu1  ;;  %v3249_v4 = vadd.f32 %v6576_v9, %v3043_v44  ;;  %v3250_v44 = vadd.f32 %v6586_v62, %v3044_v38  ;;  %v6734_v29 = vadd.f32 %v6601_v13, %v3045_v33  ;;  %v6737_v62 = vadd.f32 %v6606_v17, %v3048_v34  ;;  %v7250_v2 = vld [vmem:[#allocation8_spill] sm:$0xff]  ;;  %v7264_v31 = vld [vmem:[#allocation10_spill] sm:$0xff] }
 0x24a   : > { %v6703_v53 = vpop.f32.mrf.mxu0  ;;  %v3057_v33 = vadd.f32 %v2978_v16, %v6564_v63  ;;  %v6759_v19 = vadd.f32 %v6631_v22, %v3055_v46  ;;  %v7244_v63 = vld [vmem:[#allocation5_spill] sm:$0xff]  ;;  %v3058_v37 = vadd.f32 %v7246_v39, %v7245_v35  ;;  %v7249_v22 = vld [vmem:[#allocation20_spill] sm:$0xff]  ;;  %v6778_v48 = vadd.f32 %v7250_v2, %v3059_v30  ;;  %v7261_v30 = vld [vmem:[#allocation7_spill] sm:$0xff] }
 0x24b   : > { %v6708_v24 = vpop.f32.mrf.mxu1  ;;  %v6770_v16 = vadd.f32 %v7244_v63, %v3054_v3  ;;  %v3061_v15 = vadd.f32 %v2994_v8, %v7249_v22  ;;  %v7255_v8 = vld [vmem:[#allocation3_spill] sm:$0xff]  ;;  %v7256_v20 = vld [vmem:[#allocation40_spill] sm:$0xff]  ;;  %v7258_v5 = vld [vmem:[#allocation42_spill] sm:$0xff]  ;;  %v3071_v45 = vadd.f32 %v6700_v32, %v7264_v31 }
 0x24c   : > { %v6715_v36 = vpop.f32.mrf.mxu0  ;;  %v3067_v42 = vadd.f32 %v7256_v20, %v7255_v8  ;;  %v3065_v46 = vadd.f32 %v7258_v5, %v7257_v58  ;;  %v7263_v63 = vld [vmem:[#allocation39_spill] sm:$0xff]  ;;  %v7267_v51 = vld [vmem:[#allocation24_spill] sm:$0xff]  ;;  %v7269_v32 = vld [vmem:[#allocation26_spill] sm:$0xff] }
 0x24d   : > { %v6719_v18 = vpop.f32.mrf.mxu1  ;;  %v7266_v2 = vld [vmem:[#allocation23_spill] sm:$0xff]  ;;  %v7270_v8 = vld [vmem:[#allocation41_spill] sm:$0xff] }
 0x24e   : > { %v6727_v9 = vpop.f32.mrf.mxu0  ;;  %v6816_v56 = vadd.f32 %v7266_v2, %v3063_v40  ;;  %v7271_v40 = vld [vmem:[#allocation27_spill] sm:$0xff] }
 0x24f   : > { %v6730_v12 = vpop.f32.mrf.mxu1  ;;  %v6833_v5 = vadd.f32 %v7271_v40, %v3067_v42 }
 0x250   : > { %v6745_v7 = vpop.f32.mrf.mxu0 }
 0x251   : > { %v4979_v21 = vpop.f32.mrf.mxu1 }
 0x252   : > { %v3477_v13 = vadd.f32 %v4979_v21, %v3249_v4  ;;  %v6761_v17 = vpop.f32.mrf.mxu0  ;;  %v3062_v4 = vadd.f32 %v2997_v0, %v7253_v59  ;;  %v7259_v0 = vld [vmem:[#allocation9_spill] sm:$0xff]  ;;  %v3068_v21 = vadd.f32 %v6689_v54, %v7261_v30  ;;  %v6823_v59 = vadd.f32 %v7267_v51, %v3061_v15 }
 0x253   : > { %v3348_v38 = vpop.f32.mrf.mxu1  ;;  %v6798_v41 = vadd.f32 %v7259_v0, %v3057_v33  ;;  %v7273_v30 = vld [vmem:[#allocation29_spill] sm:$0xff] }
 0x254   : > { %v3689_v60 = vadd.f32 %v7254_v23, %v3477_v13  ;;  %v3475_v34 = vadd.f32 %v3348_v38, %v3247_v26  ;;  %v6784_v61 = vpop.f32.mrf.mxu0  ;;  %v7260_v26 = vld [vmem:[#allocation14_spill] sm:$0xff]  ;;  %v7268_v23 = vld [vmem:[#allocation25_spill] sm:$0xff] }
 0x255   : > { %v4980_v57 = vpop.f32.mrf.mxu1  ;;  %v6801_v3 = vadd.f32 %v7260_v26, %v3060_v55  ;;  %v7262_v13 = vld [vmem:[#allocation18_spill] sm:$0xff] }
 0x256   : > { %v3066_v47 = vadd.f32 %v6694_v11, %v7262_v13  ;;  %v4475_v10 = vpack.c.bf16 %v3689_v60, %v3689_v60  ;;  %v3687_v35 = vadd.f32 %v7263_v63, %v3475_v34  ;;  %v6808_v39 = vpop.f32.mrf.mxu0  ;;  %v3478_v33 = vadd.f32 %v4980_v57, %v3250_v44  ;;  %v7265_v38 = vld [vmem:[#allocation22_spill] sm:$0xff]  ;;  %v7272_v57 = vld [vmem:[#allocation28_spill] sm:$0xff] }
 0x257   : > { %v3351_v22 = vpop.f32.mrf.mxu1  ;;  %v6813_v55 = vadd.f32 %v7265_v38, %v3058_v37  ;;  %v6826_v34 = vadd.f32 %v7268_v23, %v3064_v6  ;;  %v6829_v44 = vadd.f32 %v7269_v32, %v3062_v4  ;;  %v6836_v0 = vadd.f32 %v7272_v57, %v3065_v46  ;;  %v7274_v13 = vld [vmem:[#allocation30_spill] sm:$0xff]  ;;  %v7276_v46 = vld [vmem:[#allocation43_spill] sm:$0xff] }
 0x258   : > { %3849 = vst.msk [vmem:[%s6791_s9 + $0x8] sm:$0xf] %vm427_vm1, %v4475_v10  ;;  %v4473_v54 = vpack.c.bf16 %v3687_v35, %v3687_v35  ;;  %v6820_v11 = vpop.f32.mrf.mxu0  ;;  %v3690_v37 = vadd.f32 %v7270_v8, %v3478_v33  ;;  %v3476_v20 = vadd.f32 %v3351_v22, %v3248_v14  ;;  %v3949_v15 = vmul.f32 %v3687_v35, %v3687_v35  ;;  %v7275_v14 = vld [vmem:[#allocation11_spill] sm:$0xff] }
 0x259   : > { %v4983_v58 = vpop.f32.mrf.mxu1  ;;  %v6843_v4 = vadd.f32 %v7273_v30, %v3068_v21  ;;  %v6846_v10 = vadd.f32 %v7274_v13, %v3066_v47  ;;  %v6850_v42 = vadd.f32 %v6708_v24, %v7275_v14  ;;  %v7277_v22 = vld [vmem:[#allocation31_spill] sm:$0xff]  ;;  %v3951_v21 = vmul.f32 %v3689_v60, %v3689_v60  ;;  %v7280_v30 = vld [vmem:[#allocation45_spill] sm:$0xff] }
 0x25a   : > { %3847 = vst.msk [vmem:[%s6791_s9] sm:$0xf] %vm427_vm1, %v4473_v54  ;;  %v3481_v26 = vadd.f32 %v4983_v58, %v3253_v28  ;;  %v6840_v6 = vpop.f32.mrf.mxu0  ;;  %v4476_v63 = vpack.c.bf16 %v3690_v37, %v3690_v37  ;;  %v3688_v31 = vadd.f32 %v7276_v46, %v3476_v20  ;;  %v6854_v38 = vadd.f32 %v7277_v22, %v3071_v45  ;;  %v7278_v28 = vld [vmem:[#allocation13_spill] sm:$0xff]  ;;  %v7279_v54 = vld [vmem:[#allocation44_spill] sm:$0xff] }
 0x25b   : > { %v3364_v33 = vpop.f32.mrf.mxu1  ;;  %v6858_v2 = vadd.f32 %v6719_v18, %v7278_v28  ;;  %v3879_v24 = vsel %vm1496_vm5, %v3687_v35, 0.0  ;;  %v3882_v18 = vsel %vm1496_vm5, %v3689_v60, 0.0  ;;  %v3981_v58 = vsel %vm1496_vm5, %v3949_v15, 0.0 }
 0x25c   : > { %v3693_v47 = vadd.f32 %v7279_v54, %v3481_v26  ;;  %v3479_v51 = vadd.f32 %v3364_v33, %v6734_v29  ;;  %v6862_v23 = vpop.f32.mrf.mxu0  ;;  %3850 = vst.msk [vmem:[%s6791_s9 + $0xc] sm:$0xf] %vm427_vm1, %v4476_v63  ;;  %v4474_v32 = vpack.c.bf16 %v3688_v31, %v3688_v31  ;;  %v3880_v45 = vsel %vm1496_vm5, %v3688_v31, 0.0 }
 0x25d   : > { %v3950_v8 = vmul.f32 %v3688_v31, %v3688_v31  ;;  %v4984_v20 = vpop.f32.mrf.mxu1  ;;  %v3881_v40 = vadd.f32 %v3880_v45, %v3879_v24  ;;  %v3952_v29 = vmul.f32 %v3690_v37, %v3690_v37  ;;  %v3984_v46 = vsel %vm1496_vm5, %v3951_v21, 0.0 }
 0x25e   : > { %v4479_v57 = vpack.c.bf16 %v3693_v47, %v3693_v47  ;;  %v6870_v26 = vpop.f32.mrf.mxu0  ;;  %3848 = vst.msk [vmem:[%s6791_s9 + $0x4] sm:$0xf] %vm427_vm1, %v4474_v32  ;;  %v3691_v13 = vadd.f32 %v7280_v30, %v3479_v51  ;;  %v3482_v14 = vadd.f32 %v4984_v20, %v6737_v62  ;;  %v3884_v22 = vsel %vm1496_vm5, %v3690_v37, 0.0 }
 0x25f   : > { %v3982_v35 = vsel %vm1496_vm5, %v3950_v8, 0.0  ;;  %v3367_v63 = vpop.f32.mrf.mxu1  ;;  %v3883_v31 = vadd.f32 %v3882_v18, %v3881_v40  ;;  %v3955_v20 = vmul.f32 %v3693_v47, %v3693_v47 }
 0x260   : > { %v3983_v60 = vadd.f32 %v3982_v35, %v3981_v58  ;;  %3853 = vst.msk [vmem:[%s6791_s9 + $0x18] sm:$0xf] %vm427_vm1, %v4479_v57  ;;  %v3480_v15 = vadd.f32 %v3367_v63, %v6740_v27  ;;  %v6881_v33 = vpop.f32.mrf.mxu0  ;;  %v4477_v28 = vpack.c.bf16 %v3691_v13, %v3691_v13  ;;  %v3953_v54 = vmul.f32 %v3691_v13, %v3691_v13 }
 0x261   : > { %v3694_v51 = vadd.f32 %v6703_v53, %v3482_v14  ;;  %v4987_v24 = vpop.f32.mrf.mxu1  ;;  %v3885_v32 = vadd.f32 %v3884_v22, %v3883_v31  ;;  %v3986_v27 = vsel %vm1496_vm5, %v3952_v29, 0.0  ;;  %v3886_v37 = vsel %vm1496_vm5, %v3691_v13, 0.0 }
 0x262   : > { %v3985_v62 = vadd.f32 %v3984_v46, %v3983_v60  ;;  %v3692_v21 = vadd.f32 %v6715_v36, %v3480_v15  ;;  %v3485_v45 = vadd.f32 %v4987_v24, %v6743_v52  ;;  %v6887_v8 = vpop.f32.mrf.mxu0  ;;  %3851 = vst.msk [vmem:[%s6791_s9 + $0x10] sm:$0xf] %vm427_vm1, %v4477_v28  ;;  %v3988_v52 = vsel %vm1496_vm5, %v3953_v54, 0.0  ;;  %v7281_v15 = vld [vmem:[#allocation33_spill] sm:$0xff] }
 0x263   : > { %v4480_v18 = vpack.c.bf16 %v3694_v51, %v3694_v51  ;;  %v3380_v53 = vpop.f32.mrf.mxu1  ;;  %v3887_v58 = vadd.f32 %v3886_v37, %v3885_v32  ;;  %v6908_v22 = vadd.f32 %v7281_v15, %v6850_v42  ;;  %v3890_v28 = vsel %vm1496_vm5, %v3693_v47, 0.0 }
 0x264   : > { %v3987_v40 = vadd.f32 %v3986_v27, %v3985_v62  ;;  %v4478_v57 = vpack.c.bf16 %v3692_v21, %v3692_v21  ;;  %v3888_v35 = vsel %vm1496_vm5, %v3692_v21, 0.0  ;;  %v6894_v36 = vpop.f32.mrf.mxu0  ;;  %v3954_v29 = vmul.f32 %v3692_v21, %v3692_v21 }
 0x265   : > { %3854 = vst.msk [vmem:[%s6791_s9 + $0x1c] sm:$0xf] %vm427_vm1, %v4480_v18  ;;  %v3697_v30 = vadd.f32 %v6727_v9, %v3485_v45  ;;  %v3483_v14 = vadd.f32 %v3380_v53, %v6748_v1  ;;  %v4988_v63 = vpop.f32.mrf.mxu1  ;;  %v3889_v46 = vadd.f32 %v3888_v35, %v3887_v58  ;;  %v3956_v54 = vmul.f32 %v3694_v51, %v3694_v51 }
 0x266   : > { %v3989_v13 = vadd.f32 %v3988_v52, %v3987_v40  ;;  %3852 = vst.msk [vmem:[%s6791_s9 + $0x14] sm:$0xf] %vm427_vm1, %v4478_v57  ;;  %v3486_v31 = vadd.f32 %v4988_v63, %v6751_v43  ;;  %v6904_v60 = vpop.f32.mrf.mxu0  ;;  %v3990_v9 = vsel %vm1496_vm5, %v3954_v29, 0.0  ;;  %v7282_v43 = vld [vmem:[#allocation16_spill] sm:$0xff]  ;;  %v3992_v42 = vsel %vm1496_vm5, %v3955_v20, 0.0 }
 0x267   : > { %v4483_v1 = vpack.c.bf16 %v3697_v30, %v3697_v30  ;;  %v3383_v24 = vpop.f32.mrf.mxu1  ;;  %v3891_v62 = vadd.f32 %v3890_v28, %v3889_v46  ;;  %v3695_v21 = vadd.f32 %v6745_v7, %v3483_v14  ;;  %v3070_v27 = vadd.f32 %v6730_v12, %v7282_v43 }
 0x268   : > { %v3991_v32 = vadd.f32 %v3990_v9, %v3989_v13  ;;  %v3698_v45 = vadd.f32 %v6761_v17, %v3486_v31  ;;  %v3892_v37 = vsel %vm1496_vm5, %v3694_v51, 0.0  ;;  %v3484_v47 = vadd.f32 %v3383_v24, %v6756_v25  ;;  %v6921_v7 = vpop.f32.mrf.mxu0  ;;  %v7283_v17 = vld [vmem:[#allocation35_spill] sm:$0xff] }
 0x269   : > { %3857 = vst.msk [vmem:[%s6791_s9 + $0x28] sm:$0xf] %vm427_vm1, %v4483_v1  ;;  %v4991_v18 = vpop.f32.mrf.mxu1  ;;  %v4481_v58 = vpack.c.bf16 %v3695_v21, %v3695_v21  ;;  %v3893_v40 = vadd.f32 %v3892_v37, %v3891_v62  ;;  %v6925_v57 = vadd.f32 %v7283_v17, %v6858_v2  ;;  %v3994_v12 = vsel %vm1496_vm5, %v3956_v54, 0.0  ;;  %v7284_v37 = vld [vmem:[#allocation36_spill] sm:$0xff] }
 0x26a   : > { %v3993_v53 = vadd.f32 %v3992_v42, %v3991_v32  ;;  %v3894_v20 = vsel %vm1496_vm5, %v3695_v21, 0.0  ;;  %v3957_v51 = vmul.f32 %v3695_v21, %v3695_v21  ;;  %v4484_v35 = vpack.c.bf16 %v3698_v45, %v3698_v45  ;;  %v6938_v24 = vpop.f32.mrf.mxu0 }
 0x26b   : > { %v3396_v52 = vpop.f32.mrf.mxu1  ;;  %3855 = vst.msk [vmem:[%s6791_s9 + $0x20] sm:$0xf] %vm427_vm1, %v4481_v58  ;;  %v3895_v25 = vadd.f32 %v3894_v20, %v3893_v40  ;;  %v3696_v14 = vadd.f32 %v6784_v61, %v3484_v47  ;;  %v3489_v63 = vadd.f32 %v4991_v18, %v6759_v19  ;;  %v3959_v13 = vmul.f32 %v3697_v30, %v3697_v30 }
 0x26c   : > { %v3995_v29 = vadd.f32 %v3994_v12, %v3993_v53  ;;  %v3996_v46 = vsel %vm1496_vm5, %v3957_v51, 0.0  ;;  %3858 = vst.msk [vmem:[%s6791_s9 + $0x2c] sm:$0xf] %vm427_vm1, %v4484_v35  ;;  %v3960_v2 = vmul.f32 %v3698_v45, %v3698_v45  ;;  %v3487_v31 = vadd.f32 %v3396_v52, %v6764_v49  ;;  %v6954_v12 = vpop.f32.mrf.mxu0 }
 0x26d   : > { %v4992_v15 = vpop.f32.mrf.mxu1  ;;  %v4482_v54 = vpack.c.bf16 %v3696_v14, %v3696_v14  ;;  %v3896_v9 = vsel %vm1496_vm5, %v3696_v14, 0.0  ;;  %v3958_v1 = vmul.f32 %v3696_v14, %v3696_v14  ;;  %v3701_v19 = vadd.f32 %v6808_v39, %v3489_v63 }
 0x26e   : > { %v3997_v28 = vadd.f32 %v3996_v46, %v3995_v29  ;;  %v3897_v61 = vadd.f32 %v3896_v9, %v3895_v25  ;;  %v3699_v62 = vadd.f32 %v6820_v11, %v3487_v31  ;;  %v3490_v32 = vadd.f32 %v4992_v15, %v6767_v50 }
 0x26f   : > { %v3399_v21 = vpop.f32.mrf.mxu1  ;;  %v3898_v43 = vsel %vm1496_vm5, %v3697_v30, 0.0  ;;  %3856 = vst.msk [vmem:[%s6791_s9 + $0x24] sm:$0xf] %vm427_vm1, %v4482_v54  ;;  %v3998_v49 = vsel %vm1496_vm5, %v3958_v1, 0.0  ;;  %v6949_v47 = vadd.f32 %v7284_v37, %v3070_v27  ;;  %v4000_v18 = vsel %vm1496_vm5, %v3959_v13, 0.0 }
 0x270   : > { %v3488_v42 = vadd.f32 %v3399_v21, %v6770_v16  ;;  %v3899_v39 = vadd.f32 %v3898_v43, %v3897_v61  ;;  %v3999_v11 = vadd.f32 %v3998_v49, %v3997_v28  ;;  %v4487_v53 = vpack.c.bf16 %v3701_v19, %v3701_v19  ;;  %v6967_v28 = vpop.f32.mrf.mxu0 }
 0x271   : > { %v4995_v50 = vpop.f32.mrf.mxu1  ;;  %v3900_v58 = vsel %vm1496_vm5, %v3698_v45, 0.0  ;;  %v4002_v30 = vsel %vm1496_vm5, %v3960_v2, 0.0  ;;  %v4485_v40 = vpack.c.bf16 %v3699_v62, %v3699_v62  ;;  %v3961_v17 = vmul.f32 %v3699_v62, %v3699_v62 }
 0x272   : > { %v4001_v20 = vadd.f32 %v4000_v18, %v3999_v11  ;;  %3861 = vst.msk [vmem:[%s6791_s9 + $0x38] sm:$0xf] %vm427_vm1, %v4487_v53  ;;  %v3901_v16 = vadd.f32 %v3900_v58, %v3899_v39  ;;  %v3702_v27 = vadd.f32 %v6840_v6, %v3490_v32  ;;  %v3700_v51 = vadd.f32 %v6862_v23, %v3488_v42  ;;  %v6982_v11 = vpop.f32.mrf.mxu0 }
 0x273   : > { %v3412_v35 = vpop.f32.mrf.mxu1  ;;  %v3963_v52 = vmul.f32 %v3701_v19, %v3701_v19  ;;  %3859 = vst.msk [vmem:[%s6791_s9 + $0x30] sm:$0xf] %vm427_vm1, %v4485_v40  ;;  %v3902_v45 = vsel %vm1496_vm5, %v3699_v62, 0.0  ;;  %v3493_v25 = vadd.f32 %v4995_v50, %v6778_v48  ;;  %v4004_v13 = vsel %vm1496_vm5, %v3961_v17, 0.0 }
 0x274   : > { %v3491_v29 = vadd.f32 %v3412_v35, %v6798_v41  ;;  %v3903_v14 = vadd.f32 %v3902_v45, %v3901_v16  ;;  %v4003_v63 = vadd.f32 %v4002_v30, %v4001_v20  ;;  %v4488_v46 = vpack.c.bf16 %v3702_v27, %v3702_v27 }
 0x275   : > { %v4996_v6 = vpop.f32.mrf.mxu1  ;;  %v3964_v2 = vmul.f32 %v3702_v27, %v3702_v27  ;;  %v4486_v23 = vpack.c.bf16 %v3700_v51, %v3700_v51  ;;  %v3904_v31 = vsel %vm1496_vm5, %v3700_v51, 0.0  ;;  %v3962_v15 = vmul.f32 %v3700_v51, %v3700_v51 }
 0x276   : > { %v4005_v54 = vadd.f32 %v4004_v13, %v4003_v63  ;;  %3862 = vst.msk [vmem:[%s6791_s9 + $0x3c] sm:$0xf] %vm427_vm1, %v4488_v46  ;;  %v3905_v48 = vadd.f32 %v3904_v31, %v3903_v14  ;;  %v3705_v41 = vadd.f32 %v6870_v26, %v3493_v25  ;;  %v3703_v9 = vadd.f32 %v6881_v33, %v3491_v29  ;;  %v6995_v29 = vpop.f32.mrf.mxu0 }
 0x277   : > { %v3415_v1 = vpop.f32.mrf.mxu1  ;;  %v3906_v61 = vsel %vm1496_vm5, %v3701_v19, 0.0  ;;  %3860 = vst.msk [vmem:[%s6791_s9 + $0x34] sm:$0xf] %vm427_vm1, %v4486_v23  ;;  %v4006_v62 = vsel %vm1496_vm5, %v3962_v15, 0.0  ;;  %v3494_v32 = vadd.f32 %v4996_v6, %v6801_v3  ;;  %v4008_v43 = vsel %vm1496_vm5, %v3963_v52, 0.0 }
 0x278   : > { %v3492_v21 = vadd.f32 %v3415_v1, %v6813_v55  ;;  %v3907_v49 = vadd.f32 %v3906_v61, %v3905_v48  ;;  %v4007_v42 = vadd.f32 %v4006_v62, %v4005_v54  ;;  %v4491_v26 = vpack.c.bf16 %v3705_v41, %v3705_v41  ;;  %v3659_v61 = vpop.f32.mrf.mxu0 }
 0x279   : > { %v4999_v37 = vpop.f32.mrf.mxu1  ;;  %v3908_v33 = vsel %vm1496_vm5, %v3702_v27, 0.0  ;;  %v4010_v19 = vsel %vm1496_vm5, %v3964_v2, 0.0  ;;  %v4489_v18 = vpack.c.bf16 %v3703_v9, %v3703_v9  ;;  %v3965_v39 = vmul.f32 %v3703_v9, %v3703_v9 }
 0x27a   : > { %v4009_v53 = vadd.f32 %v4008_v43, %v4007_v42  ;;  %3865 = vst.msk [vmem:[%s6791_s9 + $0x48] sm:$0xf] %vm427_vm1, %v4491_v26  ;;  %v3909_v3 = vadd.f32 %v3908_v33, %v3907_v49  ;;  %v3706_v55 = vadd.f32 %v6887_v8, %v3494_v32  ;;  %v3704_v50 = vadd.f32 %v6894_v36, %v3492_v21 }
 0x27b   : > { %v3428_v58 = vpop.f32.mrf.mxu1  ;;  %v3967_v30 = vmul.f32 %v3705_v41, %v3705_v41  ;;  %3863 = vst.msk [vmem:[%s6791_s9 + $0x40] sm:$0xf] %vm427_vm1, %v4489_v18  ;;  %v3910_v40 = vsel %vm1496_vm5, %v3703_v9, 0.0  ;;  %v3497_v17 = vadd.f32 %v4999_v37, %v6816_v56  ;;  %v4012_v51 = vsel %vm1496_vm5, %v3965_v39, 0.0 }
 0x27c   : > { %v3495_v20 = vadd.f32 %v3428_v58, %v6823_v59  ;;  %v3911_v16 = vadd.f32 %v3910_v40, %v3909_v3  ;;  %v4011_v27 = vadd.f32 %v4010_v19, %v4009_v53  ;;  %v4492_v35 = vpack.c.bf16 %v3706_v55, %v3706_v55 }
 0x27d   : > { %v5000_v8 = vpop.f32.mrf.mxu1  ;;  %v3968_v52 = vmul.f32 %v3706_v55, %v3706_v55  ;;  %v4490_v36 = vpack.c.bf16 %v3704_v50, %v3704_v50  ;;  %v3912_v45 = vsel %vm1496_vm5, %v3704_v50, 0.0  ;;  %v3966_v25 = vmul.f32 %v3704_v50, %v3704_v50 }
 0x27e   : > { %v4013_v14 = vadd.f32 %v4012_v51, %v4011_v27  ;;  %3866 = vst.msk [vmem:[%s6791_s9 + $0x4c] sm:$0xf] %vm427_vm1, %v4492_v35  ;;  %v3913_v56 = vadd.f32 %v3912_v45, %v3911_v16  ;;  %v3709_v59 = vadd.f32 %v6904_v60, %v3497_v17  ;;  %v3707_v63 = vadd.f32 %v6921_v7, %v3495_v20 }
 0x27f   : > { %v3431_v13 = vpop.f32.mrf.mxu1  ;;  %v3914_v46 = vsel %vm1496_vm5, %v3705_v41, 0.0  ;;  %3864 = vst.msk [vmem:[%s6791_s9 + $0x44] sm:$0xf] %vm427_vm1, %v4490_v36  ;;  %v4014_v6 = vsel %vm1496_vm5, %v3966_v25, 0.0  ;;  %v3498_v2 = vadd.f32 %v5000_v8, %v6826_v34  ;;  %v4016_v31 = vsel %vm1496_vm5, %v3967_v30, 0.0 }
 0x280   : > { %v3496_v23 = vadd.f32 %v3431_v13, %v6829_v44  ;;  %v3915_v15 = vadd.f32 %v3914_v46, %v3913_v56  ;;  %v4015_v54 = vadd.f32 %v4014_v6, %v4013_v14  ;;  %v4495_v60 = vpack.c.bf16 %v3709_v59, %v3709_v59 }
 0x281   : > { %v5003_v48 = vpop.f32.mrf.mxu1  ;;  %v3916_v7 = vsel %vm1496_vm5, %v3706_v55, 0.0  ;;  %v4018_v41 = vsel %vm1496_vm5, %v3968_v52, 0.0  ;;  %v4493_v9 = vpack.c.bf16 %v3707_v63, %v3707_v63  ;;  %v3969_v1 = vmul.f32 %v3707_v63, %v3707_v63  ;;  %v5041_v55 = vpop.f32.mrf.mxu0 }
 0x282   : > { %v4017_v62 = vadd.f32 %v4016_v31, %v4015_v54  ;;  %3869 = vst.msk [vmem:[%s6791_s9 + $0x58] sm:$0xf] %vm427_vm1, %v4495_v60  ;;  %v3917_v34 = vadd.f32 %v3916_v7, %v3915_v15  ;;  %v3710_v44 = vadd.f32 %v6938_v24, %v3498_v2  ;;  %v3708_v32 = vadd.f32 %v6954_v12, %v3496_v23 }
 0x283   : > { %v3444_v21 = vpop.f32.mrf.mxu1  ;;  %v3971_v43 = vmul.f32 %v3709_v59, %v3709_v59  ;;  %3867 = vst.msk [vmem:[%s6791_s9 + $0x50] sm:$0xf] %vm427_vm1, %v4493_v9  ;;  %v3918_v49 = vsel %vm1496_vm5, %v3707_v63, 0.0  ;;  %v3501_v42 = vadd.f32 %v5003_v48, %v6833_v5  ;;  %v4020_v19 = vsel %vm1496_vm5, %v3969_v1, 0.0  ;;  %v3672_v25 = vpop.f32.mrf.mxu0 }
 0x284   : > { %v3499_v26 = vadd.f32 %v3444_v21, %v6836_v0  ;;  %v3919_v37 = vadd.f32 %v3918_v49, %v3917_v34  ;;  %v4019_v33 = vadd.f32 %v4018_v41, %v4017_v62  ;;  %v4496_v18 = vpack.c.bf16 %v3710_v44, %v3710_v44 }
 0x285   : > { %v5004_v24 = vpop.f32.mrf.mxu1  ;;  %v3972_v39 = vmul.f32 %v3710_v44, %v3710_v44  ;;  %v4494_v12 = vpack.c.bf16 %v3708_v32, %v3708_v32  ;;  %v3920_v53 = vsel %vm1496_vm5, %v3708_v32, 0.0  ;;  %v3970_v3 = vmul.f32 %v3708_v32, %v3708_v32  ;;  %v5042_v41 = vpop.f32.mrf.mxu0 }
 0x286   : > { %v4021_v50 = vadd.f32 %v4020_v19, %v4019_v33  ;;  %3870 = vst.msk [vmem:[%s6791_s9 + $0x5c] sm:$0xf] %vm427_vm1, %v4496_v18  ;;  %v3921_v58 = vadd.f32 %v3920_v53, %v3919_v37  ;;  %v3713_v5 = vadd.f32 %v6967_v28, %v3501_v42  ;;  %v3711_v0 = vadd.f32 %v6982_v11, %v3499_v26 }
 0x287   : > { %v3447_v30 = vpop.f32.mrf.mxu1  ;;  %v3922_v40 = vsel %vm1496_vm5, %v3709_v59, 0.0  ;;  %3868 = vst.msk [vmem:[%s6791_s9 + $0x54] sm:$0xf] %vm427_vm1, %v4494_v12  ;;  %v4022_v17 = vsel %vm1496_vm5, %v3970_v3, 0.0  ;;  %v3502_v20 = vadd.f32 %v5004_v24, %v6843_v4  ;;  %v4024_v27 = vsel %vm1496_vm5, %v3971_v43, 0.0  ;;  %v3675_v19 = vpop.f32.mrf.mxu0 }
 0x288   : > { %v3500_v16 = vadd.f32 %v3447_v30, %v6846_v10  ;;  %v3923_v51 = vadd.f32 %v3922_v40, %v3921_v58  ;;  %v4023_v35 = vadd.f32 %v4022_v17, %v4021_v50  ;;  %v4499_v28 = vpack.c.bf16 %v3713_v5, %v3713_v5 }
 0x289   : > { %v5007_v8 = vpop.f32.mrf.mxu1  ;;  %v3924_v11 = vsel %vm1496_vm5, %v3710_v44, 0.0  ;;  %v4026_v52 = vsel %vm1496_vm5, %v3972_v39, 0.0  ;;  %v4497_v36 = vpack.c.bf16 %v3711_v0, %v3711_v0  ;;  %v3973_v45 = vmul.f32 %v3711_v0, %v3711_v0 }
 0x28a   : > { %v4025_v14 = vadd.f32 %v4024_v27, %v4023_v35  ;;  %3873 = vst.msk [vmem:[%s6791_s9 + $0x68] sm:$0xf] %vm427_vm1, %v4499_v28  ;;  %v3925_v4 = vadd.f32 %v3924_v11, %v3923_v51  ;;  %v3714_v10 = vadd.f32 %v6995_v29, %v3502_v20  ;;  %v3712_v56 = vadd.f32 %v3659_v61, %v3500_v16 }
 0x28b   : > { %v3460_v59 = vpop.f32.mrf.mxu1  ;;  %v3930_v63 = vsel %vm1496_vm5, %v3713_v5, 0.0  ;;  %3871 = vst.msk [vmem:[%s6791_s9 + $0x60] sm:$0xf] %vm427_vm1, %v4497_v36  ;;  %v3926_v13 = vsel %vm1496_vm5, %v3711_v0, 0.0  ;;  %v3505_v46 = vadd.f32 %v5007_v8, %v6854_v38  ;;  %v3975_v2 = vmul.f32 %v3713_v5, %v3713_v5 }
 0x28c   : > { %v3503_v6 = vadd.f32 %v3460_v59, %v6908_v22  ;;  %v3927_v23 = vadd.f32 %v3926_v13, %v3925_v4  ;;  %v4027_v31 = vadd.f32 %v4026_v52, %v4025_v14  ;;  %v4500_v15 = vpack.c.bf16 %v3714_v10, %v3714_v10 }
 0x28d   : > { %v5008_v54 = vpop.f32.mrf.mxu1  ;;  %v4028_v29 = vsel %vm1496_vm5, %v3973_v45, 0.0  ;;  %v4498_v60 = vpack.c.bf16 %v3712_v56, %v3712_v56  ;;  %v3928_v48 = vsel %vm1496_vm5, %v3712_v56, 0.0  ;;  %v3974_v7 = vmul.f32 %v3712_v56, %v3712_v56 }
 0x28e   : > { %v4029_v9 = vadd.f32 %v4028_v29, %v4027_v31  ;;  %3874 = vst.msk [vmem:[%s6791_s9 + $0x6c] sm:$0xf] %vm427_vm1, %v4500_v15  ;;  %v3929_v1 = vadd.f32 %v3928_v48, %v3927_v23  ;;  %v3717_v38 = vadd.f32 %v5041_v55, %v3505_v46  ;;  %v3715_v61 = vadd.f32 %v3672_v25, %v3503_v6 }
 0x28f   : > { %v3463_v22 = vpop.f32.mrf.mxu1  ;;  %v3976_v62 = vmul.f32 %v3714_v10, %v3714_v10  ;;  %3872 = vst.msk [vmem:[%s6791_s9 + $0x64] sm:$0xf] %vm427_vm1, %v4498_v60  ;;  %v4030_v34 = vsel %vm1496_vm5, %v3974_v7, 0.0  ;;  %v3506_v44 = vadd.f32 %v5008_v54, %v6925_v57  ;;  %v4032_v42 = vsel %vm1496_vm5, %v3975_v2, 0.0 }
 0x290   : > { %v3504_v32 = vadd.f32 %v3463_v22, %v6949_v47  ;;  %v3931_v21 = vadd.f32 %v3930_v63, %v3929_v1  ;;  %v4031_v43 = vadd.f32 %v4030_v34, %v4029_v9  ;;  %v4503_v49 = vpack.c.bf16 %v3717_v38, %v3717_v38 }
 0x291   : > { %v3932_v26 = vsel %vm1496_vm5, %v3714_v10, 0.0  ;;  %v4501_v37 = vpack.c.bf16 %v3715_v61, %v3715_v61  ;;  %v3977_v33 = vmul.f32 %v3715_v61, %v3715_v61  ;;  %v3718_v39 = vadd.f32 %v5042_v41, %v3506_v44 }
 0x292   : > { %v4033_v18 = vadd.f32 %v4032_v42, %v4031_v43  ;;  %3877 = vst.msk [vmem:[%s6791_s9 + $0x78] sm:$0xf] %vm427_vm1, %v4503_v49  ;;  %v3933_v24 = vadd.f32 %v3932_v26, %v3931_v21  ;;  %v3716_v57 = vadd.f32 %v3675_v19, %v3504_v32  ;;  %v4034_v12 = vsel %vm1496_vm5, %v3976_v62, 0.0 }
 0x293   : > { %3875 = vst.msk [vmem:[%s6791_s9 + $0x70] sm:$0xf] %vm427_vm1, %v4501_v37  ;;  %v3934_v47 = vsel %vm1496_vm5, %v3715_v61, 0.0  ;;  %v3979_v53 = vmul.f32 %v3717_v38, %v3717_v38  ;;  %v4504_v50 = vpack.c.bf16 %v3718_v39, %v3718_v39  ;;  %v4036_v58 = vsel %vm1496_vm5, %v3977_v33, 0.0 }
 0x294   : > { %v3935_v3 = vadd.f32 %v3934_v47, %v3933_v24  ;;  %v4035_v55 = vadd.f32 %v4034_v12, %v4033_v18  ;;  %v4502_v5 = vpack.c.bf16 %v3716_v57, %v3716_v57  ;;  %v3936_v0 = vsel %vm1496_vm5, %v3716_v57, 0.0 }
 0x295   : > { %v3978_v30 = vmul.f32 %v3716_v57, %v3716_v57  ;;  %3878 = vst.msk [vmem:[%s6791_s9 + $0x7c] sm:$0xf] %vm427_vm1, %v4504_v50  ;;  %v3938_v20 = vsel %vm1496_vm5, %v3717_v38, 0.0  ;;  %v3980_v16 = vmul.f32 %v3718_v39, %v3718_v39  ;;  %v4040_v28 = vsel %vm1496_vm5, %v3979_v53, 0.0 }
 0x296   : > { %v4037_v40 = vadd.f32 %v4036_v58, %v4035_v55  ;;  %v3937_v17 = vadd.f32 %v3936_v0, %v3935_v3  ;;  %3876 = vst.msk [vmem:[%s6791_s9 + $0x74] sm:$0xf] %vm427_vm1, %v4502_v5  ;;  %v3940_v8 = vsel %vm1496_vm5, %v3718_v39, 0.0 }
 0x297   : > { %v4038_v27 = vsel %vm1496_vm5, %v3978_v30, 0.0  ;;  %v4042_v36 = vsel %vm1496_vm5, %v3980_v16, 0.0 }
 0x298   : > { %v3939_v51 = vadd.f32 %v3938_v20, %v3937_v17  ;;  %v4039_v35 = vadd.f32 %v4038_v27, %v4037_v40 }
 0x29a   : > { %v3941_v11 = vadd.f32 %v3940_v8, %v3939_v51  ;;  %v4041_v52 = vadd.f32 %v4040_v28, %v4039_v35 }
 0x29c   : > { %v3942_v45 = vrot.slane %v3941_v11, 4  ;;  %v4043_v25 = vadd.f32 %v4042_v36, %v4041_v52 }
 0x29e   : > { %v3943_v14 = vadd.f32 %v3942_v45, %v3941_v11  ;;  %v4044_v4 = vrot.slane %v4043_v25, 4 }
 0x2a0   : > { %v3944_v10 = vrot.slane %v3943_v14, 2  ;;  %v4045_v56 = vadd.f32 %v4044_v4, %v4043_v25 }
 0x2a2   : > { %v3945_v59 = vadd.f32 %v3944_v10, %v3943_v14  ;;  %v4046_v63 = vrot.slane %v4045_v56, 2 }
 0x2a4   : > { %v3946_v13 = vrot.slane %v3945_v59, 1  ;;  %v4047_v46 = vadd.f32 %v4046_v63, %v4045_v56 }
 0x2a6   : > { %v3947_v6 = vadd.f32 %v3946_v13, %v3945_v59  ;;  %v4048_v2 = vrot.slane %v4047_v46, 1 }
 0x2a8   : > { %3948 = vst.msk [vmem:[%s235_s12] sm:$0x1] %vm430_vm2, %v3947_v6  ;;  %v4049_v23 = vadd.f32 %v4048_v2, %v4047_v46 }
 0x2aa   : > { %4050 = vst.msk [vmem:[%s235_s12 + $0x1] sm:$0x1] %vm430_vm2, %v4049_v23 }
 0x2ab PF: > { %s16_s18 = sadd.s32 1, %s5097_s18  }
 0x2ac   : > { %p13_p4 = scmp.ge.s32.totalorder %s16_s18, 4  }
 0x2ae   :  { %15 = sbr.rel (!%p13_p4) target bundleno = 1 (0x1), region = 87 }

</bundles_post_ra>
